<compile_context>
chip_gen: v7x
topology: tpu7x:2x2x1
jax: 0.10.0
libtpu: 0.0.40
codegen_flags: <defaults>
</compile_context>

<pallas_src>
import jax
import jax.numpy as jnp
from jax.experimental import pallas as pl
from jax.experimental.pallas import tpu as pltpu


# --------------------------- in-kernel helpers ------------------------------ #
def _even_odd_row_selectors(n_out, n_in):
    """L_d of shape (n_out, n_in) with L_d[i, 2*i + d] = 1, d in {0, 1}."""
    i = jax.lax.broadcasted_iota(jnp.int32, (n_out, n_in), 0)
    k = jax.lax.broadcasted_iota(jnp.int32, (n_out, n_in), 1)
    return (jnp.where(k == 2 * i, 1.0, 0.0),
            jnp.where(k == 2 * i + 1, 1.0, 0.0))


def _even_odd_col_selectors(n_in, n_out):
    """R_d of shape (n_in, n_out) with R_d[2*j + d, j] = 1, d in {0, 1}."""
    k = jax.lax.broadcasted_iota(jnp.int32, (n_in, n_out), 0)
    j = jax.lax.broadcasted_iota(jnp.int32, (n_in, n_out), 1)
    return (jnp.where(k == 2 * j, 1.0, 0.0),
            jnp.where(k == 2 * j + 1, 1.0, 0.0))


def _maxpool2x2(plane, sels):
    """2x2 / stride 2 max pooling of a 2D plane via selector matmuls (MXU)."""
    l0, l1, r0, r1 = sels
    rows = jnp.maximum(
        jnp.dot(l0, plane, preferred_element_type=jnp.float32),
        jnp.dot(l1, plane, preferred_element_type=jnp.float32))
    return jnp.maximum(
        jnp.dot(rows, r0, preferred_element_type=jnp.float32),
        jnp.dot(rows, r1, preferred_element_type=jnp.float32))


# ------------------------------ fused kernel -------------------------------- #
def _net_kernel(x_ref, c1w_ref, c1b_ref, c2w_ref, c2b_ref,
                w1_ref, b1_ref, w2_ref, b2_ref,
                out_ref, pad1_ref, pad2_ref):
    f32 = jnp.float32

    # -------- conv1: 1 -> 3 channels, 3x3, stride 1, pad 1, + ReLU --------
    pad1_ref[...] = jnp.zeros_like(pad1_ref)          # (30, 30) zero border
    pad1_ref[1:29, 1:29] = x_ref[0, 0]                # image interior
    win1 = [pad1_ref[kh:kh + 28, kw:kw + 28]          # 9 shifted 28x28 windows
            for kh in range(3) for kw in range(3)]
    conv1 = []
    for co in range(3):
        acc = c1w_ref[co * 9] * win1[0]
        for k in range(1, 9):
            acc = acc + c1w_ref[co * 9 + k] * win1[k]
        conv1.append(jnp.maximum(acc + c1b_ref[co], 0.0))

    # -------- pool1: 28x28 -> 14x14 --------
    sel1 = (*_even_odd_row_selectors(14, 28), *_even_odd_col_selectors(28, 14))
    pool1 = [_maxpool2x2(p, sel1) for p in conv1]

    # -------- conv2: 3 -> 6 channels, 3x3, stride 1, pad 1, + ReLU --------
    pad2_ref[...] = jnp.zeros_like(pad2_ref)          # (3, 16, 16) zero borders
    for ci in range(3):
        pad2_ref[ci, 1:15, 1:15] = pool1[ci]
    win2 = [pad2_ref[ci, kh:kh + 14, kw:kw + 14]      # 27 shifted 14x14 windows
            for ci in range(3) for kh in range(3) for kw in range(3)]
    conv2 = []
    for co in range(6):
        acc = c2w_ref[co * 27] * win2[0]
        for k in range(1, 27):
            acc = acc + c2w_ref[co * 27 + k] * win2[k]
        conv2.append(jnp.maximum(acc + c2b_ref[co], 0.0))

    # -------- pool2: 14x14 -> 7x7 --------
    sel2 = (*_even_odd_row_selectors(7, 14), *_even_odd_col_selectors(14, 7))
    pool2 = [_maxpool2x2(p, sel2) for p in conv2]

    # -------- flatten (order folded into fc1 weight layout) + fc1 + ReLU --------
    # PyTorch flatten index = c*49 + h*7 + w.  w1_ref[c, h] holds the matching
    # (7, 128) block of fc1_w, so no activation reshape/transpose is needed.
    h1 = b1_ref[...]                                   # (1, 128)
    for c in range(6):
        for h in range(7):
            h1 = h1 + jnp.dot(pool2[c][h:h + 1, :], w1_ref[c, h],
                              preferred_element_type=f32)
    h1 = jnp.maximum(h1, 0.0)

    # -------- fc2 --------
    out = jnp.dot(h1, w2_ref[...], preferred_element_type=f32) + b2_ref[...]
    out_ref[0] = out                                   # (1, 10)


# --------------------------------- wrappers --------------------------------- #
def init_params(key):
    """PyTorch-layout parameters (same shapes/semantics as the nn.Module)."""
    ks = jax.random.split(key, 8)

    def u(k, shape, fan_in):
        bound = 1.0 / float(fan_in) ** 0.5
        return jax.random.uniform(k, shape, jnp.float32, -bound, bound)

    return {
        "conv1_w": u(ks[0], (3, 1, 3, 3), 1 * 9),
        "conv1_b": u(ks[1], (3,), 1 * 9),
        "conv2_w": u(ks[2], (6, 3, 3, 3), 3 * 9),
        "conv2_b": u(ks[3], (6,), 3 * 9),
        "fc1_w": u(ks[4], (128, 6 * 7 * 7), 6 * 7 * 7),   # torch Linear: [out, in]
        "fc1_b": u(ks[5], (128,), 6 * 7 * 7),
        "fc2_w": u(ks[6], (10, 128), 128),
        "fc2_b": u(ks[7], (10,), 128),
    }


def pack_params(params):
    """One-time repack of PyTorch-layout params into kernel-friendly layouts."""
    w1 = params["fc1_w"].reshape(128, 6, 7, 7).transpose(1, 2, 3, 0)  # (6,7,7,128)
    return {
        "c1w": params["conv1_w"].reshape(-1).astype(jnp.float32),     # (27,)
        "c1b": params["conv1_b"].astype(jnp.float32),                 # (3,)
        "c2w": params["conv2_w"].reshape(-1).astype(jnp.float32),     # (162,)
        "c2b": params["conv2_b"].astype(jnp.float32),                 # (6,)
        "w1": w1.astype(jnp.float32),                                 # (6,7,7,128)
        "b1": params["fc1_b"].reshape(1, 128).astype(jnp.float32),
        "w2": params["fc2_w"].T.astype(jnp.float32),                  # (128,10)
        "b2": params["fc2_b"].reshape(1, 10).astype(jnp.float32),
    }


def net_forward(packed, x):
    """Forward pass of Net.  x: NCHW [B, 1, 28, 28] float32 -> [B, 10]."""
    B = x.shape[0]
    assert x.shape[1:] == (1, 28, 28)
    smem = pl.BlockSpec(memory_space=pltpu.MemorySpace.SMEM)
    out = pl.pallas_call(
        _net_kernel,
        out_shape=jax.ShapeDtypeStruct((B, 1, 10), jnp.float32),
        grid=(B,),
        in_specs=[
            pl.BlockSpec((1, 1, 28, 28), lambda b: (b, 0, 0, 0)),    # x, one sample
            smem, smem, smem, smem,                                  # conv w/b scalars
            pl.BlockSpec((6, 7, 7, 128), lambda b: (0, 0, 0, 0)),    # fc1 weight blocks
            pl.BlockSpec((1, 128), lambda b: (0, 0)),                # fc1 bias
            pl.BlockSpec((128, 10), lambda b: (0, 0)),               # fc2 weight (T)
            pl.BlockSpec((1, 10), lambda b: (0, 0)),                 # fc2 bias
        ],
        out_specs=pl.BlockSpec((1, 1, 10), lambda b: (b, 0, 0)),
        scratch_shapes=[
            pltpu.VMEM((30, 30), jnp.float32),      # conv1 zero-padded input plane
            pltpu.VMEM((3, 16, 16), jnp.float32),   # conv2 zero-padded input planes
        ],
        compiler_params=pltpu.CompilerParams(
            dimension_semantics=("parallel",)),
    )(x, packed["c1w"], packed["c1b"], packed["c2w"], packed["c2b"],
      packed["w1"], packed["b1"], packed["w2"], packed["b2"])
    return out.reshape(B, 10)


# ------------------------------ pure-XLA reference --------------------------- #
def _reference_forward(params, x):
    def conv(y, w, b):
        dn = jax.lax.conv_dimension_numbers(y.shape, w.shape,
                                            ("NCHW", "OIHW", "NCHW"))
        y = jax.lax.conv_general_dilated(y, w, (1, 1), ((1, 1), (1, 1)),
                                         dimension_numbers=dn)
        return jax.nn.relu(y + b[None, :, None, None])

    def pool(y):
        return jax.lax.reduce_window(y, -jnp.inf, jax.lax.max,
                                     (1, 1, 2, 2), (1, 1, 2, 2), "VALID")

    y = pool(conv(x, params["conv1_w"], params["conv1_b"]))
    y = pool(conv(y, params["conv2_w"], params["conv2_b"]))
    y = y.reshape(y.shape[0], -1)
    y = jax.nn.relu(y @ params["fc1_w"].T + params["fc1_b"])
    return y @ params["fc2_w"].T + params["fc2_b"]


if __name__ == "__main__":
    # Input must be 28x28 for fc1 = Linear(6*7*7, 128) to be consistent.
    x = jax.random.normal(jax.random.PRNGKey(0), (2, 1, 28, 28), jnp.float32)
    params = init_params(jax.random.PRNGKey(42))
    packed = pack_params(params)              # one-time weight repack (not hot path)

    fwd = jax.jit(net_forward)
    out = fwd(packed, x)
    jax.block_until_ready(out)
    assert out.shape == (2, 10) and out.dtype == jnp.float32

    ref = _reference_forward(params, x)
    err = jnp.max(jnp.abs(out - ref))
    assert jnp.allclose(out, ref, atol=5e-2, rtol=5e-2), f"max abs err {err}"
    print("KERNEL_OK")
</pallas_src>

<mosaic_0001>
module attributes {stable_mosaic.version = 11 : i64} {
  func.func @_net_kernel(%arg0: i32, %arg1: memref<1x1x28x28xf32, #tpu.memory_space<vmem>>, %arg2: memref<27xf32, #tpu.memory_space<smem>>, %arg3: memref<3xf32, #tpu.memory_space<smem>>, %arg4: memref<162xf32, #tpu.memory_space<smem>>, %arg5: memref<6xf32, #tpu.memory_space<smem>>, %arg6: memref<6x7x7x128xf32, #tpu.memory_space<vmem>>, %arg7: memref<1x128xf32, #tpu.memory_space<vmem>>, %arg8: memref<128x10xf32, #tpu.memory_space<vmem>>, %arg9: memref<1x10xf32, #tpu.memory_space<vmem>>, %arg10: memref<1x1x10xf32, #tpu.memory_space<vmem>>, %arg11: memref<30x30xf32, #tpu.memory_space<vmem>>, %arg12: memref<3x16x16xf32, #tpu.memory_space<vmem>>) attributes {dimension_semantics = [#tpu.dimension_semantics<parallel>], iteration_bounds = array<i64: 2>, scalar_prefetch = 0 : i64, scratch_operands = 2 : i64, tpu.core_type = #tpu.core_type<tc>, window_params = [{transform_indices = @transform_0, window_bounds = array<i64: 1, 1, 28, 28>}, {transform_indices = @transform_1, window_bounds = array<i64: 27>}, {transform_indices = @transform_2, window_bounds = array<i64: 3>}, {transform_indices = @transform_3, window_bounds = array<i64: 162>}, {transform_indices = @transform_4, window_bounds = array<i64: 6>}, {pipeline_mode = #tpu.pipeline_mode<synchronous>, transform_indices = @transform_5, window_bounds = array<i64: 6, 7, 7, 128>}, {pipeline_mode = #tpu.pipeline_mode<synchronous>, transform_indices = @transform_6, window_bounds = array<i64: 1, 128>}, {pipeline_mode = #tpu.pipeline_mode<synchronous>, transform_indices = @transform_7, window_bounds = array<i64: 128, 10>}, {pipeline_mode = #tpu.pipeline_mode<synchronous>, transform_indices = @transform_8, window_bounds = array<i64: 1, 10>}, {transform_indices = @transform_9, window_bounds = array<i64: 1, 1, 10>}]} {
    %cst = arith.constant 0.000000e+00 : f32
    %0 = vector.broadcast %cst : f32 to vector<30x30xf32>
    %c0 = arith.constant 0 : index
    %c0_0 = arith.constant 0 : index
    %1 = vector.load %arg11[%c0, %c0_0] : memref<30x30xf32, #tpu.memory_space<vmem>>, vector<30x30xf32>
    tpu.vector_store %arg11[%c0, %c0_0], %0 {strides = array<i32>} : memref<30x30xf32, #tpu.memory_space<vmem>>, vector<30x30xf32>,
    %c0_1 = arith.constant 0 : index
    %c0_2 = arith.constant 0 : index
    %c0_3 = arith.constant 0 : index
    %c0_4 = arith.constant 0 : index
    %2 = vector.load %arg1[%c0_1, %c0_2, %c0_3, %c0_4] : memref<1x1x28x28xf32, #tpu.memory_space<vmem>>, vector<1x1x28x28xf32>
    %3 = vector.shape_cast %2 : vector<1x1x28x28xf32> to vector<28x28xf32>
    %c1 = arith.constant 1 : index
    %c1_5 = arith.constant 1 : index
    %4 = vector.load %arg11[%c1, %c1_5] : memref<30x30xf32, #tpu.memory_space<vmem>>, vector<28x28xf32>
    tpu.vector_store %arg11[%c1, %c1_5], %3 {strides = array<i32>} : memref<30x30xf32, #tpu.memory_space<vmem>>, vector<28x28xf32>,
    %c0_6 = arith.constant 0 : index
    %c0_7 = arith.constant 0 : index
    %5 = vector.load %arg11[%c0_6, %c0_7] : memref<30x30xf32, #tpu.memory_space<vmem>>, vector<28x28xf32>
    %c0_8 = arith.constant 0 : index
    %c1_9 = arith.constant 1 : index
    %6 = vector.load %arg11[%c0_8, %c1_9] : memref<30x30xf32, #tpu.memory_space<vmem>>, vector<28x28xf32>
    %c0_10 = arith.constant 0 : index
    %c2 = arith.constant 2 : index
    %7 = vector.load %arg11[%c0_10, %c2] : memref<30x30xf32, #tpu.memory_space<vmem>>, vector<28x28xf32>
    %c1_11 = arith.constant 1 : index
    %c0_12 = arith.constant 0 : index
    %8 = vector.load %arg11[%c1_11, %c0_12] : memref<30x30xf32, #tpu.memory_space<vmem>>, vector<28x28xf32>
    %c1_13 = arith.constant 1 : index
    %c1_14 = arith.constant 1 : index
    %9 = vector.load %arg11[%c1_13, %c1_14] : memref<30x30xf32, #tpu.memory_space<vmem>>, vector<28x28xf32>
    %c1_15 = arith.constant 1 : index
    %c2_16 = arith.constant 2 : index
    %10 = vector.load %arg11[%c1_15, %c2_16] : memref<30x30xf32, #tpu.memory_space<vmem>>, vector<28x28xf32>
    %c2_17 = arith.constant 2 : index
    %c0_18 = arith.constant 0 : index
    %11 = vector.load %arg11[%c2_17, %c0_18] : memref<30x30xf32, #tpu.memory_space<vmem>>, vector<28x28xf32>
    %c2_19 = arith.constant 2 : index
    %c1_20 = arith.constant 1 : index
    %12 = vector.load %arg11[%c2_19, %c1_20] : memref<30x30xf32, #tpu.memory_space<vmem>>, vector<28x28xf32>
    %c2_21 = arith.constant 2 : index
    %c2_22 = arith.constant 2 : index
    %13 = vector.load %arg11[%c2_21, %c2_22] : memref<30x30xf32, #tpu.memory_space<vmem>>, vector<28x28xf32>
    %c0_23 = arith.constant 0 : index
    %14 = memref.load %arg2[%c0_23] : memref<27xf32, #tpu.memory_space<smem>>
    %15 = vector.broadcast %14 : f32 to vector<28x28xf32>
    %16 = arith.mulf %15, %5 : vector<28x28xf32>
    %c1_24 = arith.constant 1 : index
    %17 = memref.load %arg2[%c1_24] : memref<27xf32, #tpu.memory_space<smem>>
    %18 = vector.broadcast %17 : f32 to vector<28x28xf32>
    %19 = arith.mulf %18, %6 : vector<28x28xf32>
    %20 = arith.addf %16, %19 : vector<28x28xf32>
    %c2_25 = arith.constant 2 : index
    %21 = memref.load %arg2[%c2_25] : memref<27xf32, #tpu.memory_space<smem>>
    %22 = vector.broadcast %21 : f32 to vector<28x28xf32>
    %23 = arith.mulf %22, %7 : vector<28x28xf32>
    %24 = arith.addf %20, %23 : vector<28x28xf32>
    %c3 = arith.constant 3 : index
    %25 = memref.load %arg2[%c3] : memref<27xf32, #tpu.memory_space<smem>>
    %26 = vector.broadcast %25 : f32 to vector<28x28xf32>
    %27 = arith.mulf %26, %8 : vector<28x28xf32>
    %28 = arith.addf %24, %27 : vector<28x28xf32>
    %c4 = arith.constant 4 : index
    %29 = memref.load %arg2[%c4] : memref<27xf32, #tpu.memory_space<smem>>
    %30 = vector.broadcast %29 : f32 to vector<28x28xf32>
    %31 = arith.mulf %30, %9 : vector<28x28xf32>
    %32 = arith.addf %28, %31 : vector<28x28xf32>
    %c5 = arith.constant 5 : index
    %33 = memref.load %arg2[%c5] : memref<27xf32, #tpu.memory_space<smem>>
    %34 = vector.broadcast %33 : f32 to vector<28x28xf32>
    %35 = arith.mulf %34, %10 : vector<28x28xf32>
    %36 = arith.addf %32, %35 : vector<28x28xf32>
    %c6 = arith.constant 6 : index
    %37 = memref.load %arg2[%c6] : memref<27xf32, #tpu.memory_space<smem>>
    %38 = vector.broadcast %37 : f32 to vector<28x28xf32>
    %39 = arith.mulf %38, %11 : vector<28x28xf32>
    %40 = arith.addf %36, %39 : vector<28x28xf32>
    %c7 = arith.constant 7 : index
    %41 = memref.load %arg2[%c7] : memref<27xf32, #tpu.memory_space<smem>>
    %42 = vector.broadcast %41 : f32 to vector<28x28xf32>
    %43 = arith.mulf %42, %12 : vector<28x28xf32>
    %44 = arith.addf %40, %43 : vector<28x28xf32>
    %c8 = arith.constant 8 : index
    %45 = memref.load %arg2[%c8] : memref<27xf32, #tpu.memory_space<smem>>
    %46 = vector.broadcast %45 : f32 to vector<28x28xf32>
    %47 = arith.mulf %46, %13 : vector<28x28xf32>
    %48 = arith.addf %44, %47 : vector<28x28xf32>
    %c0_26 = arith.constant 0 : index
    %49 = memref.load %arg3[%c0_26] : memref<3xf32, #tpu.memory_space<smem>>
    %50 = vector.broadcast %49 : f32 to vector<28x28xf32>
    %51 = arith.addf %48, %50 : vector<28x28xf32>
    %cst_27 = arith.constant 0.000000e+00 : f32
    %52 = vector.broadcast %cst_27 : f32 to vector<28x28xf32>
    %53 = arith.maximumf %51, %52 : vector<28x28xf32>
    %c9 = arith.constant 9 : index
    %54 = memref.load %arg2[%c9] : memref<27xf32, #tpu.memory_space<smem>>
    %55 = vector.broadcast %54 : f32 to vector<28x28xf32>
    %56 = arith.mulf %55, %5 : vector<28x28xf32>
    %c10 = arith.constant 10 : index
    %57 = memref.load %arg2[%c10] : memref<27xf32, #tpu.memory_space<smem>>
    %58 = vector.broadcast %57 : f32 to vector<28x28xf32>
    %59 = arith.mulf %58, %6 : vector<28x28xf32>
    %60 = arith.addf %56, %59 : vector<28x28xf32>
    %c11 = arith.constant 11 : index
    %61 = memref.load %arg2[%c11] : memref<27xf32, #tpu.memory_space<smem>>
    %62 = vector.broadcast %61 : f32 to vector<28x28xf32>
    %63 = arith.mulf %62, %7 : vector<28x28xf32>
    %64 = arith.addf %60, %63 : vector<28x28xf32>
    %c12 = arith.constant 12 : index
    %65 = memref.load %arg2[%c12] : memref<27xf32, #tpu.memory_space<smem>>
    %66 = vector.broadcast %65 : f32 to vector<28x28xf32>
    %67 = arith.mulf %66, %8 : vector<28x28xf32>
    %68 = arith.addf %64, %67 : vector<28x28xf32>
    %c13 = arith.constant 13 : index
    %69 = memref.load %arg2[%c13] : memref<27xf32, #tpu.memory_space<smem>>
    %70 = vector.broadcast %69 : f32 to vector<28x28xf32>
    %71 = arith.mulf %70, %9 : vector<28x28xf32>
    %72 = arith.addf %68, %71 : vector<28x28xf32>
    %c14 = arith.constant 14 : index
    %73 = memref.load %arg2[%c14] : memref<27xf32, #tpu.memory_space<smem>>
    %74 = vector.broadcast %73 : f32 to vector<28x28xf32>
    %75 = arith.mulf %74, %10 : vector<28x28xf32>
    %76 = arith.addf %72, %75 : vector<28x28xf32>
    %c15 = arith.constant 15 : index
    %77 = memref.load %arg2[%c15] : memref<27xf32, #tpu.memory_space<smem>>
    %78 = vector.broadcast %77 : f32 to vector<28x28xf32>
    %79 = arith.mulf %78, %11 : vector<28x28xf32>
    %80 = arith.addf %76, %79 : vector<28x28xf32>
    %c16 = arith.constant 16 : index
    %81 = memref.load %arg2[%c16] : memref<27xf32, #tpu.memory_space<smem>>
    %82 = vector.broadcast %81 : f32 to vector<28x28xf32>
    %83 = arith.mulf %82, %12 : vector<28x28xf32>
    %84 = arith.addf %80, %83 : vector<28x28xf32>
    %c17 = arith.constant 17 : index
    %85 = memref.load %arg2[%c17] : memref<27xf32, #tpu.memory_space<smem>>
    %86 = vector.broadcast %85 : f32 to vector<28x28xf32>
    %87 = arith.mulf %86, %13 : vector<28x28xf32>
    %88 = arith.addf %84, %87 : vector<28x28xf32>
    %c1_28 = arith.constant 1 : index
    %89 = memref.load %arg3[%c1_28] : memref<3xf32, #tpu.memory_space<smem>>
    %90 = vector.broadcast %89 : f32 to vector<28x28xf32>
    %91 = arith.addf %88, %90 : vector<28x28xf32>
    %cst_29 = arith.constant 0.000000e+00 : f32
    %92 = vector.broadcast %cst_29 : f32 to vector<28x28xf32>
    %93 = arith.maximumf %91, %92 : vector<28x28xf32>
    %c18 = arith.constant 18 : index
    %94 = memref.load %arg2[%c18] : memref<27xf32, #tpu.memory_space<smem>>
    %95 = vector.broadcast %94 : f32 to vector<28x28xf32>
    %96 = arith.mulf %95, %5 : vector<28x28xf32>
    %c19 = arith.constant 19 : index
    %97 = memref.load %arg2[%c19] : memref<27xf32, #tpu.memory_space<smem>>
    %98 = vector.broadcast %97 : f32 to vector<28x28xf32>
    %99 = arith.mulf %98, %6 : vector<28x28xf32>
    %100 = arith.addf %96, %99 : vector<28x28xf32>
    %c20 = arith.constant 20 : index
    %101 = memref.load %arg2[%c20] : memref<27xf32, #tpu.memory_space<smem>>
    %102 = vector.broadcast %101 : f32 to vector<28x28xf32>
    %103 = arith.mulf %102, %7 : vector<28x28xf32>
    %104 = arith.addf %100, %103 : vector<28x28xf32>
    %c21 = arith.constant 21 : index
    %105 = memref.load %arg2[%c21] : memref<27xf32, #tpu.memory_space<smem>>
    %106 = vector.broadcast %105 : f32 to vector<28x28xf32>
    %107 = arith.mulf %106, %8 : vector<28x28xf32>
    %108 = arith.addf %104, %107 : vector<28x28xf32>
    %c22 = arith.constant 22 : index
    %109 = memref.load %arg2[%c22] : memref<27xf32, #tpu.memory_space<smem>>
    %110 = vector.broadcast %109 : f32 to vector<28x28xf32>
    %111 = arith.mulf %110, %9 : vector<28x28xf32>
    %112 = arith.addf %108, %111 : vector<28x28xf32>
    %c23 = arith.constant 23 : index
    %113 = memref.load %arg2[%c23] : memref<27xf32, #tpu.memory_space<smem>>
    %114 = vector.broadcast %113 : f32 to vector<28x28xf32>
    %115 = arith.mulf %114, %10 : vector<28x28xf32>
    %116 = arith.addf %112, %115 : vector<28x28xf32>
    %c24 = arith.constant 24 : index
    %117 = memref.load %arg2[%c24] : memref<27xf32, #tpu.memory_space<smem>>
    %118 = vector.broadcast %117 : f32 to vector<28x28xf32>
    %119 = arith.mulf %118, %11 : vector<28x28xf32>
    %120 = arith.addf %116, %119 : vector<28x28xf32>
    %c25 = arith.constant 25 : index
    %121 = memref.load %arg2[%c25] : memref<27xf32, #tpu.memory_space<smem>>
    %122 = vector.broadcast %121 : f32 to vector<28x28xf32>
    %123 = arith.mulf %122, %12 : vector<28x28xf32>
    %124 = arith.addf %120, %123 : vector<28x28xf32>
    %c26 = arith.constant 26 : index
    %125 = memref.load %arg2[%c26] : memref<27xf32, #tpu.memory_space<smem>>
    %126 = vector.broadcast %125 : f32 to vector<28x28xf32>
    %127 = arith.mulf %126, %13 : vector<28x28xf32>
    %128 = arith.addf %124, %127 : vector<28x28xf32>
    %c2_30 = arith.constant 2 : index
    %129 = memref.load %arg3[%c2_30] : memref<3xf32, #tpu.memory_space<smem>>
    %130 = vector.broadcast %129 : f32 to vector<28x28xf32>
    %131 = arith.addf %128, %130 : vector<28x28xf32>
    %cst_31 = arith.constant 0.000000e+00 : f32
    %132 = vector.broadcast %cst_31 : f32 to vector<28x28xf32>
    %133 = arith.maximumf %131, %132 : vector<28x28xf32>
    %134 = tpu.iota {dimensions = array<i32: 0>} : vector<14x28xi32>
    %135 = tpu.iota {dimensions = array<i32: 1>} : vector<14x28xi32>
    %c2_i32 = arith.constant 2 : i32
    %136 = vector.broadcast %c2_i32 : i32 to vector<14x28xi32>
    %137 = arith.muli %136, %134 : vector<14x28xi32>
    %138 = arith.cmpi eq, %135, %137 : vector<14x28xi32>
    %cst_32 = arith.constant 1.000000e+00 : f32
    %cst_33 = arith.constant 0.000000e+00 : f32
    %139 = vector.broadcast %cst_32 : f32 to vector<14x28xf32>
    %140 = vector.broadcast %cst_33 : f32 to vector<14x28xf32>
    %141 = arith.select %138, %139, %140 : vector<14x28xi1>, vector<14x28xf32>
    %c2_i32_34 = arith.constant 2 : i32
    %142 = vector.broadcast %c2_i32_34 : i32 to vector<14x28xi32>
    %143 = arith.muli %142, %134 : vector<14x28xi32>
    %c1_i32 = arith.constant 1 : i32
    %144 = vector.broadcast %c1_i32 : i32 to vector<14x28xi32>
    %145 = arith.addi %143, %144 : vector<14x28xi32>
    %146 = arith.cmpi eq, %135, %145 : vector<14x28xi32>
    %cst_35 = arith.constant 1.000000e+00 : f32
    %cst_36 = arith.constant 0.000000e+00 : f32
    %147 = vector.broadcast %cst_35 : f32 to vector<14x28xf32>
    %148 = vector.broadcast %cst_36 : f32 to vector<14x28xf32>
    %149 = arith.select %146, %147, %148 : vector<14x28xi1>, vector<14x28xf32>
    %150 = tpu.iota {dimensions = array<i32: 0>} : vector<28x14xi32>
    %151 = tpu.iota {dimensions = array<i32: 1>} : vector<28x14xi32>
    %c2_i32_37 = arith.constant 2 : i32
    %152 = vector.broadcast %c2_i32_37 : i32 to vector<28x14xi32>
    %153 = arith.muli %152, %151 : vector<28x14xi32>
    %154 = arith.cmpi eq, %150, %153 : vector<28x14xi32>
    %cst_38 = arith.constant 1.000000e+00 : f32
    %cst_39 = arith.constant 0.000000e+00 : f32
    %155 = vector.broadcast %cst_38 : f32 to vector<28x14xf32>
    %156 = vector.broadcast %cst_39 : f32 to vector<28x14xf32>
    %157 = arith.select %154, %155, %156 : vector<28x14xi1>, vector<28x14xf32>
    %c2_i32_40 = arith.constant 2 : i32
    %158 = vector.broadcast %c2_i32_40 : i32 to vector<28x14xi32>
    %159 = arith.muli %158, %151 : vector<28x14xi32>
    %c1_i32_41 = arith.constant 1 : i32
    %160 = vector.broadcast %c1_i32_41 : i32 to vector<28x14xi32>
    %161 = arith.addi %159, %160 : vector<28x14xi32>
    %162 = arith.cmpi eq, %150, %161 : vector<28x14xi32>
    %cst_42 = arith.constant 1.000000e+00 : f32
    %cst_43 = arith.constant 0.000000e+00 : f32
    %163 = vector.broadcast %cst_42 : f32 to vector<28x14xf32>
    %164 = vector.broadcast %cst_43 : f32 to vector<28x14xf32>
    %165 = arith.select %162, %163, %164 : vector<28x14xi1>, vector<28x14xf32>
    %cst_44 = arith.constant dense<0.000000e+00> : vector<14x28xf32>
    %166 = tpu.matmul %141, %53, %cst_44 {dimension_numbers = #tpu.dot_dimension_numbers<[1], [0], [0], [1], [0, 0, 1, 1], [], []>} : vector<14x28xf32>, vector<28x28xf32>, vector<14x28xf32> -> vector<14x28xf32>
    %cst_45 = arith.constant dense<0.000000e+00> : vector<14x28xf32>
    %167 = tpu.matmul %149, %53, %cst_45 {dimension_numbers = #tpu.dot_dimension_numbers<[1], [0], [0], [1], [0, 0, 1, 1], [], []>} : vector<14x28xf32>, vector<28x28xf32>, vector<14x28xf32> -> vector<14x28xf32>
    %168 = arith.maximumf %166, %167 : vector<14x28xf32>
    %cst_46 = arith.constant dense<0.000000e+00> : vector<14x14xf32>
    %169 = tpu.matmul %168, %157, %cst_46 {dimension_numbers = #tpu.dot_dimension_numbers<[1], [0], [0], [1], [0, 0, 1, 1], [], []>} : vector<14x28xf32>, vector<28x14xf32>, vector<14x14xf32> -> vector<14x14xf32>
    %cst_47 = arith.constant dense<0.000000e+00> : vector<14x14xf32>
    %170 = tpu.matmul %168, %165, %cst_47 {dimension_numbers = #tpu.dot_dimension_numbers<[1], [0], [0], [1], [0, 0, 1, 1], [], []>} : vector<14x28xf32>, vector<28x14xf32>, vector<14x14xf32> -> vector<14x14xf32>
    %171 = arith.maximumf %169, %170 : vector<14x14xf32>
    %cst_48 = arith.constant dense<0.000000e+00> : vector<14x28xf32>
    %172 = tpu.matmul %141, %93, %cst_48 {dimension_numbers = #tpu.dot_dimension_numbers<[1], [0], [0], [1], [0, 0, 1, 1], [], []>} : vector<14x28xf32>, vector<28x28xf32>, vector<14x28xf32> -> vector<14x28xf32>
    %cst_49 = arith.constant dense<0.000000e+00> : vector<14x28xf32>
    %173 = tpu.matmul %149, %93, %cst_49 {dimension_numbers = #tpu.dot_dimension_numbers<[1], [0], [0], [1], [0, 0, 1, 1], [], []>} : vector<14x28xf32>, vector<28x28xf32>, vector<14x28xf32> -> vector<14x28xf32>
    %174 = arith.maximumf %172, %173 : vector<14x28xf32>
    %cst_50 = arith.constant dense<0.000000e+00> : vector<14x14xf32>
    %175 = tpu.matmul %174, %157, %cst_50 {dimension_numbers = #tpu.dot_dimension_numbers<[1], [0], [0], [1], [0, 0, 1, 1], [], []>} : vector<14x28xf32>, vector<28x14xf32>, vector<14x14xf32> -> vector<14x14xf32>
    %cst_51 = arith.constant dense<0.000000e+00> : vector<14x14xf32>
    %176 = tpu.matmul %174, %165, %cst_51 {dimension_numbers = #tpu.dot_dimension_numbers<[1], [0], [0], [1], [0, 0, 1, 1], [], []>} : vector<14x28xf32>, vector<28x14xf32>, vector<14x14xf32> -> vector<14x14xf32>
    %177 = arith.maximumf %175, %176 : vector<14x14xf32>
    %cst_52 = arith.constant dense<0.000000e+00> : vector<14x28xf32>
    %178 = tpu.matmul %141, %133, %cst_52 {dimension_numbers = #tpu.dot_dimension_numbers<[1], [0], [0], [1], [0, 0, 1, 1], [], []>} : vector<14x28xf32>, vector<28x28xf32>, vector<14x28xf32> -> vector<14x28xf32>
    %cst_53 = arith.constant dense<0.000000e+00> : vector<14x28xf32>
    %179 = tpu.matmul %149, %133, %cst_53 {dimension_numbers = #tpu.dot_dimension_numbers<[1], [0], [0], [1], [0, 0, 1, 1], [], []>} : vector<14x28xf32>, vector<28x28xf32>, vector<14x28xf32> -> vector<14x28xf32>
    %180 = arith.maximumf %178, %179 : vector<14x28xf32>
    %cst_54 = arith.constant dense<0.000000e+00> : vector<14x14xf32>
    %181 = tpu.matmul %180, %157, %cst_54 {dimension_numbers = #tpu.dot_dimension_numbers<[1], [0], [0], [1], [0, 0, 1, 1], [], []>} : vector<14x28xf32>, vector<28x14xf32>, vector<14x14xf32> -> vector<14x14xf32>
    %cst_55 = arith.constant dense<0.000000e+00> : vector<14x14xf32>
    %182 = tpu.matmul %180, %165, %cst_55 {dimension_numbers = #tpu.dot_dimension_numbers<[1], [0], [0], [1], [0, 0, 1, 1], [], []>} : vector<14x28xf32>, vector<28x14xf32>, vector<14x14xf32> -> vector<14x14xf32>
    %183 = arith.maximumf %181, %182 : vector<14x14xf32>
    %cst_56 = arith.constant 0.000000e+00 : f32
    %184 = vector.broadcast %cst_56 : f32 to vector<3x16x16xf32>
    %c0_57 = arith.constant 0 : index
    %c0_58 = arith.constant 0 : index
    %c0_59 = arith.constant 0 : index
    %185 = vector.load %arg12[%c0_57, %c0_58, %c0_59] : memref<3x16x16xf32, #tpu.memory_space<vmem>>, vector<3x16x16xf32>
    tpu.vector_store %arg12[%c0_57, %c0_58, %c0_59], %184 {strides = array<i32>} : memref<3x16x16xf32, #tpu.memory_space<vmem>>, vector<3x16x16xf32>,
    %c0_60 = arith.constant 0 : index
    %c1_61 = arith.constant 1 : index
    %c1_62 = arith.constant 1 : index
    %186 = vector.load %arg12[%c0_60, %c1_61, %c1_62] : memref<3x16x16xf32, #tpu.memory_space<vmem>>, vector<1x14x14xf32>
    %187 = vector.shape_cast %186 : vector<1x14x14xf32> to vector<14x14xf32>
    %188 = vector.shape_cast %171 : vector<14x14xf32> to vector<1x14x14xf32>
    tpu.vector_store %arg12[%c0_60, %c1_61, %c1_62], %188 {strides = array<i32>} : memref<3x16x16xf32, #tpu.memory_space<vmem>>, vector<1x14x14xf32>,
    %c1_63 = arith.constant 1 : index
    %c1_64 = arith.constant 1 : index
    %c1_65 = arith.constant 1 : index
    %189 = vector.load %arg12[%c1_63, %c1_64, %c1_65] : memref<3x16x16xf32, #tpu.memory_space<vmem>>, vector<1x14x14xf32>
    %190 = vector.shape_cast %189 : vector<1x14x14xf32> to vector<14x14xf32>
    %191 = vector.shape_cast %177 : vector<14x14xf32> to vector<1x14x14xf32>
    tpu.vector_store %arg12[%c1_63, %c1_64, %c1_65], %191 {strides = array<i32>} : memref<3x16x16xf32, #tpu.memory_space<vmem>>, vector<1x14x14xf32>,
    %c2_66 = arith.constant 2 : index
    %c1_67 = arith.constant 1 : index
    %c1_68 = arith.constant 1 : index
    %192 = vector.load %arg12[%c2_66, %c1_67, %c1_68] : memref<3x16x16xf32, #tpu.memory_space<vmem>>, vector<1x14x14xf32>
    %193 = vector.shape_cast %192 : vector<1x14x14xf32> to vector<14x14xf32>
    %194 = vector.shape_cast %183 : vector<14x14xf32> to vector<1x14x14xf32>
    tpu.vector_store %arg12[%c2_66, %c1_67, %c1_68], %194 {strides = array<i32>} : memref<3x16x16xf32, #tpu.memory_space<vmem>>, vector<1x14x14xf32>,
    %c0_69 = arith.constant 0 : index
    %c0_70 = arith.constant 0 : index
    %c0_71 = arith.constant 0 : index
    %195 = vector.load %arg12[%c0_69, %c0_70, %c0_71] : memref<3x16x16xf32, #tpu.memory_space<vmem>>, vector<1x14x14xf32>
    %196 = vector.shape_cast %195 : vector<1x14x14xf32> to vector<14x14xf32>
    %c0_72 = arith.constant 0 : index
    %c0_73 = arith.constant 0 : index
    %c1_74 = arith.constant 1 : index
    %197 = vector.load %arg12[%c0_72, %c0_73, %c1_74] : memref<3x16x16xf32, #tpu.memory_space<vmem>>, vector<1x14x14xf32>
    %198 = vector.shape_cast %197 : vector<1x14x14xf32> to vector<14x14xf32>
    %c0_75 = arith.constant 0 : index
    %c0_76 = arith.constant 0 : index
    %c2_77 = arith.constant 2 : index
    %199 = vector.load %arg12[%c0_75, %c0_76, %c2_77] : memref<3x16x16xf32, #tpu.memory_space<vmem>>, vector<1x14x14xf32>
    %200 = vector.shape_cast %199 : vector<1x14x14xf32> to vector<14x14xf32>
    %c0_78 = arith.constant 0 : index
    %c1_79 = arith.constant 1 : index
    %c0_80 = arith.constant 0 : index
    %201 = vector.load %arg12[%c0_78, %c1_79, %c0_80] : memref<3x16x16xf32, #tpu.memory_space<vmem>>, vector<1x14x14xf32>
    %202 = vector.shape_cast %201 : vector<1x14x14xf32> to vector<14x14xf32>
    %c0_81 = arith.constant 0 : index
    %c1_82 = arith.constant 1 : index
    %c1_83 = arith.constant 1 : index
    %203 = vector.load %arg12[%c0_81, %c1_82, %c1_83] : memref<3x16x16xf32, #tpu.memory_space<vmem>>, vector<1x14x14xf32>
    %204 = vector.shape_cast %203 : vector<1x14x14xf32> to vector<14x14xf32>
    %c0_84 = arith.constant 0 : index
    %c1_85 = arith.constant 1 : index
    %c2_86 = arith.constant 2 : index
    %205 = vector.load %arg12[%c0_84, %c1_85, %c2_86] : memref<3x16x16xf32, #tpu.memory_space<vmem>>, vector<1x14x14xf32>
    %206 = vector.shape_cast %205 : vector<1x14x14xf32> to vector<14x14xf32>
    %c0_87 = arith.constant 0 : index
    %c2_88 = arith.constant 2 : index
    %c0_89 = arith.constant 0 : index
    %207 = vector.load %arg12[%c0_87, %c2_88, %c0_89] : memref<3x16x16xf32, #tpu.memory_space<vmem>>, vector<1x14x14xf32>
    %208 = vector.shape_cast %207 : vector<1x14x14xf32> to vector<14x14xf32>
    %c0_90 = arith.constant 0 : index
    %c2_91 = arith.constant 2 : index
    %c1_92 = arith.constant 1 : index
    %209 = vector.load %arg12[%c0_90, %c2_91, %c1_92] : memref<3x16x16xf32, #tpu.memory_space<vmem>>, vector<1x14x14xf32>
    %210 = vector.shape_cast %209 : vector<1x14x14xf32> to vector<14x14xf32>
    %c0_93 = arith.constant 0 : index
    %c2_94 = arith.constant 2 : index
    %c2_95 = arith.constant 2 : index
    %211 = vector.load %arg12[%c0_93, %c2_94, %c2_95] : memref<3x16x16xf32, #tpu.memory_space<vmem>>, vector<1x14x14xf32>
    %212 = vector.shape_cast %211 : vector<1x14x14xf32> to vector<14x14xf32>
    %c1_96 = arith.constant 1 : index
    %c0_97 = arith.constant 0 : index
    %c0_98 = arith.constant 0 : index
    %213 = vector.load %arg12[%c1_96, %c0_97, %c0_98] : memref<3x16x16xf32, #tpu.memory_space<vmem>>, vector<1x14x14xf32>
    %214 = vector.shape_cast %213 : vector<1x14x14xf32> to vector<14x14xf32>
    %c1_99 = arith.constant 1 : index
    %c0_100 = arith.constant 0 : index
    %c1_101 = arith.constant 1 : index
    %215 = vector.load %arg12[%c1_99, %c0_100, %c1_101] : memref<3x16x16xf32, #tpu.memory_space<vmem>>, vector<1x14x14xf32>
    %216 = vector.shape_cast %215 : vector<1x14x14xf32> to vector<14x14xf32>
    %c1_102 = arith.constant 1 : index
    %c0_103 = arith.constant 0 : index
    %c2_104 = arith.constant 2 : index
    %217 = vector.load %arg12[%c1_102, %c0_103, %c2_104] : memref<3x16x16xf32, #tpu.memory_space<vmem>>, vector<1x14x14xf32>
    %218 = vector.shape_cast %217 : vector<1x14x14xf32> to vector<14x14xf32>
    %c1_105 = arith.constant 1 : index
    %c1_106 = arith.constant 1 : index
    %c0_107 = arith.constant 0 : index
    %219 = vector.load %arg12[%c1_105, %c1_106, %c0_107] : memref<3x16x16xf32, #tpu.memory_space<vmem>>, vector<1x14x14xf32>
    %220 = vector.shape_cast %219 : vector<1x14x14xf32> to vector<14x14xf32>
    %c1_108 = arith.constant 1 : index
    %c1_109 = arith.constant 1 : index
    %c1_110 = arith.constant 1 : index
    %221 = vector.load %arg12[%c1_108, %c1_109, %c1_110] : memref<3x16x16xf32, #tpu.memory_space<vmem>>, vector<1x14x14xf32>
    %222 = vector.shape_cast %221 : vector<1x14x14xf32> to vector<14x14xf32>
    %c1_111 = arith.constant 1 : index
    %c1_112 = arith.constant 1 : index
    %c2_113 = arith.constant 2 : index
    %223 = vector.load %arg12[%c1_111, %c1_112, %c2_113] : memref<3x16x16xf32, #tpu.memory_space<vmem>>, vector<1x14x14xf32>
    %224 = vector.shape_cast %223 : vector<1x14x14xf32> to vector<14x14xf32>
    %c1_114 = arith.constant 1 : index
    %c2_115 = arith.constant 2 : index
    %c0_116 = arith.constant 0 : index
    %225 = vector.load %arg12[%c1_114, %c2_115, %c0_116] : memref<3x16x16xf32, #tpu.memory_space<vmem>>, vector<1x14x14xf32>
    %226 = vector.shape_cast %225 : vector<1x14x14xf32> to vector<14x14xf32>
    %c1_117 = arith.constant 1 : index
    %c2_118 = arith.constant 2 : index
    %c1_119 = arith.constant 1 : index
    %227 = vector.load %arg12[%c1_117, %c2_118, %c1_119] : memref<3x16x16xf32, #tpu.memory_space<vmem>>, vector<1x14x14xf32>
    %228 = vector.shape_cast %227 : vector<1x14x14xf32> to vector<14x14xf32>
    %c1_120 = arith.constant 1 : index
    %c2_121 = arith.constant 2 : index
    %c2_122 = arith.constant 2 : index
    %229 = vector.load %arg12[%c1_120, %c2_121, %c2_122] : memref<3x16x16xf32, #tpu.memory_space<vmem>>, vector<1x14x14xf32>
    %230 = vector.shape_cast %229 : vector<1x14x14xf32> to vector<14x14xf32>
    %c2_123 = arith.constant 2 : index
    %c0_124 = arith.constant 0 : index
    %c0_125 = arith.constant 0 : index
    %231 = vector.load %arg12[%c2_123, %c0_124, %c0_125] : memref<3x16x16xf32, #tpu.memory_space<vmem>>, vector<1x14x14xf32>
    %232 = vector.shape_cast %231 : vector<1x14x14xf32> to vector<14x14xf32>
    %c2_126 = arith.constant 2 : index
    %c0_127 = arith.constant 0 : index
    %c1_128 = arith.constant 1 : index
    %233 = vector.load %arg12[%c2_126, %c0_127, %c1_128] : memref<3x16x16xf32, #tpu.memory_space<vmem>>, vector<1x14x14xf32>
    %234 = vector.shape_cast %233 : vector<1x14x14xf32> to vector<14x14xf32>
    %c2_129 = arith.constant 2 : index
    %c0_130 = arith.constant 0 : index
    %c2_131 = arith.constant 2 : index
    %235 = vector.load %arg12[%c2_129, %c0_130, %c2_131] : memref<3x16x16xf32, #tpu.memory_space<vmem>>, vector<1x14x14xf32>
    %236 = vector.shape_cast %235 : vector<1x14x14xf32> to vector<14x14xf32>
    %c2_132 = arith.constant 2 : index
    %c1_133 = arith.constant 1 : index
    %c0_134 = arith.constant 0 : index
    %237 = vector.load %arg12[%c2_132, %c1_133, %c0_134] : memref<3x16x16xf32, #tpu.memory_space<vmem>>, vector<1x14x14xf32>
    %238 = vector.shape_cast %237 : vector<1x14x14xf32> to vector<14x14xf32>
    %c2_135 = arith.constant 2 : index
    %c1_136 = arith.constant 1 : index
    %c1_137 = arith.constant 1 : index
    %239 = vector.load %arg12[%c2_135, %c1_136, %c1_137] : memref<3x16x16xf32, #tpu.memory_space<vmem>>, vector<1x14x14xf32>
    %240 = vector.shape_cast %239 : vector<1x14x14xf32> to vector<14x14xf32>
    %c2_138 = arith.constant 2 : index
    %c1_139 = arith.constant 1 : index
    %c2_140 = arith.constant 2 : index
    %241 = vector.load %arg12[%c2_138, %c1_139, %c2_140] : memref<3x16x16xf32, #tpu.memory_space<vmem>>, vector<1x14x14xf32>
    %242 = vector.shape_cast %241 : vector<1x14x14xf32> to vector<14x14xf32>
    %c2_141 = arith.constant 2 : index
    %c2_142 = arith.constant 2 : index
    %c0_143 = arith.constant 0 : index
    %243 = vector.load %arg12[%c2_141, %c2_142, %c0_143] : memref<3x16x16xf32, #tpu.memory_space<vmem>>, vector<1x14x14xf32>
    %244 = vector.shape_cast %243 : vector<1x14x14xf32> to vector<14x14xf32>
    %c2_144 = arith.constant 2 : index
    %c2_145 = arith.constant 2 : index
    %c1_146 = arith.constant 1 : index
    %245 = vector.load %arg12[%c2_144, %c2_145, %c1_146] : memref<3x16x16xf32, #tpu.memory_space<vmem>>, vector<1x14x14xf32>
    %246 = vector.shape_cast %245 : vector<1x14x14xf32> to vector<14x14xf32>
    %c2_147 = arith.constant 2 : index
    %c2_148 = arith.constant 2 : index
    %c2_149 = arith.constant 2 : index
    %247 = vector.load %arg12[%c2_147, %c2_148, %c2_149] : memref<3x16x16xf32, #tpu.memory_space<vmem>>, vector<1x14x14xf32>
    %248 = vector.shape_cast %247 : vector<1x14x14xf32> to vector<14x14xf32>
    %c0_150 = arith.constant 0 : index
    %249 = memref.load %arg4[%c0_150] : memref<162xf32, #tpu.memory_space<smem>>
    %250 = vector.broadcast %249 : f32 to vector<14x14xf32>
    %251 = arith.mulf %250, %196 : vector<14x14xf32>
    %c1_151 = arith.constant 1 : index
    %252 = memref.load %arg4[%c1_151] : memref<162xf32, #tpu.memory_space<smem>>
    %253 = vector.broadcast %252 : f32 to vector<14x14xf32>
    %254 = arith.mulf %253, %198 : vector<14x14xf32>
    %255 = arith.addf %251, %254 : vector<14x14xf32>
    %c2_152 = arith.constant 2 : index
    %256 = memref.load %arg4[%c2_152] : memref<162xf32, #tpu.memory_space<smem>>
    %257 = vector.broadcast %256 : f32 to vector<14x14xf32>
    %258 = arith.mulf %257, %200 : vector<14x14xf32>
    %259 = arith.addf %255, %258 : vector<14x14xf32>
    %c3_153 = arith.constant 3 : index
    %260 = memref.load %arg4[%c3_153] : memref<162xf32, #tpu.memory_space<smem>>
    %261 = vector.broadcast %260 : f32 to vector<14x14xf32>
    %262 = arith.mulf %261, %202 : vector<14x14xf32>
    %263 = arith.addf %259, %262 : vector<14x14xf32>
    %c4_154 = arith.constant 4 : index
    %264 = memref.load %arg4[%c4_154] : memref<162xf32, #tpu.memory_space<smem>>
    %265 = vector.broadcast %264 : f32 to vector<14x14xf32>
    %266 = arith.mulf %265, %204 : vector<14x14xf32>
    %267 = arith.addf %263, %266 : vector<14x14xf32>
    %c5_155 = arith.constant 5 : index
    %268 = memref.load %arg4[%c5_155] : memref<162xf32, #tpu.memory_space<smem>>
    %269 = vector.broadcast %268 : f32 to vector<14x14xf32>
    %270 = arith.mulf %269, %206 : vector<14x14xf32>
    %271 = arith.addf %267, %270 : vector<14x14xf32>
    %c6_156 = arith.constant 6 : index
    %272 = memref.load %arg4[%c6_156] : memref<162xf32, #tpu.memory_space<smem>>
    %273 = vector.broadcast %272 : f32 to vector<14x14xf32>
    %274 = arith.mulf %273, %208 : vector<14x14xf32>
    %275 = arith.addf %271, %274 : vector<14x14xf32>
    %c7_157 = arith.constant 7 : index
    %276 = memref.load %arg4[%c7_157] : memref<162xf32, #tpu.memory_space<smem>>
    %277 = vector.broadcast %276 : f32 to vector<14x14xf32>
    %278 = arith.mulf %277, %210 : vector<14x14xf32>
    %279 = arith.addf %275, %278 : vector<14x14xf32>
    %c8_158 = arith.constant 8 : index
    %280 = memref.load %arg4[%c8_158] : memref<162xf32, #tpu.memory_space<smem>>
    %281 = vector.broadcast %280 : f32 to vector<14x14xf32>
    %282 = arith.mulf %281, %212 : vector<14x14xf32>
    %283 = arith.addf %279, %282 : vector<14x14xf32>
    %c9_159 = arith.constant 9 : index
    %284 = memref.load %arg4[%c9_159] : memref<162xf32, #tpu.memory_space<smem>>
    %285 = vector.broadcast %284 : f32 to vector<14x14xf32>
    %286 = arith.mulf %285, %214 : vector<14x14xf32>
    %287 = arith.addf %283, %286 : vector<14x14xf32>
    %c10_160 = arith.constant 10 : index
    %288 = memref.load %arg4[%c10_160] : memref<162xf32, #tpu.memory_space<smem>>
    %289 = vector.broadcast %288 : f32 to vector<14x14xf32>
    %290 = arith.mulf %289, %216 : vector<14x14xf32>
    %291 = arith.addf %287, %290 : vector<14x14xf32>
    %c11_161 = arith.constant 11 : index
    %292 = memref.load %arg4[%c11_161] : memref<162xf32, #tpu.memory_space<smem>>
    %293 = vector.broadcast %292 : f32 to vector<14x14xf32>
    %294 = arith.mulf %293, %218 : vector<14x14xf32>
    %295 = arith.addf %291, %294 : vector<14x14xf32>
    %c12_162 = arith.constant 12 : index
    %296 = memref.load %arg4[%c12_162] : memref<162xf32, #tpu.memory_space<smem>>
    %297 = vector.broadcast %296 : f32 to vector<14x14xf32>
    %298 = arith.mulf %297, %220 : vector<14x14xf32>
    %299 = arith.addf %295, %298 : vector<14x14xf32>
    %c13_163 = arith.constant 13 : index
    %300 = memref.load %arg4[%c13_163] : memref<162xf32, #tpu.memory_space<smem>>
    %301 = vector.broadcast %300 : f32 to vector<14x14xf32>
    %302 = arith.mulf %301, %222 : vector<14x14xf32>
    %303 = arith.addf %299, %302 : vector<14x14xf32>
    %c14_164 = arith.constant 14 : index
    %304 = memref.load %arg4[%c14_164] : memref<162xf32, #tpu.memory_space<smem>>
    %305 = vector.broadcast %304 : f32 to vector<14x14xf32>
    %306 = arith.mulf %305, %224 : vector<14x14xf32>
    %307 = arith.addf %303, %306 : vector<14x14xf32>
    %c15_165 = arith.constant 15 : index
    %308 = memref.load %arg4[%c15_165] : memref<162xf32, #tpu.memory_space<smem>>
    %309 = vector.broadcast %308 : f32 to vector<14x14xf32>
    %310 = arith.mulf %309, %226 : vector<14x14xf32>
    %311 = arith.addf %307, %310 : vector<14x14xf32>
    %c16_166 = arith.constant 16 : index
    %312 = memref.load %arg4[%c16_166] : memref<162xf32, #tpu.memory_space<smem>>
    %313 = vector.broadcast %312 : f32 to vector<14x14xf32>
    %314 = arith.mulf %313, %228 : vector<14x14xf32>
    %315 = arith.addf %311, %314 : vector<14x14xf32>
    %c17_167 = arith.constant 17 : index
    %316 = memref.load %arg4[%c17_167] : memref<162xf32, #tpu.memory_space<smem>>
    %317 = vector.broadcast %316 : f32 to vector<14x14xf32>
    %318 = arith.mulf %317, %230 : vector<14x14xf32>
    %319 = arith.addf %315, %318 : vector<14x14xf32>
    %c18_168 = arith.constant 18 : index
    %320 = memref.load %arg4[%c18_168] : memref<162xf32, #tpu.memory_space<smem>>
    %321 = vector.broadcast %320 : f32 to vector<14x14xf32>
    %322 = arith.mulf %321, %232 : vector<14x14xf32>
    %323 = arith.addf %319, %322 : vector<14x14xf32>
    %c19_169 = arith.constant 19 : index
    %324 = memref.load %arg4[%c19_169] : memref<162xf32, #tpu.memory_space<smem>>
    %325 = vector.broadcast %324 : f32 to vector<14x14xf32>
    %326 = arith.mulf %325, %234 : vector<14x14xf32>
    %327 = arith.addf %323, %326 : vector<14x14xf32>
    %c20_170 = arith.constant 20 : index
    %328 = memref.load %arg4[%c20_170] : memref<162xf32, #tpu.memory_space<smem>>
    %329 = vector.broadcast %328 : f32 to vector<14x14xf32>
    %330 = arith.mulf %329, %236 : vector<14x14xf32>
    %331 = arith.addf %327, %330 : vector<14x14xf32>
    %c21_171 = arith.constant 21 : index
    %332 = memref.load %arg4[%c21_171] : memref<162xf32, #tpu.memory_space<smem>>
    %333 = vector.broadcast %332 : f32 to vector<14x14xf32>
    %334 = arith.mulf %333, %238 : vector<14x14xf32>
    %335 = arith.addf %331, %334 : vector<14x14xf32>
    %c22_172 = arith.constant 22 : index
    %336 = memref.load %arg4[%c22_172] : memref<162xf32, #tpu.memory_space<smem>>
    %337 = vector.broadcast %336 : f32 to vector<14x14xf32>
    %338 = arith.mulf %337, %240 : vector<14x14xf32>
    %339 = arith.addf %335, %338 : vector<14x14xf32>
    %c23_173 = arith.constant 23 : index
    %340 = memref.load %arg4[%c23_173] : memref<162xf32, #tpu.memory_space<smem>>
    %341 = vector.broadcast %340 : f32 to vector<14x14xf32>
    %342 = arith.mulf %341, %242 : vector<14x14xf32>
    %343 = arith.addf %339, %342 : vector<14x14xf32>
    %c24_174 = arith.constant 24 : index
    %344 = memref.load %arg4[%c24_174] : memref<162xf32, #tpu.memory_space<smem>>
    %345 = vector.broadcast %344 : f32 to vector<14x14xf32>
    %346 = arith.mulf %345, %244 : vector<14x14xf32>
    %347 = arith.addf %343, %346 : vector<14x14xf32>
    %c25_175 = arith.constant 25 : index
    %348 = memref.load %arg4[%c25_175] : memref<162xf32, #tpu.memory_space<smem>>
    %349 = vector.broadcast %348 : f32 to vector<14x14xf32>
    %350 = arith.mulf %349, %246 : vector<14x14xf32>
    %351 = arith.addf %347, %350 : vector<14x14xf32>
    %c26_176 = arith.constant 26 : index
    %352 = memref.load %arg4[%c26_176] : memref<162xf32, #tpu.memory_space<smem>>
    %353 = vector.broadcast %352 : f32 to vector<14x14xf32>
    %354 = arith.mulf %353, %248 : vector<14x14xf32>
    %355 = arith.addf %351, %354 : vector<14x14xf32>
    %c0_177 = arith.constant 0 : index
    %356 = memref.load %arg5[%c0_177] : memref<6xf32, #tpu.memory_space<smem>>
    %357 = vector.broadcast %356 : f32 to vector<14x14xf32>
    %358 = arith.addf %355, %357 : vector<14x14xf32>
    %cst_178 = arith.constant 0.000000e+00 : f32
    %359 = vector.broadcast %cst_178 : f32 to vector<14x14xf32>
    %360 = arith.maximumf %358, %359 : vector<14x14xf32>
    %c27 = arith.constant 27 : index
    %361 = memref.load %arg4[%c27] : memref<162xf32, #tpu.memory_space<smem>>
    %362 = vector.broadcast %361 : f32 to vector<14x14xf32>
    %363 = arith.mulf %362, %196 : vector<14x14xf32>
    %c28 = arith.constant 28 : index
    %364 = memref.load %arg4[%c28] : memref<162xf32, #tpu.memory_space<smem>>
    %365 = vector.broadcast %364 : f32 to vector<14x14xf32>
    %366 = arith.mulf %365, %198 : vector<14x14xf32>
    %367 = arith.addf %363, %366 : vector<14x14xf32>
    %c29 = arith.constant 29 : index
    %368 = memref.load %arg4[%c29] : memref<162xf32, #tpu.memory_space<smem>>
    %369 = vector.broadcast %368 : f32 to vector<14x14xf32>
    %370 = arith.mulf %369, %200 : vector<14x14xf32>
    %371 = arith.addf %367, %370 : vector<14x14xf32>
    %c30 = arith.constant 30 : index
    %372 = memref.load %arg4[%c30] : memref<162xf32, #tpu.memory_space<smem>>
    %373 = vector.broadcast %372 : f32 to vector<14x14xf32>
    %374 = arith.mulf %373, %202 : vector<14x14xf32>
    %375 = arith.addf %371, %374 : vector<14x14xf32>
    %c31 = arith.constant 31 : index
    %376 = memref.load %arg4[%c31] : memref<162xf32, #tpu.memory_space<smem>>
    %377 = vector.broadcast %376 : f32 to vector<14x14xf32>
    %378 = arith.mulf %377, %204 : vector<14x14xf32>
    %379 = arith.addf %375, %378 : vector<14x14xf32>
    %c32 = arith.constant 32 : index
    %380 = memref.load %arg4[%c32] : memref<162xf32, #tpu.memory_space<smem>>
    %381 = vector.broadcast %380 : f32 to vector<14x14xf32>
    %382 = arith.mulf %381, %206 : vector<14x14xf32>
    %383 = arith.addf %379, %382 : vector<14x14xf32>
    %c33 = arith.constant 33 : index
    %384 = memref.load %arg4[%c33] : memref<162xf32, #tpu.memory_space<smem>>
    %385 = vector.broadcast %384 : f32 to vector<14x14xf32>
    %386 = arith.mulf %385, %208 : vector<14x14xf32>
    %387 = arith.addf %383, %386 : vector<14x14xf32>
    %c34 = arith.constant 34 : index
    %388 = memref.load %arg4[%c34] : memref<162xf32, #tpu.memory_space<smem>>
    %389 = vector.broadcast %388 : f32 to vector<14x14xf32>
    %390 = arith.mulf %389, %210 : vector<14x14xf32>
    %391 = arith.addf %387, %390 : vector<14x14xf32>
    %c35 = arith.constant 35 : index
    %392 = memref.load %arg4[%c35] : memref<162xf32, #tpu.memory_space<smem>>
    %393 = vector.broadcast %392 : f32 to vector<14x14xf32>
    %394 = arith.mulf %393, %212 : vector<14x14xf32>
    %395 = arith.addf %391, %394 : vector<14x14xf32>
    %c36 = arith.constant 36 : index
    %396 = memref.load %arg4[%c36] : memref<162xf32, #tpu.memory_space<smem>>
    %397 = vector.broadcast %396 : f32 to vector<14x14xf32>
    %398 = arith.mulf %397, %214 : vector<14x14xf32>
    %399 = arith.addf %395, %398 : vector<14x14xf32>
    %c37 = arith.constant 37 : index
    %400 = memref.load %arg4[%c37] : memref<162xf32, #tpu.memory_space<smem>>
    %401 = vector.broadcast %400 : f32 to vector<14x14xf32>
    %402 = arith.mulf %401, %216 : vector<14x14xf32>
    %403 = arith.addf %399, %402 : vector<14x14xf32>
    %c38 = arith.constant 38 : index
    %404 = memref.load %arg4[%c38] : memref<162xf32, #tpu.memory_space<smem>>
    %405 = vector.broadcast %404 : f32 to vector<14x14xf32>
    %406 = arith.mulf %405, %218 : vector<14x14xf32>
    %407 = arith.addf %403, %406 : vector<14x14xf32>
    %c39 = arith.constant 39 : index
    %408 = memref.load %arg4[%c39] : memref<162xf32, #tpu.memory_space<smem>>
    %409 = vector.broadcast %408 : f32 to vector<14x14xf32>
    %410 = arith.mulf %409, %220 : vector<14x14xf32>
    %411 = arith.addf %407, %410 : vector<14x14xf32>
    %c40 = arith.constant 40 : index
    %412 = memref.load %arg4[%c40] : memref<162xf32, #tpu.memory_space<smem>>
    %413 = vector.broadcast %412 : f32 to vector<14x14xf32>
    %414 = arith.mulf %413, %222 : vector<14x14xf32>
    %415 = arith.addf %411, %414 : vector<14x14xf32>
    %c41 = arith.constant 41 : index
    %416 = memref.load %arg4[%c41] : memref<162xf32, #tpu.memory_space<smem>>
    %417 = vector.broadcast %416 : f32 to vector<14x14xf32>
    %418 = arith.mulf %417, %224 : vector<14x14xf32>
    %419 = arith.addf %415, %418 : vector<14x14xf32>
    %c42 = arith.constant 42 : index
    %420 = memref.load %arg4[%c42] : memref<162xf32, #tpu.memory_space<smem>>
    %421 = vector.broadcast %420 : f32 to vector<14x14xf32>
    %422 = arith.mulf %421, %226 : vector<14x14xf32>
    %423 = arith.addf %419, %422 : vector<14x14xf32>
    %c43 = arith.constant 43 : index
    %424 = memref.load %arg4[%c43] : memref<162xf32, #tpu.memory_space<smem>>
    %425 = vector.broadcast %424 : f32 to vector<14x14xf32>
    %426 = arith.mulf %425, %228 : vector<14x14xf32>
    %427 = arith.addf %423, %426 : vector<14x14xf32>
    %c44 = arith.constant 44 : index
    %428 = memref.load %arg4[%c44] : memref<162xf32, #tpu.memory_space<smem>>
    %429 = vector.broadcast %428 : f32 to vector<14x14xf32>
    %430 = arith.mulf %429, %230 : vector<14x14xf32>
    %431 = arith.addf %427, %430 : vector<14x14xf32>
    %c45 = arith.constant 45 : index
    %432 = memref.load %arg4[%c45] : memref<162xf32, #tpu.memory_space<smem>>
    %433 = vector.broadcast %432 : f32 to vector<14x14xf32>
    %434 = arith.mulf %433, %232 : vector<14x14xf32>
    %435 = arith.addf %431, %434 : vector<14x14xf32>
    %c46 = arith.constant 46 : index
    %436 = memref.load %arg4[%c46] : memref<162xf32, #tpu.memory_space<smem>>
    %437 = vector.broadcast %436 : f32 to vector<14x14xf32>
    %438 = arith.mulf %437, %234 : vector<14x14xf32>
    %439 = arith.addf %435, %438 : vector<14x14xf32>
    %c47 = arith.constant 47 : index
    %440 = memref.load %arg4[%c47] : memref<162xf32, #tpu.memory_space<smem>>
    %441 = vector.broadcast %440 : f32 to vector<14x14xf32>
    %442 = arith.mulf %441, %236 : vector<14x14xf32>
    %443 = arith.addf %439, %442 : vector<14x14xf32>
    %c48 = arith.constant 48 : index
    %444 = memref.load %arg4[%c48] : memref<162xf32, #tpu.memory_space<smem>>
    %445 = vector.broadcast %444 : f32 to vector<14x14xf32>
    %446 = arith.mulf %445, %238 : vector<14x14xf32>
    %447 = arith.addf %443, %446 : vector<14x14xf32>
    %c49 = arith.constant 49 : index
    %448 = memref.load %arg4[%c49] : memref<162xf32, #tpu.memory_space<smem>>
    %449 = vector.broadcast %448 : f32 to vector<14x14xf32>
    %450 = arith.mulf %449, %240 : vector<14x14xf32>
    %451 = arith.addf %447, %450 : vector<14x14xf32>
    %c50 = arith.constant 50 : index
    %452 = memref.load %arg4[%c50] : memref<162xf32, #tpu.memory_space<smem>>
    %453 = vector.broadcast %452 : f32 to vector<14x14xf32>
    %454 = arith.mulf %453, %242 : vector<14x14xf32>
    %455 = arith.addf %451, %454 : vector<14x14xf32>
    %c51 = arith.constant 51 : index
    %456 = memref.load %arg4[%c51] : memref<162xf32, #tpu.memory_space<smem>>
    %457 = vector.broadcast %456 : f32 to vector<14x14xf32>
    %458 = arith.mulf %457, %244 : vector<14x14xf32>
    %459 = arith.addf %455, %458 : vector<14x14xf32>
    %c52 = arith.constant 52 : index
    %460 = memref.load %arg4[%c52] : memref<162xf32, #tpu.memory_space<smem>>
    %461 = vector.broadcast %460 : f32 to vector<14x14xf32>
    %462 = arith.mulf %461, %246 : vector<14x14xf32>
    %463 = arith.addf %459, %462 : vector<14x14xf32>
    %c53 = arith.constant 53 : index
    %464 = memref.load %arg4[%c53] : memref<162xf32, #tpu.memory_space<smem>>
    %465 = vector.broadcast %464 : f32 to vector<14x14xf32>
    %466 = arith.mulf %465, %248 : vector<14x14xf32>
    %467 = arith.addf %463, %466 : vector<14x14xf32>
    %c1_179 = arith.constant 1 : index
    %468 = memref.load %arg5[%c1_179] : memref<6xf32, #tpu.memory_space<smem>>
    %469 = vector.broadcast %468 : f32 to vector<14x14xf32>
    %470 = arith.addf %467, %469 : vector<14x14xf32>
    %cst_180 = arith.constant 0.000000e+00 : f32
    %471 = vector.broadcast %cst_180 : f32 to vector<14x14xf32>
    %472 = arith.maximumf %470, %471 : vector<14x14xf32>
    %c54 = arith.constant 54 : index
    %473 = memref.load %arg4[%c54] : memref<162xf32, #tpu.memory_space<smem>>
    %474 = vector.broadcast %473 : f32 to vector<14x14xf32>
    %475 = arith.mulf %474, %196 : vector<14x14xf32>
    %c55 = arith.constant 55 : index
    %476 = memref.load %arg4[%c55] : memref<162xf32, #tpu.memory_space<smem>>
    %477 = vector.broadcast %476 : f32 to vector<14x14xf32>
    %478 = arith.mulf %477, %198 : vector<14x14xf32>
    %479 = arith.addf %475, %478 : vector<14x14xf32>
    %c56 = arith.constant 56 : index
    %480 = memref.load %arg4[%c56] : memref<162xf32, #tpu.memory_space<smem>>
    %481 = vector.broadcast %480 : f32 to vector<14x14xf32>
    %482 = arith.mulf %481, %200 : vector<14x14xf32>
    %483 = arith.addf %479, %482 : vector<14x14xf32>
    %c57 = arith.constant 57 : index
    %484 = memref.load %arg4[%c57] : memref<162xf32, #tpu.memory_space<smem>>
    %485 = vector.broadcast %484 : f32 to vector<14x14xf32>
    %486 = arith.mulf %485, %202 : vector<14x14xf32>
    %487 = arith.addf %483, %486 : vector<14x14xf32>
    %c58 = arith.constant 58 : index
    %488 = memref.load %arg4[%c58] : memref<162xf32, #tpu.memory_space<smem>>
    %489 = vector.broadcast %488 : f32 to vector<14x14xf32>
    %490 = arith.mulf %489, %204 : vector<14x14xf32>
    %491 = arith.addf %487, %490 : vector<14x14xf32>
    %c59 = arith.constant 59 : index
    %492 = memref.load %arg4[%c59] : memref<162xf32, #tpu.memory_space<smem>>
    %493 = vector.broadcast %492 : f32 to vector<14x14xf32>
    %494 = arith.mulf %493, %206 : vector<14x14xf32>
    %495 = arith.addf %491, %494 : vector<14x14xf32>
    %c60 = arith.constant 60 : index
    %496 = memref.load %arg4[%c60] : memref<162xf32, #tpu.memory_space<smem>>
    %497 = vector.broadcast %496 : f32 to vector<14x14xf32>
    %498 = arith.mulf %497, %208 : vector<14x14xf32>
    %499 = arith.addf %495, %498 : vector<14x14xf32>
    %c61 = arith.constant 61 : index
    %500 = memref.load %arg4[%c61] : memref<162xf32, #tpu.memory_space<smem>>
    %501 = vector.broadcast %500 : f32 to vector<14x14xf32>
    %502 = arith.mulf %501, %210 : vector<14x14xf32>
    %503 = arith.addf %499, %502 : vector<14x14xf32>
    %c62 = arith.constant 62 : index
    %504 = memref.load %arg4[%c62] : memref<162xf32, #tpu.memory_space<smem>>
    %505 = vector.broadcast %504 : f32 to vector<14x14xf32>
    %506 = arith.mulf %505, %212 : vector<14x14xf32>
    %507 = arith.addf %503, %506 : vector<14x14xf32>
    %c63 = arith.constant 63 : index
    %508 = memref.load %arg4[%c63] : memref<162xf32, #tpu.memory_space<smem>>
    %509 = vector.broadcast %508 : f32 to vector<14x14xf32>
    %510 = arith.mulf %509, %214 : vector<14x14xf32>
    %511 = arith.addf %507, %510 : vector<14x14xf32>
    %c64 = arith.constant 64 : index
    %512 = memref.load %arg4[%c64] : memref<162xf32, #tpu.memory_space<smem>>
    %513 = vector.broadcast %512 : f32 to vector<14x14xf32>
    %514 = arith.mulf %513, %216 : vector<14x14xf32>
    %515 = arith.addf %511, %514 : vector<14x14xf32>
    %c65 = arith.constant 65 : index
    %516 = memref.load %arg4[%c65] : memref<162xf32, #tpu.memory_space<smem>>
    %517 = vector.broadcast %516 : f32 to vector<14x14xf32>
    %518 = arith.mulf %517, %218 : vector<14x14xf32>
    %519 = arith.addf %515, %518 : vector<14x14xf32>
    %c66 = arith.constant 66 : index
    %520 = memref.load %arg4[%c66] : memref<162xf32, #tpu.memory_space<smem>>
    %521 = vector.broadcast %520 : f32 to vector<14x14xf32>
    %522 = arith.mulf %521, %220 : vector<14x14xf32>
    %523 = arith.addf %519, %522 : vector<14x14xf32>
    %c67 = arith.constant 67 : index
    %524 = memref.load %arg4[%c67] : memref<162xf32, #tpu.memory_space<smem>>
    %525 = vector.broadcast %524 : f32 to vector<14x14xf32>
    %526 = arith.mulf %525, %222 : vector<14x14xf32>
    %527 = arith.addf %523, %526 : vector<14x14xf32>
    %c68 = arith.constant 68 : index
    %528 = memref.load %arg4[%c68] : memref<162xf32, #tpu.memory_space<smem>>
    %529 = vector.broadcast %528 : f32 to vector<14x14xf32>
    %530 = arith.mulf %529, %224 : vector<14x14xf32>
    %531 = arith.addf %527, %530 : vector<14x14xf32>
    %c69 = arith.constant 69 : index
    %532 = memref.load %arg4[%c69] : memref<162xf32, #tpu.memory_space<smem>>
    %533 = vector.broadcast %532 : f32 to vector<14x14xf32>
    %534 = arith.mulf %533, %226 : vector<14x14xf32>
    %535 = arith.addf %531, %534 : vector<14x14xf32>
    %c70 = arith.constant 70 : index
    %536 = memref.load %arg4[%c70] : memref<162xf32, #tpu.memory_space<smem>>
    %537 = vector.broadcast %536 : f32 to vector<14x14xf32>
    %538 = arith.mulf %537, %228 : vector<14x14xf32>
    %539 = arith.addf %535, %538 : vector<14x14xf32>
    %c71 = arith.constant 71 : index
    %540 = memref.load %arg4[%c71] : memref<162xf32, #tpu.memory_space<smem>>
    %541 = vector.broadcast %540 : f32 to vector<14x14xf32>
    %542 = arith.mulf %541, %230 : vector<14x14xf32>
    %543 = arith.addf %539, %542 : vector<14x14xf32>
    %c72 = arith.constant 72 : index
    %544 = memref.load %arg4[%c72] : memref<162xf32, #tpu.memory_space<smem>>
    %545 = vector.broadcast %544 : f32 to vector<14x14xf32>
    %546 = arith.mulf %545, %232 : vector<14x14xf32>
    %547 = arith.addf %543, %546 : vector<14x14xf32>
    %c73 = arith.constant 73 : index
    %548 = memref.load %arg4[%c73] : memref<162xf32, #tpu.memory_space<smem>>
    %549 = vector.broadcast %548 : f32 to vector<14x14xf32>
    %550 = arith.mulf %549, %234 : vector<14x14xf32>
    %551 = arith.addf %547, %550 : vector<14x14xf32>
    %c74 = arith.constant 74 : index
    %552 = memref.load %arg4[%c74] : memref<162xf32, #tpu.memory_space<smem>>
    %553 = vector.broadcast %552 : f32 to vector<14x14xf32>
    %554 = arith.mulf %553, %236 : vector<14x14xf32>
    %555 = arith.addf %551, %554 : vector<14x14xf32>
    %c75 = arith.constant 75 : index
    %556 = memref.load %arg4[%c75] : memref<162xf32, #tpu.memory_space<smem>>
    %557 = vector.broadcast %556 : f32 to vector<14x14xf32>
    %558 = arith.mulf %557, %238 : vector<14x14xf32>
    %559 = arith.addf %555, %558 : vector<14x14xf32>
    %c76 = arith.constant 76 : index
    %560 = memref.load %arg4[%c76] : memref<162xf32, #tpu.memory_space<smem>>
    %561 = vector.broadcast %560 : f32 to vector<14x14xf32>
    %562 = arith.mulf %561, %240 : vector<14x14xf32>
    %563 = arith.addf %559, %562 : vector<14x14xf32>
    %c77 = arith.constant 77 : index
    %564 = memref.load %arg4[%c77] : memref<162xf32, #tpu.memory_space<smem>>
    %565 = vector.broadcast %564 : f32 to vector<14x14xf32>
    %566 = arith.mulf %565, %242 : vector<14x14xf32>
    %567 = arith.addf %563, %566 : vector<14x14xf32>
    %c78 = arith.constant 78 : index
    %568 = memref.load %arg4[%c78] : memref<162xf32, #tpu.memory_space<smem>>
    %569 = vector.broadcast %568 : f32 to vector<14x14xf32>
    %570 = arith.mulf %569, %244 : vector<14x14xf32>
    %571 = arith.addf %567, %570 : vector<14x14xf32>
    %c79 = arith.constant 79 : index
    %572 = memref.load %arg4[%c79] : memref<162xf32, #tpu.memory_space<smem>>
    %573 = vector.broadcast %572 : f32 to vector<14x14xf32>
    %574 = arith.mulf %573, %246 : vector<14x14xf32>
    %575 = arith.addf %571, %574 : vector<14x14xf32>
    %c80 = arith.constant 80 : index
    %576 = memref.load %arg4[%c80] : memref<162xf32, #tpu.memory_space<smem>>
    %577 = vector.broadcast %576 : f32 to vector<14x14xf32>
    %578 = arith.mulf %577, %248 : vector<14x14xf32>
    %579 = arith.addf %575, %578 : vector<14x14xf32>
    %c2_181 = arith.constant 2 : index
    %580 = memref.load %arg5[%c2_181] : memref<6xf32, #tpu.memory_space<smem>>
    %581 = vector.broadcast %580 : f32 to vector<14x14xf32>
    %582 = arith.addf %579, %581 : vector<14x14xf32>
    %cst_182 = arith.constant 0.000000e+00 : f32
    %583 = vector.broadcast %cst_182 : f32 to vector<14x14xf32>
    %584 = arith.maximumf %582, %583 : vector<14x14xf32>
    %c81 = arith.constant 81 : index
    %585 = memref.load %arg4[%c81] : memref<162xf32, #tpu.memory_space<smem>>
    %586 = vector.broadcast %585 : f32 to vector<14x14xf32>
    %587 = arith.mulf %586, %196 : vector<14x14xf32>
    %c82 = arith.constant 82 : index
    %588 = memref.load %arg4[%c82] : memref<162xf32, #tpu.memory_space<smem>>
    %589 = vector.broadcast %588 : f32 to vector<14x14xf32>
    %590 = arith.mulf %589, %198 : vector<14x14xf32>
    %591 = arith.addf %587, %590 : vector<14x14xf32>
    %c83 = arith.constant 83 : index
    %592 = memref.load %arg4[%c83] : memref<162xf32, #tpu.memory_space<smem>>
    %593 = vector.broadcast %592 : f32 to vector<14x14xf32>
    %594 = arith.mulf %593, %200 : vector<14x14xf32>
    %595 = arith.addf %591, %594 : vector<14x14xf32>
    %c84 = arith.constant 84 : index
    %596 = memref.load %arg4[%c84] : memref<162xf32, #tpu.memory_space<smem>>
    %597 = vector.broadcast %596 : f32 to vector<14x14xf32>
    %598 = arith.mulf %597, %202 : vector<14x14xf32>
    %599 = arith.addf %595, %598 : vector<14x14xf32>
    %c85 = arith.constant 85 : index
    %600 = memref.load %arg4[%c85] : memref<162xf32, #tpu.memory_space<smem>>
    %601 = vector.broadcast %600 : f32 to vector<14x14xf32>
    %602 = arith.mulf %601, %204 : vector<14x14xf32>
    %603 = arith.addf %599, %602 : vector<14x14xf32>
    %c86 = arith.constant 86 : index
    %604 = memref.load %arg4[%c86] : memref<162xf32, #tpu.memory_space<smem>>
    %605 = vector.broadcast %604 : f32 to vector<14x14xf32>
    %606 = arith.mulf %605, %206 : vector<14x14xf32>
    %607 = arith.addf %603, %606 : vector<14x14xf32>
    %c87 = arith.constant 87 : index
    %608 = memref.load %arg4[%c87] : memref<162xf32, #tpu.memory_space<smem>>
    %609 = vector.broadcast %608 : f32 to vector<14x14xf32>
    %610 = arith.mulf %609, %208 : vector<14x14xf32>
    %611 = arith.addf %607, %610 : vector<14x14xf32>
    %c88 = arith.constant 88 : index
    %612 = memref.load %arg4[%c88] : memref<162xf32, #tpu.memory_space<smem>>
    %613 = vector.broadcast %612 : f32 to vector<14x14xf32>
    %614 = arith.mulf %613, %210 : vector<14x14xf32>
    %615 = arith.addf %611, %614 : vector<14x14xf32>
    %c89 = arith.constant 89 : index
    %616 = memref.load %arg4[%c89] : memref<162xf32, #tpu.memory_space<smem>>
    %617 = vector.broadcast %616 : f32 to vector<14x14xf32>
    %618 = arith.mulf %617, %212 : vector<14x14xf32>
    %619 = arith.addf %615, %618 : vector<14x14xf32>
    %c90 = arith.constant 90 : index
    %620 = memref.load %arg4[%c90] : memref<162xf32, #tpu.memory_space<smem>>
    %621 = vector.broadcast %620 : f32 to vector<14x14xf32>
    %622 = arith.mulf %621, %214 : vector<14x14xf32>
    %623 = arith.addf %619, %622 : vector<14x14xf32>
    %c91 = arith.constant 91 : index
    %624 = memref.load %arg4[%c91] : memref<162xf32, #tpu.memory_space<smem>>
    %625 = vector.broadcast %624 : f32 to vector<14x14xf32>
    %626 = arith.mulf %625, %216 : vector<14x14xf32>
    %627 = arith.addf %623, %626 : vector<14x14xf32>
    %c92 = arith.constant 92 : index
    %628 = memref.load %arg4[%c92] : memref<162xf32, #tpu.memory_space<smem>>
    %629 = vector.broadcast %628 : f32 to vector<14x14xf32>
    %630 = arith.mulf %629, %218 : vector<14x14xf32>
    %631 = arith.addf %627, %630 : vector<14x14xf32>
    %c93 = arith.constant 93 : index
    %632 = memref.load %arg4[%c93] : memref<162xf32, #tpu.memory_space<smem>>
    %633 = vector.broadcast %632 : f32 to vector<14x14xf32>
    %634 = arith.mulf %633, %220 : vector<14x14xf32>
    %635 = arith.addf %631, %634 : vector<14x14xf32>
    %c94 = arith.constant 94 : index
    %636 = memref.load %arg4[%c94] : memref<162xf32, #tpu.memory_space<smem>>
    %637 = vector.broadcast %636 : f32 to vector<14x14xf32>
    %638 = arith.mulf %637, %222 : vector<14x14xf32>
    %639 = arith.addf %635, %638 : vector<14x14xf32>
    %c95 = arith.constant 95 : index
    %640 = memref.load %arg4[%c95] : memref<162xf32, #tpu.memory_space<smem>>
    %641 = vector.broadcast %640 : f32 to vector<14x14xf32>
    %642 = arith.mulf %641, %224 : vector<14x14xf32>
    %643 = arith.addf %639, %642 : vector<14x14xf32>
    %c96 = arith.constant 96 : index
    %644 = memref.load %arg4[%c96] : memref<162xf32, #tpu.memory_space<smem>>
    %645 = vector.broadcast %644 : f32 to vector<14x14xf32>
    %646 = arith.mulf %645, %226 : vector<14x14xf32>
    %647 = arith.addf %643, %646 : vector<14x14xf32>
    %c97 = arith.constant 97 : index
    %648 = memref.load %arg4[%c97] : memref<162xf32, #tpu.memory_space<smem>>
    %649 = vector.broadcast %648 : f32 to vector<14x14xf32>
    %650 = arith.mulf %649, %228 : vector<14x14xf32>
    %651 = arith.addf %647, %650 : vector<14x14xf32>
    %c98 = arith.constant 98 : index
    %652 = memref.load %arg4[%c98] : memref<162xf32, #tpu.memory_space<smem>>
    %653 = vector.broadcast %652 : f32 to vector<14x14xf32>
    %654 = arith.mulf %653, %230 : vector<14x14xf32>
    %655 = arith.addf %651, %654 : vector<14x14xf32>
    %c99 = arith.constant 99 : index
    %656 = memref.load %arg4[%c99] : memref<162xf32, #tpu.memory_space<smem>>
    %657 = vector.broadcast %656 : f32 to vector<14x14xf32>
    %658 = arith.mulf %657, %232 : vector<14x14xf32>
    %659 = arith.addf %655, %658 : vector<14x14xf32>
    %c100 = arith.constant 100 : index
    %660 = memref.load %arg4[%c100] : memref<162xf32, #tpu.memory_space<smem>>
    %661 = vector.broadcast %660 : f32 to vector<14x14xf32>
    %662 = arith.mulf %661, %234 : vector<14x14xf32>
    %663 = arith.addf %659, %662 : vector<14x14xf32>
    %c101 = arith.constant 101 : index
    %664 = memref.load %arg4[%c101] : memref<162xf32, #tpu.memory_space<smem>>
    %665 = vector.broadcast %664 : f32 to vector<14x14xf32>
    %666 = arith.mulf %665, %236 : vector<14x14xf32>
    %667 = arith.addf %663, %666 : vector<14x14xf32>
    %c102 = arith.constant 102 : index
    %668 = memref.load %arg4[%c102] : memref<162xf32, #tpu.memory_space<smem>>
    %669 = vector.broadcast %668 : f32 to vector<14x14xf32>
    %670 = arith.mulf %669, %238 : vector<14x14xf32>
    %671 = arith.addf %667, %670 : vector<14x14xf32>
    %c103 = arith.constant 103 : index
    %672 = memref.load %arg4[%c103] : memref<162xf32, #tpu.memory_space<smem>>
    %673 = vector.broadcast %672 : f32 to vector<14x14xf32>
    %674 = arith.mulf %673, %240 : vector<14x14xf32>
    %675 = arith.addf %671, %674 : vector<14x14xf32>
    %c104 = arith.constant 104 : index
    %676 = memref.load %arg4[%c104] : memref<162xf32, #tpu.memory_space<smem>>
    %677 = vector.broadcast %676 : f32 to vector<14x14xf32>
    %678 = arith.mulf %677, %242 : vector<14x14xf32>
    %679 = arith.addf %675, %678 : vector<14x14xf32>
    %c105 = arith.constant 105 : index
    %680 = memref.load %arg4[%c105] : memref<162xf32, #tpu.memory_space<smem>>
    %681 = vector.broadcast %680 : f32 to vector<14x14xf32>
    %682 = arith.mulf %681, %244 : vector<14x14xf32>
    %683 = arith.addf %679, %682 : vector<14x14xf32>
    %c106 = arith.constant 106 : index
    %684 = memref.load %arg4[%c106] : memref<162xf32, #tpu.memory_space<smem>>
    %685 = vector.broadcast %684 : f32 to vector<14x14xf32>
    %686 = arith.mulf %685, %246 : vector<14x14xf32>
    %687 = arith.addf %683, %686 : vector<14x14xf32>
    %c107 = arith.constant 107 : index
    %688 = memref.load %arg4[%c107] : memref<162xf32, #tpu.memory_space<smem>>
    %689 = vector.broadcast %688 : f32 to vector<14x14xf32>
    %690 = arith.mulf %689, %248 : vector<14x14xf32>
    %691 = arith.addf %687, %690 : vector<14x14xf32>
    %c3_183 = arith.constant 3 : index
    %692 = memref.load %arg5[%c3_183] : memref<6xf32, #tpu.memory_space<smem>>
    %693 = vector.broadcast %692 : f32 to vector<14x14xf32>
    %694 = arith.addf %691, %693 : vector<14x14xf32>
    %cst_184 = arith.constant 0.000000e+00 : f32
    %695 = vector.broadcast %cst_184 : f32 to vector<14x14xf32>
    %696 = arith.maximumf %694, %695 : vector<14x14xf32>
    %c108 = arith.constant 108 : index
    %697 = memref.load %arg4[%c108] : memref<162xf32, #tpu.memory_space<smem>>
    %698 = vector.broadcast %697 : f32 to vector<14x14xf32>
    %699 = arith.mulf %698, %196 : vector<14x14xf32>
    %c109 = arith.constant 109 : index
    %700 = memref.load %arg4[%c109] : memref<162xf32, #tpu.memory_space<smem>>
    %701 = vector.broadcast %700 : f32 to vector<14x14xf32>
    %702 = arith.mulf %701, %198 : vector<14x14xf32>
    %703 = arith.addf %699, %702 : vector<14x14xf32>
    %c110 = arith.constant 110 : index
    %704 = memref.load %arg4[%c110] : memref<162xf32, #tpu.memory_space<smem>>
    %705 = vector.broadcast %704 : f32 to vector<14x14xf32>
    %706 = arith.mulf %705, %200 : vector<14x14xf32>
    %707 = arith.addf %703, %706 : vector<14x14xf32>
    %c111 = arith.constant 111 : index
    %708 = memref.load %arg4[%c111] : memref<162xf32, #tpu.memory_space<smem>>
    %709 = vector.broadcast %708 : f32 to vector<14x14xf32>
    %710 = arith.mulf %709, %202 : vector<14x14xf32>
    %711 = arith.addf %707, %710 : vector<14x14xf32>
    %c112 = arith.constant 112 : index
    %712 = memref.load %arg4[%c112] : memref<162xf32, #tpu.memory_space<smem>>
    %713 = vector.broadcast %712 : f32 to vector<14x14xf32>
    %714 = arith.mulf %713, %204 : vector<14x14xf32>
    %715 = arith.addf %711, %714 : vector<14x14xf32>
    %c113 = arith.constant 113 : index
    %716 = memref.load %arg4[%c113] : memref<162xf32, #tpu.memory_space<smem>>
    %717 = vector.broadcast %716 : f32 to vector<14x14xf32>
    %718 = arith.mulf %717, %206 : vector<14x14xf32>
    %719 = arith.addf %715, %718 : vector<14x14xf32>
    %c114 = arith.constant 114 : index
    %720 = memref.load %arg4[%c114] : memref<162xf32, #tpu.memory_space<smem>>
    %721 = vector.broadcast %720 : f32 to vector<14x14xf32>
    %722 = arith.mulf %721, %208 : vector<14x14xf32>
    %723 = arith.addf %719, %722 : vector<14x14xf32>
    %c115 = arith.constant 115 : index
    %724 = memref.load %arg4[%c115] : memref<162xf32, #tpu.memory_space<smem>>
    %725 = vector.broadcast %724 : f32 to vector<14x14xf32>
    %726 = arith.mulf %725, %210 : vector<14x14xf32>
    %727 = arith.addf %723, %726 : vector<14x14xf32>
    %c116 = arith.constant 116 : index
    %728 = memref.load %arg4[%c116] : memref<162xf32, #tpu.memory_space<smem>>
    %729 = vector.broadcast %728 : f32 to vector<14x14xf32>
    %730 = arith.mulf %729, %212 : vector<14x14xf32>
    %731 = arith.addf %727, %730 : vector<14x14xf32>
    %c117 = arith.constant 117 : index
    %732 = memref.load %arg4[%c117] : memref<162xf32, #tpu.memory_space<smem>>
    %733 = vector.broadcast %732 : f32 to vector<14x14xf32>
    %734 = arith.mulf %733, %214 : vector<14x14xf32>
    %735 = arith.addf %731, %734 : vector<14x14xf32>
    %c118 = arith.constant 118 : index
    %736 = memref.load %arg4[%c118] : memref<162xf32, #tpu.memory_space<smem>>
    %737 = vector.broadcast %736 : f32 to vector<14x14xf32>
    %738 = arith.mulf %737, %216 : vector<14x14xf32>
    %739 = arith.addf %735, %738 : vector<14x14xf32>
    %c119 = arith.constant 119 : index
    %740 = memref.load %arg4[%c119] : memref<162xf32, #tpu.memory_space<smem>>
    %741 = vector.broadcast %740 : f32 to vector<14x14xf32>
    %742 = arith.mulf %741, %218 : vector<14x14xf32>
    %743 = arith.addf %739, %742 : vector<14x14xf32>
    %c120 = arith.constant 120 : index
    %744 = memref.load %arg4[%c120] : memref<162xf32, #tpu.memory_space<smem>>
    %745 = vector.broadcast %744 : f32 to vector<14x14xf32>
    %746 = arith.mulf %745, %220 : vector<14x14xf32>
    %747 = arith.addf %743, %746 : vector<14x14xf32>
    %c121 = arith.constant 121 : index
    %748 = memref.load %arg4[%c121] : memref<162xf32, #tpu.memory_space<smem>>
    %749 = vector.broadcast %748 : f32 to vector<14x14xf32>
    %750 = arith.mulf %749, %222 : vector<14x14xf32>
    %751 = arith.addf %747, %750 : vector<14x14xf32>
    %c122 = arith.constant 122 : index
    %752 = memref.load %arg4[%c122] : memref<162xf32, #tpu.memory_space<smem>>
    %753 = vector.broadcast %752 : f32 to vector<14x14xf32>
    %754 = arith.mulf %753, %224 : vector<14x14xf32>
    %755 = arith.addf %751, %754 : vector<14x14xf32>
    %c123 = arith.constant 123 : index
    %756 = memref.load %arg4[%c123] : memref<162xf32, #tpu.memory_space<smem>>
    %757 = vector.broadcast %756 : f32 to vector<14x14xf32>
    %758 = arith.mulf %757, %226 : vector<14x14xf32>
    %759 = arith.addf %755, %758 : vector<14x14xf32>
    %c124 = arith.constant 124 : index
    %760 = memref.load %arg4[%c124] : memref<162xf32, #tpu.memory_space<smem>>
    %761 = vector.broadcast %760 : f32 to vector<14x14xf32>
    %762 = arith.mulf %761, %228 : vector<14x14xf32>
    %763 = arith.addf %759, %762 : vector<14x14xf32>
    %c125 = arith.constant 125 : index
    %764 = memref.load %arg4[%c125] : memref<162xf32, #tpu.memory_space<smem>>
    %765 = vector.broadcast %764 : f32 to vector<14x14xf32>
    %766 = arith.mulf %765, %230 : vector<14x14xf32>
    %767 = arith.addf %763, %766 : vector<14x14xf32>
    %c126 = arith.constant 126 : index
    %768 = memref.load %arg4[%c126] : memref<162xf32, #tpu.memory_space<smem>>
    %769 = vector.broadcast %768 : f32 to vector<14x14xf32>
    %770 = arith.mulf %769, %232 : vector<14x14xf32>
    %771 = arith.addf %767, %770 : vector<14x14xf32>
    %c127 = arith.constant 127 : index
    %772 = memref.load %arg4[%c127] : memref<162xf32, #tpu.memory_space<smem>>
    %773 = vector.broadcast %772 : f32 to vector<14x14xf32>
    %774 = arith.mulf %773, %234 : vector<14x14xf32>
    %775 = arith.addf %771, %774 : vector<14x14xf32>
    %c128 = arith.constant 128 : index
    %776 = memref.load %arg4[%c128] : memref<162xf32, #tpu.memory_space<smem>>
    %777 = vector.broadcast %776 : f32 to vector<14x14xf32>
    %778 = arith.mulf %777, %236 : vector<14x14xf32>
    %779 = arith.addf %775, %778 : vector<14x14xf32>
    %c129 = arith.constant 129 : index
    %780 = memref.load %arg4[%c129] : memref<162xf32, #tpu.memory_space<smem>>
    %781 = vector.broadcast %780 : f32 to vector<14x14xf32>
    %782 = arith.mulf %781, %238 : vector<14x14xf32>
    %783 = arith.addf %779, %782 : vector<14x14xf32>
    %c130 = arith.constant 130 : index
    %784 = memref.load %arg4[%c130] : memref<162xf32, #tpu.memory_space<smem>>
    %785 = vector.broadcast %784 : f32 to vector<14x14xf32>
    %786 = arith.mulf %785, %240 : vector<14x14xf32>
    %787 = arith.addf %783, %786 : vector<14x14xf32>
    %c131 = arith.constant 131 : index
    %788 = memref.load %arg4[%c131] : memref<162xf32, #tpu.memory_space<smem>>
    %789 = vector.broadcast %788 : f32 to vector<14x14xf32>
    %790 = arith.mulf %789, %242 : vector<14x14xf32>
    %791 = arith.addf %787, %790 : vector<14x14xf32>
    %c132 = arith.constant 132 : index
    %792 = memref.load %arg4[%c132] : memref<162xf32, #tpu.memory_space<smem>>
    %793 = vector.broadcast %792 : f32 to vector<14x14xf32>
    %794 = arith.mulf %793, %244 : vector<14x14xf32>
    %795 = arith.addf %791, %794 : vector<14x14xf32>
    %c133 = arith.constant 133 : index
    %796 = memref.load %arg4[%c133] : memref<162xf32, #tpu.memory_space<smem>>
    %797 = vector.broadcast %796 : f32 to vector<14x14xf32>
    %798 = arith.mulf %797, %246 : vector<14x14xf32>
    %799 = arith.addf %795, %798 : vector<14x14xf32>
    %c134 = arith.constant 134 : index
    %800 = memref.load %arg4[%c134] : memref<162xf32, #tpu.memory_space<smem>>
    %801 = vector.broadcast %800 : f32 to vector<14x14xf32>
    %802 = arith.mulf %801, %248 : vector<14x14xf32>
    %803 = arith.addf %799, %802 : vector<14x14xf32>
    %c4_185 = arith.constant 4 : index
    %804 = memref.load %arg5[%c4_185] : memref<6xf32, #tpu.memory_space<smem>>
    %805 = vector.broadcast %804 : f32 to vector<14x14xf32>
    %806 = arith.addf %803, %805 : vector<14x14xf32>
    %cst_186 = arith.constant 0.000000e+00 : f32
    %807 = vector.broadcast %cst_186 : f32 to vector<14x14xf32>
    %808 = arith.maximumf %806, %807 : vector<14x14xf32>
    %c135 = arith.constant 135 : index
    %809 = memref.load %arg4[%c135] : memref<162xf32, #tpu.memory_space<smem>>
    %810 = vector.broadcast %809 : f32 to vector<14x14xf32>
    %811 = arith.mulf %810, %196 : vector<14x14xf32>
    %c136 = arith.constant 136 : index
    %812 = memref.load %arg4[%c136] : memref<162xf32, #tpu.memory_space<smem>>
    %813 = vector.broadcast %812 : f32 to vector<14x14xf32>
    %814 = arith.mulf %813, %198 : vector<14x14xf32>
    %815 = arith.addf %811, %814 : vector<14x14xf32>
    %c137 = arith.constant 137 : index
    %816 = memref.load %arg4[%c137] : memref<162xf32, #tpu.memory_space<smem>>
    %817 = vector.broadcast %816 : f32 to vector<14x14xf32>
    %818 = arith.mulf %817, %200 : vector<14x14xf32>
    %819 = arith.addf %815, %818 : vector<14x14xf32>
    %c138 = arith.constant 138 : index
    %820 = memref.load %arg4[%c138] : memref<162xf32, #tpu.memory_space<smem>>
    %821 = vector.broadcast %820 : f32 to vector<14x14xf32>
    %822 = arith.mulf %821, %202 : vector<14x14xf32>
    %823 = arith.addf %819, %822 : vector<14x14xf32>
    %c139 = arith.constant 139 : index
    %824 = memref.load %arg4[%c139] : memref<162xf32, #tpu.memory_space<smem>>
    %825 = vector.broadcast %824 : f32 to vector<14x14xf32>
    %826 = arith.mulf %825, %204 : vector<14x14xf32>
    %827 = arith.addf %823, %826 : vector<14x14xf32>
    %c140 = arith.constant 140 : index
    %828 = memref.load %arg4[%c140] : memref<162xf32, #tpu.memory_space<smem>>
    %829 = vector.broadcast %828 : f32 to vector<14x14xf32>
    %830 = arith.mulf %829, %206 : vector<14x14xf32>
    %831 = arith.addf %827, %830 : vector<14x14xf32>
    %c141 = arith.constant 141 : index
    %832 = memref.load %arg4[%c141] : memref<162xf32, #tpu.memory_space<smem>>
    %833 = vector.broadcast %832 : f32 to vector<14x14xf32>
    %834 = arith.mulf %833, %208 : vector<14x14xf32>
    %835 = arith.addf %831, %834 : vector<14x14xf32>
    %c142 = arith.constant 142 : index
    %836 = memref.load %arg4[%c142] : memref<162xf32, #tpu.memory_space<smem>>
    %837 = vector.broadcast %836 : f32 to vector<14x14xf32>
    %838 = arith.mulf %837, %210 : vector<14x14xf32>
    %839 = arith.addf %835, %838 : vector<14x14xf32>
    %c143 = arith.constant 143 : index
    %840 = memref.load %arg4[%c143] : memref<162xf32, #tpu.memory_space<smem>>
    %841 = vector.broadcast %840 : f32 to vector<14x14xf32>
    %842 = arith.mulf %841, %212 : vector<14x14xf32>
    %843 = arith.addf %839, %842 : vector<14x14xf32>
    %c144 = arith.constant 144 : index
    %844 = memref.load %arg4[%c144] : memref<162xf32, #tpu.memory_space<smem>>
    %845 = vector.broadcast %844 : f32 to vector<14x14xf32>
    %846 = arith.mulf %845, %214 : vector<14x14xf32>
    %847 = arith.addf %843, %846 : vector<14x14xf32>
    %c145 = arith.constant 145 : index
    %848 = memref.load %arg4[%c145] : memref<162xf32, #tpu.memory_space<smem>>
    %849 = vector.broadcast %848 : f32 to vector<14x14xf32>
    %850 = arith.mulf %849, %216 : vector<14x14xf32>
    %851 = arith.addf %847, %850 : vector<14x14xf32>
    %c146 = arith.constant 146 : index
    %852 = memref.load %arg4[%c146] : memref<162xf32, #tpu.memory_space<smem>>
    %853 = vector.broadcast %852 : f32 to vector<14x14xf32>
    %854 = arith.mulf %853, %218 : vector<14x14xf32>
    %855 = arith.addf %851, %854 : vector<14x14xf32>
    %c147 = arith.constant 147 : index
    %856 = memref.load %arg4[%c147] : memref<162xf32, #tpu.memory_space<smem>>
    %857 = vector.broadcast %856 : f32 to vector<14x14xf32>
    %858 = arith.mulf %857, %220 : vector<14x14xf32>
    %859 = arith.addf %855, %858 : vector<14x14xf32>
    %c148 = arith.constant 148 : index
    %860 = memref.load %arg4[%c148] : memref<162xf32, #tpu.memory_space<smem>>
    %861 = vector.broadcast %860 : f32 to vector<14x14xf32>
    %862 = arith.mulf %861, %222 : vector<14x14xf32>
    %863 = arith.addf %859, %862 : vector<14x14xf32>
    %c149 = arith.constant 149 : index
    %864 = memref.load %arg4[%c149] : memref<162xf32, #tpu.memory_space<smem>>
    %865 = vector.broadcast %864 : f32 to vector<14x14xf32>
    %866 = arith.mulf %865, %224 : vector<14x14xf32>
    %867 = arith.addf %863, %866 : vector<14x14xf32>
    %c150 = arith.constant 150 : index
    %868 = memref.load %arg4[%c150] : memref<162xf32, #tpu.memory_space<smem>>
    %869 = vector.broadcast %868 : f32 to vector<14x14xf32>
    %870 = arith.mulf %869, %226 : vector<14x14xf32>
    %871 = arith.addf %867, %870 : vector<14x14xf32>
    %c151 = arith.constant 151 : index
    %872 = memref.load %arg4[%c151] : memref<162xf32, #tpu.memory_space<smem>>
    %873 = vector.broadcast %872 : f32 to vector<14x14xf32>
    %874 = arith.mulf %873, %228 : vector<14x14xf32>
    %875 = arith.addf %871, %874 : vector<14x14xf32>
    %c152 = arith.constant 152 : index
    %876 = memref.load %arg4[%c152] : memref<162xf32, #tpu.memory_space<smem>>
    %877 = vector.broadcast %876 : f32 to vector<14x14xf32>
    %878 = arith.mulf %877, %230 : vector<14x14xf32>
    %879 = arith.addf %875, %878 : vector<14x14xf32>
    %c153 = arith.constant 153 : index
    %880 = memref.load %arg4[%c153] : memref<162xf32, #tpu.memory_space<smem>>
    %881 = vector.broadcast %880 : f32 to vector<14x14xf32>
    %882 = arith.mulf %881, %232 : vector<14x14xf32>
    %883 = arith.addf %879, %882 : vector<14x14xf32>
    %c154 = arith.constant 154 : index
    %884 = memref.load %arg4[%c154] : memref<162xf32, #tpu.memory_space<smem>>
    %885 = vector.broadcast %884 : f32 to vector<14x14xf32>
    %886 = arith.mulf %885, %234 : vector<14x14xf32>
    %887 = arith.addf %883, %886 : vector<14x14xf32>
    %c155 = arith.constant 155 : index
    %888 = memref.load %arg4[%c155] : memref<162xf32, #tpu.memory_space<smem>>
    %889 = vector.broadcast %888 : f32 to vector<14x14xf32>
    %890 = arith.mulf %889, %236 : vector<14x14xf32>
    %891 = arith.addf %887, %890 : vector<14x14xf32>
    %c156 = arith.constant 156 : index
    %892 = memref.load %arg4[%c156] : memref<162xf32, #tpu.memory_space<smem>>
    %893 = vector.broadcast %892 : f32 to vector<14x14xf32>
    %894 = arith.mulf %893, %238 : vector<14x14xf32>
    %895 = arith.addf %891, %894 : vector<14x14xf32>
    %c157 = arith.constant 157 : index
    %896 = memref.load %arg4[%c157] : memref<162xf32, #tpu.memory_space<smem>>
    %897 = vector.broadcast %896 : f32 to vector<14x14xf32>
    %898 = arith.mulf %897, %240 : vector<14x14xf32>
    %899 = arith.addf %895, %898 : vector<14x14xf32>
    %c158 = arith.constant 158 : index
    %900 = memref.load %arg4[%c158] : memref<162xf32, #tpu.memory_space<smem>>
    %901 = vector.broadcast %900 : f32 to vector<14x14xf32>
    %902 = arith.mulf %901, %242 : vector<14x14xf32>
    %903 = arith.addf %899, %902 : vector<14x14xf32>
    %c159 = arith.constant 159 : index
    %904 = memref.load %arg4[%c159] : memref<162xf32, #tpu.memory_space<smem>>
    %905 = vector.broadcast %904 : f32 to vector<14x14xf32>
    %906 = arith.mulf %905, %244 : vector<14x14xf32>
    %907 = arith.addf %903, %906 : vector<14x14xf32>
    %c160 = arith.constant 160 : index
    %908 = memref.load %arg4[%c160] : memref<162xf32, #tpu.memory_space<smem>>
    %909 = vector.broadcast %908 : f32 to vector<14x14xf32>
    %910 = arith.mulf %909, %246 : vector<14x14xf32>
    %911 = arith.addf %907, %910 : vector<14x14xf32>
    %c161 = arith.constant 161 : index
    %912 = memref.load %arg4[%c161] : memref<162xf32, #tpu.memory_space<smem>>
    %913 = vector.broadcast %912 : f32 to vector<14x14xf32>
    %914 = arith.mulf %913, %248 : vector<14x14xf32>
    %915 = arith.addf %911, %914 : vector<14x14xf32>
    %c5_187 = arith.constant 5 : index
    %916 = memref.load %arg5[%c5_187] : memref<6xf32, #tpu.memory_space<smem>>
    %917 = vector.broadcast %916 : f32 to vector<14x14xf32>
    %918 = arith.addf %915, %917 : vector<14x14xf32>
    %cst_188 = arith.constant 0.000000e+00 : f32
    %919 = vector.broadcast %cst_188 : f32 to vector<14x14xf32>
    %920 = arith.maximumf %918, %919 : vector<14x14xf32>
    %921 = tpu.iota {dimensions = array<i32: 0>} : vector<7x14xi32>
    %922 = tpu.iota {dimensions = array<i32: 1>} : vector<7x14xi32>
    %c2_i32_189 = arith.constant 2 : i32
    %923 = vector.broadcast %c2_i32_189 : i32 to vector<7x14xi32>
    %924 = arith.muli %923, %921 : vector<7x14xi32>
    %925 = arith.cmpi eq, %922, %924 : vector<7x14xi32>
    %cst_190 = arith.constant 1.000000e+00 : f32
    %cst_191 = arith.constant 0.000000e+00 : f32
    %926 = vector.broadcast %cst_190 : f32 to vector<7x14xf32>
    %927 = vector.broadcast %cst_191 : f32 to vector<7x14xf32>
    %928 = arith.select %925, %926, %927 : vector<7x14xi1>, vector<7x14xf32>
    %c2_i32_192 = arith.constant 2 : i32
    %929 = vector.broadcast %c2_i32_192 : i32 to vector<7x14xi32>
    %930 = arith.muli %929, %921 : vector<7x14xi32>
    %c1_i32_193 = arith.constant 1 : i32
    %931 = vector.broadcast %c1_i32_193 : i32 to vector<7x14xi32>
    %932 = arith.addi %930, %931 : vector<7x14xi32>
    %933 = arith.cmpi eq, %922, %932 : vector<7x14xi32>
    %cst_194 = arith.constant 1.000000e+00 : f32
    %cst_195 = arith.constant 0.000000e+00 : f32
    %934 = vector.broadcast %cst_194 : f32 to vector<7x14xf32>
    %935 = vector.broadcast %cst_195 : f32 to vector<7x14xf32>
    %936 = arith.select %933, %934, %935 : vector<7x14xi1>, vector<7x14xf32>
    %937 = tpu.iota {dimensions = array<i32: 0>} : vector<14x7xi32>
    %938 = tpu.iota {dimensions = array<i32: 1>} : vector<14x7xi32>
    %c2_i32_196 = arith.constant 2 : i32
    %939 = vector.broadcast %c2_i32_196 : i32 to vector<14x7xi32>
    %940 = arith.muli %939, %938 : vector<14x7xi32>
    %941 = arith.cmpi eq, %937, %940 : vector<14x7xi32>
    %cst_197 = arith.constant 1.000000e+00 : f32
    %cst_198 = arith.constant 0.000000e+00 : f32
    %942 = vector.broadcast %cst_197 : f32 to vector<14x7xf32>
    %943 = vector.broadcast %cst_198 : f32 to vector<14x7xf32>
    %944 = arith.select %941, %942, %943 : vector<14x7xi1>, vector<14x7xf32>
    %c2_i32_199 = arith.constant 2 : i32
    %945 = vector.broadcast %c2_i32_199 : i32 to vector<14x7xi32>
    %946 = arith.muli %945, %938 : vector<14x7xi32>
    %c1_i32_200 = arith.constant 1 : i32
    %947 = vector.broadcast %c1_i32_200 : i32 to vector<14x7xi32>
    %948 = arith.addi %946, %947 : vector<14x7xi32>
    %949 = arith.cmpi eq, %937, %948 : vector<14x7xi32>
    %cst_201 = arith.constant 1.000000e+00 : f32
    %cst_202 = arith.constant 0.000000e+00 : f32
    %950 = vector.broadcast %cst_201 : f32 to vector<14x7xf32>
    %951 = vector.broadcast %cst_202 : f32 to vector<14x7xf32>
    %952 = arith.select %949, %950, %951 : vector<14x7xi1>, vector<14x7xf32>
    %cst_203 = arith.constant dense<0.000000e+00> : vector<7x14xf32>
    %953 = tpu.matmul %928, %360, %cst_203 {dimension_numbers = #tpu.dot_dimension_numbers<[1], [0], [0], [1], [0, 0, 1, 1], [], []>} : vector<7x14xf32>, vector<14x14xf32>, vector<7x14xf32> -> vector<7x14xf32>
    %cst_204 = arith.constant dense<0.000000e+00> : vector<7x14xf32>
    %954 = tpu.matmul %936, %360, %cst_204 {dimension_numbers = #tpu.dot_dimension_numbers<[1], [0], [0], [1], [0, 0, 1, 1], [], []>} : vector<7x14xf32>, vector<14x14xf32>, vector<7x14xf32> -> vector<7x14xf32>
    %955 = arith.maximumf %953, %954 : vector<7x14xf32>
    %cst_205 = arith.constant dense<0.000000e+00> : vector<7x7xf32>
    %956 = tpu.matmul %955, %944, %cst_205 {dimension_numbers = #tpu.dot_dimension_numbers<[1], [0], [0], [1], [0, 0, 1, 1], [], []>} : vector<7x14xf32>, vector<14x7xf32>, vector<7x7xf32> -> vector<7x7xf32>
    %cst_206 = arith.constant dense<0.000000e+00> : vector<7x7xf32>
    %957 = tpu.matmul %955, %952, %cst_206 {dimension_numbers = #tpu.dot_dimension_numbers<[1], [0], [0], [1], [0, 0, 1, 1], [], []>} : vector<7x14xf32>, vector<14x7xf32>, vector<7x7xf32> -> vector<7x7xf32>
    %958 = arith.maximumf %956, %957 : vector<7x7xf32>
    %cst_207 = arith.constant dense<0.000000e+00> : vector<7x14xf32>
    %959 = tpu.matmul %928, %472, %cst_207 {dimension_numbers = #tpu.dot_dimension_numbers<[1], [0], [0], [1], [0, 0, 1, 1], [], []>} : vector<7x14xf32>, vector<14x14xf32>, vector<7x14xf32> -> vector<7x14xf32>
    %cst_208 = arith.constant dense<0.000000e+00> : vector<7x14xf32>
    %960 = tpu.matmul %936, %472, %cst_208 {dimension_numbers = #tpu.dot_dimension_numbers<[1], [0], [0], [1], [0, 0, 1, 1], [], []>} : vector<7x14xf32>, vector<14x14xf32>, vector<7x14xf32> -> vector<7x14xf32>
    %961 = arith.maximumf %959, %960 : vector<7x14xf32>
    %cst_209 = arith.constant dense<0.000000e+00> : vector<7x7xf32>
    %962 = tpu.matmul %961, %944, %cst_209 {dimension_numbers = #tpu.dot_dimension_numbers<[1], [0], [0], [1], [0, 0, 1, 1], [], []>} : vector<7x14xf32>, vector<14x7xf32>, vector<7x7xf32> -> vector<7x7xf32>
    %cst_210 = arith.constant dense<0.000000e+00> : vector<7x7xf32>
    %963 = tpu.matmul %961, %952, %cst_210 {dimension_numbers = #tpu.dot_dimension_numbers<[1], [0], [0], [1], [0, 0, 1, 1], [], []>} : vector<7x14xf32>, vector<14x7xf32>, vector<7x7xf32> -> vector<7x7xf32>
    %964 = arith.maximumf %962, %963 : vector<7x7xf32>
    %cst_211 = arith.constant dense<0.000000e+00> : vector<7x14xf32>
    %965 = tpu.matmul %928, %584, %cst_211 {dimension_numbers = #tpu.dot_dimension_numbers<[1], [0], [0], [1], [0, 0, 1, 1], [], []>} : vector<7x14xf32>, vector<14x14xf32>, vector<7x14xf32> -> vector<7x14xf32>
    %cst_212 = arith.constant dense<0.000000e+00> : vector<7x14xf32>
    %966 = tpu.matmul %936, %584, %cst_212 {dimension_numbers = #tpu.dot_dimension_numbers<[1], [0], [0], [1], [0, 0, 1, 1], [], []>} : vector<7x14xf32>, vector<14x14xf32>, vector<7x14xf32> -> vector<7x14xf32>
    %967 = arith.maximumf %965, %966 : vector<7x14xf32>
    %cst_213 = arith.constant dense<0.000000e+00> : vector<7x7xf32>
    %968 = tpu.matmul %967, %944, %cst_213 {dimension_numbers = #tpu.dot_dimension_numbers<[1], [0], [0], [1], [0, 0, 1, 1], [], []>} : vector<7x14xf32>, vector<14x7xf32>, vector<7x7xf32> -> vector<7x7xf32>
    %cst_214 = arith.constant dense<0.000000e+00> : vector<7x7xf32>
    %969 = tpu.matmul %967, %952, %cst_214 {dimension_numbers = #tpu.dot_dimension_numbers<[1], [0], [0], [1], [0, 0, 1, 1], [], []>} : vector<7x14xf32>, vector<14x7xf32>, vector<7x7xf32> -> vector<7x7xf32>
    %970 = arith.maximumf %968, %969 : vector<7x7xf32>
    %cst_215 = arith.constant dense<0.000000e+00> : vector<7x14xf32>
    %971 = tpu.matmul %928, %696, %cst_215 {dimension_numbers = #tpu.dot_dimension_numbers<[1], [0], [0], [1], [0, 0, 1, 1], [], []>} : vector<7x14xf32>, vector<14x14xf32>, vector<7x14xf32> -> vector<7x14xf32>
    %cst_216 = arith.constant dense<0.000000e+00> : vector<7x14xf32>
    %972 = tpu.matmul %936, %696, %cst_216 {dimension_numbers = #tpu.dot_dimension_numbers<[1], [0], [0], [1], [0, 0, 1, 1], [], []>} : vector<7x14xf32>, vector<14x14xf32>, vector<7x14xf32> -> vector<7x14xf32>
    %973 = arith.maximumf %971, %972 : vector<7x14xf32>
    %cst_217 = arith.constant dense<0.000000e+00> : vector<7x7xf32>
    %974 = tpu.matmul %973, %944, %cst_217 {dimension_numbers = #tpu.dot_dimension_numbers<[1], [0], [0], [1], [0, 0, 1, 1], [], []>} : vector<7x14xf32>, vector<14x7xf32>, vector<7x7xf32> -> vector<7x7xf32>
    %cst_218 = arith.constant dense<0.000000e+00> : vector<7x7xf32>
    %975 = tpu.matmul %973, %952, %cst_218 {dimension_numbers = #tpu.dot_dimension_numbers<[1], [0], [0], [1], [0, 0, 1, 1], [], []>} : vector<7x14xf32>, vector<14x7xf32>, vector<7x7xf32> -> vector<7x7xf32>
    %976 = arith.maximumf %974, %975 : vector<7x7xf32>
    %cst_219 = arith.constant dense<0.000000e+00> : vector<7x14xf32>
    %977 = tpu.matmul %928, %808, %cst_219 {dimension_numbers = #tpu.dot_dimension_numbers<[1], [0], [0], [1], [0, 0, 1, 1], [], []>} : vector<7x14xf32>, vector<14x14xf32>, vector<7x14xf32> -> vector<7x14xf32>
    %cst_220 = arith.constant dense<0.000000e+00> : vector<7x14xf32>
    %978 = tpu.matmul %936, %808, %cst_220 {dimension_numbers = #tpu.dot_dimension_numbers<[1], [0], [0], [1], [0, 0, 1, 1], [], []>} : vector<7x14xf32>, vector<14x14xf32>, vector<7x14xf32> -> vector<7x14xf32>
    %979 = arith.maximumf %977, %978 : vector<7x14xf32>
    %cst_221 = arith.constant dense<0.000000e+00> : vector<7x7xf32>
    %980 = tpu.matmul %979, %944, %cst_221 {dimension_numbers = #tpu.dot_dimension_numbers<[1], [0], [0], [1], [0, 0, 1, 1], [], []>} : vector<7x14xf32>, vector<14x7xf32>, vector<7x7xf32> -> vector<7x7xf32>
    %cst_222 = arith.constant dense<0.000000e+00> : vector<7x7xf32>
    %981 = tpu.matmul %979, %952, %cst_222 {dimension_numbers = #tpu.dot_dimension_numbers<[1], [0], [0], [1], [0, 0, 1, 1], [], []>} : vector<7x14xf32>, vector<14x7xf32>, vector<7x7xf32> -> vector<7x7xf32>
    %982 = arith.maximumf %980, %981 : vector<7x7xf32>
    %cst_223 = arith.constant dense<0.000000e+00> : vector<7x14xf32>
    %983 = tpu.matmul %928, %920, %cst_223 {dimension_numbers = #tpu.dot_dimension_numbers<[1], [0], [0], [1], [0, 0, 1, 1], [], []>} : vector<7x14xf32>, vector<14x14xf32>, vector<7x14xf32> -> vector<7x14xf32>
    %cst_224 = arith.constant dense<0.000000e+00> : vector<7x14xf32>
    %984 = tpu.matmul %936, %920, %cst_224 {dimension_numbers = #tpu.dot_dimension_numbers<[1], [0], [0], [1], [0, 0, 1, 1], [], []>} : vector<7x14xf32>, vector<14x14xf32>, vector<7x14xf32> -> vector<7x14xf32>
    %985 = arith.maximumf %983, %984 : vector<7x14xf32>
    %cst_225 = arith.constant dense<0.000000e+00> : vector<7x7xf32>
    %986 = tpu.matmul %985, %944, %cst_225 {dimension_numbers = #tpu.dot_dimension_numbers<[1], [0], [0], [1], [0, 0, 1, 1], [], []>} : vector<7x14xf32>, vector<14x7xf32>, vector<7x7xf32> -> vector<7x7xf32>
    %cst_226 = arith.constant dense<0.000000e+00> : vector<7x7xf32>
    %987 = tpu.matmul %985, %952, %cst_226 {dimension_numbers = #tpu.dot_dimension_numbers<[1], [0], [0], [1], [0, 0, 1, 1], [], []>} : vector<7x14xf32>, vector<14x7xf32>, vector<7x7xf32> -> vector<7x7xf32>
    %988 = arith.maximumf %986, %987 : vector<7x7xf32>
    %c0_227 = arith.constant 0 : index
    %c0_228 = arith.constant 0 : index
    %989 = vector.load %arg7[%c0_227, %c0_228] : memref<1x128xf32, #tpu.memory_space<vmem>>, vector<1x128xf32>
    %990 = vector.extract_strided_slice %958 {offsets = [0, 0], sizes = [1, 7], strides = [1, 1]} : vector<7x7xf32> to vector<1x7xf32>
    %c0_229 = arith.constant 0 : index
    %c0_230 = arith.constant 0 : index
    %c0_231 = arith.constant 0 : index
    %c0_232 = arith.constant 0 : index
    %991 = vector.load %arg6[%c0_229, %c0_230, %c0_231, %c0_232] : memref<6x7x7x128xf32, #tpu.memory_space<vmem>>, vector<1x1x7x128xf32>
    %992 = vector.shape_cast %991 : vector<1x1x7x128xf32> to vector<7x128xf32>
    %cst_233 = arith.constant dense<0.000000e+00> : vector<1x128xf32>
    %993 = tpu.matmul %990, %992, %cst_233 {dimension_numbers = #tpu.dot_dimension_numbers<[1], [0], [0], [1], [0, 0, 1, 1], [], []>} : vector<1x7xf32>, vector<7x128xf32>, vector<1x128xf32> -> vector<1x128xf32>
    %994 = arith.addf %989, %993 : vector<1x128xf32>
    %995 = vector.extract_strided_slice %958 {offsets = [1, 0], sizes = [1, 7], strides = [1, 1]} : vector<7x7xf32> to vector<1x7xf32>
    %c0_234 = arith.constant 0 : index
    %c1_235 = arith.constant 1 : index
    %c0_236 = arith.constant 0 : index
    %c0_237 = arith.constant 0 : index
    %996 = vector.load %arg6[%c0_234, %c1_235, %c0_236, %c0_237] : memref<6x7x7x128xf32, #tpu.memory_space<vmem>>, vector<1x1x7x128xf32>
    %997 = vector.shape_cast %996 : vector<1x1x7x128xf32> to vector<7x128xf32>
    %cst_238 = arith.constant dense<0.000000e+00> : vector<1x128xf32>
    %998 = tpu.matmul %995, %997, %cst_238 {dimension_numbers = #tpu.dot_dimension_numbers<[1], [0], [0], [1], [0, 0, 1, 1], [], []>} : vector<1x7xf32>, vector<7x128xf32>, vector<1x128xf32> -> vector<1x128xf32>
    %999 = arith.addf %994, %998 : vector<1x128xf32>
    %1000 = vector.extract_strided_slice %958 {offsets = [2, 0], sizes = [1, 7], strides = [1, 1]} : vector<7x7xf32> to vector<1x7xf32>
    %c0_239 = arith.constant 0 : index
    %c2_240 = arith.constant 2 : index
    %c0_241 = arith.constant 0 : index
    %c0_242 = arith.constant 0 : index
    %1001 = vector.load %arg6[%c0_239, %c2_240, %c0_241, %c0_242] : memref<6x7x7x128xf32, #tpu.memory_space<vmem>>, vector<1x1x7x128xf32>
    %1002 = vector.shape_cast %1001 : vector<1x1x7x128xf32> to vector<7x128xf32>
    %cst_243 = arith.constant dense<0.000000e+00> : vector<1x128xf32>
    %1003 = tpu.matmul %1000, %1002, %cst_243 {dimension_numbers = #tpu.dot_dimension_numbers<[1], [0], [0], [1], [0, 0, 1, 1], [], []>} : vector<1x7xf32>, vector<7x128xf32>, vector<1x128xf32> -> vector<1x128xf32>
    %1004 = arith.addf %999, %1003 : vector<1x128xf32>
    %1005 = vector.extract_strided_slice %958 {offsets = [3, 0], sizes = [1, 7], strides = [1, 1]} : vector<7x7xf32> to vector<1x7xf32>
    %c0_244 = arith.constant 0 : index
    %c3_245 = arith.constant 3 : index
    %c0_246 = arith.constant 0 : index
    %c0_247 = arith.constant 0 : index
    %1006 = vector.load %arg6[%c0_244, %c3_245, %c0_246, %c0_247] : memref<6x7x7x128xf32, #tpu.memory_space<vmem>>, vector<1x1x7x128xf32>
    %1007 = vector.shape_cast %1006 : vector<1x1x7x128xf32> to vector<7x128xf32>
    %cst_248 = arith.constant dense<0.000000e+00> : vector<1x128xf32>
    %1008 = tpu.matmul %1005, %1007, %cst_248 {dimension_numbers = #tpu.dot_dimension_numbers<[1], [0], [0], [1], [0, 0, 1, 1], [], []>} : vector<1x7xf32>, vector<7x128xf32>, vector<1x128xf32> -> vector<1x128xf32>
    %1009 = arith.addf %1004, %1008 : vector<1x128xf32>
    %1010 = vector.extract_strided_slice %958 {offsets = [4, 0], sizes = [1, 7], strides = [1, 1]} : vector<7x7xf32> to vector<1x7xf32>
    %c0_249 = arith.constant 0 : index
    %c4_250 = arith.constant 4 : index
    %c0_251 = arith.constant 0 : index
    %c0_252 = arith.constant 0 : index
    %1011 = vector.load %arg6[%c0_249, %c4_250, %c0_251, %c0_252] : memref<6x7x7x128xf32, #tpu.memory_space<vmem>>, vector<1x1x7x128xf32>
    %1012 = vector.shape_cast %1011 : vector<1x1x7x128xf32> to vector<7x128xf32>
    %cst_253 = arith.constant dense<0.000000e+00> : vector<1x128xf32>
    %1013 = tpu.matmul %1010, %1012, %cst_253 {dimension_numbers = #tpu.dot_dimension_numbers<[1], [0], [0], [1], [0, 0, 1, 1], [], []>} : vector<1x7xf32>, vector<7x128xf32>, vector<1x128xf32> -> vector<1x128xf32>
    %1014 = arith.addf %1009, %1013 : vector<1x128xf32>
    %1015 = vector.extract_strided_slice %958 {offsets = [5, 0], sizes = [1, 7], strides = [1, 1]} : vector<7x7xf32> to vector<1x7xf32>
    %c0_254 = arith.constant 0 : index
    %c5_255 = arith.constant 5 : index
    %c0_256 = arith.constant 0 : index
    %c0_257 = arith.constant 0 : index
    %1016 = vector.load %arg6[%c0_254, %c5_255, %c0_256, %c0_257] : memref<6x7x7x128xf32, #tpu.memory_space<vmem>>, vector<1x1x7x128xf32>
    %1017 = vector.shape_cast %1016 : vector<1x1x7x128xf32> to vector<7x128xf32>
    %cst_258 = arith.constant dense<0.000000e+00> : vector<1x128xf32>
    %1018 = tpu.matmul %1015, %1017, %cst_258 {dimension_numbers = #tpu.dot_dimension_numbers<[1], [0], [0], [1], [0, 0, 1, 1], [], []>} : vector<1x7xf32>, vector<7x128xf32>, vector<1x128xf32> -> vector<1x128xf32>
    %1019 = arith.addf %1014, %1018 : vector<1x128xf32>
    %1020 = vector.extract_strided_slice %958 {offsets = [6, 0], sizes = [1, 7], strides = [1, 1]} : vector<7x7xf32> to vector<1x7xf32>
    %c0_259 = arith.constant 0 : index
    %c6_260 = arith.constant 6 : index
    %c0_261 = arith.constant 0 : index
    %c0_262 = arith.constant 0 : index
    %1021 = vector.load %arg6[%c0_259, %c6_260, %c0_261, %c0_262] : memref<6x7x7x128xf32, #tpu.memory_space<vmem>>, vector<1x1x7x128xf32>
    %1022 = vector.shape_cast %1021 : vector<1x1x7x128xf32> to vector<7x128xf32>
    %cst_263 = arith.constant dense<0.000000e+00> : vector<1x128xf32>
    %1023 = tpu.matmul %1020, %1022, %cst_263 {dimension_numbers = #tpu.dot_dimension_numbers<[1], [0], [0], [1], [0, 0, 1, 1], [], []>} : vector<1x7xf32>, vector<7x128xf32>, vector<1x128xf32> -> vector<1x128xf32>
    %1024 = arith.addf %1019, %1023 : vector<1x128xf32>
    %1025 = vector.extract_strided_slice %964 {offsets = [0, 0], sizes = [1, 7], strides = [1, 1]} : vector<7x7xf32> to vector<1x7xf32>
    %c1_264 = arith.constant 1 : index
    %c0_265 = arith.constant 0 : index
    %c0_266 = arith.constant 0 : index
    %c0_267 = arith.constant 0 : index
    %1026 = vector.load %arg6[%c1_264, %c0_265, %c0_266, %c0_267] : memref<6x7x7x128xf32, #tpu.memory_space<vmem>>, vector<1x1x7x128xf32>
    %1027 = vector.shape_cast %1026 : vector<1x1x7x128xf32> to vector<7x128xf32>
    %cst_268 = arith.constant dense<0.000000e+00> : vector<1x128xf32>
    %1028 = tpu.matmul %1025, %1027, %cst_268 {dimension_numbers = #tpu.dot_dimension_numbers<[1], [0], [0], [1], [0, 0, 1, 1], [], []>} : vector<1x7xf32>, vector<7x128xf32>, vector<1x128xf32> -> vector<1x128xf32>
    %1029 = arith.addf %1024, %1028 : vector<1x128xf32>
    %1030 = vector.extract_strided_slice %964 {offsets = [1, 0], sizes = [1, 7], strides = [1, 1]} : vector<7x7xf32> to vector<1x7xf32>
    %c1_269 = arith.constant 1 : index
    %c1_270 = arith.constant 1 : index
    %c0_271 = arith.constant 0 : index
    %c0_272 = arith.constant 0 : index
    %1031 = vector.load %arg6[%c1_269, %c1_270, %c0_271, %c0_272] : memref<6x7x7x128xf32, #tpu.memory_space<vmem>>, vector<1x1x7x128xf32>
    %1032 = vector.shape_cast %1031 : vector<1x1x7x128xf32> to vector<7x128xf32>
    %cst_273 = arith.constant dense<0.000000e+00> : vector<1x128xf32>
    %1033 = tpu.matmul %1030, %1032, %cst_273 {dimension_numbers = #tpu.dot_dimension_numbers<[1], [0], [0], [1], [0, 0, 1, 1], [], []>} : vector<1x7xf32>, vector<7x128xf32>, vector<1x128xf32> -> vector<1x128xf32>
    %1034 = arith.addf %1029, %1033 : vector<1x128xf32>
    %1035 = vector.extract_strided_slice %964 {offsets = [2, 0], sizes = [1, 7], strides = [1, 1]} : vector<7x7xf32> to vector<1x7xf32>
    %c1_274 = arith.constant 1 : index
    %c2_275 = arith.constant 2 : index
    %c0_276 = arith.constant 0 : index
    %c0_277 = arith.constant 0 : index
    %1036 = vector.load %arg6[%c1_274, %c2_275, %c0_276, %c0_277] : memref<6x7x7x128xf32, #tpu.memory_space<vmem>>, vector<1x1x7x128xf32>
    %1037 = vector.shape_cast %1036 : vector<1x1x7x128xf32> to vector<7x128xf32>
    %cst_278 = arith.constant dense<0.000000e+00> : vector<1x128xf32>
    %1038 = tpu.matmul %1035, %1037, %cst_278 {dimension_numbers = #tpu.dot_dimension_numbers<[1], [0], [0], [1], [0, 0, 1, 1], [], []>} : vector<1x7xf32>, vector<7x128xf32>, vector<1x128xf32> -> vector<1x128xf32>
    %1039 = arith.addf %1034, %1038 : vector<1x128xf32>
    %1040 = vector.extract_strided_slice %964 {offsets = [3, 0], sizes = [1, 7], strides = [1, 1]} : vector<7x7xf32> to vector<1x7xf32>
    %c1_279 = arith.constant 1 : index
    %c3_280 = arith.constant 3 : index
    %c0_281 = arith.constant 0 : index
    %c0_282 = arith.constant 0 : index
    %1041 = vector.load %arg6[%c1_279, %c3_280, %c0_281, %c0_282] : memref<6x7x7x128xf32, #tpu.memory_space<vmem>>, vector<1x1x7x128xf32>
    %1042 = vector.shape_cast %1041 : vector<1x1x7x128xf32> to vector<7x128xf32>
    %cst_283 = arith.constant dense<0.000000e+00> : vector<1x128xf32>
    %1043 = tpu.matmul %1040, %1042, %cst_283 {dimension_numbers = #tpu.dot_dimension_numbers<[1], [0], [0], [1], [0, 0, 1, 1], [], []>} : vector<1x7xf32>, vector<7x128xf32>, vector<1x128xf32> -> vector<1x128xf32>
    %1044 = arith.addf %1039, %1043 : vector<1x128xf32>
    %1045 = vector.extract_strided_slice %964 {offsets = [4, 0], sizes = [1, 7], strides = [1, 1]} : vector<7x7xf32> to vector<1x7xf32>
    %c1_284 = arith.constant 1 : index
    %c4_285 = arith.constant 4 : index
    %c0_286 = arith.constant 0 : index
    %c0_287 = arith.constant 0 : index
    %1046 = vector.load %arg6[%c1_284, %c4_285, %c0_286, %c0_287] : memref<6x7x7x128xf32, #tpu.memory_space<vmem>>, vector<1x1x7x128xf32>
    %1047 = vector.shape_cast %1046 : vector<1x1x7x128xf32> to vector<7x128xf32>
    %cst_288 = arith.constant dense<0.000000e+00> : vector<1x128xf32>
    %1048 = tpu.matmul %1045, %1047, %cst_288 {dimension_numbers = #tpu.dot_dimension_numbers<[1], [0], [0], [1], [0, 0, 1, 1], [], []>} : vector<1x7xf32>, vector<7x128xf32>, vector<1x128xf32> -> vector<1x128xf32>
    %1049 = arith.addf %1044, %1048 : vector<1x128xf32>
    %1050 = vector.extract_strided_slice %964 {offsets = [5, 0], sizes = [1, 7], strides = [1, 1]} : vector<7x7xf32> to vector<1x7xf32>
    %c1_289 = arith.constant 1 : index
    %c5_290 = arith.constant 5 : index
    %c0_291 = arith.constant 0 : index
    %c0_292 = arith.constant 0 : index
    %1051 = vector.load %arg6[%c1_289, %c5_290, %c0_291, %c0_292] : memref<6x7x7x128xf32, #tpu.memory_space<vmem>>, vector<1x1x7x128xf32>
    %1052 = vector.shape_cast %1051 : vector<1x1x7x128xf32> to vector<7x128xf32>
    %cst_293 = arith.constant dense<0.000000e+00> : vector<1x128xf32>
    %1053 = tpu.matmul %1050, %1052, %cst_293 {dimension_numbers = #tpu.dot_dimension_numbers<[1], [0], [0], [1], [0, 0, 1, 1], [], []>} : vector<1x7xf32>, vector<7x128xf32>, vector<1x128xf32> -> vector<1x128xf32>
    %1054 = arith.addf %1049, %1053 : vector<1x128xf32>
    %1055 = vector.extract_strided_slice %964 {offsets = [6, 0], sizes = [1, 7], strides = [1, 1]} : vector<7x7xf32> to vector<1x7xf32>
    %c1_294 = arith.constant 1 : index
    %c6_295 = arith.constant 6 : index
    %c0_296 = arith.constant 0 : index
    %c0_297 = arith.constant 0 : index
    %1056 = vector.load %arg6[%c1_294, %c6_295, %c0_296, %c0_297] : memref<6x7x7x128xf32, #tpu.memory_space<vmem>>, vector<1x1x7x128xf32>
    %1057 = vector.shape_cast %1056 : vector<1x1x7x128xf32> to vector<7x128xf32>
    %cst_298 = arith.constant dense<0.000000e+00> : vector<1x128xf32>
    %1058 = tpu.matmul %1055, %1057, %cst_298 {dimension_numbers = #tpu.dot_dimension_numbers<[1], [0], [0], [1], [0, 0, 1, 1], [], []>} : vector<1x7xf32>, vector<7x128xf32>, vector<1x128xf32> -> vector<1x128xf32>
    %1059 = arith.addf %1054, %1058 : vector<1x128xf32>
    %1060 = vector.extract_strided_slice %970 {offsets = [0, 0], sizes = [1, 7], strides = [1, 1]} : vector<7x7xf32> to vector<1x7xf32>
    %c2_299 = arith.constant 2 : index
    %c0_300 = arith.constant 0 : index
    %c0_301 = arith.constant 0 : index
    %c0_302 = arith.constant 0 : index
    %1061 = vector.load %arg6[%c2_299, %c0_300, %c0_301, %c0_302] : memref<6x7x7x128xf32, #tpu.memory_space<vmem>>, vector<1x1x7x128xf32>
    %1062 = vector.shape_cast %1061 : vector<1x1x7x128xf32> to vector<7x128xf32>
    %cst_303 = arith.constant dense<0.000000e+00> : vector<1x128xf32>
    %1063 = tpu.matmul %1060, %1062, %cst_303 {dimension_numbers = #tpu.dot_dimension_numbers<[1], [0], [0], [1], [0, 0, 1, 1], [], []>} : vector<1x7xf32>, vector<7x128xf32>, vector<1x128xf32> -> vector<1x128xf32>
    %1064 = arith.addf %1059, %1063 : vector<1x128xf32>
    %1065 = vector.extract_strided_slice %970 {offsets = [1, 0], sizes = [1, 7], strides = [1, 1]} : vector<7x7xf32> to vector<1x7xf32>
    %c2_304 = arith.constant 2 : index
    %c1_305 = arith.constant 1 : index
    %c0_306 = arith.constant 0 : index
    %c0_307 = arith.constant 0 : index
    %1066 = vector.load %arg6[%c2_304, %c1_305, %c0_306, %c0_307] : memref<6x7x7x128xf32, #tpu.memory_space<vmem>>, vector<1x1x7x128xf32>
    %1067 = vector.shape_cast %1066 : vector<1x1x7x128xf32> to vector<7x128xf32>
    %cst_308 = arith.constant dense<0.000000e+00> : vector<1x128xf32>
    %1068 = tpu.matmul %1065, %1067, %cst_308 {dimension_numbers = #tpu.dot_dimension_numbers<[1], [0], [0], [1], [0, 0, 1, 1], [], []>} : vector<1x7xf32>, vector<7x128xf32>, vector<1x128xf32> -> vector<1x128xf32>
    %1069 = arith.addf %1064, %1068 : vector<1x128xf32>
    %1070 = vector.extract_strided_slice %970 {offsets = [2, 0], sizes = [1, 7], strides = [1, 1]} : vector<7x7xf32> to vector<1x7xf32>
    %c2_309 = arith.constant 2 : index
    %c2_310 = arith.constant 2 : index
    %c0_311 = arith.constant 0 : index
    %c0_312 = arith.constant 0 : index
    %1071 = vector.load %arg6[%c2_309, %c2_310, %c0_311, %c0_312] : memref<6x7x7x128xf32, #tpu.memory_space<vmem>>, vector<1x1x7x128xf32>
    %1072 = vector.shape_cast %1071 : vector<1x1x7x128xf32> to vector<7x128xf32>
    %cst_313 = arith.constant dense<0.000000e+00> : vector<1x128xf32>
    %1073 = tpu.matmul %1070, %1072, %cst_313 {dimension_numbers = #tpu.dot_dimension_numbers<[1], [0], [0], [1], [0, 0, 1, 1], [], []>} : vector<1x7xf32>, vector<7x128xf32>, vector<1x128xf32> -> vector<1x128xf32>
    %1074 = arith.addf %1069, %1073 : vector<1x128xf32>
    %1075 = vector.extract_strided_slice %970 {offsets = [3, 0], sizes = [1, 7], strides = [1, 1]} : vector<7x7xf32> to vector<1x7xf32>
    %c2_314 = arith.constant 2 : index
    %c3_315 = arith.constant 3 : index
    %c0_316 = arith.constant 0 : index
    %c0_317 = arith.constant 0 : index
    %1076 = vector.load %arg6[%c2_314, %c3_315, %c0_316, %c0_317] : memref<6x7x7x128xf32, #tpu.memory_space<vmem>>, vector<1x1x7x128xf32>
    %1077 = vector.shape_cast %1076 : vector<1x1x7x128xf32> to vector<7x128xf32>
    %cst_318 = arith.constant dense<0.000000e+00> : vector<1x128xf32>
    %1078 = tpu.matmul %1075, %1077, %cst_318 {dimension_numbers = #tpu.dot_dimension_numbers<[1], [0], [0], [1], [0, 0, 1, 1], [], []>} : vector<1x7xf32>, vector<7x128xf32>, vector<1x128xf32> -> vector<1x128xf32>
    %1079 = arith.addf %1074, %1078 : vector<1x128xf32>
    %1080 = vector.extract_strided_slice %970 {offsets = [4, 0], sizes = [1, 7], strides = [1, 1]} : vector<7x7xf32> to vector<1x7xf32>
    %c2_319 = arith.constant 2 : index
    %c4_320 = arith.constant 4 : index
    %c0_321 = arith.constant 0 : index
    %c0_322 = arith.constant 0 : index
    %1081 = vector.load %arg6[%c2_319, %c4_320, %c0_321, %c0_322] : memref<6x7x7x128xf32, #tpu.memory_space<vmem>>, vector<1x1x7x128xf32>
    %1082 = vector.shape_cast %1081 : vector<1x1x7x128xf32> to vector<7x128xf32>
    %cst_323 = arith.constant dense<0.000000e+00> : vector<1x128xf32>
    %1083 = tpu.matmul %1080, %1082, %cst_323 {dimension_numbers = #tpu.dot_dimension_numbers<[1], [0], [0], [1], [0, 0, 1, 1], [], []>} : vector<1x7xf32>, vector<7x128xf32>, vector<1x128xf32> -> vector<1x128xf32>
    %1084 = arith.addf %1079, %1083 : vector<1x128xf32>
    %1085 = vector.extract_strided_slice %970 {offsets = [5, 0], sizes = [1, 7], strides = [1, 1]} : vector<7x7xf32> to vector<1x7xf32>
    %c2_324 = arith.constant 2 : index
    %c5_325 = arith.constant 5 : index
    %c0_326 = arith.constant 0 : index
    %c0_327 = arith.constant 0 : index
    %1086 = vector.load %arg6[%c2_324, %c5_325, %c0_326, %c0_327] : memref<6x7x7x128xf32, #tpu.memory_space<vmem>>, vector<1x1x7x128xf32>
    %1087 = vector.shape_cast %1086 : vector<1x1x7x128xf32> to vector<7x128xf32>
    %cst_328 = arith.constant dense<0.000000e+00> : vector<1x128xf32>
    %1088 = tpu.matmul %1085, %1087, %cst_328 {dimension_numbers = #tpu.dot_dimension_numbers<[1], [0], [0], [1], [0, 0, 1, 1], [], []>} : vector<1x7xf32>, vector<7x128xf32>, vector<1x128xf32> -> vector<1x128xf32>
    %1089 = arith.addf %1084, %1088 : vector<1x128xf32>
    %1090 = vector.extract_strided_slice %970 {offsets = [6, 0], sizes = [1, 7], strides = [1, 1]} : vector<7x7xf32> to vector<1x7xf32>
    %c2_329 = arith.constant 2 : index
    %c6_330 = arith.constant 6 : index
    %c0_331 = arith.constant 0 : index
    %c0_332 = arith.constant 0 : index
    %1091 = vector.load %arg6[%c2_329, %c6_330, %c0_331, %c0_332] : memref<6x7x7x128xf32, #tpu.memory_space<vmem>>, vector<1x1x7x128xf32>
    %1092 = vector.shape_cast %1091 : vector<1x1x7x128xf32> to vector<7x128xf32>
    %cst_333 = arith.constant dense<0.000000e+00> : vector<1x128xf32>
    %1093 = tpu.matmul %1090, %1092, %cst_333 {dimension_numbers = #tpu.dot_dimension_numbers<[1], [0], [0], [1], [0, 0, 1, 1], [], []>} : vector<1x7xf32>, vector<7x128xf32>, vector<1x128xf32> -> vector<1x128xf32>
    %1094 = arith.addf %1089, %1093 : vector<1x128xf32>
    %1095 = vector.extract_strided_slice %976 {offsets = [0, 0], sizes = [1, 7], strides = [1, 1]} : vector<7x7xf32> to vector<1x7xf32>
    %c3_334 = arith.constant 3 : index
    %c0_335 = arith.constant 0 : index
    %c0_336 = arith.constant 0 : index
    %c0_337 = arith.constant 0 : index
    %1096 = vector.load %arg6[%c3_334, %c0_335, %c0_336, %c0_337] : memref<6x7x7x128xf32, #tpu.memory_space<vmem>>, vector<1x1x7x128xf32>
    %1097 = vector.shape_cast %1096 : vector<1x1x7x128xf32> to vector<7x128xf32>
    %cst_338 = arith.constant dense<0.000000e+00> : vector<1x128xf32>
    %1098 = tpu.matmul %1095, %1097, %cst_338 {dimension_numbers = #tpu.dot_dimension_numbers<[1], [0], [0], [1], [0, 0, 1, 1], [], []>} : vector<1x7xf32>, vector<7x128xf32>, vector<1x128xf32> -> vector<1x128xf32>
    %1099 = arith.addf %1094, %1098 : vector<1x128xf32>
    %1100 = vector.extract_strided_slice %976 {offsets = [1, 0], sizes = [1, 7], strides = [1, 1]} : vector<7x7xf32> to vector<1x7xf32>
    %c3_339 = arith.constant 3 : index
    %c1_340 = arith.constant 1 : index
    %c0_341 = arith.constant 0 : index
    %c0_342 = arith.constant 0 : index
    %1101 = vector.load %arg6[%c3_339, %c1_340, %c0_341, %c0_342] : memref<6x7x7x128xf32, #tpu.memory_space<vmem>>, vector<1x1x7x128xf32>
    %1102 = vector.shape_cast %1101 : vector<1x1x7x128xf32> to vector<7x128xf32>
    %cst_343 = arith.constant dense<0.000000e+00> : vector<1x128xf32>
    %1103 = tpu.matmul %1100, %1102, %cst_343 {dimension_numbers = #tpu.dot_dimension_numbers<[1], [0], [0], [1], [0, 0, 1, 1], [], []>} : vector<1x7xf32>, vector<7x128xf32>, vector<1x128xf32> -> vector<1x128xf32>
    %1104 = arith.addf %1099, %1103 : vector<1x128xf32>
    %1105 = vector.extract_strided_slice %976 {offsets = [2, 0], sizes = [1, 7], strides = [1, 1]} : vector<7x7xf32> to vector<1x7xf32>
    %c3_344 = arith.constant 3 : index
    %c2_345 = arith.constant 2 : index
    %c0_346 = arith.constant 0 : index
    %c0_347 = arith.constant 0 : index
    %1106 = vector.load %arg6[%c3_344, %c2_345, %c0_346, %c0_347] : memref<6x7x7x128xf32, #tpu.memory_space<vmem>>, vector<1x1x7x128xf32>
    %1107 = vector.shape_cast %1106 : vector<1x1x7x128xf32> to vector<7x128xf32>
    %cst_348 = arith.constant dense<0.000000e+00> : vector<1x128xf32>
    %1108 = tpu.matmul %1105, %1107, %cst_348 {dimension_numbers = #tpu.dot_dimension_numbers<[1], [0], [0], [1], [0, 0, 1, 1], [], []>} : vector<1x7xf32>, vector<7x128xf32>, vector<1x128xf32> -> vector<1x128xf32>
    %1109 = arith.addf %1104, %1108 : vector<1x128xf32>
    %1110 = vector.extract_strided_slice %976 {offsets = [3, 0], sizes = [1, 7], strides = [1, 1]} : vector<7x7xf32> to vector<1x7xf32>
    %c3_349 = arith.constant 3 : index
    %c3_350 = arith.constant 3 : index
    %c0_351 = arith.constant 0 : index
    %c0_352 = arith.constant 0 : index
    %1111 = vector.load %arg6[%c3_349, %c3_350, %c0_351, %c0_352] : memref<6x7x7x128xf32, #tpu.memory_space<vmem>>, vector<1x1x7x128xf32>
    %1112 = vector.shape_cast %1111 : vector<1x1x7x128xf32> to vector<7x128xf32>
    %cst_353 = arith.constant dense<0.000000e+00> : vector<1x128xf32>
    %1113 = tpu.matmul %1110, %1112, %cst_353 {dimension_numbers = #tpu.dot_dimension_numbers<[1], [0], [0], [1], [0, 0, 1, 1], [], []>} : vector<1x7xf32>, vector<7x128xf32>, vector<1x128xf32> -> vector<1x128xf32>
    %1114 = arith.addf %1109, %1113 : vector<1x128xf32>
    %1115 = vector.extract_strided_slice %976 {offsets = [4, 0], sizes = [1, 7], strides = [1, 1]} : vector<7x7xf32> to vector<1x7xf32>
    %c3_354 = arith.constant 3 : index
    %c4_355 = arith.constant 4 : index
    %c0_356 = arith.constant 0 : index
    %c0_357 = arith.constant 0 : index
    %1116 = vector.load %arg6[%c3_354, %c4_355, %c0_356, %c0_357] : memref<6x7x7x128xf32, #tpu.memory_space<vmem>>, vector<1x1x7x128xf32>
    %1117 = vector.shape_cast %1116 : vector<1x1x7x128xf32> to vector<7x128xf32>
    %cst_358 = arith.constant dense<0.000000e+00> : vector<1x128xf32>
    %1118 = tpu.matmul %1115, %1117, %cst_358 {dimension_numbers = #tpu.dot_dimension_numbers<[1], [0], [0], [1], [0, 0, 1, 1], [], []>} : vector<1x7xf32>, vector<7x128xf32>, vector<1x128xf32> -> vector<1x128xf32>
    %1119 = arith.addf %1114, %1118 : vector<1x128xf32>
    %1120 = vector.extract_strided_slice %976 {offsets = [5, 0], sizes = [1, 7], strides = [1, 1]} : vector<7x7xf32> to vector<1x7xf32>
    %c3_359 = arith.constant 3 : index
    %c5_360 = arith.constant 5 : index
    %c0_361 = arith.constant 0 : index
    %c0_362 = arith.constant 0 : index
    %1121 = vector.load %arg6[%c3_359, %c5_360, %c0_361, %c0_362] : memref<6x7x7x128xf32, #tpu.memory_space<vmem>>, vector<1x1x7x128xf32>
    %1122 = vector.shape_cast %1121 : vector<1x1x7x128xf32> to vector<7x128xf32>
    %cst_363 = arith.constant dense<0.000000e+00> : vector<1x128xf32>
    %1123 = tpu.matmul %1120, %1122, %cst_363 {dimension_numbers = #tpu.dot_dimension_numbers<[1], [0], [0], [1], [0, 0, 1, 1], [], []>} : vector<1x7xf32>, vector<7x128xf32>, vector<1x128xf32> -> vector<1x128xf32>
    %1124 = arith.addf %1119, %1123 : vector<1x128xf32>
    %1125 = vector.extract_strided_slice %976 {offsets = [6, 0], sizes = [1, 7], strides = [1, 1]} : vector<7x7xf32> to vector<1x7xf32>
    %c3_364 = arith.constant 3 : index
    %c6_365 = arith.constant 6 : index
    %c0_366 = arith.constant 0 : index
    %c0_367 = arith.constant 0 : index
    %1126 = vector.load %arg6[%c3_364, %c6_365, %c0_366, %c0_367] : memref<6x7x7x128xf32, #tpu.memory_space<vmem>>, vector<1x1x7x128xf32>
    %1127 = vector.shape_cast %1126 : vector<1x1x7x128xf32> to vector<7x128xf32>
    %cst_368 = arith.constant dense<0.000000e+00> : vector<1x128xf32>
    %1128 = tpu.matmul %1125, %1127, %cst_368 {dimension_numbers = #tpu.dot_dimension_numbers<[1], [0], [0], [1], [0, 0, 1, 1], [], []>} : vector<1x7xf32>, vector<7x128xf32>, vector<1x128xf32> -> vector<1x128xf32>
    %1129 = arith.addf %1124, %1128 : vector<1x128xf32>
    %1130 = vector.extract_strided_slice %982 {offsets = [0, 0], sizes = [1, 7], strides = [1, 1]} : vector<7x7xf32> to vector<1x7xf32>
    %c4_369 = arith.constant 4 : index
    %c0_370 = arith.constant 0 : index
    %c0_371 = arith.constant 0 : index
    %c0_372 = arith.constant 0 : index
    %1131 = vector.load %arg6[%c4_369, %c0_370, %c0_371, %c0_372] : memref<6x7x7x128xf32, #tpu.memory_space<vmem>>, vector<1x1x7x128xf32>
    %1132 = vector.shape_cast %1131 : vector<1x1x7x128xf32> to vector<7x128xf32>
    %cst_373 = arith.constant dense<0.000000e+00> : vector<1x128xf32>
    %1133 = tpu.matmul %1130, %1132, %cst_373 {dimension_numbers = #tpu.dot_dimension_numbers<[1], [0], [0], [1], [0, 0, 1, 1], [], []>} : vector<1x7xf32>, vector<7x128xf32>, vector<1x128xf32> -> vector<1x128xf32>
    %1134 = arith.addf %1129, %1133 : vector<1x128xf32>
    %1135 = vector.extract_strided_slice %982 {offsets = [1, 0], sizes = [1, 7], strides = [1, 1]} : vector<7x7xf32> to vector<1x7xf32>
    %c4_374 = arith.constant 4 : index
    %c1_375 = arith.constant 1 : index
    %c0_376 = arith.constant 0 : index
    %c0_377 = arith.constant 0 : index
    %1136 = vector.load %arg6[%c4_374, %c1_375, %c0_376, %c0_377] : memref<6x7x7x128xf32, #tpu.memory_space<vmem>>, vector<1x1x7x128xf32>
    %1137 = vector.shape_cast %1136 : vector<1x1x7x128xf32> to vector<7x128xf32>
    %cst_378 = arith.constant dense<0.000000e+00> : vector<1x128xf32>
    %1138 = tpu.matmul %1135, %1137, %cst_378 {dimension_numbers = #tpu.dot_dimension_numbers<[1], [0], [0], [1], [0, 0, 1, 1], [], []>} : vector<1x7xf32>, vector<7x128xf32>, vector<1x128xf32> -> vector<1x128xf32>
    %1139 = arith.addf %1134, %1138 : vector<1x128xf32>
    %1140 = vector.extract_strided_slice %982 {offsets = [2, 0], sizes = [1, 7], strides = [1, 1]} : vector<7x7xf32> to vector<1x7xf32>
    %c4_379 = arith.constant 4 : index
    %c2_380 = arith.constant 2 : index
    %c0_381 = arith.constant 0 : index
    %c0_382 = arith.constant 0 : index
    %1141 = vector.load %arg6[%c4_379, %c2_380, %c0_381, %c0_382] : memref<6x7x7x128xf32, #tpu.memory_space<vmem>>, vector<1x1x7x128xf32>
    %1142 = vector.shape_cast %1141 : vector<1x1x7x128xf32> to vector<7x128xf32>
    %cst_383 = arith.constant dense<0.000000e+00> : vector<1x128xf32>
    %1143 = tpu.matmul %1140, %1142, %cst_383 {dimension_numbers = #tpu.dot_dimension_numbers<[1], [0], [0], [1], [0, 0, 1, 1], [], []>} : vector<1x7xf32>, vector<7x128xf32>, vector<1x128xf32> -> vector<1x128xf32>
    %1144 = arith.addf %1139, %1143 : vector<1x128xf32>
    %1145 = vector.extract_strided_slice %982 {offsets = [3, 0], sizes = [1, 7], strides = [1, 1]} : vector<7x7xf32> to vector<1x7xf32>
    %c4_384 = arith.constant 4 : index
    %c3_385 = arith.constant 3 : index
    %c0_386 = arith.constant 0 : index
    %c0_387 = arith.constant 0 : index
    %1146 = vector.load %arg6[%c4_384, %c3_385, %c0_386, %c0_387] : memref<6x7x7x128xf32, #tpu.memory_space<vmem>>, vector<1x1x7x128xf32>
    %1147 = vector.shape_cast %1146 : vector<1x1x7x128xf32> to vector<7x128xf32>
    %cst_388 = arith.constant dense<0.000000e+00> : vector<1x128xf32>
    %1148 = tpu.matmul %1145, %1147, %cst_388 {dimension_numbers = #tpu.dot_dimension_numbers<[1], [0], [0], [1], [0, 0, 1, 1], [], []>} : vector<1x7xf32>, vector<7x128xf32>, vector<1x128xf32> -> vector<1x128xf32>
    %1149 = arith.addf %1144, %1148 : vector<1x128xf32>
    %1150 = vector.extract_strided_slice %982 {offsets = [4, 0], sizes = [1, 7], strides = [1, 1]} : vector<7x7xf32> to vector<1x7xf32>
    %c4_389 = arith.constant 4 : index
    %c4_390 = arith.constant 4 : index
    %c0_391 = arith.constant 0 : index
    %c0_392 = arith.constant 0 : index
    %1151 = vector.load %arg6[%c4_389, %c4_390, %c0_391, %c0_392] : memref<6x7x7x128xf32, #tpu.memory_space<vmem>>, vector<1x1x7x128xf32>
    %1152 = vector.shape_cast %1151 : vector<1x1x7x128xf32> to vector<7x128xf32>
    %cst_393 = arith.constant dense<0.000000e+00> : vector<1x128xf32>
    %1153 = tpu.matmul %1150, %1152, %cst_393 {dimension_numbers = #tpu.dot_dimension_numbers<[1], [0], [0], [1], [0, 0, 1, 1], [], []>} : vector<1x7xf32>, vector<7x128xf32>, vector<1x128xf32> -> vector<1x128xf32>
    %1154 = arith.addf %1149, %1153 : vector<1x128xf32>
    %1155 = vector.extract_strided_slice %982 {offsets = [5, 0], sizes = [1, 7], strides = [1, 1]} : vector<7x7xf32> to vector<1x7xf32>
    %c4_394 = arith.constant 4 : index
    %c5_395 = arith.constant 5 : index
    %c0_396 = arith.constant 0 : index
    %c0_397 = arith.constant 0 : index
    %1156 = vector.load %arg6[%c4_394, %c5_395, %c0_396, %c0_397] : memref<6x7x7x128xf32, #tpu.memory_space<vmem>>, vector<1x1x7x128xf32>
    %1157 = vector.shape_cast %1156 : vector<1x1x7x128xf32> to vector<7x128xf32>
    %cst_398 = arith.constant dense<0.000000e+00> : vector<1x128xf32>
    %1158 = tpu.matmul %1155, %1157, %cst_398 {dimension_numbers = #tpu.dot_dimension_numbers<[1], [0], [0], [1], [0, 0, 1, 1], [], []>} : vector<1x7xf32>, vector<7x128xf32>, vector<1x128xf32> -> vector<1x128xf32>
    %1159 = arith.addf %1154, %1158 : vector<1x128xf32>
    %1160 = vector.extract_strided_slice %982 {offsets = [6, 0], sizes = [1, 7], strides = [1, 1]} : vector<7x7xf32> to vector<1x7xf32>
    %c4_399 = arith.constant 4 : index
    %c6_400 = arith.constant 6 : index
    %c0_401 = arith.constant 0 : index
    %c0_402 = arith.constant 0 : index
    %1161 = vector.load %arg6[%c4_399, %c6_400, %c0_401, %c0_402] : memref<6x7x7x128xf32, #tpu.memory_space<vmem>>, vector<1x1x7x128xf32>
    %1162 = vector.shape_cast %1161 : vector<1x1x7x128xf32> to vector<7x128xf32>
    %cst_403 = arith.constant dense<0.000000e+00> : vector<1x128xf32>
    %1163 = tpu.matmul %1160, %1162, %cst_403 {dimension_numbers = #tpu.dot_dimension_numbers<[1], [0], [0], [1], [0, 0, 1, 1], [], []>} : vector<1x7xf32>, vector<7x128xf32>, vector<1x128xf32> -> vector<1x128xf32>
    %1164 = arith.addf %1159, %1163 : vector<1x128xf32>
    %1165 = vector.extract_strided_slice %988 {offsets = [0, 0], sizes = [1, 7], strides = [1, 1]} : vector<7x7xf32> to vector<1x7xf32>
    %c5_404 = arith.constant 5 : index
    %c0_405 = arith.constant 0 : index
    %c0_406 = arith.constant 0 : index
    %c0_407 = arith.constant 0 : index
    %1166 = vector.load %arg6[%c5_404, %c0_405, %c0_406, %c0_407] : memref<6x7x7x128xf32, #tpu.memory_space<vmem>>, vector<1x1x7x128xf32>
    %1167 = vector.shape_cast %1166 : vector<1x1x7x128xf32> to vector<7x128xf32>
    %cst_408 = arith.constant dense<0.000000e+00> : vector<1x128xf32>
    %1168 = tpu.matmul %1165, %1167, %cst_408 {dimension_numbers = #tpu.dot_dimension_numbers<[1], [0], [0], [1], [0, 0, 1, 1], [], []>} : vector<1x7xf32>, vector<7x128xf32>, vector<1x128xf32> -> vector<1x128xf32>
    %1169 = arith.addf %1164, %1168 : vector<1x128xf32>
    %1170 = vector.extract_strided_slice %988 {offsets = [1, 0], sizes = [1, 7], strides = [1, 1]} : vector<7x7xf32> to vector<1x7xf32>
    %c5_409 = arith.constant 5 : index
    %c1_410 = arith.constant 1 : index
    %c0_411 = arith.constant 0 : index
    %c0_412 = arith.constant 0 : index
    %1171 = vector.load %arg6[%c5_409, %c1_410, %c0_411, %c0_412] : memref<6x7x7x128xf32, #tpu.memory_space<vmem>>, vector<1x1x7x128xf32>
    %1172 = vector.shape_cast %1171 : vector<1x1x7x128xf32> to vector<7x128xf32>
    %cst_413 = arith.constant dense<0.000000e+00> : vector<1x128xf32>
    %1173 = tpu.matmul %1170, %1172, %cst_413 {dimension_numbers = #tpu.dot_dimension_numbers<[1], [0], [0], [1], [0, 0, 1, 1], [], []>} : vector<1x7xf32>, vector<7x128xf32>, vector<1x128xf32> -> vector<1x128xf32>
    %1174 = arith.addf %1169, %1173 : vector<1x128xf32>
    %1175 = vector.extract_strided_slice %988 {offsets = [2, 0], sizes = [1, 7], strides = [1, 1]} : vector<7x7xf32> to vector<1x7xf32>
    %c5_414 = arith.constant 5 : index
    %c2_415 = arith.constant 2 : index
    %c0_416 = arith.constant 0 : index
    %c0_417 = arith.constant 0 : index
    %1176 = vector.load %arg6[%c5_414, %c2_415, %c0_416, %c0_417] : memref<6x7x7x128xf32, #tpu.memory_space<vmem>>, vector<1x1x7x128xf32>
    %1177 = vector.shape_cast %1176 : vector<1x1x7x128xf32> to vector<7x128xf32>
    %cst_418 = arith.constant dense<0.000000e+00> : vector<1x128xf32>
    %1178 = tpu.matmul %1175, %1177, %cst_418 {dimension_numbers = #tpu.dot_dimension_numbers<[1], [0], [0], [1], [0, 0, 1, 1], [], []>} : vector<1x7xf32>, vector<7x128xf32>, vector<1x128xf32> -> vector<1x128xf32>
    %1179 = arith.addf %1174, %1178 : vector<1x128xf32>
    %1180 = vector.extract_strided_slice %988 {offsets = [3, 0], sizes = [1, 7], strides = [1, 1]} : vector<7x7xf32> to vector<1x7xf32>
    %c5_419 = arith.constant 5 : index
    %c3_420 = arith.constant 3 : index
    %c0_421 = arith.constant 0 : index
    %c0_422 = arith.constant 0 : index
    %1181 = vector.load %arg6[%c5_419, %c3_420, %c0_421, %c0_422] : memref<6x7x7x128xf32, #tpu.memory_space<vmem>>, vector<1x1x7x128xf32>
    %1182 = vector.shape_cast %1181 : vector<1x1x7x128xf32> to vector<7x128xf32>
    %cst_423 = arith.constant dense<0.000000e+00> : vector<1x128xf32>
    %1183 = tpu.matmul %1180, %1182, %cst_423 {dimension_numbers = #tpu.dot_dimension_numbers<[1], [0], [0], [1], [0, 0, 1, 1], [], []>} : vector<1x7xf32>, vector<7x128xf32>, vector<1x128xf32> -> vector<1x128xf32>
    %1184 = arith.addf %1179, %1183 : vector<1x128xf32>
    %1185 = vector.extract_strided_slice %988 {offsets = [4, 0], sizes = [1, 7], strides = [1, 1]} : vector<7x7xf32> to vector<1x7xf32>
    %c5_424 = arith.constant 5 : index
    %c4_425 = arith.constant 4 : index
    %c0_426 = arith.constant 0 : index
    %c0_427 = arith.constant 0 : index
    %1186 = vector.load %arg6[%c5_424, %c4_425, %c0_426, %c0_427] : memref<6x7x7x128xf32, #tpu.memory_space<vmem>>, vector<1x1x7x128xf32>
    %1187 = vector.shape_cast %1186 : vector<1x1x7x128xf32> to vector<7x128xf32>
    %cst_428 = arith.constant dense<0.000000e+00> : vector<1x128xf32>
    %1188 = tpu.matmul %1185, %1187, %cst_428 {dimension_numbers = #tpu.dot_dimension_numbers<[1], [0], [0], [1], [0, 0, 1, 1], [], []>} : vector<1x7xf32>, vector<7x128xf32>, vector<1x128xf32> -> vector<1x128xf32>
    %1189 = arith.addf %1184, %1188 : vector<1x128xf32>
    %1190 = vector.extract_strided_slice %988 {offsets = [5, 0], sizes = [1, 7], strides = [1, 1]} : vector<7x7xf32> to vector<1x7xf32>
    %c5_429 = arith.constant 5 : index
    %c5_430 = arith.constant 5 : index
    %c0_431 = arith.constant 0 : index
    %c0_432 = arith.constant 0 : index
    %1191 = vector.load %arg6[%c5_429, %c5_430, %c0_431, %c0_432] : memref<6x7x7x128xf32, #tpu.memory_space<vmem>>, vector<1x1x7x128xf32>
    %1192 = vector.shape_cast %1191 : vector<1x1x7x128xf32> to vector<7x128xf32>
    %cst_433 = arith.constant dense<0.000000e+00> : vector<1x128xf32>
    %1193 = tpu.matmul %1190, %1192, %cst_433 {dimension_numbers = #tpu.dot_dimension_numbers<[1], [0], [0], [1], [0, 0, 1, 1], [], []>} : vector<1x7xf32>, vector<7x128xf32>, vector<1x128xf32> -> vector<1x128xf32>
    %1194 = arith.addf %1189, %1193 : vector<1x128xf32>
    %1195 = vector.extract_strided_slice %988 {offsets = [6, 0], sizes = [1, 7], strides = [1, 1]} : vector<7x7xf32> to vector<1x7xf32>
    %c5_434 = arith.constant 5 : index
    %c6_435 = arith.constant 6 : index
    %c0_436 = arith.constant 0 : index
    %c0_437 = arith.constant 0 : index
    %1196 = vector.load %arg6[%c5_434, %c6_435, %c0_436, %c0_437] : memref<6x7x7x128xf32, #tpu.memory_space<vmem>>, vector<1x1x7x128xf32>
    %1197 = vector.shape_cast %1196 : vector<1x1x7x128xf32> to vector<7x128xf32>
    %cst_438 = arith.constant dense<0.000000e+00> : vector<1x128xf32>
    %1198 = tpu.matmul %1195, %1197, %cst_438 {dimension_numbers = #tpu.dot_dimension_numbers<[1], [0], [0], [1], [0, 0, 1, 1], [], []>} : vector<1x7xf32>, vector<7x128xf32>, vector<1x128xf32> -> vector<1x128xf32>
    %1199 = arith.addf %1194, %1198 : vector<1x128xf32>
    %cst_439 = arith.constant 0.000000e+00 : f32
    %1200 = vector.broadcast %cst_439 : f32 to vector<1x128xf32>
    %1201 = arith.maximumf %1199, %1200 : vector<1x128xf32>
    %c0_440 = arith.constant 0 : index
    %c0_441 = arith.constant 0 : index
    %1202 = vector.load %arg8[%c0_440, %c0_441] : memref<128x10xf32, #tpu.memory_space<vmem>>, vector<128x10xf32>
    %cst_442 = arith.constant dense<0.000000e+00> : vector<1x10xf32>
    %1203 = tpu.matmul %1201, %1202, %cst_442 {dimension_numbers = #tpu.dot_dimension_numbers<[1], [0], [0], [1], [0, 0, 1, 1], [], []>} : vector<1x128xf32>, vector<128x10xf32>, vector<1x10xf32> -> vector<1x10xf32>
    %c0_443 = arith.constant 0 : index
    %c0_444 = arith.constant 0 : index
    %1204 = vector.load %arg9[%c0_443, %c0_444] : memref<1x10xf32, #tpu.memory_space<vmem>>, vector<1x10xf32>
    %1205 = arith.addf %1203, %1204 : vector<1x10xf32>
    %c0_445 = arith.constant 0 : index
    %c0_446 = arith.constant 0 : index
    %c0_447 = arith.constant 0 : index
    %1206 = vector.load %arg10[%c0_445, %c0_446, %c0_447] : memref<1x1x10xf32, #tpu.memory_space<vmem>>, vector<1x1x10xf32>
    %1207 = vector.shape_cast %1206 : vector<1x1x10xf32> to vector<1x10xf32>
    %1208 = vector.shape_cast %1205 : vector<1x10xf32> to vector<1x1x10xf32>
    tpu.vector_store %arg10[%c0_445, %c0_446, %c0_447], %1208 {strides = array<i32>} : memref<1x1x10xf32, #tpu.memory_space<vmem>>, vector<1x1x10xf32>,
    return
  }
  func.func @transform_0(%arg0: i32) -> (i32, i32, i32, i32) {
    %c0_i32 = arith.constant 0 : i32
    %c0_i32_0 = arith.constant 0 : i32
    %c0_i32_1 = arith.constant 0 : i32
    %c0_i32_2 = arith.constant 0 : i32
    return %arg0, %c0_i32, %c0_i32_0, %c0_i32_1 : i32, i32, i32, i32
  }
  func.func @transform_1(%arg0: i32) -> i32 {
    %c0_i32 = arith.constant 0 : i32
    %c0_i32_0 = arith.constant 0 : i32
    return %c0_i32 : i32
  }
  func.func @transform_2(%arg0: i32) -> i32 {
    %c0_i32 = arith.constant 0 : i32
    %c0_i32_0 = arith.constant 0 : i32
    return %c0_i32 : i32
  }
  func.func @transform_3(%arg0: i32) -> i32 {
    %c0_i32 = arith.constant 0 : i32
    %c0_i32_0 = arith.constant 0 : i32
    return %c0_i32 : i32
  }
  func.func @transform_4(%arg0: i32) -> i32 {
    %c0_i32 = arith.constant 0 : i32
    %c0_i32_0 = arith.constant 0 : i32
    return %c0_i32 : i32
  }
  func.func @transform_5(%arg0: i32) -> (i32, i32, i32, i32) {
    %c0_i32 = arith.constant 0 : i32
    %c0_i32_0 = arith.constant 0 : i32
    %c0_i32_1 = arith.constant 0 : i32
    %c0_i32_2 = arith.constant 0 : i32
    %c0_i32_3 = arith.constant 0 : i32
    return %c0_i32, %c0_i32_0, %c0_i32_1, %c0_i32_2 : i32, i32, i32, i32
  }
  func.func @transform_6(%arg0: i32) -> (i32, i32) {
    %c0_i32 = arith.constant 0 : i32
    %c0_i32_0 = arith.constant 0 : i32
    %c0_i32_1 = arith.constant 0 : i32
    return %c0_i32, %c0_i32_0 : i32, i32
  }
  func.func @transform_7(%arg0: i32) -> (i32, i32) {
    %c0_i32 = arith.constant 0 : i32
    %c0_i32_0 = arith.constant 0 : i32
    %c0_i32_1 = arith.constant 0 : i32
    return %c0_i32, %c0_i32_0 : i32, i32
  }
  func.func @transform_8(%arg0: i32) -> (i32, i32) {
    %c0_i32 = arith.constant 0 : i32
    %c0_i32_0 = arith.constant 0 : i32
    %c0_i32_1 = arith.constant 0 : i32
    return %c0_i32, %c0_i32_0 : i32, i32
  }
  func.func @transform_9(%arg0: i32) -> (i32, i32, i32) {
    %c0_i32 = arith.constant 0 : i32
    %c0_i32_0 = arith.constant 0 : i32
    %c0_i32_1 = arith.constant 0 : i32
    return %arg0, %c0_i32, %c0_i32_0 : i32, i32, i32
  }
}

</mosaic_0001>

<bundles_post_ra>
// kernel: net_forward.1
= control target key start
LH: loop header
LB: loop body
LE: loop exit
PB: predicated region body
PF: predicated region fallthrough
CT: control target
= control target key end

     0   :  { %s13325_s0 = inlined_call_operand.vmem [shape: f32[2,1,28,28], index: 0, kind: input, shape index: {}]   ;;  %s13326_s1 = inlined_call_operand.vmem [shape: f32[27], index: 1, kind: input, shape index: {}]   ;;  %s13327_s2 = inlined_call_operand.vmem [shape: f32[3], index: 2, kind: input, shape index: {}]   ;;  %s13328_s3 = inlined_call_operand.vmem [shape: f32[162], index: 3, kind: input, shape index: {}]   ;;  %s13329_s4 = inlined_call_operand.vmem [shape: f32[6], index: 4, kind: input, shape index: {}]   ;;  %s13330_s5 = inlined_call_operand.hbm [shape: f32[6,7,7,128], index: 5, kind: input, shape index: {}]   ;;  %s13331_s6 = inlined_call_operand.vmem [shape: f32[1,128], index: 6, kind: input, shape index: {}]   ;;  %s13332_s7 = inlined_call_operand.vmem [shape: f32[128,10], index: 7, kind: input, shape index: {}]   ;;  %s13333_s8 = inlined_call_operand.vmem [shape: f32[1,10], index: 8, kind: input, shape index: {}]   ;;  %s13334_s9 = inlined_call_operand.hbm [shape: f32[2,1,10], index: 9, kind: output, shape index: {}]  }
   0x1   :  { %13338 = sst [smem:[#allocation20_spill]] %s13326_s1 }
   0x2   :  { %13339 = sst [smem:[#allocation21_spill]] %s13327_s2 }
   0x3   :  { %14 = vsyncpa [#allocation7], 0 }
   0x4   :  { %15 = vsyncpa [#allocation9], 0 }
   0x5   :  { %16 = vsyncpa [#allocation12], 0 }
   0x6   :  { %17 = vsyncpa [#allocation5], 0 }
   0x7   :  { %18 = vsyncpa [#allocation6], 0 }
   0x8   :  { %20 = vsyncpa [#allocation6 + $0x1], 0  ;;  %s11100_s30 = smov 0   ;;  %s11102_s10 = smov 0  }
   0x9   :  { %s11104_s11 = smov 0   ;;  %s11106_s12 = smov 0  }
   0xa LB: > { %s11121_s13 = sadd.s32 4294967295, %s11031_s12   ;;  %s9203_s14 = sadd.s32 4294967294, %s11031_s12   ;;  %s11031_s12 = sphi %s11106_s12, %s13377_s12   ;;  %s11027_s11 = sphi %s11104_s11, %s13376_s11   ;;  %s11023_s10 = sphi %s11102_s10, %s13375_s10   ;;  %s11019_s30 = sphi %s11100_s30, %s13374_s30  }
   0xb   : > { %s11125_s15 = sadd.s32 1, %s11031_s12   ;;  %s227_s16 = sadd.s32 1, %s11027_s11 }
   0xc   : > { %s224_s17 = ssub.s32 %s11031_s12, %s11125_s15  ;;  %p237_p0 = scmp.ne.s32.totalorder %s11027_s11, %s11023_s10 }
   0xd   : > { %p225_p1 = scmp.eq.s32.totalorder %s224_s17, 0  ;;  %p238_p2 = scmp.eq.s32.totalorder %s11121_s13, 1 }
   0xe   : > { %p243_p3 = scmp.ne.s32.totalorder %s11023_s10, %s11019_s30  ;;  %p244_p4 = scmp.eq.s32.totalorder %s9203_s14, 1 }
   0xf   : > { %s11136_s18 = scalar_select %p225_p1, %s11027_s11, %s227_s16  }
  0x10   : > { %p11138_p5 = por %p238_p2, %p237_p0  ;;  %p11142_p6 = por %p244_p4, %p243_p3 }
  0x11   : > { %p9204_p7 = scmp.ge.s32.totalorder %s11031_s12, 1  ;;  %p251_p8 = scmp.lt.s32.totalorder %s11031_s12, 3 }
  0x12   : > { %s13340_s19 = scalar_select %p11138_p5, 1, 0 }
  0x13   : > { %s13341_s20 = scalar_select %p11142_p6, 1, 0 }
  0x14   : > { %p13335_p9 = scmp.eq.s32.totalorder %s11121_s13, 0  ;;  %p11149_p10 = pnand %p9204_p7, %p251_p8 }
  0x15   : > { %s13343_s2 = sld [smem:[#allocation21_spill]]  ;;  %s13344_s1 = sld [smem:[#allocation20_spill]] }
  0x16   : > { %s13342_s21 = scalar_select %p11149_p10, 1, 0 }
  0x17   : > { %p10750_p11 = pneg %p11149_p10  ;;  %s286_s16 = sshll.u32 %s13328_s3, 4  ;;  %s11170_s16 = int_to_ptr.vmem [resolvable:$true] %s286_s16 }
  0x18   : > { %s297_s23 = sshll.u32 %s13329_s4, 4  ;;  %s298_s23 = int_to_ptr.vmem [resolvable:$true] %s297_s23 }
  0x19   : > { %p11163_p12 = pnand %p13335_p9, %p10750_p11 }
  0x1b   : > { %s275_s24 = sshll.u32 %s13343_s2, 4  ;;  %s264_s27 = sshll.u32 %s13344_s1, 4  ;;  %s276_s24 = int_to_ptr.vmem [resolvable:$true] %s275_s24  ;;  %s265_s27 = int_to_ptr.vmem [resolvable:$true] %s264_s27 }
  0x1c   : > { %s10865_s2 = scalar_lea.vmem %s276_s24, 16  ;;  %p11177_p0 = pneg %p11163_p12 }
  0x1d   : > { %p10866_p13 = scmp.ne.s32.totalorder %s276_s24, %s10865_s2  ;;  %p10873_p3 = scmp.lt.s32.totalorder %s276_s24, %s276_s24 }
  0x1e   : > { %p10874_p4 = scmp.lt.s32.totalorder %s10865_s2, %s10865_s2 }
  0x1f   : > { %p10868_p1 = pnand %p11177_p0, %p10866_p13 }
  0x20   : > { %p10875_p7 = por %p10874_p4, %p10873_p3 }
  0x21   : > { %p10869_p2 = pneg %p10868_p1 }
  0x23   : > { %p10876_p8 = pnand %p10875_p7, %p10869_p2 }
  0x25   : > { %10879 = shalt.err (!%p10876_p8)
}
  0x26   : > { %s11033_s26 = smov [#allocation8]   ;;  %s10880_s29 = scalar_lea.vmem %s265_s27, 16 }
  0x27   : > { %10756 = dma.vmem_to_smem (!%p11163_p12), %s276_s24, 16, %s11033_s26, [#allocation9]  }
  0x28   : > { %p10881_p11 = scmp.ne.s32.totalorder %s265_s27, %s10880_s29  ;;  %p10888_p5 = scmp.lt.s32.totalorder %s265_s27, %s265_s27 }
  0x29   : > { %p10889_p10 = scmp.lt.s32.totalorder %s10880_s29, %s10880_s29 }
  0x2a   : > { %p10883_p9 = pnand %p10881_p11, %p11177_p0 }
  0x2b   : > { %p10890_p13 = por %p10889_p10, %p10888_p5 }
  0x2c   : > { %p10884_p6 = pneg %p10883_p9 }
  0x2e   : > { %p10891_p1 = pnand %p10890_p13, %p10884_p6 }
  0x30   : > { %10894 = shalt.err (!%p10891_p1)
}
  0x31   : > { %s11034_s14 = smov [#allocation4]   ;;  %s10895_s2 = scalar_lea.vmem %s11170_s16, 32 }
  0x32   : > { %10753 = dma.vmem_to_smem (!%p11163_p12), %s265_s27, 16, %s11034_s14, [#allocation7]  }
  0x33   : > { %p10896_p2 = scmp.ne.s32.totalorder %s11170_s16, %s10895_s2  ;;  %p10903_p9 = scmp.lt.s32.totalorder %s11170_s16, %s11170_s16 }
  0x34   : > { %p10904_p7 = scmp.lt.s32.totalorder %s10895_s2, %s10895_s2 }
  0x35   : > { %p10898_p3 = pnand %p10896_p2, %p11177_p0 }
  0x36   : > { %p10905_p8 = por %p10904_p7, %p10903_p9 }
  0x37   : > { %p10899_p4 = pneg %p10898_p3 }
  0x39   : > { %p10906_p5 = pnand %p10905_p8, %p10899_p4 }
  0x3b   : > { %10909 = shalt.err (!%p10906_p5)
}
  0x3c   : > { %s11035_s24 = smov [#allocation10]   ;;  %s10910_s27 = scalar_lea.vmem %s298_s23, 16 }
  0x3d   : > { %10759 = dma.vmem_to_smem (!%p11163_p12), %s11170_s16, 32, %s11035_s24, [#allocation9]  }
  0x3e   : > { %p10911_p6 = scmp.ne.s32.totalorder %s298_s23, %s10910_s27  ;;  %p10918_p13 = scmp.lt.s32.totalorder %s298_s23, %s298_s23 }
  0x3f   : > { %p10919_p1 = scmp.lt.s32.totalorder %s10910_s27, %s10910_s27 }
  0x40   : > { %p10913_p10 = pnand %p10911_p6, %p11177_p0 }
  0x41   : > { %p10920_p2 = por %p10919_p1, %p10918_p13 }
  0x42   : > { %p10914_p11 = pneg %p10913_p10 }
  0x44   : > { %p10921_p3 = pnand %p10920_p2, %p10914_p11 }
  0x46   : > { %10924 = shalt.err (!%p10921_p3)
}
  0x47   : > { %s11036_s26 = smov [#allocation11]   ;;  %s11037_s16 = smov [#allocation13]  }
  0x48   : > { %10762 = dma.vmem_to_smem (!%p11163_p12), %s298_s23, 16, %s11036_s26, [#allocation12]  }
  0x49   : > { %s307_s29 = sshll.u32 %s11037_s16, 4  ;;  %s10925_s24 = scalar_lea.hbm %s13330_s5, 5376  ;;  %s308_s29 = int_to_ptr.vmem [resolvable:$true] %s307_s29 }
  0x4a   : > { %p10926_p4 = scmp.ne.s32.totalorder %s13330_s5, %s10925_s24  ;;  %p10932_p8 = scmp.lt.u32.totalorder %s10925_s24, %s13330_s5 }
  0x4c   : > { %p10928_p9 = pnand %p10926_p4, %p11177_p0 }
  0x4e   : > { %p10929_p7 = pneg %p10928_p9 }
  0x50   : > { %p10934_p5 = pnand %p10932_p8, %p10929_p7 }
  0x52   : > { %10937 = shalt.err (!%p10934_p5)
}
  0x53   : > { %s10938_s23 = scalar_lea.vmem %s308_s29, 5376  ;;  %p10946_p13 = scmp.lt.s32.totalorder %s308_s29, %s308_s29 }
  0x54   : > { %p10939_p6 = scmp.ne.s32.totalorder %s308_s29, %s10938_s23  ;;  %p10947_p1 = scmp.lt.s32.totalorder %s10938_s23, %s10938_s23 }
  0x56   : > { %p10941_p10 = pnand %p10939_p6, %p11177_p0  ;;  %p10948_p2 = por %p10947_p1, %p10946_p13 }
  0x58   : > { %p10942_p11 = pneg %p10941_p10 }
  0x5a   : > { %p10949_p3 = pnand %p10948_p2, %p10942_p11 }
  0x5c   : > { %10952 = shalt.err (!%p10949_p3)
}
  0x5d   : > { %s11038_s26 = smov 128   ;;  %s11039_s16 = smov 8  }
  0x5e   : > { %10765 = dma.hbm_to_vmem [thread:$0]  (!%p11163_p12), %s13330_s5, 5376, %s308_s29, [#allocation5], %s11038_s26, %s11038_s26, %s11039_s16  }
  0x5f   : > { %p13347_p4 = scmp.ne.s32.totalorder %s13342_s21, 0 }
  0x60   : > { %p13348_p9 = scmp.eq.s32.totalorder (!%p13347_p4), %s11121_s13, 0 }
  0x61   : > { %340 = sbr.rel (%p13347_p4) target bundleno = 3722 (0xe8a), region = 56 }
  0x68   : > { %10998 = dma.done.wait (%p13348_p9), [#allocation7], 16   ;;  %p13349_p0 = pmov %p13348_p9 }
  0x6a   : > { %11000 = vsyncadd (%p13349_p0), [#allocation7], 4294967280  ;;  %p13350_p7 = pmov %p13349_p0 }
  0x6b   : > { %p13351_p8 = pmov %p13349_p0 }
  0x6c   : > { %11002 = dma.done.wait (%p13350_p7), [#allocation9], 48  }
  0x6d   : > { %11004 = vsyncadd (%p13351_p8), [#allocation9], 4294967248  ;;  %p13352_p5 = pmov %p13349_p0 }
  0x6e   : > { %p13353_p12 = pmov %p13349_p0 }
  0x6f   : > { %11006 = dma.done.wait (%p13352_p5), [#allocation12], 16  }
  0x70   : > { %11008 = vsyncadd (%p13353_p12), [#allocation12], 4294967280  ;;  %p13354_p6 = pmov %p13349_p0 }
  0x71   : > { %p13355_p10 = pmov %p13349_p0 }
  0x72   : > { %11010 = dma.done.wait (%p13354_p6), [#allocation5], 5376  }
  0x73   : > { %11012 = vsyncadd (%p13355_p10), [#allocation5], 4294961920 }
  0x74   : > { %362 = sfence }
  0x75   : > { %p392_p11 = scmp.lt.s32.totalorder %s11121_s13, 1  ;;  %vm397_vm0 = vcmask 244736   ;;  %vm401_vm1 = vcmask 242688   ;;  %v11040_v0 = vmov 0.0   ;;  %s11041_s24 = smov 1   ;;  %vm423_vm2 = vcmask 236552  }
  0x76   : > { %398 = vst.msk [vmem:[#allocation2] sm:$0xff] %vm397_vm0, %v11040_v0  ;;  %399 = vst.msk [vmem:[#allocation2 + $0x8] sm:$0xff] %vm397_vm0, %v11040_v0  ;;  %s9219_s17 = sld [smem:[#allocation4 + $0x1]]  ;;  %vm427_vm3 = vcmask 232456   ;;  %s9220_s22 = sld [smem:[#allocation4 + $0x2]]  ;;  %v1017_v51 = vlaneseq  ;;  %vm1054_vm4 = vcmask 228352  }
  0x77   : > { %400 = vst.msk [vmem:[#allocation2 + $0x10] sm:$0xff] %vm397_vm0, %v11040_v0  ;;  %s393_s21 = scalar_select %p392_p11, %s11121_s13, 1  ;;  %vm1061_vm6 = vcmask 1043456   ;;  %vm11044_vm7 = vmmov 1  }
  0x78   : > { %402 = vst.msk [vmem:[#allocation2 + $0x18] sm:$0x3f] %vm401_vm1, %v11040_v0  ;;  %s11042_s27 = smov 127   ;;  %s9222_s23 = sld [smem:[#allocation4 + $0x4]]  ;;  %v11327_v55 = vshrl.u32 %v1017_v51, 7  ;;  %v11329_v56 = vand.u32 127, %v1017_v51  ;;  %vm11459_vm8 = vmpackc.low %vm1061_vm6, %vm11044_vm7 }
  0x79   : > { %s9614_s28 = sshll.u32 %s393_s21, 5  ;;  %s11043_s26 = smov 126  }
  0x7a   : > { %s396_s2 = scalar_lea.vmem %s13325_s0, %s9614_s28  ;;  %s9223_s16 = sld [smem:[#allocation4 + $0x5]]  ;;  %v1022_v57 = vmul.u32 2, %v11327_v55 }
  0x7b   : > { %v403_v1 = vld [vmem:[%s396_s2] sm:$0xff]  ;;  %v405_v2 = vld [vmem:[%s396_s2 + $0x10] sm:$0xff]  ;;  %v404_v3 = vld [vmem:[%s396_s2 + $0x8] sm:$0xff]  ;;  %s9225_s14 = sld [smem:[#allocation4 + $0x7]]  ;;  %s9226_s1 = sld [smem:[#allocation4 + $0x8]] }
  0x7c   : > { %411 = vrot.lane.b32.xlu0 %v403_v1, %s11041_s24  ;;  %415 = vrot.lane.b32.xlu1 %v405_v2, %s11041_s24  ;;  %v406_v4 = vld [vmem:[%s396_s2 + $0x18] sm:$0xf]  ;;  %v448_v9 = vstv %s9219_s17  ;;  %s9228_s21 = sld [smem:[#allocation4 + $0xa]]  ;;  %s9229_s28 = sld [smem:[#allocation4 + $0xb]]  ;;  %vm1024_vm5 = vcmp.eq.s32.totalorder %v11329_v56, %v1022_v57 }
  0x7d   : > { %v474_v12 = vstv %s9220_s22  ;;  %s9231_s25 = sld [smem:[#allocation4 + $0xd]]  ;;  %v11342_v60 = vsel %vm1024_vm5, 1.0, %v11040_v0  ;;  %s9232_s29 = sld [smem:[#allocation4 + $0xe]] }
  0x7e   : > { %v510_v23 = vstv %s9222_s23  ;;  %9868 = vmatprep.mubr.msk.f32.mxu1 %vm1054_vm4, %v11342_v60  ;;  %s9234_s2 = sld [smem:[#allocation4 + $0x10]]  ;;  %s9235_s17 = sld [smem:[#allocation4 + $0x11]] }
  0x7f   : > { %s9238_s22 = sld [smem:[#allocation4 + $0x13]]  ;;  %s9239_s23 = sld [smem:[#allocation4 + $0x14]] }
  0x80   : > { %413 = vrot.lane.b32.xlu0 %v404_v3, %s11041_s24  ;;  %417 = vrot.lane.b32.xlu1 %v406_v4, %s11041_s24  ;;  %v536_v26 = vstv %s9223_s16  ;;  %s9241_s16 = sld [smem:[#allocation4 + $0x16]]  ;;  %p13372_p1 = scmp.ne.s32.totalorder %s13340_s19, 0 }
  0x81   : > { %v572_v37 = vstv %s9225_s14  ;;  %v598_v40 = vstv %s9226_s1  ;;  %s9242_s14 = sld [smem:[#allocation4 + $0x17]]  ;;  %s441_s1 = sld [smem:[#allocation4]] }
  0x82   : > { %v640_v50 = vstv %s9228_s21  ;;  %v666_v54 = vstv %s9229_s28  ;;  %s9221_s21 = sld [smem:[#allocation4 + $0x3]]  ;;  %s9244_s28 = sld [smem:[#allocation4 + $0x19]] }
  0x83   : > { %v702_v2 = vstv %s9231_s25  ;;  %s9245_s25 = sld [smem:[#allocation4 + $0x1a]] }
  0xee   : > { %v412_v5 = vpop.permute.xlu0 %411  ;;  %v416_v6 = vpop.permute.xlu1 %415 }
  0xef   : > { %424 = vst.msk [vmem:[#allocation2 + $0x1] sm:$0xff] %vm423_vm2, %v412_v5  ;;  %426 = vst.msk [vmem:[#allocation2 + $0x11] sm:$0xff] %vm423_vm2, %v416_v6  ;;  %v728_v5 = vstv %s9232_s29  ;;  %s9224_s29 = sld [smem:[#allocation4 + $0x6]] }
  0xf2   : > { %v414_v7 = vpop.permute.xlu0 %413  ;;  %v418_v8 = vpop.permute.xlu1 %417 }
  0xf3   : > { %425 = vst.msk [vmem:[#allocation2 + $0x9] sm:$0xff] %vm423_vm2, %v414_v7 }
  0xf4   : > { %428 = vst.msk [vmem:[#allocation2 + $0x19] sm:$0xf] %vm427_vm3, %v418_v8 }
  0xf6   : > { %v11255_v10 = vld [vmem:[#allocation2] sm:$0xff]  ;;  %v11287_v30 = vld [vmem:[#allocation2 + $0x11] sm:$0xff] }
  0xf7   : > { %v449_v11 = vmul.f32 %v448_v9, %v11255_v10  ;;  %v475_v14 = vmul.f32 %v474_v12, %v11255_v10  ;;  %v11275_v22 = vld [vmem:[#allocation2 + $0x1] sm:$0xff]  ;;  %v513_v31 = vmul.f32 %v510_v23, %v11287_v30  ;;  %v539_v34 = vmul.f32 %v536_v26, %v11287_v30 }
  0xf8   : > { %v511_v24 = vmul.f32 %v510_v23, %v11275_v22  ;;  %v537_v28 = vmul.f32 %v536_v26, %v11275_v22  ;;  %v641_v52 = vmul.f32 %v640_v50, %v11255_v10  ;;  %v667_v58 = vmul.f32 %v666_v54, %v11255_v10 }
  0xf9   : > { %457 = vrot.lane.b32.xlu0 %v449_v11, %s11042_s27  ;;  %v703_v3 = vmul.f32 %v702_v2, %v11275_v22  ;;  %v729_v6 = vmul.f32 %v728_v5, %v11275_v22  ;;  %v705_v8 = vmul.f32 %v702_v2, %v11287_v30  ;;  %v731_v11 = vmul.f32 %v728_v5, %v11287_v30 }
  0xfa   : > { %v11259_v13 = vld [vmem:[#allocation2 + $0x8] sm:$0xff]  ;;  %v11263_v16 = vld [vmem:[#allocation2 + $0x10] sm:$0xff] }
  0xfb   : > { %v450_v15 = vmul.f32 %v448_v9, %v11259_v13  ;;  %v451_v17 = vmul.f32 %v448_v9, %v11263_v16  ;;  %v476_v18 = vmul.f32 %v474_v12, %v11259_v13  ;;  %v11269_v19 = vld [vmem:[#allocation2 + $0x18] sm:$0xf]  ;;  %v477_v20 = vmul.f32 %v474_v12, %v11263_v16  ;;  %v11281_v27 = vld [vmem:[#allocation2 + $0x9] sm:$0xff] }
  0xfc   : > { %v452_v21 = vmul.f32 %v448_v9, %v11269_v19  ;;  %v478_v25 = vmul.f32 %v474_v12, %v11269_v19  ;;  %v512_v29 = vmul.f32 %v510_v23, %v11281_v27  ;;  %v538_v32 = vmul.f32 %v536_v26, %v11281_v27  ;;  %v11293_v33 = vld [vmem:[#allocation2 + $0x19] sm:$0xf]  ;;  %v11299_v36 = vld [vmem:[#allocation2 + $0x2] sm:$0xff]  ;;  %v11305_v41 = vld [vmem:[#allocation2 + $0xa] sm:$0xff] }
  0xfd   : > { %483 = vrot.lane.b32.xlu0 %v475_v14, %s11043_s26  ;;  %459 = vrot.lane.b32.xlu1 %v450_v15, %s11042_s27  ;;  %v514_v35 = vmul.f32 %v510_v23, %v11293_v33  ;;  %v573_v38 = vmul.f32 %v572_v37, %v11299_v36  ;;  %v540_v39 = vmul.f32 %v536_v26, %v11293_v33  ;;  %v11311_v44 = vld [vmem:[#allocation2 + $0x12] sm:$0xff]  ;;  %v11317_v47 = vld [vmem:[#allocation2 + $0x1a] sm:$0xf]  ;;  %v764_v14 = vstv %s9234_s2  ;;  %s623_s2 = sld [smem:[#allocation8]] }
  0xfe   : > { %v599_v42 = vmul.f32 %v598_v40, %v11299_v36  ;;  %v574_v43 = vmul.f32 %v572_v37, %v11305_v41  ;;  %v575_v45 = vmul.f32 %v572_v37, %v11311_v44  ;;  %v600_v46 = vmul.f32 %v598_v40, %v11305_v41 }
  0xff   : > { %v601_v48 = vmul.f32 %v598_v40, %v11311_v44  ;;  %v576_v49 = vmul.f32 %v572_v37, %v11317_v47  ;;  %v602_v53 = vmul.f32 %v598_v40, %v11317_v47  ;;  %v642_v59 = vmul.f32 %v640_v50, %v11259_v13 }
 0x100   : > { %v643_v61 = vmul.f32 %v640_v50, %v11263_v16  ;;  %v668_v62 = vmul.f32 %v666_v54, %v11259_v13  ;;  %v669_v63 = vmul.f32 %v666_v54, %v11263_v16  ;;  %v644_v1 = vmul.f32 %v640_v50, %v11269_v19 }
 0x101   : > { %461 = vrot.lane.b32.xlu0 %v451_v17, %s11042_s27  ;;  %485 = vrot.lane.b32.xlu1 %v476_v18, %s11043_s26  ;;  %v670_v4 = vmul.f32 %v666_v54, %v11269_v19  ;;  %v704_v7 = vmul.f32 %v702_v2, %v11281_v27  ;;  %v730_v9 = vmul.f32 %v728_v5, %v11281_v27  ;;  %v790_v18 = vstv %s9235_s17  ;;  %s9227_s17 = sld [smem:[#allocation4 + $0x9]] }
 0x102   : > { %v706_v12 = vmul.f32 %v702_v2, %v11293_v33  ;;  %v765_v15 = vmul.f32 %v764_v14, %v11299_v36  ;;  %v732_v17 = vmul.f32 %v728_v5, %v11293_v33  ;;  %v767_v23 = vmul.f32 %v764_v14, %v11311_v44 }
 0x103   : > { %v768_v26 = vmul.f32 %v764_v14, %v11317_v47 }
 0x105   : > { %487 = vrot.lane.b32.xlu0 %v477_v20, %s11043_s26  ;;  %463 = vrot.lane.b32.xlu1 %v452_v21, %s11042_s27  ;;  %v791_v20 = vmul.f32 %v790_v18, %v11299_v36  ;;  %v766_v21 = vmul.f32 %v764_v14, %v11305_v41 }
 0x109   : > { %519 = vrot.lane.b32.xlu0 %v511_v24, %s11042_s27  ;;  %489 = vrot.lane.b32.xlu1 %v478_v25, %s11043_s26  ;;  %v792_v24 = vmul.f32 %v790_v18, %v11305_v41  ;;  %v793_v25 = vmul.f32 %v790_v18, %v11311_v44 }
 0x10d   : > { %545 = vrot.lane.b32.xlu0 %v537_v28, %s11043_s26  ;;  %521 = vrot.lane.b32.xlu1 %v512_v29, %s11042_s27  ;;  %v832_v28 = vstv %s9238_s22  ;;  %s9230_s22 = sld [smem:[#allocation4 + $0xc]] }
 0x10e   : > { %v833_v29 = vmul.f32 %v832_v28, %v11255_v10  ;;  %v835_v37 = vmul.f32 %v832_v28, %v11263_v16  ;;  %v836_v40 = vmul.f32 %v832_v28, %v11269_v19 }
 0x111   : > { %523 = vrot.lane.b32.xlu0 %v513_v31, %s11042_s27  ;;  %547 = vrot.lane.b32.xlu1 %v538_v32, %s11043_s26  ;;  %v794_v31 = vmul.f32 %v790_v18, %v11317_v47  ;;  %v858_v32 = vstv %s9239_s23  ;;  %s9233_s23 = sld [smem:[#allocation4 + $0xf]] }
 0x115   : > { %549 = vrot.lane.b32.xlu0 %v539_v34, %s11043_s26  ;;  %525 = vrot.lane.b32.xlu1 %v514_v35, %s11042_s27  ;;  %v859_v34 = vmul.f32 %v858_v32, %v11255_v10  ;;  %v834_v35 = vmul.f32 %v832_v28, %v11259_v13 }
 0x119   : > { %581 = vrot.lane.b32.xlu0 %v573_v38, %s11042_s27  ;;  %551 = vrot.lane.b32.xlu1 %v540_v39, %s11043_s26  ;;  %v860_v38 = vmul.f32 %v858_v32, %v11259_v13  ;;  %v861_v39 = vmul.f32 %v858_v32, %v11263_v16 }
 0x11d   : > { %607 = vrot.lane.b32.xlu0 %v599_v42, %s11043_s26  ;;  %583 = vrot.lane.b32.xlu1 %v574_v43, %s11042_s27  ;;  %v894_v42 = vstv %s9241_s16  ;;  %s9236_s16 = sld [smem:[#allocation8 + $0x1]] }
 0x11e   : > { %v895_v43 = vmul.f32 %v894_v42, %v11275_v22  ;;  %v896_v51 = vmul.f32 %v894_v42, %v11281_v27 }
 0x121   : > { %585 = vrot.lane.b32.xlu0 %v575_v45, %s11042_s27  ;;  %609 = vrot.lane.b32.xlu1 %v600_v46, %s11043_s26  ;;  %v862_v45 = vmul.f32 %v858_v32, %v11269_v19  ;;  %v920_v46 = vstv %s9242_s14  ;;  %s9237_s14 = sld [smem:[#allocation4 + $0x12]] }
 0x122   : > { %v921_v50 = vmul.f32 %v920_v46, %v11275_v22 }
 0x125   : > { %611 = vrot.lane.b32.xlu0 %v601_v48, %s11043_s26  ;;  %587 = vrot.lane.b32.xlu1 %v576_v49, %s11042_s27  ;;  %v442_v48 = vstv %s441_s1  ;;  %s9240_s1 = sld [smem:[#allocation4 + $0x15]] }
 0x129   : > { %649 = vrot.lane.b32.xlu0 %v641_v52, %s11042_s27  ;;  %613 = vrot.lane.b32.xlu1 %v602_v53, %s11043_s26  ;;  %v443_v52 = vmul.f32 %v442_v48, %v11255_v10  ;;  %v500_v53 = vstv %s9221_s21  ;;  %s9243_s21 = sld [smem:[#allocation4 + $0x18]] }
 0x12a   : > { %v501_v2 = vmul.f32 %v500_v53, %v11275_v22  ;;  %v502_v14 = vmul.f32 %v500_v53, %v11281_v27  ;;  %v503_v28 = vmul.f32 %v500_v53, %v11287_v30 }
 0x12d   : > { %675 = vrot.lane.b32.xlu0 %v667_v58, %s11043_s26  ;;  %651 = vrot.lane.b32.xlu1 %v642_v59, %s11042_s27 }
 0x131   : > { %653 = vrot.lane.b32.xlu0 %v643_v61, %s11042_s27  ;;  %677 = vrot.lane.b32.xlu1 %v668_v62, %s11043_s26  ;;  %v897_v61 = vmul.f32 %v894_v42, %v11287_v30  ;;  %v922_v62 = vmul.f32 %v920_v46, %v11281_v27 }
 0x135   : > { %679 = vrot.lane.b32.xlu0 %v669_v63, %s11043_s26  ;;  %655 = vrot.lane.b32.xlu1 %v644_v1, %s11042_s27  ;;  %v444_v63 = vmul.f32 %v442_v48, %v11259_v13 }
 0x139   : > { %711 = vrot.lane.b32.xlu0 %v703_v3, %s11042_s27  ;;  %681 = vrot.lane.b32.xlu1 %v670_v4, %s11043_s26 }
 0x13d   : > { %737 = vrot.lane.b32.xlu0 %v729_v6, %s11043_s26  ;;  %713 = vrot.lane.b32.xlu1 %v704_v7, %s11042_s27  ;;  %v923_v7 = vmul.f32 %v920_v46, %v11287_v30 }
 0x141   : > { %715 = vrot.lane.b32.xlu0 %v705_v8, %s11042_s27  ;;  %739 = vrot.lane.b32.xlu1 %v730_v9, %s11043_s26  ;;  %v898_v8 = vmul.f32 %v894_v42, %v11293_v33 }
 0x145   : > { %741 = vrot.lane.b32.xlu0 %v731_v11, %s11043_s26  ;;  %717 = vrot.lane.b32.xlu1 %v706_v12, %s11042_s27  ;;  %v445_v11 = vmul.f32 %v442_v48, %v11263_v16  ;;  %v956_v12 = vstv %s9244_s28  ;;  %s9246_s28 = sld [smem:[#allocation8 + $0x2]] }
 0x149   : > { %773 = vrot.lane.b32.xlu0 %v765_v15, %s11042_s27  ;;  %743 = vrot.lane.b32.xlu1 %v732_v17, %s11043_s26 }
 0x14d   : > { %799 = vrot.lane.b32.xlu0 %v791_v20, %s11043_s26  ;;  %775 = vrot.lane.b32.xlu1 %v766_v21, %s11042_s27  ;;  %v957_v21 = vmul.f32 %v956_v12, %v11299_v36 }
 0x151   : > { %777 = vrot.lane.b32.xlu0 %v767_v23, %s11042_s27  ;;  %801 = vrot.lane.b32.xlu1 %v792_v24, %s11043_s26  ;;  %v924_v23 = vmul.f32 %v920_v46, %v11293_v33  ;;  %v446_v24 = vmul.f32 %v442_v48, %v11269_v19  ;;  %v959_v48 = vmul.f32 %v956_v12, %v11311_v44 }
 0x155   : > { %803 = vrot.lane.b32.xlu0 %v793_v25, %s11043_s26  ;;  %779 = vrot.lane.b32.xlu1 %v768_v26, %s11042_s27  ;;  %v982_v26 = vstv %s9245_s25  ;;  %s9301_s25 = sld [smem:[#allocation10 + $0x1]] }
 0x159   : > { %841 = vrot.lane.b32.xlu0 %v833_v29, %s11042_s27  ;;  %805 = vrot.lane.b32.xlu1 %v794_v31, %s11043_s26 }
 0x15d   : > { %867 = vrot.lane.b32.xlu0 %v859_v34, %s11043_s26  ;;  %843 = vrot.lane.b32.xlu1 %v834_v35, %s11042_s27  ;;  %v983_v35 = vmul.f32 %v982_v26, %v11299_v36 }
 0x161   : > { %845 = vrot.lane.b32.xlu0 %v835_v37, %s11042_s27  ;;  %869 = vrot.lane.b32.xlu1 %v860_v38, %s11043_s26  ;;  %v958_v37 = vmul.f32 %v956_v12, %v11305_v41 }
 0x165   : > { %871 = vrot.lane.b32.xlu0 %v861_v39, %s11043_s26  ;;  %847 = vrot.lane.b32.xlu1 %v836_v40, %s11042_s27  ;;  %v504_v39 = vmul.f32 %v500_v53, %v11293_v33  ;;  %v562_v40 = vstv %s9224_s29  ;;  %s9302_s29 = sld [smem:[#allocation10 + $0x2]] }
 0x169   : > { %903 = vrot.lane.b32.xlu0 %v895_v43, %s11042_s27  ;;  %873 = vrot.lane.b32.xlu1 %v862_v45, %s11043_s26 }
 0x16b   : > { %v458_v49 = vpop.permute.xlu0 %457 }
 0x16c   : > { %v469_v54 = vadd.f32 %v458_v49, %v443_v52  ;;  %v984_v49 = vmul.f32 %v982_v26, %v11305_v41 }
 0x16d   : > { %929 = vrot.lane.b32.xlu0 %v921_v50, %s11043_s26  ;;  %905 = vrot.lane.b32.xlu1 %v896_v51, %s11042_s27  ;;  %v563_v51 = vmul.f32 %v562_v40, %v11299_v36 }
 0x16f   : > { %v460_v58 = vpop.permute.xlu1 %459  ;;  %v484_v59 = vpop.permute.xlu0 %483 }
 0x170   : > { %v495_v1 = vadd.f32 %v484_v59, %v469_v54  ;;  %v470_v3 = vadd.f32 %v460_v58, %v444_v63  ;;  %v985_v59 = vmul.f32 %v982_v26, %v11311_v44  ;;  %v564_v63 = vmul.f32 %v562_v40, %v11305_v41 }
 0x171   : > { %907 = vrot.lane.b32.xlu0 %v897_v61, %s11042_s27  ;;  %931 = vrot.lane.b32.xlu1 %v922_v62, %s11043_s26  ;;  %v960_v61 = vmul.f32 %v956_v12, %v11317_v47 }
 0x172   : > { %v505_v4 = vadd.f32 %v501_v2, %v495_v1 }
 0x173   : > { %v486_v5 = vpop.permute.xlu1 %485  ;;  %v462_v6 = vpop.permute.xlu0 %461 }
 0x174   : > { %v496_v9 = vadd.f32 %v486_v5, %v470_v3  ;;  %v471_v15 = vadd.f32 %v462_v6, %v445_v11  ;;  %v986_v5 = vmul.f32 %v982_v26, %v11317_v47 }
 0x175   : > { %933 = vrot.lane.b32.xlu0 %v923_v7, %s11043_s26  ;;  %909 = vrot.lane.b32.xlu1 %v898_v8, %s11042_s27  ;;  %v565_v7 = vmul.f32 %v562_v40, %v11311_v44 }
 0x176   : > { %v506_v17 = vadd.f32 %v502_v14, %v496_v9 }
 0x177   : > { %v464_v18 = vpop.permute.xlu1 %463  ;;  %v488_v20 = vpop.permute.xlu0 %487 }
 0x178   : > { %v497_v25 = vadd.f32 %v488_v20, %v471_v15  ;;  %v472_v29 = vadd.f32 %v464_v18, %v446_v24  ;;  %v566_v15 = vmul.f32 %v562_v40, %v11317_v47  ;;  %v624_v24 = vstv %s623_s2  ;;  %s9304_s2 = sld [smem:[#allocation10 + $0x4]] }
 0x179   : > { %965 = vrot.lane.b32.xlu0 %v957_v21, %s11042_s27  ;;  %935 = vrot.lane.b32.xlu1 %v924_v23, %s11043_s26 }
 0x17a   : > { %v507_v31 = vadd.f32 %v503_v28, %v497_v25 }
 0x17b   : > { %v490_v32 = vpop.permute.xlu1 %489  ;;  %v520_v34 = vpop.permute.xlu0 %519 }
 0x17c   : > { %v498_v38 = vadd.f32 %v490_v32, %v472_v29  ;;  %v531_v42 = vadd.f32 %v520_v34, %v505_v4 }
 0x17d   : > { %991 = vrot.lane.b32.xlu0 %v983_v35, %s11043_s26  ;;  %967 = vrot.lane.b32.xlu1 %v958_v37, %s11042_s27 }
 0x17e   : > { %v508_v43 = vadd.f32 %v504_v39, %v498_v38 }
 0x17f   : > { %v522_v45 = vpop.permute.xlu1 %521  ;;  %v546_v46 = vpop.permute.xlu0 %545 }
 0x180   : > { %v557_v50 = vadd.f32 %v546_v46, %v531_v42  ;;  %v532_v52 = vadd.f32 %v522_v45, %v506_v17  ;;  %v634_v42 = vstv %s9227_s17  ;;  %v11449_v46 = vadd.s32 8, %v11327_v55  ;;  %s9305_s17 = sld [smem:[#allocation10 + $0x5]] }
 0x181   : > { %969 = vrot.lane.b32.xlu0 %v959_v48, %s11042_s27  ;;  %993 = vrot.lane.b32.xlu1 %v984_v49, %s11043_s26 }
 0x182   : > { %v567_v53 = vadd.f32 %v563_v51, %v557_v50 }
 0x183   : > { %v548_v54 = vpop.permute.xlu1 %547  ;;  %v524_v58 = vpop.permute.xlu0 %523 }
 0x184   : > { %v558_v62 = vadd.f32 %v548_v54, %v532_v52  ;;  %v533_v1 = vadd.f32 %v524_v58, %v507_v31  ;;  %v635_v52 = vmul.f32 %v634_v42, %v11255_v10 }
 0x185   : > { %995 = vrot.lane.b32.xlu0 %v985_v59, %s11043_s26  ;;  %971 = vrot.lane.b32.xlu1 %v960_v61, %s11042_s27  ;;  %v1023_v59 = vmul.u32 2, %v11449_v46  ;;  %v636_v61 = vmul.f32 %v634_v42, %v11259_v13 }
 0x186   : > { %v568_v2 = vadd.f32 %v564_v63, %v558_v62 }
 0x187   : > { %v526_v3 = vpop.permute.xlu1 %525  ;;  %v550_v4 = vpop.permute.xlu0 %549  ;;  %vm1025_vm9 = vcmp.eq.s32.totalorder %v11329_v56, %v1023_v59 }
 0x188   : > { %v559_v6 = vadd.f32 %v550_v4, %v533_v1  ;;  %v534_v8 = vadd.f32 %v526_v3, %v508_v43  ;;  %v1028_v1 = vadd.s32 1, %v1022_v57 }
 0x189   : > { %997 = vrot.lane.b32.xlu1 %v986_v5, %s11043_s26 }
 0x18a   : > { %v569_v9 = vadd.f32 %v565_v7, %v559_v6  ;;  %vm1030_vm10 = vcmp.eq.s32.totalorder %v11329_v56, %v1028_v1 }
 0x18b   : > { %v552_v11 = vpop.permute.xlu1 %551  ;;  %v582_v12 = vpop.permute.xlu0 %581 }
 0x18c   : > { %v560_v14 = vadd.f32 %v552_v11, %v534_v8  ;;  %v593_v17 = vadd.f32 %v582_v12, %v567_v53  ;;  %v692_v53 = vstv %s9230_s22  ;;  %s9307_s22 = sld [smem:[#allocation10 + $0x7]] }
 0x18d   : > { %v693_v5 = vmul.f32 %v692_v53, %v11275_v22 }
 0x18e   : > { %v570_v18 = vadd.f32 %v566_v15, %v560_v14  ;;  %v637_v14 = vmul.f32 %v634_v42, %v11263_v16  ;;  %v694_v15 = vmul.f32 %v692_v53, %v11281_v27 }
 0x18f   : > { %v584_v20 = vpop.permute.xlu1 %583  ;;  %v608_v21 = vpop.permute.xlu0 %607 }
 0x190   : > { %v619_v23 = vadd.f32 %v608_v21, %v593_v17  ;;  %v594_v25 = vadd.f32 %v584_v20, %v568_v2  ;;  %v11472_v17 = vsel %vm1025_vm9, 1.0, %v11040_v0  ;;  %v1029_v20 = vadd.s32 1, %v1023_v59 }
 0x192   : > { %v625_v29 = vadd.f32 %v624_v24, %v619_v23  ;;  %v11475_v23 = vsel %vm1030_vm10, 1.0, %v11040_v0  ;;  %vm1031_vm11 = vcmp.eq.s32.totalorder %v11329_v56, %v1029_v20  ;;  %v816_v20 = vstv %s9236_s16  ;;  %s9311_s16 = sld [smem:[#allocation10 + $0xb]] }
 0x193   : > { %v610_v26 = vpop.permute.xlu1 %609  ;;  %v586_v28 = vpop.permute.xlu0 %585 }
 0x194   : > { %v620_v31 = vadd.f32 %v610_v26, %v594_v25  ;;  %v595_v34 = vadd.f32 %v586_v28, %v569_v9  ;;  %v629_v38 = vmax.f32 %v625_v29, 0.0  ;;  %v638_v26 = vmul.f32 %v634_v42, %v11269_v19 }
 0x195   : > { %v695_v29 = vmul.f32 %v692_v53, %v11287_v30 }
 0x196   : > { %v626_v32 = vadd.f32 %v624_v24, %v620_v31 }
 0x197   : > { %v588_v35 = vpop.permute.xlu1 %587  ;;  %v612_v37 = vpop.permute.xlu0 %611 }
 0x198   : > { %v630_v39 = vmax.f32 %v626_v32, 0.0  ;;  %v621_v40 = vadd.f32 %v612_v37, %v595_v34  ;;  %v596_v45 = vadd.f32 %v588_v35, %v570_v18 }
 0x19a   : > { %v10405_v43 = vpack.c.bf16 %v630_v39, %v629_v38  ;;  %v627_v50 = vadd.f32 %v624_v24, %v621_v40  ;;  %v696_v38 = vmul.f32 %v692_v53, %v11293_v33  ;;  %v11490_v39 = vsel %vm1031_vm11, 1.0, %v11040_v0 }
 0x19b   : > { %v614_v48 = vpop.permute.xlu1 %613  ;;  %v650_v49 = vpop.permute.xlu0 %649  ;;  %v754_v40 = vstv %s9233_s23  ;;  %s9310_s23 = sld [smem:[#allocation10 + $0xa]] }
 0x19c   : > { %v622_v51 = vadd.f32 %v614_v48, %v596_v45  ;;  %10406 = vmatprep.subr.bf16.mxu1 %v10405_v43  ;;  %v661_v58 = vadd.f32 %v650_v49, %v635_v52  ;;  %v631_v2 = vmax.f32 %v627_v50, 0.0  ;;  %v755_v50 = vmul.f32 %v754_v40, %v11299_v36 }
 0x19d   : > { %10408 = vmatpush3.bf16.msra.mxu1 %v10405_v43  ;;  %v756_v59 = vmul.f32 %v754_v40, %v11305_v41 }
 0x19e   : > { %v628_v54 = vadd.f32 %v624_v24, %v622_v51 }
 0x19f   : > { %v652_v62 = vpop.permute.xlu1 %651  ;;  %v676_v63 = vpop.permute.xlu0 %675 }
 0x1a0   : > { %v632_v3 = vmax.f32 %v628_v54, 0.0  ;;  %v687_v4 = vadd.f32 %v676_v63, %v661_v58  ;;  %v662_v8 = vadd.f32 %v652_v62, %v636_v61 }
 0x1a2   : > { %v10409_v7 = vpack.c.bf16 %v632_v3, %v631_v2  ;;  %v697_v9 = vadd.f32 %v693_v5, %v687_v4  ;;  %v757_v3 = vmul.f32 %v754_v40, %v11311_v44 }
 0x1a3   : > { %v678_v11 = vpop.permute.xlu1 %677  ;;  %v654_v12 = vpop.permute.xlu0 %653 }
 0x1a4   : > { %v688_v57 = vadd.f32 %v678_v11, %v662_v8  ;;  %10411 = vmatprep.subr.msk.bf16.mxu1 %vm11459_vm8, %v10409_v7  ;;  %v663_v18 = vadd.f32 %v654_v12, %v637_v14  ;;  %v758_v11 = vmul.f32 %v754_v40, %v11317_v47  ;;  %v826_v40 = vstv %s9237_s14  ;;  %s9313_s14 = sld [smem:[#allocation10 + $0xd]] }
 0x1a5   : > { %10414 = vmatpush3.bf16.msk.msra.mxu1 %vm11459_vm8, %v10409_v7 }
 0x1a6   : > { %10416 = vmatprep.subr.bf16.mxu1 %v10405_v43  ;;  %v698_v21 = vadd.f32 %v694_v15, %v688_v57 }
 0x1a7   : > { %v656_v24 = vpop.permute.xlu1 %655  ;;  %v680_v25 = vpop.permute.xlu0 %679 }
 0x1a8   : > { %v689_v28 = vadd.f32 %v680_v25, %v663_v18  ;;  %9869 = vmatmul.mubr.msk.f32.vlgmr.msra.gmra.mrb[0].mxu1 %vm1054_vm4, %v11472_v17  ;;  %v664_v31 = vadd.f32 %v656_v24, %v638_v26 }
 0x1a9   : > { %10418 = vmatpush3.bf16.msra.mxu1 %v10405_v43  ;;  %9879 = vmatprep.mubr.msk.f32.mxu1 %vm1054_vm4, %v11475_v23 }
 0x1aa   : > { %10421 = vmatprep.subr.msk.bf16.mxu1 %vm11459_vm8, %v10409_v7  ;;  %v699_v32 = vadd.f32 %v695_v29, %v689_v28 }
 0x1ab   : > { %v682_v34 = vpop.permute.xlu1 %681  ;;  %v712_v35 = vpop.permute.xlu0 %711 }
 0x1ac   : > { %v690_v37 = vadd.f32 %v682_v34, %v664_v31  ;;  %v723_v42 = vadd.f32 %v712_v35, %v697_v9 }
 0x1ad   : > { %10424 = vmatpush3.bf16.msk.msra.mxu1 %vm11459_vm8, %v10409_v7 }
 0x1ae   : > { %v700_v43 = vadd.f32 %v696_v38, %v690_v37 }
 0x1af   : > { %v714_v45 = vpop.permute.xlu1 %713  ;;  %v738_v48 = vpop.permute.xlu0 %737 }
 0x1b0   : > { %v749_v49 = vadd.f32 %v738_v48, %v723_v42  ;;  %9880 = vmatmul.mubr.msk.f32.vlgmr.msra.gmra.mrb[2].mxu1 %vm1054_vm4, %v11490_v39  ;;  %v724_v51 = vadd.f32 %v714_v45, %v698_v21 }
 0x1b2   : > { %v759_v52 = vadd.f32 %v755_v50, %v749_v49 }
 0x1b3   : > { %v740_v53 = vpop.permute.xlu1 %739  ;;  %v716_v54 = vpop.permute.xlu0 %715 }
 0x1b4   : > { %v750_v58 = vadd.f32 %v740_v53, %v724_v51  ;;  %v725_v61 = vadd.f32 %v716_v54, %v699_v32  ;;  %v827_v51 = vmul.f32 %v826_v40, %v11255_v10  ;;  %v829_v10 = vmul.f32 %v826_v40, %v11263_v16 }
 0x1b5   : > { %v946_v16 = vstv %s9243_s21  ;;  %s9316_s21 = sld [smem:[#allocation10 + $0x10]] }
 0x1b6   : > { %v760_v62 = vadd.f32 %v756_v59, %v750_v58  ;;  %v828_v58 = vmul.f32 %v826_v40, %v11259_v13 }
 0x1b7   : > { %v718_v63 = vpop.permute.xlu1 %717  ;;  %v742_v1 = vpop.permute.xlu0 %741 }
 0x1b8   : > { %v751_v2 = vadd.f32 %v742_v1, %v725_v61  ;;  %v726_v4 = vadd.f32 %v718_v63, %v700_v43 }
 0x1ba   : > { %v761_v5 = vadd.f32 %v757_v3, %v751_v2 }
 0x1bb   : > { %v744_v7 = vpop.permute.xlu1 %743  ;;  %v774_v8 = vpop.permute.xlu0 %773 }
 0x1bc   : > { %v752_v9 = vadd.f32 %v744_v7, %v726_v4  ;;  %v785_v12 = vadd.f32 %v774_v8, %v759_v52  ;;  %v884_v52 = vstv %s9240_s1  ;;  %s9314_s1 = sld [smem:[#allocation10 + $0xe]] }
 0x1bd   : > { %v885_v2 = vmul.f32 %v884_v52, %v11275_v22  ;;  %v887_v22 = vmul.f32 %v884_v52, %v11287_v30 }
 0x1be   : > { %v762_v57 = vadd.f32 %v758_v11, %v752_v9  ;;  %v886_v11 = vmul.f32 %v884_v52, %v11281_v27 }
 0x1bf   : > { %v776_v14 = vpop.permute.xlu1 %775  ;;  %v800_v15 = vpop.permute.xlu0 %799 }
 0x1c0   : > { %v811_v18 = vadd.f32 %v800_v15, %v785_v12  ;;  %v786_v21 = vadd.f32 %v776_v14, %v760_v62  ;;  %v830_v15 = vmul.f32 %v826_v40, %v11269_v19 }
 0x1c2   : > { %v817_v26 = vadd.f32 %v816_v20, %v811_v18 }
 0x1c3   : > { %v802_v24 = vpop.permute.xlu1 %801  ;;  %v778_v25 = vpop.permute.xlu0 %777 }
 0x1c4   : > { %v812_v28 = vadd.f32 %v802_v24, %v786_v21  ;;  %v787_v31 = vadd.f32 %v778_v25, %v761_v5  ;;  %v821_v35 = vmax.f32 %v817_v26, 0.0 }
 0x1c6   : > { %v818_v29 = vadd.f32 %v816_v20, %v812_v28  ;;  %v888_v28 = vmul.f32 %v884_v52, %v11293_v33 }
 0x1c7   : > { %v780_v32 = vpop.permute.xlu1 %779  ;;  %v804_v34 = vpop.permute.xlu0 %803 }
 0x1c8   : > { %v822_v37 = vmax.f32 %v818_v29, 0.0  ;;  %v813_v38 = vadd.f32 %v804_v34, %v787_v31  ;;  %v788_v43 = vadd.f32 %v780_v32, %v762_v57 }
 0x1ca   : > { %v11498_v42 = vpack.c.bf16 %v822_v37, %v821_v35  ;;  %v819_v49 = vadd.f32 %v816_v20, %v813_v38  ;;  %v947_v35 = vmul.f32 %v946_v16, %v11299_v36 }
 0x1cb   : > { %v806_v45 = vpop.permute.xlu1 %805  ;;  %v842_v48 = vpop.permute.xlu0 %841 }
 0x1cc   : > { %v814_v50 = vadd.f32 %v806_v45, %v788_v43  ;;  %v853_v54 = vadd.f32 %v842_v48, %v827_v51  ;;  %v823_v62 = vmax.f32 %v819_v49, 0.0  ;;  %v948_v43 = vmul.f32 %v946_v16, %v11305_v41 }
 0x1cd   : > { %v949_v51 = vmul.f32 %v946_v16, %v11311_v44 }
 0x1ce   : > { %v820_v53 = vadd.f32 %v816_v20, %v814_v50 }
 0x1cf   : > { %v844_v59 = vpop.permute.xlu1 %843  ;;  %v868_v61 = vpop.permute.xlu0 %867 }
 0x1d0   : > { %v824_v63 = vmax.f32 %v820_v53, 0.0  ;;  %v879_v1 = vadd.f32 %v868_v61, %v853_v54  ;;  %v854_v4 = vadd.f32 %v844_v59, %v828_v58  ;;  %v950_v59 = vmul.f32 %v946_v16, %v11317_v47 }
 0x1d2   : > { %v11503_v3 = vpack.c.bf16 %v824_v63, %v823_v62  ;;  %v889_v5 = vadd.f32 %v885_v2, %v879_v1  ;;  %v1008_v2 = vstv %s9246_s28  ;;  %s9317_s28 = sld [smem:[#allocation10 + $0x11]] }
 0x1d3   : > { %v870_v7 = vpop.permute.xlu1 %869  ;;  %v846_v8 = vpop.permute.xlu0 %845 }
 0x1d4   : > { %v880_v9 = vadd.f32 %v870_v7, %v854_v4  ;;  %v855_v13 = vadd.f32 %v846_v8, %v829_v10 }
 0x1d6   : > { %v890_v12 = vadd.f32 %v886_v11, %v880_v9 }
 0x1d7   : > { %v848_v57 = vpop.permute.xlu1 %847  ;;  %v872_v14 = vpop.permute.xlu0 %871 }
 0x1d8   : > { %v881_v18 = vadd.f32 %v872_v14, %v855_v13  ;;  %v856_v20 = vadd.f32 %v848_v57, %v830_v15 }
 0x1da   : > { %v891_v21 = vadd.f32 %v887_v22, %v881_v18 }
 0x1db   : > { %v874_v24 = vpop.permute.xlu1 %873  ;;  %v904_v25 = vpop.permute.xlu0 %903 }
 0x1dc   : > { %v882_v26 = vadd.f32 %v874_v24, %v856_v20  ;;  %v915_v29 = vadd.f32 %v904_v25, %v889_v5 }
 0x1de   : > { %v892_v27 = vadd.f32 %v888_v28, %v882_v26 }
 0x1df   : > { %v906_v31 = vpop.permute.xlu1 %905  ;;  %v930_v32 = vpop.permute.xlu0 %929 }
 0x1e0   : > { %v941_v34 = vadd.f32 %v930_v32, %v915_v29  ;;  %v916_v37 = vadd.f32 %v906_v31, %v890_v12  ;;  %v11046_v29 = vmov 1.0   ;;  %v1034_v32 = vadd.s32 16, %v11327_v55 }
 0x1e2   : > { %v951_v19 = vadd.f32 %v947_v35, %v941_v34  ;;  %v1035_v34 = vadd.s32 24, %v11327_v55 }
 0x1e3   : > { %v932_v38 = vpop.permute.xlu1 %931  ;;  %v908_v40 = vpop.permute.xlu0 %907 }
 0x1e4   : > { %v942_v30 = vadd.f32 %v932_v38, %v916_v37  ;;  %v917_v45 = vadd.f32 %v908_v40, %v891_v21  ;;  %v11517_v21 = vmul.u32 2, %v11329_v56  ;;  %v11045_v56 = vmov 1.0|1.0  }
 0x1e5   : > { %v2111_v37 = vstv %s9304_s2  ;;  %s9303_s2 = sld [smem:[#allocation10 + $0x3]] }
 0x1e6   : > { %v952_v48 = vadd.f32 %v948_v43, %v942_v30  ;;  %vm1037_vm12 = vcmp.eq.s32.totalorder %v11327_v55, %v11517_v21  ;;  %vm1038_vm13 = vcmp.eq.s32.totalorder %v11449_v46, %v11517_v21  ;;  %vm1039_vm15 = vcmp.eq.s32.totalorder %v1034_v32, %v11517_v21 }
 0x1e7   : > { %v910_v49 = vpop.permute.xlu1 %909  ;;  %v934_v50 = vpop.permute.xlu0 %933  ;;  %v1042_v25 = vsel %vm1038_vm13, 1.0, %v11040_v0  ;;  %vm11527_vm14 = vmpackc.low %vm1038_vm13, %vm1037_vm12  ;;  %vm1040_vm0 = vcmp.eq.s32.totalorder %v1035_v34, %v11517_v21  ;;  %vm2028_vm13 = vcmask 121864  }
 0x1e8   : > { %v943_v33 = vadd.f32 %v934_v50, %v917_v45  ;;  %v918_v52 = vadd.f32 %v910_v49, %v892_v27  ;;  %10426 = vmatprep.subr.msk.bf16.mxu1 %vm11527_vm14, %v11045_v56  ;;  %v11534_v27 = vpack.c.bf16 %v1042_v25, %v11046_v29  ;;  %v1044_v35 = vsel %vm1040_vm0, 1.0, %v11040_v0  ;;  %vm11547_vm1 = vmpackc.low %vm1061_vm6, %vm1039_vm15 }
 0x1e9   : > { %10428 = vmatpush3.bf16.msk.msra.mxu1 %vm11527_vm14, %v11045_v56  ;;  %v11554_v38 = vpack.c.bf16 %v1044_v35, %v11046_v29 }
 0x1ea   : > { %v953_v53 = vadd.f32 %v949_v51, %v943_v33 }
 0x1eb   : > { %v936_v54 = vpop.permute.xlu1 %935  ;;  %v966_v58 = vpop.permute.xlu0 %965  ;;  %10431 = vmatprep.subr.msk.bf16.mxu1 %vm11547_vm1, %v11554_v38 }
 0x1ec   : > { %v944_v36 = vadd.f32 %v936_v54, %v918_v52  ;;  %v977_v61 = vadd.f32 %v966_v58, %v951_v19  ;;  %v11552_v19 = vadd.s32 1, %v11517_v21 }
 0x1ed   : > { %10434 = vmatpush3.bf16.msk.msra.mxu1 %vm11547_vm1, %v11554_v38 }
 0x1ee   : > { %v954_v62 = vadd.f32 %v950_v59, %v944_v36  ;;  %vm1046_vm2 = vcmp.eq.s32.totalorder %v11327_v55, %v11552_v19  ;;  %vm1047_vm3 = vcmp.eq.s32.totalorder %v11449_v46, %v11552_v19  ;;  %vm1048_vm5 = vcmp.eq.s32.totalorder %v1034_v32, %v11552_v19 }
 0x1ef   : > { %v968_v63 = vpop.permute.xlu1 %967  ;;  %v992_v1 = vpop.permute.xlu0 %991  ;;  %vm1049_vm9 = vcmp.eq.s32.totalorder %v1035_v34, %v11552_v19  ;;  %v1051_v40 = vsel %vm1047_vm3, 1.0, %v11040_v0  ;;  %vm11569_vm10 = vmpackc.low %vm1047_vm3, %vm1046_vm2  ;;  %vm9080_vm3 = vcmask 73728  }
 0x1f0   : > { %v1003_v41 = vadd.f32 %v992_v1, %v977_v61  ;;  %v978_v4 = vadd.f32 %v968_v63, %v952_v48  ;;  %v1053_v43 = vsel %vm1049_vm9, 1.0, %v11040_v0  ;;  %v11577_v46 = vpack.c.bf16 %v1051_v40, %v11046_v29  ;;  %10436 = vmatprep.subr.msk.bf16.mxu1 %vm11569_vm10, %v11045_v56  ;;  %vm11588_vm11 = vmpackc.low %vm1061_vm6, %vm1048_vm5 }
 0x1f1   : > { %v11579_v45 = vpack.c.bf16 %v1053_v43, %v11046_v29  ;;  %vm2013_vm6 = vcmask 130048   ;;  %v2125_v43 = vstv %s9305_s17  ;;  %s11798_s17 = sld [smem:[#allocation10 + $0x13]] }
 0x1f2   : > { %v1009_v8 = vadd.f32 %v1008_v2, %v1003_v41  ;;  %2015 = vst.msk [vmem:[#allocation3 + $0x8] sm:$0xff] %vm2013_vm6, %v11040_v0  ;;  %2014 = vst.msk [vmem:[#allocation3] sm:$0xff] %vm2013_vm6, %v11040_v0 }
 0x1f3   : > { %v994_v5 = vpop.permute.xlu1 %993  ;;  %v970_v7 = vpop.permute.xlu0 %969  ;;  %2016 = vst.msk [vmem:[#allocation3 + $0x10] sm:$0xff] %vm2013_vm6, %v11040_v0  ;;  %2017 = vst.msk [vmem:[#allocation3 + $0x18] sm:$0xff] %vm2013_vm6, %v11040_v0 }
 0x1f4   : > { %v1004_v9 = vadd.f32 %v994_v5, %v978_v4  ;;  %v979_v10 = vadd.f32 %v970_v7, %v953_v53  ;;  %v1013_v12 = vmax.f32 %v1009_v8, 0.0  ;;  %2018 = vst.msk [vmem:[#allocation3 + $0x20] sm:$0xff] %vm2013_vm6, %v11040_v0  ;;  %2019 = vst.msk [vmem:[#allocation3 + $0x28] sm:$0xff] %vm2013_vm6, %v11040_v0 }
 0x1f6   : > { %v1010_v44 = vadd.f32 %v1008_v2, %v1004_v9 }
 0x1f7   : > { %v972_v11 = vpop.permute.xlu1 %971  ;;  %v996_v13 = vpop.permute.xlu0 %995 }
 0x1f8   : > { %v1014_v57 = vmax.f32 %v1010_v44, 0.0  ;;  %v1005_v14 = vadd.f32 %v996_v13, %v979_v10  ;;  %v980_v47 = vadd.f32 %v972_v11, %v954_v62 }
 0x1fa   : > { %v11514_v15 = vpack.c.bf16 %v1014_v57, %v1013_v12  ;;  %v1011_v22 = vadd.f32 %v1008_v2, %v1005_v14 }
 0x1fb   : > { %v998_v18 = vpop.permute.xlu1 %997 }
 0x1fc   : > { %v1006_v20 = vadd.f32 %v998_v18, %v980_v47  ;;  %v1015_v28 = vmax.f32 %v1011_v22, 0.0 }
 0x1fe   : > { %v1012_v24 = vadd.f32 %v1008_v2, %v1006_v20 }
 0x200   : > { %v1016_v16 = vmax.f32 %v1012_v24, 0.0 }
 0x202   : > { %v11539_v31 = vpack.c.bf16 %v1016_v16, %v1015_v28  ;;  %v2077_v28 = vstv %s9301_s25  ;;  %s2072_s25 = sld [smem:[#allocation10]] }
 0x27b   : > { %v9870_v48 = vpop.f32.mrb[0].mxu1 }
 0x27c   : > { %v1131_v49 = vpop.f32.mrb[1].mxu1 }
 0x283   : > { %v9881_v50 = vpop.f32.mrb[2].mxu1 }
 0x284   : > { %v1222_v33 = vmax.f32 %v9870_v48, %v9881_v50  ;;  %v1212_v51 = vpop.f32.mrb[3].mxu1  ;;  %v2145_v50 = vstv %s9307_s22  ;;  %s11802_s22 = sld [smem:[#allocation10 + $0x14]] }
 0x285   : > { %v1221_v52 = vmax.f32 %v1131_v49, %v1212_v51 }
 0x287   : > { %9890 = vmatprep.mubr.msk.f32.mxu1 %vm1054_vm4, %v1221_v52 }
 0x288   : > { %9891 = vmatmul.mubr.msk.f32.vlgmr.msra.gmra.mrb[4].mxu1 %vm1054_vm4, %v1222_v33 }
 0x289   : > { %10438 = vmatpush3.bf16.msk.msra.mxu1 %vm11569_vm10, %v11045_v56  ;;  %9901 = vmatprep.mubr.msk.f32.mxu1 %vm1054_vm4, %v1221_v52 }
 0x28a   : > { %10441 = vmatprep.subr.msk.bf16.mxu1 %vm11588_vm11, %v11579_v45 }
 0x28d   : > { %10444 = vmatpush3.bf16.msk.msra.mxu1 %vm11588_vm11, %v11579_v45 }
 0x28e   : > { %10446 = vmatprep.subr.bf16.mxu1 %v11498_v42 }
 0x290   : > { %9902 = vmatmul.mubr.msk.f32.vlgmr.msra.gmra.mrb[6].mxu1 %vm1054_vm4, %v1222_v33 }
 0x291   : > { %10448 = vmatpush3.bf16.msra.mxu1 %v11498_v42  ;;  %9912 = vmatprep.mubr.msk.f32.mxu1 %vm1054_vm4, %v11342_v60 }
 0x292   : > { %10451 = vmatprep.subr.msk.bf16.mxu1 %vm11459_vm8, %v11503_v3 }
 0x295   : > { %10454 = vmatpush3.bf16.msk.msra.mxu1 %vm11459_vm8, %v11503_v3 }
 0x296   : > { %10456 = vmatprep.subr.bf16.mxu1 %v11498_v42 }
 0x298   : > { %9913 = vmatmul.mubr.msk.f32.vlgmr.msra.gmra.mrb[8].mxu1 %vm1054_vm4, %v11472_v17 }
 0x299   : > { %10458 = vmatpush3.bf16.msra.mxu1 %v11498_v42  ;;  %9923 = vmatprep.mubr.msk.f32.mxu1 %vm1054_vm4, %v11475_v23 }
 0x29a   : > { %10461 = vmatprep.subr.msk.bf16.mxu1 %vm11459_vm8, %v11503_v3 }
 0x29d   : > { %10464 = vmatpush3.bf16.msk.msra.mxu1 %vm11459_vm8, %v11503_v3 }
 0x29e   : > { %10466 = vmatprep.subr.msk.bf16.mxu1 %vm11527_vm14, %v11045_v56 }
 0x2a0   : > { %9924 = vmatmul.mubr.msk.f32.vlgmr.msra.gmra.mrb[10].mxu1 %vm1054_vm4, %v11490_v39 }
 0x2a1   : > { %10468 = vmatpush3.bf16.msk.msra.mxu1 %vm11527_vm14, %v11045_v56 }
 0x2a2   : > { %10471 = vmatprep.subr.msk.bf16.mxu1 %vm11547_vm1, %v11554_v38 }
 0x2a5   : > { %10474 = vmatpush3.bf16.msk.msra.mxu1 %vm11547_vm1, %v11554_v38 }
 0x2a6   : > { %10476 = vmatprep.subr.msk.bf16.mxu1 %vm11569_vm10, %v11045_v56 }
 0x35b   : > { %v9892_v42 = vpop.f32.mrb[4].mxu1 }
 0x35c   : > { %v1298_v3 = vpop.f32.mrb[5].mxu1 }
 0x363   : > { %v9903_v54 = vpop.f32.mrb[6].mxu1 }
 0x364   : > { %v1386_v58 = vmax.f32 %v9892_v42, %v9903_v54  ;;  %v1376_v36 = vpop.f32.mrb[7].mxu1 }
 0x365   : > { %v1385_v59 = vmax.f32 %v1298_v3, %v1376_v36 }
 0x366   : > { %2024 = vrot.lane.b32.xlu1 %v1386_v58, %s11041_s24  ;;  %v2179_v58 = vstv %s9310_s23  ;;  %s11820_s23 = sld [smem:[#allocation10 + $0x17]] }
 0x367   : > { %2022 = vrot.lane.b32.xlu0 %v1385_v59, %s11041_s24 }
 0x36b   : > { %v9914_v61 = vpop.f32.mrb[8].mxu1 }
 0x36c   : > { %v1456_v62 = vpop.f32.mrb[9].mxu1 }
 0x373   : > { %v9925_v63 = vpop.f32.mrb[10].mxu1 }
 0x374   : > { %v1541_v1 = vmax.f32 %v9914_v61, %v9925_v63  ;;  %v1531_v41 = vpop.f32.mrb[11].mxu1 }
 0x375   : > { %v1540_v2 = vmax.f32 %v1456_v62, %v1531_v41  ;;  %v2193_v62 = vstv %s9311_s16  ;;  %s11828_s16 = sld [smem:[#allocation10 + $0x19]] }
 0x377   : > { %9934 = vmatprep.mubr.msk.f32.mxu1 %vm1054_vm4, %v1540_v2 }
 0x378   : > { %9935 = vmatmul.mubr.msk.f32.vlgmr.msra.gmra.mrb[12].mxu1 %vm1054_vm4, %v1541_v1 }
 0x379   : > { %10478 = vmatpush3.bf16.msk.msra.mxu1 %vm11569_vm10, %v11045_v56  ;;  %9945 = vmatprep.mubr.msk.f32.mxu1 %vm1054_vm4, %v1540_v2  ;;  %v2213_v2 = vstv %s9313_s14  ;;  %s11830_s14 = sld [smem:[#allocation10 + $0x9]] }
 0x37a   : > { %10481 = vmatprep.subr.msk.bf16.mxu1 %vm11588_vm11, %v11579_v45 }
 0x37d   : > { %10484 = vmatpush3.bf16.msk.msra.mxu1 %vm11588_vm11, %v11579_v45 }
 0x37e   : > { %10486 = vmatprep.subr.bf16.mxu1 %v11514_v15 }
 0x380   : > { %9946 = vmatmul.mubr.msk.f32.vlgmr.msra.gmra.mrb[14].mxu1 %vm1054_vm4, %v1541_v1 }
 0x381   : > { %10488 = vmatpush3.bf16.msra.mxu1 %v11514_v15  ;;  %9956 = vmatprep.mubr.msk.f32.mxu1 %vm1054_vm4, %v11342_v60 }
 0x382   : > { %10491 = vmatprep.subr.msk.bf16.mxu1 %vm11459_vm8, %v11539_v31 }
 0x385   : > { %10494 = vmatpush3.bf16.msk.msra.mxu1 %vm11459_vm8, %v11539_v31 }
 0x386   : > { %10496 = vmatprep.subr.bf16.mxu1 %v11514_v15 }
 0x388   : > { %9957 = vmatmul.mubr.msk.f32.vlgmr.msra.gmra.mrb[16].mxu1 %vm1054_vm4, %v11472_v17 }
 0x389   : > { %10498 = vmatpush3.bf16.msra.mxu1 %v11514_v15  ;;  %9967 = vmatprep.mubr.msk.f32.mxu1 %vm1054_vm4, %v11475_v23 }
 0x38a   : > { %10501 = vmatprep.subr.msk.bf16.mxu1 %vm11459_vm8, %v11539_v31 }
 0x38d   : > { %10504 = vmatpush3.bf16.msk.msra.mxu1 %vm11459_vm8, %v11539_v31  ;;  %vm2030_vm8 = vcmask 119816   ;;  %v2091_v31 = vstv %s9302_s29  ;;  %s11796_s29 = sld [smem:[#allocation10 + $0x16]] }
 0x38e   : > { %10506 = vmatprep.subr.msk.bf16.mxu1 %vm11527_vm14, %v11045_v56 }
 0x390   : > { %9968 = vmatmul.mubr.msk.f32.vlgmr.msra.gmra.mrb[18].mxu1 %vm1054_vm4, %v11490_v39 }
 0x391   : > { %10508 = vmatpush3.bf16.msk.msra.mxu1 %vm11527_vm14, %v11045_v56  ;;  %vm3935_vm14 = vcmask 1045504  }
 0x392   : > { %10511 = vmatprep.subr.msk.bf16.mxu1 %vm11547_vm1, %v11554_v38  ;;  %vm12079_vm15 = vmpackc.low %vm3935_vm14, %vm11044_vm7  ;;  %vm3932_vm7 = vcmask 113664  }
 0x393   : > { %vm12358_vm0 = vmpackc.low %vm3935_vm14, %vm1037_vm12 }
 0x394   : > { %vm12705_vm12 = vmpackc.low %vm3935_vm14, %vm1046_vm2  ;;  %vm5674_vm2 = vcmask 56320  }
 0x395   : > { %10514 = vmatpush3.bf16.msk.msra.mxu1 %vm11547_vm1, %v11554_v38  ;;  %vm5678_vm1 = vcmask 1046528  }
 0x396   : > { %10516 = vmatprep.subr.msk.bf16.mxu1 %vm11569_vm10, %v11045_v56 }
 0x3d8   : > { %v2025_v6 = vpop.permute.xlu1 %2024 }
 0x3d9   : > { %2031 = vst.msk [vmem:[#allocation3 + $0x9] sm:$0x3f] %vm2030_vm8, %v2025_v6  ;;  %v2023_v17 = vpop.permute.xlu0 %2022 }
 0x3da   : > { %2029 = vst.msk [vmem:[#allocation3 + $0x1] sm:$0xff] %vm2028_vm13, %v2023_v17 }
 0x3e0   : > { %v11733_v34 = vld [vmem:[#allocation3 + $0x9] sm:$0x3f] }
 0x3e1   : > { %v11722_v25 = vld [vmem:[#allocation3 + $0x8] sm:$0x3f]  ;;  %v11724_v16 = vld [vmem:[#allocation3] sm:$0xff]  ;;  %v2113_v40 = vmul.f32 %v2111_v37, %v11733_v34 }
 0x3e2   : > { %v2078_v29 = vmul.f32 %v2077_v28, %v11724_v16  ;;  %v2093_v32 = vmul.f32 %v2091_v31, %v11722_v25  ;;  %v2092_v35 = vmul.f32 %v2091_v31, %v11724_v16  ;;  %v11736_v38 = vld [vmem:[#allocation3 + $0x1] sm:$0xff]  ;;  %v11745_v48 = vld [vmem:[#allocation3 + $0xa] sm:$0x3f] }
 0x3e3   : > { %v2112_v30 = vmul.f32 %v2111_v37, %v11736_v38  ;;  %v2126_v49 = vmul.f32 %v2125_v43, %v11736_v38  ;;  %v11748_v33 = vld [vmem:[#allocation3 + $0x2] sm:$0xff]  ;;  %v2147_v51 = vmul.f32 %v2145_v50, %v11745_v48 }
 0x3e4   : > { %v2146_v52 = vmul.f32 %v2145_v50, %v11748_v33 }
 0x44b   : > { %v9936_v39 = vpop.f32.mrb[12].mxu1 }
 0x44c   : > { %v1614_v4 = vpop.f32.mrb[13].mxu1 }
 0x453   : > { %v9947_v5 = vpop.f32.mrb[14].mxu1 }
 0x454   : > { %v1699_v7 = vmax.f32 %v9936_v39, %v9947_v5  ;;  %v1689_v8 = vpop.f32.mrb[15].mxu1 }
 0x455   : > { %v1698_v9 = vmax.f32 %v1614_v4, %v1689_v8  ;;  %v2227_v4 = vstv %s9314_s1  ;;  %s11841_s1 = sld [smem:[#allocation10 + $0x1a]] }
 0x456   : > { %2036 = vrot.lane.b32.xlu1 %v1699_v7, %s11041_s24 }
 0x457   : > { %2034 = vrot.lane.b32.xlu0 %v1698_v9, %s11041_s24  ;;  %v2247_v9 = vstv %s9316_s21  ;;  %s11851_s21 = sld [smem:[#allocation10 + $0x1c]] }
 0x45b   : > { %v9958_v44 = vpop.f32.mrb[16].mxu1 }
 0x45c   : > { %v1769_v10 = vpop.f32.mrb[17].mxu1 }
 0x463   : > { %v9969_v11 = vpop.f32.mrb[18].mxu1 }
 0x464   : > { %v1854_v13 = vmax.f32 %v9958_v44, %v9969_v11  ;;  %v1844_v12 = vpop.f32.mrb[19].mxu1 }
 0x465   : > { %v1853_v57 = vmax.f32 %v1769_v10, %v1844_v12 }
 0x467   : > { %9978 = vmatprep.mubr.msk.f32.mxu1 %vm1054_vm4, %v1853_v57 }
 0x468   : > { %9979 = vmatmul.mubr.msk.f32.vlgmr.msra.gmra.mrb[20].mxu1 %vm1054_vm4, %v1854_v13 }
 0x469   : > { %10518 = vmatpush3.bf16.msk.msra.mxu1 %vm11569_vm10, %v11045_v56  ;;  %9989 = vmatprep.mubr.msk.f32.mxu1 %vm1054_vm4, %v1853_v57  ;;  %v2079_v56 = vmul.f32 %v2077_v28, %v11722_v25  ;;  %v2105_v28 = vstv %s9303_s2  ;;  %s11878_s2 = sld [smem:[#allocation10 + $0xf]] }
 0x46a   : > { %10521 = vmatprep.subr.msk.bf16.mxu1 %vm11588_vm11, %v11579_v45 }
 0x46d   : > { %10524 = vmatpush3.bf16.msk.msra.mxu1 %vm11588_vm11, %v11579_v45  ;;  %v2127_v45 = vmul.f32 %v2125_v43, %v11733_v34 }
 0x470   : > { %9990 = vmatmul.mubr.msk.f32.vlgmr.msra.gmra.mrb[22].mxu1 %vm1054_vm4, %v1854_v13  ;;  %v2261_v13 = vstv %s9317_s28  ;;  %s11853_s28 = sld [smem:[#allocation10 + $0xc]]  ;;  %vm11048_vm4 = vmmov 0  }
 0x471   : > { %9996 = vmatprep.mubr.msk.f32.mxu1 %vm11048_vm4, %v11040_v0  ;;  %10066 = vmatprep.mubr.msk.f32.mxu0 %vm11048_vm4, %v11040_v0 }
 0x4c8   : > { %v2037_v14 = vpop.permute.xlu1 %2036 }
 0x4c9   : > { %2042 = vst.msk [vmem:[#allocation3 + $0x19] sm:$0x3f] %vm2030_vm8, %v2037_v14  ;;  %v2035_v15 = vpop.permute.xlu0 %2034 }
 0x4ca   : > { %2041 = vst.msk [vmem:[#allocation3 + $0x11] sm:$0xff] %vm2028_vm13, %v2035_v15 }
 0x4d0   : > { %v11769_v1 = vld [vmem:[#allocation3 + $0x19] sm:$0x3f] }
 0x4d1   : > { %v11757_v3 = vld [vmem:[#allocation3 + $0x18] sm:$0x3f]  ;;  %v11760_v36 = vld [vmem:[#allocation3 + $0x10] sm:$0xff]  ;;  %v2215_v17 = vmul.f32 %v2213_v2, %v11769_v1  ;;  %v2229_v5 = vmul.f32 %v2227_v4, %v11769_v1 }
 0x4d2   : > { %v2181_v59 = vmul.f32 %v2179_v58, %v11757_v3  ;;  %v2180_v61 = vmul.f32 %v2179_v58, %v11760_v36  ;;  %v2195_v63 = vmul.f32 %v2193_v62, %v11757_v3  ;;  %v2194_v41 = vmul.f32 %v2193_v62, %v11760_v36  ;;  %v11772_v6 = vld [vmem:[#allocation3 + $0x11] sm:$0xff]  ;;  %v11781_v7 = vld [vmem:[#allocation3 + $0x1a] sm:$0x3f] }
 0x4d3   : > { %v2214_v39 = vmul.f32 %v2213_v2, %v11772_v6  ;;  %v2228_v8 = vmul.f32 %v2227_v4, %v11772_v6  ;;  %v11784_v44 = vld [vmem:[#allocation3 + $0x12] sm:$0xff]  ;;  %v2249_v10 = vmul.f32 %v2247_v9, %v11781_v7  ;;  %v2263_v12 = vmul.f32 %v2261_v13, %v11781_v7 }
 0x4d4   : > { %v2248_v11 = vmul.f32 %v2247_v9, %v11784_v44  ;;  %v2262_v57 = vmul.f32 %v2261_v13, %v11784_v44 }
 0x53b   : > { %v9980_v47 = vpop.f32.mrb[20].mxu1 }
 0x53c   : > { %v1927_v18 = vpop.f32.mrb[21].mxu1 }
 0x543   : > { %v9991_v22 = vpop.f32.mrb[22].mxu1 }
 0x544   : > { %v2012_v20 = vmax.f32 %v9980_v47, %v9991_v22  ;;  %v2002_v24 = vpop.f32.mrb[23].mxu1  ;;  %v2073_v47 = vstv %s2072_s25  ;;  %s11864_s25 = sld [smem:[#allocation10 + $0x1d]] }
 0x545   : > { %v2011_v26 = vmax.f32 %v1927_v18, %v2002_v24  ;;  %v2075_v22 = vmul.f32 %v2073_v47, %v11722_v25  ;;  %v2074_v24 = vmul.f32 %v2073_v47, %v11724_v16 }
 0x546   : > { %2047 = vrot.lane.b32.xlu1 %v2012_v20, %s11041_s24 }
 0x547   : > { %2045 = vrot.lane.b32.xlu0 %v2011_v26, %s11041_s24  ;;  %s9308_s24 = sld [smem:[#allocation10 + $0x8]]  ;;  %v2315_v26 = vstv %s11796_s29  ;;  %s11876_s29 = sld [smem:[#allocation10 + $0x1f]] }
 0x54a   : > { %2084 = vrot.lane.b32.xlu1 %v2079_v56, %s11042_s27 }
 0x54b   : > { %2082 = vrot.lane.b32.xlu0 %v2078_v29, %s11042_s27  ;;  %v2281_v29 = vstv %s11798_s17  ;;  %s11889_s17 = sld [smem:[#allocation10 + $0x20]] }
 0x54d   : > { %v2159_v53 = vstv %s9308_s24  ;;  %s11807_s24 = sld [smem:[#allocation10 + $0x6]] }
 0x54e   : > { %2098 = vrot.lane.b32.xlu1 %v2093_v32, %s11043_s26  ;;  %v2161_v42 = vmul.f32 %v2159_v53, %v11745_v48  ;;  %v2160_v54 = vmul.f32 %v2159_v53, %v11748_v33 }
 0x54f   : > { %2096 = vrot.lane.b32.xlu0 %v2092_v35, %s11043_s26 }
 0x552   : > { %2118 = vrot.lane.b32.xlu1 %v2113_v40, %s11042_s27 }
 0x553   : > { %2116 = vrot.lane.b32.xlu0 %v2112_v30, %s11042_s27 }
 0x556   : > { %2132 = vrot.lane.b32.xlu1 %v2127_v45, %s11043_s26  ;;  %v2107_v45 = vmul.f32 %v2105_v28, %v11733_v34 }
 0x557   : > { %2130 = vrot.lane.b32.xlu0 %v2126_v49, %s11043_s26 }
 0x55a   : > { %2152 = vrot.lane.b32.xlu1 %v2147_v51, %s11042_s27 }
 0x55b   : > { %2150 = vrot.lane.b32.xlu0 %v2146_v52, %s11042_s27  ;;  %v2106_v52 = vmul.f32 %v2105_v28, %v11736_v38 }
 0x55e   : > { %2166 = vrot.lane.b32.xlu1 %v2161_v42, %s11043_s26  ;;  %v2295_v42 = vstv %s11802_s22  ;;  %s11897_s22 = sld [smem:[#allocation10 + $0x22]] }
 0x55f   : > { %2164 = vrot.lane.b32.xlu0 %v2160_v54, %s11043_s26 }
 0x562   : > { %2186 = vrot.lane.b32.xlu1 %v2181_v59, %s11042_s27 }
 0x563   : > { %2184 = vrot.lane.b32.xlu0 %v2180_v61, %s11042_s27 }
 0x566   : > { %2200 = vrot.lane.b32.xlu1 %v2195_v63, %s11043_s26  ;;  %v2139_v63 = vstv %s11807_s24  ;;  %s11899_s24 = sld [smem:[#allocation10 + $0x12]] }
 0x567   : > { %2198 = vrot.lane.b32.xlu0 %v2194_v41, %s11043_s26  ;;  %v2141_v9 = vmul.f32 %v2139_v63, %v11745_v48  ;;  %v2140_v13 = vmul.f32 %v2139_v63, %v11748_v33  ;;  %v2387_v63 = vstv %s11851_s21  ;;  %s9341_s21 = sld [smem:[#allocation10 + $0x29]] }
 0x56a   : > { %2220 = vrot.lane.b32.xlu1 %v2215_v17, %s11042_s27 }
 0x56b   : > { %2218 = vrot.lane.b32.xlu0 %v2214_v39, %s11042_s27 }
 0x56e   : > { %2234 = vrot.lane.b32.xlu1 %v2229_v5, %s11043_s26 }
 0x56f   : > { %2232 = vrot.lane.b32.xlu0 %v2228_v8, %s11043_s26 }
 0x572   : > { %2254 = vrot.lane.b32.xlu1 %v2249_v10, %s11042_s27 }
 0x573   : > { %2252 = vrot.lane.b32.xlu0 %v2248_v11, %s11042_s27 }
 0x576   : > { %2268 = vrot.lane.b32.xlu1 %v2263_v12, %s11043_s26  ;;  %v2329_v12 = vstv %s11820_s23  ;;  %s11908_s23 = sld [smem:[#allocation10 + $0x23]] }
 0x577   : > { %2266 = vrot.lane.b32.xlu0 %v2262_v57, %s11043_s26 }
 0x5b8   : > { %v2048_v14 = vpop.permute.xlu1 %2047 }
 0x5b9   : > { %2053 = vst.msk [vmem:[#allocation3 + $0x29] sm:$0x3f] %vm2030_vm8, %v2048_v14  ;;  %v2046_v15 = vpop.permute.xlu0 %2045 }
 0x5ba   : > { %2052 = vst.msk [vmem:[#allocation3 + $0x21] sm:$0xff] %vm2028_vm13, %v2046_v15 }
 0x5bc   : > { %v2085_v18 = vpop.permute.xlu1 %2084 }
 0x5bd   : > { %v2083_v20 = vpop.permute.xlu0 %2082  ;;  %v2089_v56 = vadd.f32 %v2085_v18, %v2075_v22 }
 0x5be   : > { %v2088_v32 = vadd.f32 %v2083_v20, %v2074_v24  ;;  %v2349_v24 = vstv %s11828_s16  ;;  %s9337_s16 = sld [smem:[#allocation10 + $0x25]] }
 0x5c0   : > { %v11810_v31 = vld [vmem:[#allocation3 + $0x29] sm:$0x3f]  ;;  %v2099_v35 = vpop.permute.xlu1 %2098 }
 0x5c1   : > { %v11812_v37 = vld [vmem:[#allocation3 + $0x20] sm:$0xff]  ;;  %v2103_v40 = vadd.f32 %v2099_v35, %v2089_v56  ;;  %v2097_v30 = vpop.permute.xlu0 %2096  ;;  %v2317_v43 = vmul.f32 %v2315_v26, %v11810_v31  ;;  %v11816_v49 = vld [vmem:[#allocation3 + $0x28] sm:$0x3f]  ;;  %v2331_v18 = vmul.f32 %v2329_v12, %v11810_v31 }
 0x5c2   : > { %v2102_v50 = vadd.f32 %v2097_v30, %v2088_v32  ;;  %v2282_v51 = vmul.f32 %v2281_v29, %v11812_v37  ;;  %v2283_v61 = vmul.f32 %v2281_v29, %v11816_v49  ;;  %v2296_v62 = vmul.f32 %v2295_v42, %v11812_v37  ;;  %v11832_v41 = vld [vmem:[#allocation3 + $0x21] sm:$0xff]  ;;  %v11846_v22 = vld [vmem:[#allocation3 + $0x2a] sm:$0x3f] }
 0x5c3   : > { %2322 = vrot.lane.b32.xlu1 %v2317_v43, %s11042_s27  ;;  %v2109_v53 = vadd.f32 %v2107_v45, %v2103_v40  ;;  %v2297_v8 = vmul.f32 %v2295_v42, %v11816_v49  ;;  %v2316_v11 = vmul.f32 %v2315_v26, %v11832_v41  ;;  %v2330_v20 = vmul.f32 %v2329_v12, %v11832_v41  ;;  %v11855_v28 = vld [vmem:[#allocation3 + $0x22] sm:$0xff] }
 0x5c4   : > { %v2119_v54 = vpop.permute.xlu1 %2118  ;;  %2286 = vrot.lane.b32.xlu0 %v2282_v51, %s11042_s27  ;;  %v2108_v58 = vadd.f32 %v2106_v52, %v2102_v50  ;;  %v2173_v26 = vstv %s11830_s14  ;;  %v2351_v30 = vmul.f32 %v2349_v24, %v11846_v22  ;;  %v2350_v51 = vmul.f32 %v2349_v24, %v11855_v28  ;;  %s9338_s14 = sld [smem:[#allocation10 + $0x26]] }
 0x5c5   : > { %v2117_v59 = vpop.permute.xlu0 %2116  ;;  %v2123_v2 = vadd.f32 %v2119_v54, %v2109_v53  ;;  %v2175_v43 = vmul.f32 %v2173_v26, %v11757_v3  ;;  %v2174_v45 = vmul.f32 %v2173_v26, %v11760_v36  ;;  %v2363_v52 = vstv %s11841_s1  ;;  %s9340_s1 = sld [smem:[#allocation10 + $0x28]] }
 0x5c6   : > { %v2122_v17 = vadd.f32 %v2117_v59, %v2108_v58  ;;  %v11047_v42 = vmov 0.0|0.0   ;;  %v2421_v26 = vstv %s11876_s29  ;;  %s9349_s29 = sld [smem:[#allocation10 + $0x31]] }
 0x5c7   : > { %2288 = vrot.lane.b32.xlu1 %v2283_v61, %s11042_s27  ;;  %10525 = vmatprep.subr.bf16.mxu1 %v11047_v42  ;;  %v2365_v61 = vmul.f32 %v2363_v52, %v11846_v22 }
 0x5c8   : > { %v2133_v39 = vpop.permute.xlu1 %2132  ;;  %2300 = vrot.lane.b32.xlu0 %v2296_v62, %s11043_s26  ;;  %10565 = vmatprep.subr.bf16.mxu0 %v11047_v42  ;;  %v2364_v62 = vmul.f32 %v2363_v52, %v11855_v28 }
 0x5c9   : > { %v2137_v4 = vadd.f32 %v2133_v39, %v2123_v2  ;;  %v2131_v5 = vpop.permute.xlu0 %2130  ;;  %v2207_v2 = vstv %s11853_s28  ;;  %s9343_s28 = sld [smem:[#allocation10 + $0x2b]]  ;;  %10568 = vmatpush3.bf16.msk.msra.mxu0 %vm12358_vm0, %v11534_v27 }
 0x5ca   : > { %v2136_v10 = vadd.f32 %v2131_v5, %v2122_v17  ;;  %v2208_v12 = vmul.f32 %v2207_v2, %v11772_v6  ;;  %10573 = vmatprep.subr.bf16.mxu0 %v11047_v42 }
 0x5cb   : > { %2302 = vrot.lane.b32.xlu1 %v2297_v8, %s11043_s26  ;;  %v2143_v57 = vadd.f32 %v2141_v9, %v2137_v4  ;;  %v2389_v9 = vmul.f32 %v2387_v63, %v11722_v25 }
 0x5cc   : > { %v2153_v14 = vpop.permute.xlu1 %2152  ;;  %2320 = vrot.lane.b32.xlu0 %v2316_v11, %s11042_s27  ;;  %v2142_v15 = vadd.f32 %v2140_v13, %v2136_v10  ;;  %v2209_v10 = vmul.f32 %v2207_v2, %v11769_v1  ;;  %v2388_v13 = vmul.f32 %v2387_v63, %v11724_v16  ;;  %v2455_v2 = vstv %s11897_s22  ;;  %s9350_s22 = sld [smem:[#allocation10 + $0x32]] }
 0x5cd   : > { %v2151_v47 = vpop.permute.xlu0 %2150  ;;  %v2157_v56 = vadd.f32 %v2153_v14, %v2143_v57  ;;  %v2401_v57 = vstv %s11864_s25  ;;  %s9344_s25 = sld [smem:[#allocation10 + $0x2c]] }
 0x5ce   : > { %v2156_v29 = vadd.f32 %v2151_v47, %v2142_v15  ;;  %v2402_v24 = vmul.f32 %v2401_v57, %v11724_v16 }
 0x5cf   : > { %2336 = vrot.lane.b32.xlu1 %v2331_v18, %s11043_s26 }
 0x5d0   : > { %v2167_v32 = vpop.permute.xlu1 %2166  ;;  %2334 = vrot.lane.b32.xlu0 %v2330_v20, %s11043_s26  ;;  %v2403_v20 = vmul.f32 %v2401_v57, %v11722_v25  ;;  %v2469_v57 = vstv %s11908_s23  ;;  %s9353_s23 = sld [smem:[#allocation10 + $0x35]] }
 0x5d1   : > { %v2171_v35 = vadd.f32 %v2167_v32, %v2157_v56  ;;  %v2165_v40 = vpop.permute.xlu0 %2164  ;;  %v2241_v56 = vstv %s11878_s2  ;;  %s9346_s2 = sld [smem:[#allocation10 + $0x2e]] }
 0x5d2   : > { %v2170_v50 = vadd.f32 %v2165_v40, %v2156_v29  ;;  %v2242_v52 = vmul.f32 %v2241_v56, %v11784_v44 }
 0x5d3   : > { %2356 = vrot.lane.b32.xlu1 %v2351_v30, %s11042_s27  ;;  %v2177_v53 = vadd.f32 %v2175_v43, %v2171_v35  ;;  %v2423_v43 = vmul.f32 %v2421_v26, %v11733_v34 }
 0x5d4   : > { %v2187_v54 = vpop.permute.xlu1 %2186  ;;  %2354 = vrot.lane.b32.xlu0 %v2350_v51, %s11042_s27  ;;  %v2176_v58 = vadd.f32 %v2174_v45, %v2170_v50  ;;  %v2243_v45 = vmul.f32 %v2241_v56, %v11781_v7  ;;  %v2422_v51 = vmul.f32 %v2421_v26, %v11736_v38 }
 0x5d5   : > { %v2185_v59 = vpop.permute.xlu0 %2184  ;;  %v2191_v17 = vadd.f32 %v2187_v54, %v2177_v53  ;;  %v2435_v53 = vstv %s11889_s17  ;;  %s9347_s17 = sld [smem:[#allocation10 + $0x2f]] }
 0x5d6   : > { %v2190_v39 = vadd.f32 %v2185_v59, %v2176_v58  ;;  %v2436_v63 = vmul.f32 %v2435_v53, %v11736_v38 }
 0x5d7   : > { %2370 = vrot.lane.b32.xlu1 %v2365_v61, %s11043_s26 }
 0x5d8   : > { %v2201_v4 = vpop.permute.xlu1 %2200  ;;  %2368 = vrot.lane.b32.xlu0 %v2364_v62, %s11043_s26  ;;  %v2437_v62 = vmul.f32 %v2435_v53, %v11733_v34 }
 0x5d9   : > { %v2205_v5 = vadd.f32 %v2201_v4, %v2191_v17  ;;  %v2199_v8 = vpop.permute.xlu0 %2198  ;;  %v2275_v17 = vstv %s11899_s24  ;;  %s9352_s24 = sld [smem:[#allocation10 + $0x34]] }
 0x5da   : > { %v2204_v11 = vadd.f32 %v2199_v8, %v2190_v39 }
 0x5db   : > { %2394 = vrot.lane.b32.xlu1 %v2389_v9, %s11042_s27  ;;  %v2211_v14 = vadd.f32 %v2209_v10, %v2205_v5  ;;  %v2457_v10 = vmul.f32 %v2455_v2, %v11745_v48 }
 0x5dc   : > { %v2221_v15 = vpop.permute.xlu1 %2220  ;;  %2392 = vrot.lane.b32.xlu0 %v2388_v13, %s11042_s27  ;;  %v2210_v47 = vadd.f32 %v2208_v12, %v2204_v11  ;;  %v2277_v11 = vmul.f32 %v2275_v17, %v11816_v49  ;;  %v2456_v12 = vmul.f32 %v2455_v2, %v11748_v33 }
 0x5dd   : > { %v2219_v18 = vpop.permute.xlu0 %2218  ;;  %v2225_v29 = vadd.f32 %v2221_v15, %v2211_v14  ;;  %v2276_v14 = vmul.f32 %v2275_v17, %v11812_v37 }
 0x5de   : > { %v2224_v32 = vadd.f32 %v2219_v18, %v2210_v47  ;;  %v2471_v18 = vmul.f32 %v2469_v57, %v11745_v48 }
 0x5df   : > { %2408 = vrot.lane.b32.xlu1 %v2403_v20, %s11043_s26  ;;  %v2470_v20 = vmul.f32 %v2469_v57, %v11748_v33 }
 0x5e0   : > { %v2235_v35 = vpop.permute.xlu1 %2234  ;;  %2406 = vrot.lane.b32.xlu0 %v2402_v24, %s11043_s26  ;;  %v2489_v24 = vstv %s9337_s16  ;;  %s9356_s16 = sld [smem:[#allocation10 + $0x37]] }
 0x5e1   : > { %v2239_v40 = vadd.f32 %v2235_v35, %v2225_v29  ;;  %v2233_v30 = vpop.permute.xlu0 %2232  ;;  %v2491_v26 = vmul.f32 %v2489_v24, %v11757_v3  ;;  %v2490_v56 = vmul.f32 %v2489_v24, %v11760_v36  ;;  %v2503_v29 = vstv %s9338_s14  ;;  %s9357_s14 = sld [smem:[#allocation10 + $0x38]] }
 0x5e2   : > { %v2238_v50 = vadd.f32 %v2233_v30, %v2224_v32  ;;  %v2505_v32 = vmul.f32 %v2503_v29, %v11757_v3  ;;  %v2504_v35 = vmul.f32 %v2503_v29, %v11760_v36 }
 0x5e3   : > { %2428 = vrot.lane.b32.xlu1 %v2423_v43, %s11042_s27  ;;  %v2245_v54 = vadd.f32 %v2243_v45, %v2239_v40  ;;  %v2523_v40 = vstv %s9340_s1  ;;  %v2537_v45 = vstv %s9341_s21  ;;  %s9359_s1 = sld [smem:[#allocation10 + $0x3a]]  ;;  %s9360_s21 = sld [smem:[#allocation10 + $0x3b]] }
 0x5e4   : > { %v2255_v58 = vpop.permute.xlu1 %2254  ;;  %2426 = vrot.lane.b32.xlu0 %v2422_v51, %s11042_s27  ;;  %v2244_v59 = vadd.f32 %v2242_v52, %v2238_v50  ;;  %v2525_v30 = vmul.f32 %v2523_v40, %v11769_v1  ;;  %v2524_v43 = vmul.f32 %v2523_v40, %v11772_v6  ;;  %v2539_v50 = vmul.f32 %v2537_v45, %v11769_v1 }
 0x5e5   : > { %v2253_v61 = vpop.permute.xlu0 %2252  ;;  %v2259_v39 = vadd.f32 %v2255_v58, %v2245_v54  ;;  %v2538_v51 = vmul.f32 %v2537_v45, %v11772_v6  ;;  %v2557_v52 = vstv %s9343_s28  ;;  %v2571_v58 = vstv %s9344_s25  ;;  %s9362_s28 = sld [smem:[#allocation10 + $0x3d]]  ;;  %s9363_s25 = sld [smem:[#allocation10 + $0x3e]] }
 0x5e6   : > { %v2258_v4 = vadd.f32 %v2253_v61, %v2244_v59  ;;  %v2559_v53 = vmul.f32 %v2557_v52, %v11781_v7  ;;  %v2558_v54 = vmul.f32 %v2557_v52, %v11784_v44  ;;  %v2573_v59 = vmul.f32 %v2571_v58, %v11781_v7 }
 0x5e7   : > { %2442 = vrot.lane.b32.xlu1 %v2437_v62, %s11043_s26  ;;  %v2572_v61 = vmul.f32 %v2571_v58, %v11784_v44  ;;  %v2625_v62 = vstv %s9349_s29  ;;  %s9365_s29 = sld [smem:[#allocation10 + $0x40]] }
 0x5e8   : > { %v2269_v5 = vpop.permute.xlu1 %2268  ;;  %2440 = vrot.lane.b32.xlu0 %v2436_v63, %s11043_s26  ;;  %v2591_v63 = vstv %s9346_s2  ;;  %v2627_v2 = vmul.f32 %v2625_v62, %v11810_v31  ;;  %s11997_s2 = sld [smem:[#allocation10 + $0x15]] }
 0x5e9   : > { %v2273_v8 = vadd.f32 %v2269_v5, %v2259_v39  ;;  %v2267_v9 = vpop.permute.xlu0 %2266  ;;  %v2592_v17 = vmul.f32 %v2591_v63, %v11812_v37  ;;  %v2605_v39 = vstv %s9347_s17  ;;  %s12001_s17 = sld [smem:[#allocation10 + $0x41]] }
 0x5ea   : > { %v2272_v13 = vadd.f32 %v2267_v9, %v2258_v4  ;;  %v2593_v4 = vmul.f32 %v2591_v63, %v11816_v49  ;;  %v2606_v5 = vmul.f32 %v2605_v39, %v11812_v37  ;;  %v2626_v9 = vmul.f32 %v2625_v62, %v11832_v41 }
 0x5eb   : > { %2462 = vrot.lane.b32.xlu1 %v2457_v10, %s11042_s27  ;;  %v11924_v15 = vadd.f32 %v2277_v11, %v2273_v8  ;;  %v2607_v8 = vmul.f32 %v2605_v39, %v11816_v49  ;;  %v2639_v10 = vstv %s9350_s22  ;;  %s12007_s22 = sld [smem:[#allocation10 + $0x43]] }
 0x5ec   : > { %2460 = vrot.lane.b32.xlu0 %v2456_v12, %s11042_s27  ;;  %v11927_v47 = vadd.f32 %v2276_v14, %v2272_v13  ;;  %v2641_v11 = vmul.f32 %v2639_v10, %v11810_v31  ;;  %v2640_v13 = vmul.f32 %v2639_v10, %v11832_v41  ;;  %v2659_v12 = vstv %s9352_s24  ;;  %s12012_s24 = sld [smem:[#allocation10 + $0x18]] }
 0x5ed   : > { %v2661_v57 = vmul.f32 %v2659_v12, %v11846_v22  ;;  %v2660_v14 = vmul.f32 %v2659_v12, %v11855_v28 }
 0x5ee   : > { %v2309_v39 = vstv %s11997_s2  ;;  %s12063_s2 = sld [smem:[#allocation10 + $0x4a]] }
 0x5ef   : > { %2476 = vrot.lane.b32.xlu1 %v2471_v18, %s11043_s26  ;;  %v2673_v18 = vstv %s9353_s23  ;;  %s12018_s23 = sld [smem:[#allocation10 + $0x44]]  ;;  %v2310_v12 = vmul.f32 %v2309_v39, %v11832_v41 }
 0x5f0   : > { %2474 = vrot.lane.b32.xlu0 %v2470_v20, %s11043_s26  ;;  %v2675_v20 = vmul.f32 %v2673_v18, %v11846_v22  ;;  %v2674_v24 = vmul.f32 %v2673_v18, %v11855_v28 }
 0x5f3   : > { %2496 = vrot.lane.b32.xlu1 %v2491_v26, %s11042_s27  ;;  %v2697_v26 = vstv %s9356_s16  ;;  %s12028_s16 = sld [smem:[#allocation10 + $0x46]] }
 0x5f4   : > { %2494 = vrot.lane.b32.xlu0 %v2490_v56, %s11042_s27  ;;  %v2699_v56 = vmul.f32 %v2697_v26, %v11722_v25  ;;  %v2698_v29 = vmul.f32 %v2697_v26, %v11724_v16 }
 0x5f7   : > { %2510 = vrot.lane.b32.xlu1 %v2505_v32, %s11043_s26  ;;  %v2711_v32 = vstv %s9357_s14  ;;  %s12034_s14 = sld [smem:[#allocation11]] }
 0x5f8   : > { %2508 = vrot.lane.b32.xlu0 %v2504_v35, %s11043_s26  ;;  %v2713_v35 = vmul.f32 %v2711_v32, %v11722_v25  ;;  %v2712_v40 = vmul.f32 %v2711_v32, %v11724_v16 }
 0x5fb   : > { %2530 = vrot.lane.b32.xlu1 %v2525_v30, %s11042_s27  ;;  %v2731_v30 = vstv %s9359_s1  ;;  %s12038_s1 = sld [smem:[#allocation10 + $0x47]] }
 0x5fc   : > { %2528 = vrot.lane.b32.xlu0 %v2524_v43, %s11042_s27  ;;  %v2733_v43 = vmul.f32 %v2731_v30, %v11733_v34  ;;  %v2732_v45 = vmul.f32 %v2731_v30, %v11736_v38 }
 0x5ff   : > { %2544 = vrot.lane.b32.xlu1 %v2539_v50, %s11043_s26  ;;  %v2745_v50 = vstv %s9360_s21  ;;  %s12042_s21 = sld [smem:[#allocation10 + $0x1b]] }
 0x600   : > { %2542 = vrot.lane.b32.xlu0 %v2538_v51, %s11043_s26  ;;  %v2747_v51 = vmul.f32 %v2745_v50, %v11733_v34  ;;  %v2746_v52 = vmul.f32 %v2745_v50, %v11736_v38 }
 0x603   : > { %2564 = vrot.lane.b32.xlu1 %v2559_v53, %s11042_s27  ;;  %v2765_v53 = vstv %s9362_s28  ;;  %s12049_s28 = sld [smem:[#allocation10 + $0x4c]] }
 0x604   : > { %2562 = vrot.lane.b32.xlu0 %v2558_v54, %s11042_s27  ;;  %v2767_v54 = vmul.f32 %v2765_v53, %v11745_v48  ;;  %v2766_v58 = vmul.f32 %v2765_v53, %v11748_v33 }
 0x607   : > { %2578 = vrot.lane.b32.xlu1 %v2573_v59, %s11043_s26  ;;  %v2779_v59 = vstv %s9363_s25  ;;  %s12052_s25 = sld [smem:[#allocation10 + $0x49]] }
 0x608   : > { %2576 = vrot.lane.b32.xlu0 %v2572_v61, %s11043_s26  ;;  %v2781_v62 = vmul.f32 %v2779_v59, %v11745_v48 }
 0x60b   : > { %2632 = vrot.lane.b32.xlu1 %v2627_v2, %s11042_s27  ;;  %v2780_v2 = vmul.f32 %v2779_v59, %v11748_v33 }
 0x60c   : > { %2596 = vrot.lane.b32.xlu0 %v2592_v17, %s11042_s27  ;;  %v2799_v17 = vstv %s9365_s29  ;;  %s12054_s29 = sld [smem:[#allocation10 + $0x1e]] }
 0x60d   : > { %v2800_v10 = vmul.f32 %v2799_v17, %v11760_v36 }
 0x60f   : > { %2598 = vrot.lane.b32.xlu1 %v2593_v4, %s11042_s27 }
 0x610   : > { %2610 = vrot.lane.b32.xlu0 %v2606_v5, %s11043_s26 }
 0x613   : > { %2612 = vrot.lane.b32.xlu1 %v2607_v8, %s11043_s26  ;;  %v2801_v8 = vmul.f32 %v2799_v17, %v11757_v3 }
 0x614   : > { %2630 = vrot.lane.b32.xlu0 %v2626_v9, %s11042_s27 }
 0x617   : > { %2646 = vrot.lane.b32.xlu1 %v2641_v11, %s11043_s26  ;;  %v2813_v11 = vstv %s12001_s17  ;;  %s12074_s17 = sld [smem:[#allocation10 + $0x21]] }
 0x618   : > { %2644 = vrot.lane.b32.xlu0 %v2640_v13, %s11043_s26  ;;  %v2815_v18 = vmul.f32 %v2813_v11, %v11757_v3 }
 0x61b   : > { %2666 = vrot.lane.b32.xlu1 %v2661_v57, %s11042_s27 }
 0x61c   : > { %2664 = vrot.lane.b32.xlu0 %v2660_v14, %s11042_s27 }
 0x61f   : > { %2680 = vrot.lane.b32.xlu1 %v2675_v20, %s11043_s26  ;;  %v2311_v20 = vmul.f32 %v2309_v39, %v11810_v31  ;;  %v2867_v39 = vstv %s12028_s16  ;;  %s12117_s16 = sld [smem:[#allocation10 + $0x50]] }
 0x620   : > { %2678 = vrot.lane.b32.xlu0 %v2674_v24, %s11043_s26 }
 0x623   : > { %2704 = vrot.lane.b32.xlu1 %v2699_v56, %s11042_s27  ;;  %v2814_v56 = vmul.f32 %v2813_v11, %v11760_v36 }
 0x624   : > { %2702 = vrot.lane.b32.xlu0 %v2698_v29, %s11042_s27  ;;  %v2833_v29 = vstv %s12007_s22  ;;  %s12086_s22 = sld [smem:[#allocation10 + $0x4d]] }
 0x625   : > { %v2835_v30 = vmul.f32 %v2833_v29, %v11769_v1  ;;  %v2834_v50 = vmul.f32 %v2833_v29, %v11772_v6 }
 0x627   : > { %2718 = vrot.lane.b32.xlu1 %v2713_v35, %s11043_s26 }
 0x628   : > { %2716 = vrot.lane.b32.xlu0 %v2712_v40, %s11043_s26 }
 0x62b   : > { %2738 = vrot.lane.b32.xlu1 %v2733_v43, %s11042_s27 }
 0x62c   : > { %2736 = vrot.lane.b32.xlu0 %v2732_v45, %s11042_s27 }
 0x62f   : > { %2752 = vrot.lane.b32.xlu1 %v2747_v51, %s11043_s26  ;;  %v2847_v51 = vstv %s12018_s23  ;;  %s12105_s23 = sld [smem:[#allocation10 + $0x24]] }
 0x630   : > { %2750 = vrot.lane.b32.xlu0 %v2746_v52, %s11043_s26  ;;  %v2848_v17 = vmul.f32 %v2847_v51, %v11772_v6 }
 0x633   : > { %2772 = vrot.lane.b32.xlu1 %v2767_v54, %s11042_s27 }
 0x634   : > { %2770 = vrot.lane.b32.xlu0 %v2766_v58, %s11042_s27 }
 0x635   : > { %v2323_v61 = vpop.permute.xlu1 %2322 }
 0x636   : > { %v2287_v63 = vpop.permute.xlu0 %2286 }
 0x637   : > { %2786 = vrot.lane.b32.xlu1 %v2781_v62, %s11043_s26  ;;  %v2292_v4 = vadd.f32 %v2287_v63, %v11927_v47  ;;  %v2849_v62 = vmul.f32 %v2847_v51, %v11769_v1 }
 0x638   : > { %2784 = vrot.lane.b32.xlu0 %v2780_v2, %s11043_s26 }
 0x639   : > { %v2289_v5 = vpop.permute.xlu1 %2288 }
 0x63a   : > { %v2301_v9 = vpop.permute.xlu0 %2300  ;;  %v2293_v57 = vadd.f32 %v2289_v5, %v11924_v15  ;;  %v2343_v15 = vstv %s12012_s24  ;;  %s12099_s24 = sld [smem:[#allocation10 + $0x4f]] }
 0x63b   : > { %v2306_v13 = vadd.f32 %v2301_v9, %v2292_v4  ;;  %2806 = vrot.lane.b32.xlu1 %v2801_v8, %s11042_s27  ;;  %v2344_v53 = vmul.f32 %v2343_v15, %v11855_v28  ;;  %v2345_v58 = vmul.f32 %v2343_v15, %v11846_v22  ;;  %v2377_v8 = vstv %s12034_s14  ;;  %s12127_s14 = sld [smem:[#allocation10 + $0x52]] }
 0x63c   : > { %2804 = vrot.lane.b32.xlu0 %v2800_v10, %s11042_s27  ;;  %v2869_v10 = vmul.f32 %v2867_v39, %v11781_v7 }
 0x63d   : > { %v2303_v47 = vpop.permute.xlu1 %2302  ;;  %v2312_v14 = vadd.f32 %v2310_v12, %v2306_v13  ;;  %v2868_v12 = vmul.f32 %v2867_v39, %v11784_v44 }
 0x63e   : > { %v2307_v24 = vadd.f32 %v2303_v47, %v2293_v57  ;;  %v2321_v26 = vpop.permute.xlu0 %2320  ;;  %v2881_v57 = vstv %s12038_s1  ;;  %s12131_s1 = sld [smem:[#allocation10 + $0x27]] }
 0x63f   : > { %2820 = vrot.lane.b32.xlu1 %v2815_v18, %s11043_s26  ;;  %v2326_v35 = vadd.f32 %v2321_v26, %v2312_v14  ;;  %v2383_v14 = vstv %s12042_s21  ;;  %v2883_v26 = vmul.f32 %v2881_v57, %v11781_v7  ;;  %v2882_v15 = vmul.f32 %v2881_v57, %v11784_v44  ;;  %s12138_s21 = sld [smem:[#allocation10 + $0x53]] }
 0x640   : > { %v2313_v32 = vadd.f32 %v2311_v20, %v2307_v24  ;;  %2818 = vrot.lane.b32.xlu0 %v2814_v56, %s11043_s26  ;;  %v2385_v29 = vmul.f32 %v2383_v14, %v11722_v25 }
 0x641   : > { %v2337_v40 = vpop.permute.xlu1 %2336 }
 0x642   : > { %v2327_v43 = vadd.f32 %v2323_v61, %v2313_v32  ;;  %v2335_v45 = vpop.permute.xlu0 %2334 }
 0x643   : > { %v2340_v52 = vadd.f32 %v2335_v45, %v2326_v35  ;;  %2840 = vrot.lane.b32.xlu1 %v2835_v30, %s11042_s27  ;;  %v2935_v35 = vstv %s12049_s28  ;;  %v2384_v30 = vmul.f32 %v2383_v14, %v11724_v16  ;;  %v2415_v45 = vstv %s12054_s29  ;;  %s12146_s28 = sld [smem:[#allocation10 + $0x55]]  ;;  %s12161_s29 = sld [smem:[#allocation10 + $0x56]] }
 0x644   : > { %v2341_v54 = vadd.f32 %v2337_v40, %v2327_v43  ;;  %2838 = vrot.lane.b32.xlu0 %v2834_v50, %s11042_s27  ;;  %v2901_v43 = vstv %s12052_s25  ;;  %v2937_v16 = vmul.f32 %v2935_v35, %v11810_v31  ;;  %s12150_s25 = sld [smem:[#allocation10 + $0x2a]] }
 0x645   : > { %v2357_v59 = vpop.permute.xlu1 %2356  ;;  %v2346_v61 = vadd.f32 %v2344_v53, %v2340_v52 }
 0x646   : > { %v2347_v63 = vadd.f32 %v2345_v58, %v2341_v54  ;;  %v2355_v2 = vpop.permute.xlu0 %2354  ;;  %v2902_v54 = vmul.f32 %v2901_v43, %v11812_v37  ;;  %v2417_v58 = vmul.f32 %v2415_v45, %v11733_v34 }
 0x647   : > { %2854 = vrot.lane.b32.xlu1 %v2849_v62, %s11043_s26  ;;  %v2360_v5 = vadd.f32 %v2355_v2, %v2346_v61  ;;  %v2416_v61 = vmul.f32 %v2415_v45, %v11736_v38  ;;  %v2915_v62 = vstv %s12063_s2  ;;  %v2449_v38 = vstv %s12074_s17  ;;  %s12169_s2 = sld [smem:[#allocation10 + $0x58]]  ;;  %s12173_s17 = sld [smem:[#allocation10 + $0x2d]] }
 0x648   : > { %v2361_v4 = vadd.f32 %v2357_v59, %v2347_v63  ;;  %2852 = vrot.lane.b32.xlu0 %v2848_v17, %s11043_s26  ;;  %v2903_v17 = vmul.f32 %v2901_v43, %v11816_v49  ;;  %v2451_v57 = vmul.f32 %v2449_v38, %v11745_v48 }
 0x649   : > { %v2371_v9 = vpop.permute.xlu1 %2370 }
 0x64a   : > { %v2375_v11 = vadd.f32 %v2371_v9, %v2361_v4  ;;  %v2369_v13 = vpop.permute.xlu0 %2368  ;;  %v2916_v4 = vmul.f32 %v2915_v62, %v11812_v37 }
 0x64b   : > { %v2374_v47 = vadd.f32 %v2369_v13, %v2360_v5  ;;  %2874 = vrot.lane.b32.xlu1 %v2869_v10, %s11042_s27  ;;  %v2917_v10 = vmul.f32 %v2915_v62, %v11816_v49 }
 0x64c   : > { %v2379_v18 = vadd.f32 %v2377_v8, %v2375_v11  ;;  %2872 = vrot.lane.b32.xlu0 %v2868_v12, %s11042_s27  ;;  %v2936_v12 = vmul.f32 %v2935_v35, %v11832_v41 }
 0x64d   : > { %v2378_v20 = vadd.f32 %v2377_v8, %v2374_v47  ;;  %v2395_v24 = vpop.permute.xlu1 %2394  ;;  %v2949_v47 = vstv %s12086_s22  ;;  %s12186_s22 = sld [smem:[#allocation10 + $0x59]] }
 0x64e   : > { %v2381_v56 = vmax.f32 %v2379_v18, 0.0  ;;  %v2393_v32 = vpop.permute.xlu0 %2392  ;;  %v2399_v50 = vadd.f32 %v2395_v24, %v2385_v29  ;;  %v2450_v18 = vmul.f32 %v2449_v38, %v11748_v33  ;;  %v2950_v29 = vmul.f32 %v2949_v47, %v11832_v41 }
 0x64f   : > { %v2380_v40 = vmax.f32 %v2378_v20, 0.0  ;;  %2888 = vrot.lane.b32.xlu1 %v2883_v26, %s11043_s26  ;;  %v2398_v44 = vadd.f32 %v2393_v32, %v2384_v30  ;;  %v2969_v32 = vstv %s12099_s24  ;;  %v2483_v33 = vstv %s12105_s23  ;;  %s12196_s24 = sld [smem:[#allocation10 + $0x5b]]  ;;  %s12201_s23 = sld [smem:[#allocation10 + $0x30]] }
 0x650   : > { %2886 = vrot.lane.b32.xlu0 %v2882_v15, %s11043_s26  ;;  %v2971_v30 = vmul.f32 %v2969_v32, %v11846_v22  ;;  %v2970_v45 = vmul.f32 %v2969_v32, %v11855_v28 }
 0x651   : > { %v10526_v7 = vpack.c.bf16 %v2381_v56, %v2380_v40  ;;  %v2409_v51 = vpop.permute.xlu1 %2408  ;;  %v2951_v56 = vmul.f32 %v2949_v47, %v11810_v31 }
 0x652   : > { %v2413_v52 = vadd.f32 %v2409_v51, %v2399_v50  ;;  %v2407_v53 = vpop.permute.xlu0 %2406  ;;  %v2485_v50 = vmul.f32 %v2483_v33, %v11757_v3  ;;  %v2484_v51 = vmul.f32 %v2483_v33, %v11760_v36  ;;  %v3007_v3 = vstv %s12127_s14  ;;  %v12182_v33 = vld [vmem:[#allocation3 + $0x1a] sm:$0x3f]  ;;  %s12219_s14 = sld [smem:[#allocation10 + $0x5e]] }
 0x653   : > { %v2412_v59 = vadd.f32 %v2407_v53, %v2398_v44  ;;  %2942 = vrot.lane.b32.xlu1 %v2937_v16, %s11042_s27  ;;  %10528 = vmatpush3.bf16.msk.msra.mxu1 %vm12079_vm15, %v10526_v7 }
 0x654   : > { %2906 = vrot.lane.b32.xlu0 %v2902_v54, %s11042_s27  ;;  %v2419_v63 = vadd.f32 %v2417_v58, %v2413_v52  ;;  %10529 = vmatprep.subr.bf16.mxu1 %v11047_v42 }
 0x655   : > { %v2429_v2 = vpop.permute.xlu1 %2428  ;;  %v2418_v34 = vadd.f32 %v2416_v61, %v2412_v59  ;;  %v2517_v61 = vstv %s12131_s1  ;;  %s12224_s1 = sld [smem:[#allocation10 + $0x33]] }
 0x656   : > { %9997 = vmatmul.mubr.msk.f32.vlgmr.msra.gmra.mrb[24].mxu1 %vm3932_vm7, %v11342_v60  ;;  %v2427_v39 = vpop.permute.xlu0 %2426  ;;  %v2433_v5 = vadd.f32 %v2429_v2, %v2419_v63  ;;  %v12153_v2 = vld [vmem:[#allocation3 + $0x8] sm:$0x3f]  ;;  %v2519_v38 = vmul.f32 %v2517_v61, %v11769_v1  ;;  %v3041_v1 = vstv %s12146_s28  ;;  %s12244_s28 = sld [smem:[#allocation10 + $0x61]] }
 0x657   : > { %2908 = vrot.lane.b32.xlu1 %v2903_v17, %s11042_s27  ;;  %10532 = vmatpush3.bf16.msk.msra.mxu1 %vm12079_vm15, %v10526_v7  ;;  %v2432_v8 = vadd.f32 %v2427_v39, %v2418_v34  ;;  %v2983_v7 = vstv %s12117_s16  ;;  %v12156_v39 = vld [vmem:[#allocation3] sm:$0xff]  ;;  %s12211_s16 = sld [smem:[#allocation10 + $0x5c]] }
 0x658   : > { %2920 = vrot.lane.b32.xlu0 %v2916_v4, %s11043_s26  ;;  %10003 = vmatprep.mubr.msk.f32.mxu1 %vm11048_vm4, %v11040_v0  ;;  %v2985_v54 = vmul.f32 %v2983_v7, %v11846_v22  ;;  %v2984_v59 = vmul.f32 %v2983_v7, %v11855_v28  ;;  %v3009_v22 = vmul.f32 %v12153_v2, %v3007_v3 }
 0x659   : > { %v2443_v9 = vpop.permute.xlu1 %2442  ;;  %10533 = vmatprep.subr.bf16.mxu1 %v11047_v42  ;;  %v3008_v4 = vmul.f32 %v12156_v39, %v3007_v3 }
 0x65a   : > { %v2447_v11 = vadd.f32 %v2443_v9, %v2433_v5  ;;  %10004 = vmatmul.mubr.msk.f32.vlgmr.msra.gmra.mrb[26].mxu1 %vm3932_vm7, %v11475_v23  ;;  %v2441_v13 = vpop.permute.xlu0 %2440  ;;  %v3021_v5 = vstv %s12138_s21  ;;  %v2518_v9 = vmul.f32 %v2517_v61, %v11772_v6  ;;  %s12233_s21 = sld [smem:[#allocation10 + $0x5f]] }
 0x65b   : > { %v2446_v14 = vadd.f32 %v2441_v13, %v2432_v8  ;;  %2922 = vrot.lane.b32.xlu1 %v2917_v10, %s11043_s26  ;;  %10010 = vmatprep.mubr.msk.f32.mxu1 %vm11048_vm4, %v11040_v0  ;;  %v3022_v47 = vmul.f32 %v12156_v39, %v3021_v5 }
 0x65c   : > { %2940 = vrot.lane.b32.xlu0 %v2936_v12, %s11042_s27  ;;  %v2453_v20 = vadd.f32 %v2451_v57, %v2447_v11  ;;  %v3023_v12 = vmul.f32 %v12153_v2, %v3021_v5  ;;  %10536 = vmatpush3.bf16.msk.msra.mxu1 %vm12358_vm0, %v11534_v27 }
 0x65d   : > { %v2463_v24 = vpop.permute.xlu1 %2462  ;;  %v2452_v26 = vadd.f32 %v2450_v18, %v2446_v14  ;;  %v2551_v14 = vstv %s12150_s25  ;;  %s12252_s25 = sld [smem:[#allocation11 + $0x1]]  ;;  %10537 = vmatprep.subr.bf16.mxu1 %v11047_v42 }
 0x65e   : > { %v2461_v48 = vpop.permute.xlu0 %2460  ;;  %v2467_v15 = vadd.f32 %v2463_v24, %v2453_v20  ;;  %v12176_v24 = vld [vmem:[#allocation3 + $0x9] sm:$0x3f] }
 0x65f   : > { %2956 = vrot.lane.b32.xlu1 %v2951_v56, %s11043_s26  ;;  %v2466_v35 = vadd.f32 %v2461_v48, %v2452_v26  ;;  %v3043_v26 = vmul.f32 %v12176_v24, %v3041_v1 }
 0x660   : > { %2954 = vrot.lane.b32.xlu0 %v2950_v29, %s11043_s26  ;;  %v12179_v29 = vld [vmem:[#allocation3 + $0x1] sm:$0xff] }
 0x661   : > { %v2477_v40 = vpop.permute.xlu1 %2476  ;;  %v3042_v32 = vmul.f32 %v12179_v29, %v3041_v1 }
 0x662   : > { %v2481_v31 = vadd.f32 %v2477_v40, %v2467_v15  ;;  %v2475_v43 = vpop.permute.xlu0 %2474  ;;  %v2553_v15 = vmul.f32 %v12182_v33, %v2551_v14 }
 0x663   : > { %v2480_v44 = vadd.f32 %v2475_v43, %v2466_v35  ;;  %2976 = vrot.lane.b32.xlu1 %v2971_v30, %s11042_s27  ;;  %v3055_v35 = vstv %s12161_s29  ;;  %v12189_v30 = vld [vmem:[#allocation3 + $0x12] sm:$0xff]  ;;  %s12258_s29 = sld [smem:[#allocation10 + $0x62]] }
 0x664   : > { %2974 = vrot.lane.b32.xlu0 %v2970_v45, %s11042_s27  ;;  %v2487_v16 = vadd.f32 %v2485_v50, %v2481_v31  ;;  %v2552_v31 = vmul.f32 %v12189_v30, %v2551_v14  ;;  %v3057_v7 = vmul.f32 %v12176_v24, %v3055_v35  ;;  %v12229_v14 = vld [vmem:[#allocation3 + $0x10] sm:$0xff] }
 0x665   : > { %v2497_v52 = vpop.permute.xlu1 %2496  ;;  %v2486_v53 = vadd.f32 %v2484_v51, %v2480_v44  ;;  %v3056_v51 = vmul.f32 %v12179_v29, %v3055_v35  ;;  %v12239_v35 = vld [vmem:[#allocation3 + $0x29] sm:$0x3f] }
 0x666   : > { %v2495_v58 = vpop.permute.xlu0 %2494  ;;  %v2501_v36 = vadd.f32 %v2497_v52, %v2487_v16  ;;  %v3075_v16 = vstv %s12169_s2  ;;  %v2585_v52 = vstv %s12173_s17  ;;  %s12262_s2 = sld [smem:[#allocation10 + $0x36]]  ;;  %s12271_s17 = sld [smem:[#allocation10 + $0x67]] }
 0x667   : > { %2990 = vrot.lane.b32.xlu1 %v2985_v54, %s11043_s26  ;;  %v2500_v62 = vadd.f32 %v2495_v58, %v2486_v53 }
 0x668   : > { %2988 = vrot.lane.b32.xlu0 %v2984_v59, %s11043_s26  ;;  %v12203_v59 = vld [vmem:[#allocation3 + $0xa] sm:$0x3f] }
 0x669   : > { %v2511_v63 = vpop.permute.xlu1 %2510  ;;  %v3077_v3 = vmul.f32 %v12203_v59, %v3075_v16 }
 0x66a   : > { %v2515_v34 = vadd.f32 %v2511_v63, %v2501_v36  ;;  %v2509_v17 = vpop.permute.xlu0 %2508 }
 0x66b   : > { %v2514_v8 = vadd.f32 %v2509_v17, %v2500_v62  ;;  %3014 = vrot.lane.b32.xlu1 %v3009_v22, %s11042_s27  ;;  %v12206_v62 = vld [vmem:[#allocation3 + $0x2] sm:$0xff]  ;;  %v3089_v22 = vstv %s12186_s22  ;;  %s12274_s22 = sld [smem:[#allocation10 + $0x64]] }
 0x66c   : > { %3012 = vrot.lane.b32.xlu0 %v3008_v4, %s11042_s27  ;;  %v2521_v10 = vadd.f32 %v2519_v38, %v2515_v34  ;;  %v3076_v63 = vmul.f32 %v12206_v62, %v3075_v16  ;;  %v2587_v34 = vmul.f32 %v2585_v52, %v11816_v49  ;;  %v2586_v4 = vmul.f32 %v2585_v52, %v11812_v37  ;;  %v12249_v16 = vld [vmem:[#allocation3 + $0x19] sm:$0x3f] }
 0x66d   : > { %v2531_v11 = vpop.permute.xlu1 %2530  ;;  %v2520_v13 = vadd.f32 %v2518_v9, %v2514_v8  ;;  %v3091_v9 = vmul.f32 %v12203_v59, %v3089_v22  ;;  %v3109_v49 = vstv %s12196_s24  ;;  %s12276_s24 = sld [smem:[#allocation10 + $0x39]] }
 0x66e   : > { %v2529_v57 = vpop.permute.xlu0 %2528  ;;  %v2535_v6 = vadd.f32 %v2531_v11, %v2521_v10  ;;  %v3090_v11 = vmul.f32 %v12206_v62, %v3089_v22 }
 0x66f   : > { %3028 = vrot.lane.b32.xlu1 %v3023_v12, %s11043_s26  ;;  %v2534_v18 = vadd.f32 %v2529_v57, %v2520_v13  ;;  %v2619_v13 = vstv %s12201_s23  ;;  %v12226_v57 = vld [vmem:[#allocation3 + $0x18] sm:$0x3f]  ;;  %s12285_s23 = sld [smem:[#allocation10 + $0x65]] }
 0x670   : > { %3026 = vrot.lane.b32.xlu0 %v3022_v47, %s11043_s26  ;;  %v3111_v47 = vmul.f32 %v12226_v57, %v3109_v49 }
 0x671   : > { %v2545_v20 = vpop.permute.xlu1 %2544 }
 0x672   : > { %v2549_v56 = vadd.f32 %v2545_v20, %v2535_v6  ;;  %v2543_v48 = vpop.permute.xlu0 %2542  ;;  %v3110_v6 = vmul.f32 %v12229_v14, %v3109_v49 }
 0x673   : > { %v2548_v40 = vadd.f32 %v2543_v48, %v2534_v18  ;;  %3048 = vrot.lane.b32.xlu1 %v3043_v26, %s11042_s27  ;;  %v3123_v18 = vstv %s12211_s16  ;;  %v2620_v26 = vmul.f32 %v2619_v13, %v11832_v41  ;;  %s12296_s16 = sld [smem:[#allocation10 + $0x3c]] }
 0x674   : > { %3046 = vrot.lane.b32.xlu0 %v3042_v32, %s11042_s27  ;;  %v2555_v43 = vadd.f32 %v2553_v15, %v2549_v56  ;;  %v3125_v15 = vmul.f32 %v12226_v57, %v3123_v18 }
 0x675   : > { %v2565_v45 = vpop.permute.xlu1 %2564  ;;  %v2554_v50 = vadd.f32 %v2552_v31, %v2548_v40  ;;  %v2621_v40 = vmul.f32 %v12239_v35, %v2619_v13  ;;  %v2687_v13 = vstv %s12252_s25  ;;  %s12337_s25 = sld [smem:[#allocation10 + $0x6d]] }
 0x676   : > { %v2563_v44 = vpop.permute.xlu0 %2562  ;;  %v2569_v53 = vadd.f32 %v2565_v45, %v2555_v43  ;;  %v3124_v45 = vmul.f32 %v12229_v14, %v3123_v18  ;;  %v3191_v18 = vstv %s12258_s29  ;;  %s12341_s29 = sld [smem:[#allocation10 + $0x42]] }
 0x677   : > { %3062 = vrot.lane.b32.xlu1 %v3057_v7, %s11043_s26  ;;  %v2568_v54 = vadd.f32 %v2563_v44, %v2554_v50  ;;  %v3143_v50 = vstv %s12219_s14  ;;  %v2653_v7 = vstv %s12224_s1  ;;  %s12306_s14 = sld [smem:[#allocation10 + $0x68]]  ;;  %s12316_s1 = sld [smem:[#allocation10 + $0x6a]] }
 0x678   : > { %3060 = vrot.lane.b32.xlu0 %v3056_v51, %s11043_s26  ;;  %v3145_v52 = vmul.f32 %v12249_v16, %v3143_v50 }
 0x679   : > { %v2579_v58 = vpop.permute.xlu1 %2578 }
 0x67a   : > { %v2583_v61 = vadd.f32 %v2579_v58, %v2569_v53  ;;  %v2577_v36 = vpop.permute.xlu0 %2576  ;;  %v12254_v58 = vld [vmem:[#allocation3 + $0x11] sm:$0xff] }
 0x67b   : > { %v2582_v17 = vadd.f32 %v2577_v36, %v2568_v54  ;;  %3082 = vrot.lane.b32.xlu1 %v3077_v3, %s11042_s27  ;;  %v3144_v3 = vmul.f32 %v12254_v58, %v3143_v50  ;;  %v3245_v50 = vstv %s12271_s17  ;;  %s12373_s17 = sld [smem:[#allocation10 + $0x70]] }
 0x67c   : > { %3080 = vrot.lane.b32.xlu0 %v3076_v63, %s11042_s27  ;;  %v2589_v38 = vadd.f32 %v2587_v34, %v2583_v61  ;;  %v3157_v61 = vstv %s12233_s21  ;;  %v2654_v63 = vmul.f32 %v2653_v7, %v11855_v28  ;;  %v12265_v34 = vld [vmem:[#allocation3 + $0x2a] sm:$0x3f]  ;;  %v3177_v28 = vstv %s12244_s28  ;;  %s12320_s21 = sld [smem:[#allocation10 + $0x3f]]  ;;  %s12329_s28 = sld [smem:[#allocation10 + $0x6b]] }
 0x67d   : > { %v2633_v5 = vpop.permute.xlu1 %2632  ;;  %v2588_v8 = vadd.f32 %v2586_v4, %v2582_v17  ;;  %v2655_v17 = vmul.f32 %v12265_v34, %v2653_v7 }
 0x67e   : > { %v2597_v10 = vpop.permute.xlu0 %2596 }
 0x67f   : > { %3096 = vrot.lane.b32.xlu1 %v3091_v9, %s11043_s26  ;;  %v2602_v37 = vadd.f32 %v2597_v10, %v2588_v8  ;;  %v3158_v10 = vmul.f32 %v12254_v58, %v3157_v61 }
 0x680   : > { %3094 = vrot.lane.b32.xlu0 %v3090_v11, %s11043_s26 }
 0x681   : > { %v2599_v12 = vpop.permute.xlu1 %2598 }
 0x682   : > { %v2611_v1 = vpop.permute.xlu0 %2610  ;;  %v2603_v56 = vadd.f32 %v2599_v12, %v2589_v38  ;;  %v3179_v12 = vmul.f32 %v12182_v33, %v3177_v28 }
 0x683   : > { %v2616_v20 = vadd.f32 %v2611_v1, %v2602_v37  ;;  %3116 = vrot.lane.b32.xlu1 %v3111_v47, %s11042_s27 }
 0x684   : > { %3114 = vrot.lane.b32.xlu0 %v3110_v6, %s11042_s27  ;;  %v3178_v6 = vmul.f32 %v12189_v30, %v3177_v28 }
 0x685   : > { %v2613_v48 = vpop.permute.xlu1 %2612  ;;  %v2622_v32 = vadd.f32 %v2620_v26, %v2616_v20  ;;  %v2693_v26 = vstv %s12262_s2  ;;  %s12350_s2 = sld [smem:[#allocation10 + $0x6e]] }
 0x686   : > { %v2617_v31 = vadd.f32 %v2613_v48, %v2603_v56  ;;  %v2631_v43 = vpop.permute.xlu0 %2630  ;;  %v2694_v7 = vmul.f32 %v12156_v39, %v2693_v26 }
 0x687   : > { %3130 = vrot.lane.b32.xlu1 %v3125_v15, %s11043_s26  ;;  %v2636_v44 = vadd.f32 %v2631_v43, %v2622_v32  ;;  %v3193_v15 = vmul.f32 %v12182_v33, %v3191_v18 }
 0x688   : > { %v2623_v41 = vadd.f32 %v2621_v40, %v2617_v31  ;;  %3128 = vrot.lane.b32.xlu0 %v3124_v45, %s11043_s26  ;;  %v2695_v31 = vmul.f32 %v12153_v2, %v2693_v26  ;;  %v3192_v45 = vmul.f32 %v12189_v30, %v3191_v18 }
 0x689   : > { %v2647_v51 = vpop.permute.xlu1 %2646 }
 0x68a   : > { %v2637_v53 = vadd.f32 %v2633_v5, %v2623_v41  ;;  %v2645_v54 = vpop.permute.xlu0 %2644  ;;  %v3159_v5 = vmul.f32 %v12249_v16, %v3157_v61  ;;  %v3247_v61 = vmul.f32 %v12239_v35, %v3245_v50 }
 0x68b   : > { %v2650_v36 = vadd.f32 %v2645_v54, %v2636_v44  ;;  %3150 = vrot.lane.b32.xlu1 %v3145_v52, %s11042_s27  ;;  %v3211_v44 = vstv %s12274_s22  ;;  %s12378_s22 = sld [smem:[#allocation10 + $0x45]] }
 0x68c   : > { %v2651_v22 = vadd.f32 %v2647_v51, %v2637_v53  ;;  %3148 = vrot.lane.b32.xlu0 %v3144_v3, %s11042_s27  ;;  %v2725_v51 = vstv %s12276_s24  ;;  %s12385_s24 = sld [smem:[#allocation10 + $0x71]] }
 0x68d   : > { %v2667_v4 = vpop.permute.xlu1 %2666  ;;  %v2656_v38 = vadd.f32 %v2654_v63, %v2650_v36 }
 0x68e   : > { %v2657_v8 = vadd.f32 %v2655_v17, %v2651_v22  ;;  %v2665_v9 = vpop.permute.xlu0 %2664  ;;  %v12302_v22 = vld [vmem:[#allocation3 + $0x20] sm:$0xff] }
 0x68f   : > { %3164 = vrot.lane.b32.xlu1 %v3159_v5, %s11043_s26  ;;  %v2670_v49 = vadd.f32 %v2665_v9, %v2656_v38  ;;  %v3212_v17 = vmul.f32 %v12302_v22, %v3211_v44  ;;  %v2726_v5 = vmul.f32 %v12179_v29, %v2725_v51 }
 0x690   : > { %v2671_v11 = vadd.f32 %v2667_v4, %v2657_v8  ;;  %3162 = vrot.lane.b32.xlu0 %v3158_v10, %s11043_s26  ;;  %v2727_v4 = vmul.f32 %v12176_v24, %v2725_v51  ;;  %v3225_v8 = vstv %s12285_s23  ;;  %v3279_v51 = vstv %s12316_s1  ;;  %s12393_s23 = sld [smem:[#allocation10 + $0x73]]  ;;  %s12412_s1 = sld [smem:[#allocation10 + $0x76]] }
 0x691   : > { %v2681_v37 = vpop.permute.xlu1 %2680 }
 0x692   : > { %v2685_v47 = vadd.f32 %v2681_v37, %v2671_v11  ;;  %v2679_v1 = vpop.permute.xlu0 %2678  ;;  %v12312_v11 = vld [vmem:[#allocation3 + $0x28] sm:$0x3f]  ;;  %v3226_v37 = vmul.f32 %v12302_v22, %v3225_v8 }
 0x693   : > { %v2684_v20 = vadd.f32 %v2679_v1, %v2670_v49  ;;  %3184 = vrot.lane.b32.xlu1 %v3179_v12, %s11042_s27  ;;  %v3213_v49 = vmul.f32 %v12312_v11, %v3211_v44  ;;  %v2759_v12 = vstv %s12296_s16  ;;  %v3227_v18 = vmul.f32 %v12312_v11, %v3225_v8  ;;  %s12397_s16 = sld [smem:[#allocation10 + $0x48]] }
 0x694   : > { %v2689_v56 = vadd.f32 %v2687_v13, %v2685_v47  ;;  %3182 = vrot.lane.b32.xlu0 %v3178_v6, %s11042_s27  ;;  %v3293_v8 = vstv %s12329_s28  ;;  %s12423_s28 = sld [smem:[#allocation10 + $0x77]] }
 0x695   : > { %v2688_v48 = vadd.f32 %v2687_v13, %v2684_v20  ;;  %v2705_v32 = vpop.permute.xlu1 %2704 }
 0x696   : > { %v2691_v40 = vmax.f32 %v2689_v56, 0.0  ;;  %v2703_v43 = vpop.permute.xlu0 %2702  ;;  %v2709_v52 = vadd.f32 %v2705_v32, %v2695_v31  ;;  %v12324_v56 = vld [vmem:[#allocation3 + $0x21] sm:$0xff]  ;;  %v2761_v32 = vmul.f32 %v12203_v59, %v2759_v12  ;;  %v2760_v31 = vmul.f32 %v12206_v62, %v2759_v12 }
 0x697   : > { %v2690_v41 = vmax.f32 %v2688_v48, 0.0  ;;  %3198 = vrot.lane.b32.xlu1 %v3193_v15, %s11043_s26  ;;  %v2708_v54 = vadd.f32 %v2703_v43, %v2694_v7  ;;  %v3246_v48 = vmul.f32 %v12324_v56, %v3245_v50  ;;  %v3259_v15 = vstv %s12306_s14  ;;  %s12404_s14 = sld [smem:[#allocation10 + $0x74]] }
 0x698   : > { %3196 = vrot.lane.b32.xlu0 %v3192_v45, %s11043_s26  ;;  %v3261_v7 = vmul.f32 %v12239_v35, %v3259_v15  ;;  %v3260_v50 = vmul.f32 %v12324_v56, %v3259_v15  ;;  %v3295_v12 = vmul.f32 %v12265_v34, %v3293_v8 }
 0x699   : > { %v12299_v53 = vpack.c.bf16 %v2691_v40, %v2690_v41  ;;  %v2719_v3 = vpop.permute.xlu1 %2718 }
 0x69a   : > { %v2723_v36 = vadd.f32 %v2719_v3, %v2709_v52  ;;  %v2717_v63 = vpop.permute.xlu0 %2716  ;;  %v2793_v52 = vstv %s12320_s21  ;;  %s12417_s21 = sld [smem:[#allocation10 + $0x4b]] }
 0x69b   : > { %v2722_v38 = vadd.f32 %v2717_v63, %v2708_v54  ;;  %3252 = vrot.lane.b32.xlu1 %v3247_v61, %s11042_s27 }
 0x69c   : > { %3216 = vrot.lane.b32.xlu0 %v3212_v17, %s11042_s27  ;;  %v2729_v9 = vadd.f32 %v2727_v4, %v2723_v36  ;;  %v3281_v36 = vmul.f32 %v12265_v34, %v3279_v51  ;;  %v12345_v4 = vld [vmem:[#allocation3 + $0x22] sm:$0xff] }
 0x69d   : > { %v2739_v10 = vpop.permute.xlu1 %2738  ;;  %v2728_v28 = vadd.f32 %v2726_v5, %v2722_v38  ;;  %v3280_v38 = vmul.f32 %v12345_v4, %v3279_v51  ;;  %v2795_v5 = vmul.f32 %v12226_v57, %v2793_v52 }
 0x69e   : > { %v2737_v13 = vpop.permute.xlu0 %2736  ;;  %v2743_v47 = vadd.f32 %v2739_v10, %v2729_v9  ;;  %v2794_v10 = vmul.f32 %v12229_v14, %v2793_v52 }
 0x69f   : > { %3218 = vrot.lane.b32.xlu1 %v3213_v49, %s11042_s27  ;;  %v2742_v1 = vadd.f32 %v2737_v13, %v2728_v28 }
 0x6a0   : > { %3230 = vrot.lane.b32.xlu0 %v3226_v37, %s11043_s26 }
 0x6a1   : > { %v2753_v6 = vpop.permute.xlu1 %2752 }
 0x6a2   : > { %v2757_v20 = vadd.f32 %v2753_v6, %v2743_v47  ;;  %v2751_v26 = vpop.permute.xlu0 %2750  ;;  %v3294_v47 = vmul.f32 %v12345_v4, %v3293_v8  ;;  %v2827_v6 = vstv %s12341_s29  ;;  %s12436_s29 = sld [smem:[#allocation10 + $0x4e]] }
 0x6a3   : > { %v2756_v40 = vadd.f32 %v2751_v26, %v2742_v1  ;;  %3232 = vrot.lane.b32.xlu1 %v3227_v18, %s11043_s26  ;;  %v3317_v1 = vstv %s12337_s25  ;;  %s12431_s25 = sld [smem:[#allocation10 + $0x79]] }
 0x6a4   : > { %3250 = vrot.lane.b32.xlu0 %v3246_v48, %s11042_s27  ;;  %v2763_v43 = vadd.f32 %v2761_v32, %v2757_v20  ;;  %v3319_v48 = vmul.f32 %v12153_v2, %v3317_v1 }
 0x6a5   : > { %v2773_v45 = vpop.permute.xlu1 %2772  ;;  %v2762_v41 = vadd.f32 %v2760_v31, %v2756_v40  ;;  %v3318_v40 = vmul.f32 %v12156_v39, %v3317_v1  ;;  %v2829_v31 = vmul.f32 %v12249_v16, %v2827_v6 }
 0x6a6   : > { %v2771_v44 = vpop.permute.xlu0 %2770  ;;  %v2777_v54 = vadd.f32 %v2773_v45, %v2763_v43  ;;  %v3331_v43 = vstv %s12350_s2  ;;  %s12441_s2 = sld [smem:[#allocation10 + $0x7a]] }
 0x6a7   : > { %3266 = vrot.lane.b32.xlu1 %v3261_v7, %s11043_s26  ;;  %v2776_v3 = vadd.f32 %v2771_v44, %v2762_v41  ;;  %v2828_v41 = vmul.f32 %v12254_v58, %v2827_v6  ;;  %v3333_v51 = vmul.f32 %v12153_v2, %v3331_v43 }
 0x6a8   : > { %3264 = vrot.lane.b32.xlu0 %v3260_v50, %s11043_s26 }
 0x6a9   : > { %v2787_v61 = vpop.permute.xlu1 %2786 }
 0x6aa   : > { %v2791_v63 = vadd.f32 %v2787_v61, %v2777_v54  ;;  %v2785_v17 = vpop.permute.xlu0 %2784  ;;  %v3332_v54 = vmul.f32 %v12156_v39, %v3331_v43  ;;  %v2861_v61 = vstv %s12378_s22  ;;  %s12456_s22 = sld [smem:[#allocation11 + $0x2]] }
 0x6ab   : > { %v2790_v9 = vadd.f32 %v2785_v17, %v2776_v3  ;;  %3286 = vrot.lane.b32.xlu1 %v3281_v36, %s11042_s27  ;;  %v3351_v3 = vstv %s12373_s17  ;;  %s12450_s17 = sld [smem:[#allocation10 + $0x7c]] }
 0x6ac   : > { %3284 = vrot.lane.b32.xlu0 %v3280_v38, %s11042_s27  ;;  %v2797_v49 = vadd.f32 %v2795_v5, %v2791_v63  ;;  %v3353_v38 = vmul.f32 %v12176_v24, %v3351_v3 }
 0x6ad   : > { %v2807_v13 = vpop.permute.xlu1 %2806  ;;  %v2796_v37 = vadd.f32 %v2794_v10, %v2790_v9  ;;  %v3352_v9 = vmul.f32 %v12179_v29, %v3351_v3  ;;  %v2863_v10 = vmul.f32 %v12182_v33, %v2861_v61 }
 0x6ae   : > { %v2805_v21 = vpop.permute.xlu0 %2804  ;;  %v2811_v18 = vadd.f32 %v2807_v13, %v2797_v49  ;;  %v3365_v49 = vstv %s12385_s24  ;;  %s12460_s24 = sld [smem:[#allocation10 + $0x7d]] }
 0x6af   : > { %3300 = vrot.lane.b32.xlu1 %v3295_v12, %s11043_s26  ;;  %v2810_v20 = vadd.f32 %v2805_v21, %v2796_v37  ;;  %v2862_v37 = vmul.f32 %v12189_v30, %v2861_v61  ;;  %v3367_v1 = vmul.f32 %v12176_v24, %v3365_v49 }
 0x6b0   : > { %3298 = vrot.lane.b32.xlu0 %v3294_v47, %s11043_s26 }
 0x6b1   : > { %v2821_v26 = vpop.permute.xlu1 %2820 }
 0x6b2   : > { %v2825_v32 = vadd.f32 %v2821_v26, %v2811_v18  ;;  %v2819_v15 = vpop.permute.xlu0 %2818  ;;  %v3366_v18 = vmul.f32 %v12179_v29, %v3365_v49  ;;  %v2895_v26 = vstv %s12397_s16  ;;  %v3433_v49 = vstv %s12423_s28  ;;  %s12471_s16 = sld [smem:[#allocation10 + $0x82]]  ;;  %s12496_s28 = sld [smem:[#allocation10 + $0x57]] }
 0x6b3   : > { %v2824_v45 = vadd.f32 %v2819_v15, %v2810_v20  ;;  %3324 = vrot.lane.b32.xlu1 %v3319_v48, %s11042_s27  ;;  %v3385_v20 = vstv %s12393_s23  ;;  %s12464_s23 = sld [smem:[#allocation10 + $0x51]] }
 0x6b4   : > { %3322 = vrot.lane.b32.xlu0 %v3318_v40, %s11042_s27  ;;  %v2831_v7 = vadd.f32 %v2829_v31, %v2825_v32  ;;  %v3387_v40 = vmul.f32 %v12203_v59, %v3385_v20 }
 0x6b5   : > { %v2841_v44 = vpop.permute.xlu1 %2840  ;;  %v2830_v50 = vadd.f32 %v2828_v41, %v2824_v45  ;;  %v3386_v45 = vmul.f32 %v12206_v62, %v3385_v20  ;;  %v3399_v41 = vstv %s12404_s14  ;;  %s12474_s14 = sld [smem:[#allocation10 + $0x7f]] }
 0x6b6   : > { %v2839_v52 = vpop.permute.xlu0 %2838  ;;  %v2845_v36 = vadd.f32 %v2841_v44, %v2831_v7  ;;  %v2897_v7 = vmul.f32 %v12312_v11, %v2895_v26  ;;  %v3401_v3 = vmul.f32 %v12203_v59, %v3399_v41 }
 0x6b7   : > { %3338 = vrot.lane.b32.xlu1 %v3333_v51, %s11043_s26  ;;  %v2844_v63 = vadd.f32 %v2839_v52, %v2830_v50  ;;  %v2896_v50 = vmul.f32 %v12302_v22, %v2895_v26  ;;  %v3434_v26 = vmul.f32 %v12229_v14, %v3433_v49 }
 0x6b8   : > { %3336 = vrot.lane.b32.xlu0 %v3332_v54, %s11043_s26 }
 0x6b9   : > { %v2855_v17 = vpop.permute.xlu1 %2854 }
 0x6ba   : > { %v2859_v5 = vadd.f32 %v2855_v17, %v2845_v36  ;;  %v2853_v8 = vpop.permute.xlu0 %2852  ;;  %v3400_v36 = vmul.f32 %v12206_v62, %v3399_v41  ;;  %v2929_v17 = vstv %s12417_s21  ;;  %s12485_s21 = sld [smem:[#allocation10 + $0x80]] }
 0x6bb   : > { %v2858_v13 = vadd.f32 %v2853_v8, %v2844_v63  ;;  %3358 = vrot.lane.b32.xlu1 %v3353_v38, %s11042_s27  ;;  %v3419_v63 = vstv %s12412_s1  ;;  %s12476_s1 = sld [smem:[#allocation10 + $0x54]] }
 0x6bc   : > { %3356 = vrot.lane.b32.xlu0 %v3352_v9, %s11042_s27  ;;  %v2865_v12 = vadd.f32 %v2863_v10, %v2859_v5  ;;  %v3421_v8 = vmul.f32 %v12226_v57, %v3419_v63  ;;  %v3420_v10 = vmul.f32 %v12229_v14, %v3419_v63 }
 0x6bd   : > { %v2875_v21 = vpop.permute.xlu1 %2874  ;;  %v2864_v47 = vadd.f32 %v2862_v37, %v2858_v13  ;;  %v2930_v37 = vmul.f32 %v12324_v56, %v2929_v17 }
 0x6be   : > { %v2873_v6 = vpop.permute.xlu0 %2872  ;;  %v2879_v48 = vadd.f32 %v2875_v21, %v2865_v12 }
 0x6bf   : > { %3372 = vrot.lane.b32.xlu1 %v3367_v1, %s11043_s26  ;;  %v2878_v32 = vadd.f32 %v2873_v6, %v2864_v47  ;;  %v3435_v1 = vmul.f32 %v12226_v57, %v3433_v49  ;;  %v2931_v6 = vmul.f32 %v12239_v35, %v2929_v17 }
 0x6c0   : > { %3370 = vrot.lane.b32.xlu0 %v3366_v18, %s11043_s26 }
 0x6c1   : > { %v2889_v15 = vpop.permute.xlu1 %2888 }
 0x6c2   : > { %v2893_v31 = vadd.f32 %v2889_v15, %v2879_v48  ;;  %v2887_v43 = vpop.permute.xlu0 %2886  ;;  %v3453_v48 = vstv %s12431_s25  ;;  %v2963_v15 = vstv %s12436_s29  ;;  %s12504_s25 = sld [smem:[#allocation10 + $0x83]]  ;;  %s12512_s29 = sld [smem:[#allocation10 + $0x85]] }
 0x6c3   : > { %v2892_v44 = vadd.f32 %v2887_v43, %v2878_v32  ;;  %3392 = vrot.lane.b32.xlu1 %v3387_v40, %s11042_s27  ;;  %v3455_v43 = vmul.f32 %v12249_v16, %v3453_v48 }
 0x6c4   : > { %3390 = vrot.lane.b32.xlu0 %v3386_v45, %s11042_s27  ;;  %v2899_v51 = vadd.f32 %v2897_v7, %v2893_v31  ;;  %v3454_v7 = vmul.f32 %v12254_v58, %v3453_v48 }
 0x6c5   : > { %v2943_v52 = vpop.permute.xlu1 %2942  ;;  %v2898_v54 = vadd.f32 %v2896_v50, %v2892_v44  ;;  %v3467_v44 = vstv %s12441_s2  ;;  %s12516_s2 = sld [smem:[#allocation10 + $0x5a]] }
 0x6c6   : > { %v2907_v61 = vpop.permute.xlu0 %2906 }
 0x6c7   : > { %3406 = vrot.lane.b32.xlu1 %v3401_v3, %s11043_s26  ;;  %v2912_v38 = vadd.f32 %v2907_v61, %v2898_v54 }
 0x6c8   : > { %3404 = vrot.lane.b32.xlu0 %v3400_v36, %s11043_s26  ;;  %v3469_v36 = vmul.f32 %v12249_v16, %v3467_v44 }
 0x6c9   : > { %v2909_v5 = vpop.permute.xlu1 %2908 }
 0x6ca   : > { %v2921_v9 = vpop.permute.xlu0 %2920  ;;  %v2913_v12 = vadd.f32 %v2909_v5, %v2899_v51  ;;  %v2964_v51 = vmul.f32 %v12345_v4, %v2963_v15  ;;  %v3487_v5 = vstv %s12450_s17  ;;  %s12523_s17 = sld [smem:[#allocation10 + $0x86]] }
 0x6cb   : > { %v2926_v13 = vadd.f32 %v2921_v9, %v2912_v38  ;;  %3426 = vrot.lane.b32.xlu1 %v3421_v8, %s11042_s27  ;;  %v3468_v38 = vmul.f32 %v12254_v58, %v3467_v44  ;;  %v3035_v44 = vstv %s12476_s1  ;;  %s12561_s1 = sld [smem:[#allocation10 + $0x8c]] }
 0x6cc   : > { %3424 = vrot.lane.b32.xlu0 %v3420_v10, %s11042_s27  ;;  %v2997_v10 = vstv %s12456_s22  ;;  %s12531_s22 = sld [smem:[#allocation10 + $0x88]] }
 0x6cd   : > { %v2923_v21 = vpop.permute.xlu1 %2922  ;;  %v2932_v47 = vadd.f32 %v2930_v37, %v2926_v13  ;;  %v3489_v13 = vmul.f32 %v12182_v33, %v3487_v5 }
 0x6ce   : > { %v2927_v18 = vadd.f32 %v2923_v21, %v2913_v12  ;;  %v2941_v20 = vpop.permute.xlu0 %2940  ;;  %v3488_v21 = vmul.f32 %v12189_v30, %v3487_v5  ;;  %v3036_v5 = vmul.f32 %v12179_v29, %v3035_v44 }
 0x6cf   : > { %3440 = vrot.lane.b32.xlu1 %v3435_v1, %s11043_s26  ;;  %v2946_v40 = vadd.f32 %v2941_v20, %v2932_v47  ;;  %v3501_v47 = vstv %s12460_s24  ;;  %s12535_s24 = sld [smem:[#allocation10 + $0x5d]] }
 0x6d0   : > { %v2933_v32 = vadd.f32 %v2931_v6, %v2927_v18  ;;  %3438 = vrot.lane.b32.xlu0 %v3434_v26, %s11043_s26  ;;  %v3003_v6 = vstv %s12464_s23  ;;  %v3503_v48 = vmul.f32 %v12182_v33, %v3501_v47  ;;  %s12542_s23 = sld [smem:[#allocation10 + $0x89]] }
 0x6d1   : > { %v2957_v31 = vpop.permute.xlu1 %2956 }
 0x6d2   : > { %v2947_v45 = vadd.f32 %v2943_v52, %v2933_v32  ;;  %v2955_v41 = vpop.permute.xlu0 %2954  ;;  %v2965_v52 = vmul.f32 %v12265_v34, %v2963_v15  ;;  %v3005_v15 = vmul.f32 %v12153_v2, %v3003_v6 }
 0x6d3   : > { %v2960_v50 = vadd.f32 %v2955_v41, %v2946_v40  ;;  %3460 = vrot.lane.b32.xlu1 %v3455_v43, %s11042_s27  ;;  %v3555_v43 = vstv %s12471_s16  ;;  %v3004_v41 = vmul.f32 %v12156_v39, %v3003_v6  ;;  %s12550_s16 = sld [smem:[#allocation10 + $0x8b]] }
 0x6d4   : > { %v2961_v54 = vadd.f32 %v2957_v31, %v2947_v45  ;;  %3458 = vrot.lane.b32.xlu0 %v3454_v7, %s11042_s27  ;;  %v3502_v31 = vmul.f32 %v12189_v30, %v3501_v47  ;;  %v3521_v7 = vstv %s12474_s14  ;;  %s12554_s14 = sld [smem:[#allocation10 + $0x60]] }
 0x6d5   : > { %v2977_v3 = vpop.permute.xlu1 %2976  ;;  %v2966_v61 = vadd.f32 %v2964_v51, %v2960_v50 }
 0x6d6   : > { %v2967_v63 = vadd.f32 %v2965_v52, %v2961_v54  ;;  %v2975_v17 = vpop.permute.xlu0 %2974 }
 0x6d7   : > { %3474 = vrot.lane.b32.xlu1 %v3469_v36, %s11043_s26  ;;  %v2980_v9 = vadd.f32 %v2975_v17, %v2966_v61  ;;  %v3037_v17 = vmul.f32 %v12176_v24, %v3035_v44 }
 0x6d8   : > { %v2981_v8 = vadd.f32 %v2977_v3, %v2967_v63  ;;  %3472 = vrot.lane.b32.xlu0 %v3468_v38, %s11043_s26  ;;  %v3557_v3 = vmul.f32 %v12239_v35, %v3555_v43  ;;  %v3522_v63 = vmul.f32 %v12302_v22, %v3521_v7 }
 0x6d9   : > { %v2991_v49 = vpop.permute.xlu1 %2990 }
 0x6da   : > { %v2995_v37 = vadd.f32 %v2991_v49, %v2981_v8  ;;  %v2989_v12 = vpop.permute.xlu0 %2988  ;;  %v3535_v8 = vstv %s12485_s21  ;;  %s12569_s21 = sld [smem:[#allocation10 + $0x8e]] }
 0x6db   : > { %v2994_v1 = vadd.f32 %v2989_v12, %v2980_v9  ;;  %3494 = vrot.lane.b32.xlu1 %v3489_v13, %s11042_s27  ;;  %v3523_v13 = vmul.f32 %v12312_v11, %v3521_v7  ;;  %v3536_v12 = vmul.f32 %v12302_v22, %v3535_v8 }
 0x6dc   : > { %v2999_v18 = vadd.f32 %v2997_v10, %v2995_v37  ;;  %3492 = vrot.lane.b32.xlu0 %v3488_v21, %s11042_s27  ;;  %v3069_v21 = vstv %s12496_s28  ;;  %s12573_s28 = sld [smem:[#allocation10 + $0x63]] }
 0x6dd   : > { %v2998_v20 = vadd.f32 %v2997_v10, %v2994_v1  ;;  %v3015_v26 = vpop.permute.xlu1 %3014 }
 0x6de   : > { %v3001_v32 = vmax.f32 %v2999_v18, 0.0  ;;  %v3013_v40 = vpop.permute.xlu0 %3012  ;;  %v3019_v50 = vadd.f32 %v3015_v26, %v3005_v15  ;;  %v3537_v18 = vmul.f32 %v12312_v11, %v3535_v8  ;;  %v3569_v15 = vstv %s12504_s25  ;;  %s12580_s25 = sld [smem:[#allocation10 + $0x8f]] }
 0x6df   : > { %v3000_v45 = vmax.f32 %v2998_v20, 0.0  ;;  %3508 = vrot.lane.b32.xlu1 %v3503_v48, %s11043_s26  ;;  %v3018_v54 = vadd.f32 %v3013_v40, %v3004_v41  ;;  %v3556_v48 = vmul.f32 %v12324_v56, %v3555_v43  ;;  %v3571_v44 = vmul.f32 %v12239_v35, %v3569_v15 }
 0x6e0   : > { %3506 = vrot.lane.b32.xlu0 %v3502_v31, %s11043_s26  ;;  %v3070_v31 = vmul.f32 %v12206_v62, %v3069_v21  ;;  %v3570_v43 = vmul.f32 %v12324_v56, %v3569_v15 }
 0x6e1   : > { %v12499_v51 = vpack.c.bf16 %v3001_v32, %v3000_v45  ;;  %v3029_v52 = vpop.permute.xlu1 %3028  ;;  %v3071_v32 = vmul.f32 %v12203_v59, %v3069_v21 }
 0x6e2   : > { %v3033_v61 = vadd.f32 %v3029_v52, %v3019_v50  ;;  %v3027_v36 = vpop.permute.xlu0 %3026  ;;  %v3103_v52 = vstv %s12516_s2  ;;  %s12593_s2 = sld [smem:[#allocation10 + $0x66]] }
 0x6e3   : > { %v3032_v38 = vadd.f32 %v3027_v36, %v3018_v54  ;;  %3562 = vrot.lane.b32.xlu1 %v3557_v3, %s11042_s27  ;;  %v3589_v54 = vstv %s12512_s29  ;;  %v3105_v8 = vmul.f32 %v12226_v57, %v3103_v52  ;;  %s12588_s29 = sld [smem:[#allocation10 + $0x91]] }
 0x6e4   : > { %3526 = vrot.lane.b32.xlu0 %v3522_v63, %s11042_s27  ;;  %v3039_v9 = vadd.f32 %v3037_v17, %v3033_v61  ;;  %v3591_v63 = vmul.f32 %v12265_v34, %v3589_v54 }
 0x6e5   : > { %v3049_v10 = vpop.permute.xlu1 %3048  ;;  %v3038_v49 = vadd.f32 %v3036_v5, %v3032_v38  ;;  %v3590_v5 = vmul.f32 %v12345_v4, %v3589_v54 }
 0x6e6   : > { %v3047_v37 = vpop.permute.xlu0 %3046  ;;  %v3053_v47 = vadd.f32 %v3049_v10, %v3039_v9  ;;  %v3603_v9 = vstv %s12523_s17  ;;  %s12599_s17 = sld [smem:[#allocation10 + $0x92]] }
 0x6e7   : > { %3528 = vrot.lane.b32.xlu1 %v3523_v13, %s11042_s27  ;;  %v3052_v1 = vadd.f32 %v3047_v37, %v3038_v49  ;;  %v3104_v49 = vmul.f32 %v12229_v14, %v3103_v52  ;;  %v3605_v21 = vmul.f32 %v12265_v34, %v3603_v9 }
 0x6e8   : > { %3540 = vrot.lane.b32.xlu0 %v3536_v12, %s11043_s26 }
 0x6e9   : > { %v3063_v6 = vpop.permute.xlu1 %3062 }
 0x6ea   : > { %v3067_v20 = vadd.f32 %v3063_v6, %v3053_v47  ;;  %v3061_v26 = vpop.permute.xlu0 %3060  ;;  %v3627_v6 = vstv %s12531_s22  ;;  %s12607_s22 = sld [smem:[#allocation10 + $0x94]] }
 0x6eb   : > { %v3066_v40 = vadd.f32 %v3061_v26, %v3052_v1  ;;  %3542 = vrot.lane.b32.xlu1 %v3537_v18, %s11043_s26  ;;  %v3604_v1 = vmul.f32 %v12345_v4, %v3603_v9  ;;  %v3137_v18 = vstv %s12535_s24  ;;  %s12612_s24 = sld [smem:[#allocation10 + $0x69]] }
 0x6ec   : > { %3560 = vrot.lane.b32.xlu0 %v3556_v48, %s11042_s27  ;;  %v3073_v45 = vadd.f32 %v3071_v32, %v3067_v20  ;;  %v3629_v32 = vmul.f32 %v12153_v2, %v3627_v6 }
 0x6ed   : > { %v3083_v41 = vpop.permute.xlu1 %3082  ;;  %v3072_v7 = vadd.f32 %v3070_v31, %v3066_v40  ;;  %v3628_v31 = vmul.f32 %v12156_v39, %v3627_v6 }
 0x6ee   : > { %v3081_v50 = vpop.permute.xlu0 %3080  ;;  %v3087_v3 = vadd.f32 %v3083_v41, %v3073_v45  ;;  %v3139_v45 = vmul.f32 %v12249_v16, %v3137_v18  ;;  %v3641_v41 = vstv %s12542_s23  ;;  %s12617_s23 = sld [smem:[#allocation10 + $0x95]] }
 0x6ef   : > { %3576 = vrot.lane.b32.xlu1 %v3571_v44, %s11043_s26  ;;  %v3086_v61 = vadd.f32 %v3081_v50, %v3072_v7  ;;  %v3138_v44 = vmul.f32 %v12254_v58, %v3137_v18  ;;  %v3643_v52 = vmul.f32 %v12153_v2, %v3641_v41  ;;  %v3695_v18 = vstv %s12569_s21  ;;  %s12640_s21 = sld [smem:[#allocation10 + $0x6c]] }
 0x6f0   : > { %3574 = vrot.lane.b32.xlu0 %v3570_v43, %s11043_s26 }
 0x6f1   : > { %v3097_v36 = vpop.permute.xlu1 %3096 }
 0x6f2   : > { %v3101_v17 = vadd.f32 %v3097_v36, %v3087_v3  ;;  %v3095_v38 = vpop.permute.xlu0 %3094  ;;  %v3661_v36 = vstv %s12550_s16  ;;  %s12626_s16 = sld [smem:[#allocation10 + $0x97]] }
 0x6f3   : > { %v3100_v10 = vadd.f32 %v3095_v38, %v3086_v61  ;;  %3596 = vrot.lane.b32.xlu1 %v3591_v63, %s11042_s27  ;;  %v3642_v61 = vmul.f32 %v12156_v39, %v3641_v41  ;;  %v3171_v63 = vstv %s12554_s14  ;;  %v3662_v39 = vmul.f32 %v12179_v29, %v3661_v36  ;;  %s12632_s14 = sld [smem:[#allocation11 + $0x3]] }
 0x6f4   : > { %3594 = vrot.lane.b32.xlu0 %v3590_v5, %s11042_s27  ;;  %v3107_v13 = vadd.f32 %v3105_v8, %v3101_v17  ;;  %v3663_v8 = vmul.f32 %v12176_v24, %v3661_v36 }
 0x6f5   : > { %v3117_v37 = vpop.permute.xlu1 %3116  ;;  %v3106_v12 = vadd.f32 %v3104_v49, %v3100_v10  ;;  %v3173_v10 = vmul.f32 %v12182_v33, %v3171_v63  ;;  %v3675_v49 = vstv %s12561_s1  ;;  %s12636_s1 = sld [smem:[#allocation10 + $0x98]] }
 0x6f6   : > { %v3115_v47 = vpop.permute.xlu0 %3114  ;;  %v3121_v20 = vadd.f32 %v3117_v37, %v3107_v13  ;;  %v3172_v37 = vmul.f32 %v12189_v30, %v3171_v63  ;;  %v3676_v33 = vmul.f32 %v12179_v29, %v3675_v49  ;;  %v3696_v29 = vmul.f32 %v12206_v62, %v3695_v18 }
 0x6f7   : > { %3610 = vrot.lane.b32.xlu1 %v3605_v21, %s11043_s26  ;;  %v3120_v26 = vadd.f32 %v3115_v47, %v3106_v12 }
 0x6f8   : > { %3608 = vrot.lane.b32.xlu0 %v3604_v1, %s11043_s26  ;;  %v3677_v1 = vmul.f32 %v12176_v24, %v3675_v49 }
 0x6f9   : > { %v3131_v48 = vpop.permute.xlu1 %3130 }
 0x6fa   : > { %v3135_v15 = vadd.f32 %v3131_v48, %v3121_v20  ;;  %v3129_v40 = vpop.permute.xlu0 %3128  ;;  %v3205_v20 = vstv %s12573_s28  ;;  %s12647_s28 = sld [smem:[#allocation10 + $0x9d]] }
 0x6fb   : > { %v3134_v7 = vadd.f32 %v3129_v40, %v3120_v26  ;;  %3634 = vrot.lane.b32.xlu1 %v3629_v32, %s11042_s27  ;;  %v3697_v32 = vmul.f32 %v12203_v59, %v3695_v18  ;;  %v3709_v40 = vstv %s12580_s25  ;;  %v3206_v41 = vmul.f32 %v12302_v22, %v3205_v20  ;;  %s12650_s25 = sld [smem:[#allocation10 + $0x9a]] }
 0x6fc   : > { %3632 = vrot.lane.b32.xlu0 %v3628_v31, %s11042_s27  ;;  %v3141_v50 = vadd.f32 %v3139_v45, %v3135_v15  ;;  %v3207_v31 = vmul.f32 %v12312_v11, %v3205_v20 }
 0x6fd   : > { %v3151_v43 = vpop.permute.xlu1 %3150  ;;  %v3140_v54 = vadd.f32 %v3138_v44, %v3134_v7 }
 0x6fe   : > { %v3149_v3 = vpop.permute.xlu0 %3148  ;;  %v3155_v17 = vadd.f32 %v3151_v43, %v3141_v50  ;;  %v3711_v43 = vmul.f32 %v12203_v59, %v3709_v40 }
 0x6ff   : > { %3648 = vrot.lane.b32.xlu1 %v3643_v52, %s11043_s26  ;;  %v3154_v38 = vadd.f32 %v3149_v3, %v3140_v54  ;;  %v3710_v52 = vmul.f32 %v12206_v62, %v3709_v40  ;;  %v3729_v3 = vstv %s12588_s29  ;;  %s12652_s29 = sld [smem:[#allocation10 + $0x6f]] }
 0x700   : > { %3646 = vrot.lane.b32.xlu0 %v3642_v61, %s11043_s26  ;;  %v3239_v61 = vstv %s12593_s2  ;;  %v3730_v59 = vmul.f32 %v12229_v14, %v3729_v3  ;;  %s12665_s2 = sld [smem:[#allocation10 + $0x9b]] }
 0x701   : > { %v3165_v5 = vpop.permute.xlu1 %3164  ;;  %v3241_v49 = vmul.f32 %v12239_v35, %v3239_v61 }
 0x702   : > { %v3169_v2 = vadd.f32 %v3165_v5, %v3155_v17  ;;  %v3163_v9 = vpop.permute.xlu0 %3162  ;;  %v3731_v17 = vmul.f32 %v12226_v57, %v3729_v3  ;;  %v3743_v5 = vstv %s12599_s17  ;;  %s12680_s17 = sld [smem:[#allocation10 + $0x72]] }
 0x703   : > { %v3168_v13 = vadd.f32 %v3163_v9, %v3154_v38  ;;  %3668 = vrot.lane.b32.xlu1 %v3663_v8, %s11042_s27  ;;  %v3240_v8 = vmul.f32 %v12324_v56, %v3239_v61  ;;  %v3811_v61 = vstv %s12636_s1  ;;  %s9429_s1 = sld [smem:[#allocation10 + $0x7e]] }
 0x704   : > { %3666 = vrot.lane.b32.xlu0 %v3662_v39, %s11042_s27  ;;  %v3175_v12 = vadd.f32 %v3173_v10, %v3169_v2  ;;  %v3745_v10 = vmul.f32 %v12226_v57, %v3743_v5 }
 0x705   : > { %v3185_v21 = vpop.permute.xlu1 %3184  ;;  %v3174_v47 = vadd.f32 %v3172_v37, %v3168_v13 }
 0x706   : > { %v3183_v6 = vpop.permute.xlu0 %3182  ;;  %v3189_v26 = vadd.f32 %v3185_v21, %v3175_v12  ;;  %v3744_v12 = vmul.f32 %v12229_v14, %v3743_v5  ;;  %v3763_v21 = vstv %s12607_s22  ;;  %v3777_v14 = vstv %s12617_s23  ;;  %s12692_s22 = sld [smem:[#allocation10 + $0x9e]]  ;;  %s12714_s23 = sld [smem:[#allocation10 + $0x75]] }
 0x707   : > { %3682 = vrot.lane.b32.xlu1 %v3677_v1, %s11043_s26  ;;  %v3188_v30 = vadd.f32 %v3183_v6, %v3174_v47  ;;  %v3273_v1 = vstv %s12612_s24  ;;  %v3765_v57 = vmul.f32 %v12249_v16, %v3763_v21  ;;  %v3764_v20 = vmul.f32 %v12254_v58, %v3763_v21  ;;  %s12710_s24 = sld [smem:[#allocation10 + $0xa0]] }
 0x708   : > { %3680 = vrot.lane.b32.xlu0 %v3676_v33, %s11043_s26  ;;  %v3345_v21 = vstv %s12652_s29  ;;  %s9442_s29 = sld [smem:[#allocation10 + $0x8a]] }
 0x709   : > { %v3199_v48 = vpop.permute.xlu1 %3198 }
 0x70a   : > { %v3203_v24 = vadd.f32 %v3199_v48, %v3189_v26  ;;  %v3197_v15 = vpop.permute.xlu0 %3196 }
 0x70b   : > { %v3202_v45 = vadd.f32 %v3197_v15, %v3188_v30  ;;  %3702 = vrot.lane.b32.xlu1 %v3697_v32, %s11042_s27  ;;  %v3274_v30 = vmul.f32 %v12345_v4, %v3273_v1  ;;  %v3275_v32 = vmul.f32 %v12265_v34, %v3273_v1 }
 0x70c   : > { %3700 = vrot.lane.b32.xlu0 %v3696_v29, %s11042_s27  ;;  %v3209_v7 = vadd.f32 %v3207_v31, %v3203_v24  ;;  %v3779_v29 = vmul.f32 %v12249_v16, %v3777_v14  ;;  %v3307_v16 = vstv %s12632_s14  ;;  %s12749_s14 = sld [smem:[#allocation10 + $0x78]] }
 0x70d   : > { %v3253_v44 = vpop.permute.xlu1 %3252  ;;  %v3208_v50 = vadd.f32 %v3206_v41, %v3202_v45  ;;  %v3778_v45 = vmul.f32 %v12254_v58, %v3777_v14  ;;  %v3797_v41 = vstv %s12626_s16  ;;  %s12730_s16 = sld [smem:[#allocation10 + $0xa1]] }
 0x70e   : > { %v3217_v54 = vpop.permute.xlu0 %3216 }
 0x70f   : > { %3716 = vrot.lane.b32.xlu1 %v3711_v43, %s11043_s26  ;;  %v3222_v36 = vadd.f32 %v3217_v54, %v3208_v50  ;;  %v12656_v50 = vld [vmem:[#allocation3 + $0x1a] sm:$0x3f] }
 0x710   : > { %3714 = vrot.lane.b32.xlu0 %v3710_v52, %s11043_s26  ;;  %v3799_v58 = vmul.f32 %v12656_v50, %v3797_v41  ;;  %v12659_v52 = vld [vmem:[#allocation3 + $0x12] sm:$0xff]  ;;  %v3813_v5 = vmul.f32 %v12656_v50, %v3811_v61 }
 0x711   : > { %v3219_v63 = vpop.permute.xlu1 %3218  ;;  %v3798_v3 = vmul.f32 %v12659_v52, %v3797_v41 }
 0x712   : > { %v3231_v38 = vpop.permute.xlu0 %3230  ;;  %v3223_v2 = vadd.f32 %v3219_v63, %v3209_v7  ;;  %v3313_v63 = vstv %s12640_s21  ;;  %s9435_s21 = sld [smem:[#allocation10 + $0x84]] }
 0x713   : > { %v3236_v62 = vadd.f32 %v3231_v38, %v3222_v36  ;;  %3736 = vrot.lane.b32.xlu1 %v3731_v17, %s11042_s27 }
 0x714   : > { %3734 = vrot.lane.b32.xlu0 %v3730_v59, %s11042_s27 }
 0x715   : > { %v3233_v9 = vpop.permute.xlu1 %3232  ;;  %v3242_v39 = vadd.f32 %v3240_v8, %v3236_v62  ;;  %v12669_v8 = vld [vmem:[#allocation3 + $0x8] sm:$0x3f] }
 0x716   : > { %v3237_v13 = vadd.f32 %v3233_v9, %v3223_v2  ;;  %v3251_v37 = vpop.permute.xlu0 %3250  ;;  %v3315_v2 = vmul.f32 %v12669_v8, %v3313_v63 }
 0x717   : > { %3750 = vrot.lane.b32.xlu1 %v3745_v10, %s11043_s26  ;;  %v3256_v6 = vadd.f32 %v3251_v37, %v3242_v39  ;;  %v3812_v39 = vmul.f32 %v12659_v52, %v3811_v61  ;;  %v3865_v10 = vstv %s12647_s28  ;;  %s9438_s28 = sld [smem:[#allocation11 + $0x4]] }
 0x718   : > { %v3243_v47 = vadd.f32 %v3241_v49, %v3237_v13  ;;  %3748 = vrot.lane.b32.xlu0 %v3744_v12, %s11043_s26  ;;  %v12674_v13 = vld [vmem:[#allocation3] sm:$0xff]  ;;  %v3831_v12 = vstv %s12650_s25  ;;  %s9439_s25 = sld [smem:[#allocation10 + $0x87]] }
 0x719   : > { %v3267_v33 = vpop.permute.xlu1 %3266  ;;  %v3314_v37 = vmul.f32 %v12674_v13, %v3313_v63 }
 0x71a   : > { %v3257_v35 = vadd.f32 %v3253_v44, %v3243_v47  ;;  %v3265_v18 = vpop.permute.xlu0 %3264 }
 0x71b   : > { %v3270_v26 = vadd.f32 %v3265_v18, %v3256_v6  ;;  %3770 = vrot.lane.b32.xlu1 %v3765_v57, %s11042_s27 }
 0x71c   : > { %v3271_v48 = vadd.f32 %v3267_v33, %v3257_v35  ;;  %3768 = vrot.lane.b32.xlu0 %v3764_v20, %s11042_s27  ;;  %v12685_v35 = vld [vmem:[#allocation3 + $0x29] sm:$0x3f] }
 0x71d   : > { %v3287_v24 = vpop.permute.xlu1 %3286  ;;  %v3276_v15 = vadd.f32 %v3274_v30, %v3270_v26  ;;  %v3867_v18 = vmul.f32 %v12685_v35, %v3865_v10  ;;  %v3832_v30 = vmul.f32 %v12302_v22, %v3831_v12 }
 0x71e   : > { %v3277_v40 = vadd.f32 %v3275_v32, %v3271_v48  ;;  %v3285_v31 = vpop.permute.xlu0 %3284  ;;  %v12689_v48 = vld [vmem:[#allocation3 + $0x9] sm:$0x3f] }
 0x71f   : > { %3784 = vrot.lane.b32.xlu1 %v3779_v29, %s11043_s26  ;;  %v3290_v7 = vadd.f32 %v3285_v31, %v3276_v15  ;;  %v3347_v32 = vmul.f32 %v12689_v48, %v3345_v21  ;;  %v12695_v15 = vld [vmem:[#allocation3 + $0x1] sm:$0xff] }
 0x720   : > { %v3291_v34 = vadd.f32 %v3287_v24, %v3277_v40  ;;  %3782 = vrot.lane.b32.xlu0 %v3778_v45, %s11043_s26  ;;  %v3346_v29 = vmul.f32 %v12695_v15, %v3345_v21  ;;  %v3845_v40 = vstv %s12665_s2  ;;  %v3899_v21 = vstv %s12710_s24  ;;  %s9445_s2 = sld [smem:[#allocation10 + $0x8d]]  ;;  %s9454_s24 = sld [smem:[#allocation10 + $0x96]] }
 0x721   : > { %v3301_v44 = vpop.permute.xlu1 %3300 }
 0x722   : > { %v3305_v43 = vadd.f32 %v3301_v44, %v3291_v34  ;;  %v3299_v54 = vpop.permute.xlu0 %3298 }
 0x723   : > { %v3304_v36 = vadd.f32 %v3299_v54, %v3290_v7  ;;  %3804 = vrot.lane.b32.xlu1 %v3799_v58, %s11042_s27  ;;  %v3833_v7 = vmul.f32 %v12312_v11, %v3831_v12  ;;  %v3846_v54 = vmul.f32 %v12302_v22, %v3845_v40  ;;  %v3847_v22 = vmul.f32 %v12312_v11, %v3845_v40  ;;  %v12733_v11 = vld [vmem:[#allocation3 + $0x2] sm:$0xff] }
 0x724   : > { %v3309_v17 = vadd.f32 %v3307_v16, %v3305_v43  ;;  %3802 = vrot.lane.b32.xlu0 %v3798_v3, %s11042_s27  ;;  %v3379_v3 = vstv %s12680_s17  ;;  %s9448_s17 = sld [smem:[#allocation10 + $0x90]] }
 0x725   : > { %v3308_v38 = vadd.f32 %v3307_v16, %v3304_v36  ;;  %v3325_v59 = vpop.permute.xlu1 %3324 }
 0x726   : > { %v3311_v62 = vmax.f32 %v3309_v17, 0.0  ;;  %v3323_v9 = vpop.permute.xlu0 %3322  ;;  %v3329_v47 = vadd.f32 %v3325_v59, %v3315_v2  ;;  %v3866_v17 = vmul.f32 %v12324_v56, %v3865_v10  ;;  %v3380_v2 = vmul.f32 %v12733_v11, %v3379_v3 }
 0x727   : > { %v3310_v49 = vmax.f32 %v3308_v38, 0.0  ;;  %3818 = vrot.lane.b32.xlu1 %v3813_v5, %s11043_s26  ;;  %v3328_v6 = vadd.f32 %v3323_v9, %v3314_v37  ;;  %v12726_v38 = vld [vmem:[#allocation3 + $0xa] sm:$0x3f]  ;;  %v3879_v5 = vstv %s12692_s22  ;;  %s9451_s22 = sld [smem:[#allocation10 + $0x93]] }
 0x728   : > { %3816 = vrot.lane.b32.xlu0 %v3812_v39, %s11043_s26  ;;  %v3381_v59 = vmul.f32 %v12726_v38, %v3379_v3  ;;  %v3880_v12 = vmul.f32 %v12324_v56, %v3879_v5  ;;  %v12757_v56 = vld [vmem:[#allocation3 + $0x2a] sm:$0x3f] }
 0x729   : > { %v12683_v1 = vpack.c.bf16 %v3311_v62, %v3310_v49  ;;  %v3339_v33 = vpop.permute.xlu1 %3338  ;;  %v4005_v57 = vpop.f32.mrb[24].mxu1  ;;  %v3881_v49 = vmul.f32 %v12685_v35, %v3879_v5 }
 0x72a   : > { %v3343_v20 = vadd.f32 %v3339_v33, %v3329_v47  ;;  %v9998_v14 = vpop.f32.mrb[25].mxu1  ;;  %v3337_v26 = vpop.permute.xlu0 %3336  ;;  %v3413_v47 = vstv %s12714_s23  ;;  %s9457_s23 = sld [smem:[#allocation10 + $0x99]] }
 0x72b   : > { %v3342_v24 = vadd.f32 %v3337_v26, %v3328_v6  ;;  %3872 = vrot.lane.b32.xlu1 %v3867_v18, %s11042_s27  ;;  %v3901_v18 = vmul.f32 %v12757_v56, %v3899_v21  ;;  %v3900_v26 = vmul.f32 %v12345_v4, %v3899_v21 }
 0x72c   : > { %3836 = vrot.lane.b32.xlu0 %v3832_v30, %s11042_s27  ;;  %v3349_v31 = vadd.f32 %v3347_v32, %v3343_v20  ;;  %v12763_v30 = vld [vmem:[#allocation3 + $0x18] sm:$0x3f] }
 0x72d   : > { %v3359_v45 = vpop.permute.xlu1 %3358  ;;  %v4077_v41 = vpop.f32.mrb[26].mxu1  ;;  %v3348_v34 = vadd.f32 %v3346_v29, %v3342_v24  ;;  %v3415_v32 = vmul.f32 %v12763_v30, %v3413_v47  ;;  %v3913_v24 = vstv %s12730_s16  ;;  %v12769_v29 = vld [vmem:[#allocation3 + $0x10] sm:$0xff]  ;;  %s9460_s16 = sld [smem:[#allocation10 + $0x9c]] }
 0x72e   : > { %v4081_v16 = vmax.f32 %v4005_v57, %v4077_v41  ;;  %v10005_v44 = vpop.f32.mrb[27].mxu1  ;;  %v3357_v58 = vpop.permute.xlu0 %3356  ;;  %v3363_v61 = vadd.f32 %v3359_v45, %v3349_v31  ;;  %v3414_v40 = vmul.f32 %v12769_v29, %v3413_v47  ;;  %v3915_v41 = vmul.f32 %v12757_v56, %v3913_v24 }
 0x72f   : > { %3838 = vrot.lane.b32.xlu1 %v3833_v7, %s11042_s27  ;;  %v3362_v55 = vadd.f32 %v3357_v58, %v3348_v34  ;;  %v12781_v7 = vld [vmem:[#allocation3 + $0x22] sm:$0xff]  ;;  %v3447_v44 = vstv %s12749_s14  ;;  %s9463_s14 = sld [smem:[#allocation10 + $0x9f]] }
 0x730   : > { %10011 = vmatmul.mubr.msk.f32.vlgmr.msra.gmra.mrb[28].mxu1 %vm3932_vm7, %v4081_v16  ;;  %3850 = vrot.lane.b32.xlu0 %v3846_v54, %s11043_s26 }
 0x731   : > { %10540 = vmatpush3.bf16.msk.msra.mxu1 %vm12705_vm12, %v11577_v46  ;;  %v3373_v19 = vpop.permute.xlu1 %3372  ;;  %10017 = vmatprep.mubr.msk.f32.mxu1 %vm11048_vm4, %v11040_v0 }
 0x732   : > { %v3377_v36 = vadd.f32 %v3373_v19, %v3363_v61  ;;  %v3371_v63 = vpop.permute.xlu0 %3370  ;;  %10541 = vmatprep.subr.bf16.mxu1 %v11047_v42  ;;  %v12788_v19 = vld [vmem:[#allocation3 + $0x19] sm:$0x3f] }
 0x733   : > { %v3376_v62 = vadd.f32 %v3371_v63, %v3362_v55  ;;  %3852 = vrot.lane.b32.xlu1 %v3847_v22, %s11043_s26  ;;  %v3449_v22 = vmul.f32 %v12788_v19, %v3447_v44  ;;  %v12791_v63 = vld [vmem:[#allocation3 + $0x11] sm:$0xff] }
 0x734   : > { %10018 = vmatmul.mubr.msk.f32.vlgmr.msra.gmra.mrb[30].mxu1 %vm3932_vm7, %v4081_v16  ;;  %3870 = vrot.lane.b32.xlu0 %v3866_v17, %s11042_s27  ;;  %v3383_v9 = vadd.f32 %v3381_v59, %v3377_v36  ;;  %v3914_v16 = vmul.f32 %v12781_v7, %v3913_v24  ;;  %v3448_v17 = vmul.f32 %v12791_v63, %v3447_v44 }
 0x735   : > { %10544 = vmatpush3.bf16.msk.msra.mxu1 %vm12079_vm15, %v12299_v53  ;;  %v3393_v39 = vpop.permute.xlu1 %3392  ;;  %v3382_v10 = vadd.f32 %v3380_v2, %v3376_v62  ;;  %10024 = vmatprep.mubr.msk.f32.mxu1 %vm11048_vm4, %v11040_v0 }
 0x736   : > { %v3391_v37 = vpop.permute.xlu0 %3390  ;;  %10545 = vmatprep.subr.bf16.mxu1 %v11047_v42  ;;  %v3397_v6 = vadd.f32 %v3393_v39, %v3383_v9 }
 0x737   : > { %3886 = vrot.lane.b32.xlu1 %v3881_v49, %s11043_s26  ;;  %v3396_v33 = vadd.f32 %v3391_v37, %v3382_v10 }
 0x738   : > { %10025 = vmatmul.mubr.msk.f32.vlgmr.msra.gmra.mrb[32].mxu1 %vm3932_vm7, %v11342_v60  ;;  %3884 = vrot.lane.b32.xlu0 %v3880_v12, %s11043_s26 }
 0x739   : > { %10548 = vmatpush3.bf16.msk.msra.mxu1 %vm12079_vm15, %v12299_v53  ;;  %v3407_v57 = vpop.permute.xlu1 %3406  ;;  %10031 = vmatprep.mubr.msk.f32.mxu1 %vm11048_vm4, %v11040_v0 }
 0x73a   : > { %v3411_v20 = vadd.f32 %v3407_v57, %v3397_v6  ;;  %v3405_v14 = vpop.permute.xlu0 %3404  ;;  %10549 = vmatprep.subr.bf16.mxu1 %v11047_v42 }
 0x73b   : > { %v3410_v53 = vadd.f32 %v3405_v14, %v3396_v33  ;;  %3906 = vrot.lane.b32.xlu1 %v3901_v18, %s11042_s27  ;;  %v3515_v14 = vstv %s9429_s1 }
 0x73c   : > { %10032 = vmatmul.mubr.msk.f32.vlgmr.msra.gmra.mrb[34].mxu1 %vm3932_vm7, %v11475_v23  ;;  %3904 = vrot.lane.b32.xlu0 %v3900_v26, %s11042_s27  ;;  %v3417_v4 = vadd.f32 %v3415_v32, %v3411_v20  ;;  %s9426_s27 = sld [smem:[#allocation10 + $0x7b]] }
 0x73d   : > { %v3427_v31 = vpop.permute.xlu1 %3426  ;;  %v3416_v45 = vadd.f32 %v3414_v40, %v3410_v53  ;;  %10552 = vmatpush3.bf16.msk.msra.mxu1 %vm12358_vm0, %v11534_v27  ;;  %10038 = vmatprep.mubr.msk.f32.mxu1 %vm11048_vm4, %v11040_v0 }
 0x73e   : > { %v3425_v34 = vpop.permute.xlu0 %3424  ;;  %10553 = vmatprep.subr.bf16.mxu1 %v11047_v42  ;;  %v3431_v58 = vadd.f32 %v3427_v31, %v3417_v4  ;;  %v12796_v4 = vld [vmem:[#allocation3 + $0x28] sm:$0x3f] }
 0x73f   : > { %3920 = vrot.lane.b32.xlu1 %v3915_v41, %s11043_s26  ;;  %v3430_v54 = vadd.f32 %v3425_v34, %v3416_v45  ;;  %v3517_v31 = vmul.f32 %v12796_v4, %v3515_v14  ;;  %v12799_v41 = vld [vmem:[#allocation3 + $0x20] sm:$0xff] }
 0x740   : > { %3918 = vrot.lane.b32.xlu0 %v3914_v16, %s11043_s26  ;;  %s9432_s26 = sld [smem:[#allocation10 + $0x81]]  ;;  %v3516_v34 = vmul.f32 %v12799_v41, %v3515_v14 }
 0x741   : > { %v3441_v3 = vpop.permute.xlu1 %3440 }
 0x742   : > { %v3445_v61 = vadd.f32 %v3441_v3, %v3431_v58  ;;  %v3439_v55 = vpop.permute.xlu0 %3438  ;;  %v3481_v9 = vstv %s9426_s27  ;;  %s9466_s27 = sld [smem:[#allocation11 + $0x5]] }
 0x743   : > { %v3444_v36 = vadd.f32 %v3439_v55, %v3430_v54  ;;  %v3483_v21 = vmul.f32 %v12656_v50, %v3481_v9  ;;  %v3482_v6 = vmul.f32 %v12659_v52, %v3481_v9 }
 0x744   : > { %v3451_v59 = vadd.f32 %v3449_v22, %v3445_v61 }
 0x745   : > { %v3461_v5 = vpop.permute.xlu1 %3460  ;;  %v3450_v62 = vadd.f32 %v3448_v17, %v3444_v36  ;;  %v12802_v17 = vld [vmem:[#allocation3 + $0x21] sm:$0xff] }
 0x746   : > { %v3459_v2 = vpop.permute.xlu0 %3458  ;;  %v3465_v39 = vadd.f32 %v3461_v5, %v3451_v59  ;;  %v3549_v3 = vstv %s9432_s26 }
 0x747   : > { %v3464_v10 = vadd.f32 %v3459_v2, %v3450_v62  ;;  %v3550_v59 = vmul.f32 %v12802_v17, %v3549_v3  ;;  %v3551_v9 = vmul.f32 %v12685_v35, %v3549_v3 }
 0x749   : > { %v3475_v49 = vpop.permute.xlu1 %3474 }
 0x74a   : > { %v3479_v37 = vadd.f32 %v3475_v49, %v3465_v39  ;;  %v3473_v12 = vpop.permute.xlu0 %3472 }
 0x74b   : > { %v3478_v47 = vadd.f32 %v3473_v12, %v3464_v10 }
 0x74c   : > { %v3485_v33 = vadd.f32 %v3483_v21, %v3479_v37  ;;  %v3583_v37 = vstv %s9435_s21 }
 0x74d   : > { %v3495_v57 = vpop.permute.xlu1 %3494  ;;  %v3484_v18 = vadd.f32 %v3482_v6, %v3478_v47 }
 0x74e   : > { %v3493_v20 = vpop.permute.xlu0 %3492  ;;  %v3499_v26 = vadd.f32 %v3495_v57, %v3485_v33  ;;  %v3584_v57 = vmul.f32 %v12781_v7, %v3583_v37 }
 0x74f   : > { %v3498_v32 = vadd.f32 %v3493_v20, %v3484_v18  ;;  %v3585_v20 = vmul.f32 %v12757_v56, %v3583_v37 }
 0x751   : > { %v3509_v24 = vpop.permute.xlu1 %3508 }
 0x752   : > { %v3513_v53 = vadd.f32 %v3509_v24, %v3499_v26  ;;  %v3507_v40 = vpop.permute.xlu0 %3506 }
 0x753   : > { %v3512_v45 = vadd.f32 %v3507_v40, %v3498_v32 }
 0x754   : > { %v3519_v16 = vadd.f32 %v3517_v31, %v3513_v53  ;;  %v3617_v31 = vstv %s9438_s28 }
 0x755   : > { %v3563_v44 = vpop.permute.xlu1 %3562  ;;  %v3518_v58 = vadd.f32 %v3516_v34, %v3512_v45 }
 0x756   : > { %v3527_v54 = vpop.permute.xlu0 %3526 }
 0x757   : > { %v3532_v61 = vadd.f32 %v3527_v54, %v3518_v58  ;;  %v3623_v58 = vstv %s9439_s25 }
 0x759   : > { %v3529_v55 = vpop.permute.xlu1 %3528 }
 0x75a   : > { %v3541_v22 = vpop.permute.xlu0 %3540  ;;  %v3533_v5 = vadd.f32 %v3529_v55, %v3519_v16 }
 0x75b   : > { %v3546_v36 = vadd.f32 %v3541_v22, %v3532_v61  ;;  %v3625_v22 = vmul.f32 %v12669_v8, %v3623_v58 }
 0x75d   : > { %v3543_v62 = vpop.permute.xlu1 %3542  ;;  %v3552_v2 = vadd.f32 %v3550_v59, %v3546_v36 }
 0x75e   : > { %v3547_v39 = vadd.f32 %v3543_v62, %v3533_v5  ;;  %v3561_v10 = vpop.permute.xlu0 %3560  ;;  %v3624_v5 = vmul.f32 %v12674_v13, %v3623_v58  ;;  %v3655_v62 = vstv %s9442_s29 }
 0x75f   : > { %v3566_v12 = vadd.f32 %v3561_v10, %v3552_v2 }
 0x760   : > { %v3553_v49 = vadd.f32 %v3551_v9, %v3547_v39 }
 0x761   : > { %v3577_v21 = vpop.permute.xlu1 %3576 }
 0x762   : > { %v3567_v47 = vadd.f32 %v3563_v44, %v3553_v49  ;;  %v3575_v6 = vpop.permute.xlu0 %3574 }
 0x763   : > { %v3580_v33 = vadd.f32 %v3575_v6, %v3566_v12  ;;  %v3657_v12 = vmul.f32 %v12689_v48, %v3655_v62 }
 0x764   : > { %v3581_v18 = vadd.f32 %v3577_v21, %v3567_v47  ;;  %v3656_v47 = vmul.f32 %v12695_v15, %v3655_v62 }
 0x765   : > { %v3597_v14 = vpop.permute.xlu1 %3596  ;;  %v3586_v26 = vadd.f32 %v3584_v57, %v3580_v33 }
 0x766   : > { %v3587_v32 = vadd.f32 %v3585_v20, %v3581_v18  ;;  %v3595_v24 = vpop.permute.xlu0 %3594  ;;  %v3689_v18 = vstv %s9445_s2  ;;  %s390_s2 = sand.u32 1, %s11023_s10  }
 0x767   : > { %v3600_v40 = vadd.f32 %v3595_v24, %v3586_v26  ;;  %v3691_v24 = vmul.f32 %v12726_v38, %v3689_v18  ;;  %s9083_s26 = scalar_lea.sflag [#allocation6], %s390_s2 }
 0x768   : > { %v3601_v53 = vadd.f32 %v3597_v14, %v3587_v32 }
 0x769   : > { %v3611_v45 = vpop.permute.xlu1 %3610 }
 0x76a   : > { %v3615_v34 = vadd.f32 %v3611_v45, %v3601_v53  ;;  %v3609_v16 = vpop.permute.xlu0 %3608 }
 0x76b   : > { %v3614_v44 = vadd.f32 %v3609_v16, %v3600_v40  ;;  %v3690_v40 = vmul.f32 %v12733_v11, %v3689_v18 }
 0x76c   : > { %v3619_v54 = vadd.f32 %v3617_v31, %v3615_v34  ;;  %v3723_v34 = vstv %s9448_s17 }
 0x76d   : > { %v3618_v3 = vadd.f32 %v3617_v31, %v3614_v44  ;;  %v3635_v61 = vpop.permute.xlu1 %3634 }
 0x76e   : > { %v3621_v55 = vmax.f32 %v3619_v54, 0.0  ;;  %v3633_v36 = vpop.permute.xlu0 %3632  ;;  %v3639_v2 = vadd.f32 %v3635_v61, %v3625_v22  ;;  %v3725_v61 = vmul.f32 %v12763_v30, %v3723_v34  ;;  %v3724_v22 = vmul.f32 %v12769_v29, %v3723_v34 }
 0x76f   : > { %v3620_v59 = vmax.f32 %v3618_v3, 0.0  ;;  %v3638_v39 = vadd.f32 %v3633_v36, %v3624_v5  ;;  %v3757_v5 = vstv %s9451_s22 }
 0x771   : > { %v12810_v9 = vpack.c.bf16 %v3621_v55, %v3620_v59  ;;  %v3649_v10 = vpop.permute.xlu1 %3648 }
 0x772   : > { %v3653_v49 = vadd.f32 %v3649_v10, %v3639_v2  ;;  %v3647_v37 = vpop.permute.xlu0 %3646 }
 0x773   : > { %v3652_v21 = vadd.f32 %v3647_v37, %v3638_v39  ;;  %v3759_v37 = vmul.f32 %v12788_v19, %v3757_v5 }
 0x774   : > { %v3659_v6 = vadd.f32 %v3657_v12, %v3653_v49 }
 0x775   : > { %v3669_v8 = vpop.permute.xlu1 %3668  ;;  %v3658_v33 = vadd.f32 %v3656_v47, %v3652_v21  ;;  %v3758_v21 = vmul.f32 %v12791_v63, %v3757_v5 }
 0x776   : > { %v3667_v57 = vpop.permute.xlu0 %3666  ;;  %v3673_v13 = vadd.f32 %v3669_v8, %v3659_v6  ;;  %v3791_v8 = vstv %s9454_s24  ;;  %s9611_s24 = sshll.u32 %s11121_s13, 4  ;;  %s11049_s13 = smov [#allocation14]  }
 0x777   : > { %v3672_v20 = vadd.f32 %v3667_v57, %v3658_v33  ;;  %s13283_s1 = scalar_lea.hbm %s13334_s9, %s9611_s24  ;;  %s10957_s28 = sshll.u32 %s11049_s13, 4  ;;  %s10958_s28 = int_to_ptr.vmem [resolvable:$false] %s10957_s28 }
 0x778   : > { %s10959_s25 = scalar_lea.vmem %s10958_s28, 32 }
 0x779   : > { %v3683_v14 = vpop.permute.xlu1 %3682 }
 0x77a   : > { %v3687_v26 = vadd.f32 %v3683_v14, %v3673_v13  ;;  %v3681_v32 = vpop.permute.xlu0 %3680  ;;  %v3793_v14 = vmul.f32 %v12656_v50, %v3791_v8 }
 0x77b   : > { %v3686_v53 = vadd.f32 %v3681_v32, %v3672_v20  ;;  %v3792_v32 = vmul.f32 %v12659_v52, %v3791_v8 }
 0x77c   : > { %v3693_v48 = vadd.f32 %v3691_v24, %v3687_v26 }
 0x77d   : > { %v3703_v31 = vpop.permute.xlu1 %3702  ;;  %v3692_v45 = vadd.f32 %v3690_v40, %v3686_v53  ;;  %v3825_v40 = vstv %s9457_s23  ;;  %s391_s23 = scalar_lea.vmem [#allocation14], %s390_s2 }
 0x77e   : > { %v3701_v15 = vpop.permute.xlu0 %3700  ;;  %v3707_v16 = vadd.f32 %v3703_v31, %v3693_v48 }
 0x77f   : > { %v3706_v44 = vadd.f32 %v3701_v15, %v3692_v45 }
 0x781   : > { %v3717_v58 = vpop.permute.xlu1 %3716 }
 0x782   : > { %v3721_v54 = vadd.f32 %v3717_v58, %v3707_v16  ;;  %v3715_v3 = vpop.permute.xlu0 %3714  ;;  %v3827_v16 = vmul.f32 %v12796_v4, %v3825_v40  ;;  %v3826_v58 = vmul.f32 %v12799_v41, %v3825_v40 }
 0x783   : > { %v3720_v55 = vadd.f32 %v3715_v3, %v3706_v44 }
 0x784   : > { %v3727_v38 = vadd.f32 %v3725_v61, %v3721_v54  ;;  %v3859_v61 = vstv %s9460_s16  ;;  %s9095_s16 = sshll.u32 %s391_s23, 4  ;;  %s13285_s16 = int_to_ptr.vmem [resolvable:$true] %s9095_s16 }
 0x785   : > { %v3737_v36 = vpop.permute.xlu1 %3736  ;;  %v3726_v59 = vadd.f32 %v3724_v22, %v3720_v55  ;;  %v3861_v4 = vmul.f32 %v12685_v35, %v3859_v61  ;;  %s10953_s21 = scalar_lea.vmem %s13285_s16, 16  ;;  %p10960_p4 = scmp.lt.s32.totalorder %s13285_s16, %s10958_s28 }
 0x786   : > { %v3735_v11 = vpop.permute.xlu0 %3734  ;;  %v3741_v62 = vadd.f32 %v3737_v36, %v3727_v38  ;;  %p10954_p13 = scmp.ne.s32.totalorder %s13285_s16, %s10953_s21  ;;  %p10961_p9 = scmp.lt.s32.totalorder %s10959_s25, %s10953_s21 }
 0x787   : > { %v3740_v2 = vadd.f32 %v3735_v11, %v3726_v59  ;;  %v3860_v59 = vmul.f32 %v12802_v17, %v3859_v61 }
 0x788   : > { %p10955_p2 = pnand %p10954_p13, %p13372_p1  ;;  %p10962_p0 = por %p10961_p9, %p10960_p4 }
 0x789   : > { %v3751_v39 = vpop.permute.xlu1 %3750 }
 0x78a   : > { %v3755_v10 = vadd.f32 %v3751_v39, %v3741_v62  ;;  %v3749_v49 = vpop.permute.xlu0 %3748  ;;  %p10956_p3 = pneg %p10955_p2 }
 0x78b   : > { %v3754_v12 = vadd.f32 %v3749_v49, %v3740_v2 }
 0x78c   : > { %v3761_v30 = vadd.f32 %v3759_v37, %v3755_v10  ;;  %v3893_v10 = vstv %s9463_s14  ;;  %p10963_p7 = pnand %p10962_p0, %p10956_p3 }
 0x78d   : > { %v3771_v47 = vpop.permute.xlu1 %3770  ;;  %v3760_v6 = vadd.f32 %v3758_v21, %v3754_v12  ;;  %v3895_v17 = vmul.f32 %v12757_v56, %v3893_v10 }
 0x78e   : > { %v3769_v29 = vpop.permute.xlu0 %3768  ;;  %v3775_v33 = vadd.f32 %v3771_v47, %v3761_v30  ;;  %v3894_v47 = vmul.f32 %v12781_v7, %v3893_v10 }
 0x78f   : > { %v3774_v57 = vadd.f32 %v3769_v29, %v3760_v6 }
 0x791   : > { %v3785_v18 = vpop.permute.xlu1 %3784 }
 0x792   : > { %v3789_v13 = vadd.f32 %v3785_v18, %v3775_v33  ;;  %v3783_v20 = vpop.permute.xlu0 %3782 }
 0x793   : > { %v3788_v26 = vadd.f32 %v3783_v20, %v3774_v57 }
 0x794   : > { %v3795_v19 = vadd.f32 %v3793_v14, %v3789_v13  ;;  %v3927_v13 = vstv %s9466_s27 }
 0x795   : > { %v3805_v24 = vpop.permute.xlu1 %3804  ;;  %v3794_v53 = vadd.f32 %v3792_v32, %v3788_v26 }
 0x796   : > { %v3803_v63 = vpop.permute.xlu0 %3802  ;;  %v3809_v48 = vadd.f32 %v3805_v24, %v3795_v19 }
 0x797   : > { %v3808_v31 = vadd.f32 %v3803_v63, %v3794_v53 }
 0x799   : > { %v3819_v45 = vpop.permute.xlu1 %3818 }
 0x79a   : > { %v3823_v15 = vadd.f32 %v3819_v45, %v3809_v48  ;;  %v3817_v34 = vpop.permute.xlu0 %3816 }
 0x79b   : > { %v3822_v44 = vadd.f32 %v3817_v34, %v3808_v31 }
 0x79c   : > { %v3829_v50 = vadd.f32 %v3827_v16, %v3823_v15 }
 0x79d   : > { %v3873_v54 = vpop.permute.xlu1 %3872  ;;  %v3828_v3 = vadd.f32 %v3826_v58, %v3822_v44 }
 0x79e   : > { %v3837_v52 = vpop.permute.xlu0 %3836 }
 0x79f   : > { %v3842_v55 = vadd.f32 %v3837_v52, %v3828_v3 }
 0x7a1   : > { %v3839_v22 = vpop.permute.xlu1 %3838 }
 0x7a2   : > { %v3851_v38 = vpop.permute.xlu0 %3850  ;;  %v3843_v11 = vadd.f32 %v3839_v22, %v3829_v50 }
 0x7a3   : > { %v3856_v36 = vadd.f32 %v3851_v38, %v3842_v55 }
 0x7a5   : > { %v3853_v5 = vpop.permute.xlu1 %3852  ;;  %v3862_v62 = vadd.f32 %v3860_v59, %v3856_v36 }
 0x7a6   : > { %v3857_v2 = vadd.f32 %v3853_v5, %v3843_v11  ;;  %v3871_v39 = vpop.permute.xlu0 %3870 }
 0x7a7   : > { %v3876_v49 = vadd.f32 %v3871_v39, %v3862_v62 }
 0x7a8   : > { %v3863_v41 = vadd.f32 %v3861_v4, %v3857_v2 }
 0x7a9   : > { %v3887_v37 = vpop.permute.xlu1 %3886 }
 0x7aa   : > { %v3877_v12 = vadd.f32 %v3873_v54, %v3863_v41  ;;  %v3885_v21 = vpop.permute.xlu0 %3884 }
 0x7ab   : > { %v3890_v30 = vadd.f32 %v3885_v21, %v3876_v49 }
 0x7ac   : > { %v3891_v6 = vadd.f32 %v3887_v37, %v3877_v12 }
 0x7ad   : > { %v3907_v29 = vpop.permute.xlu1 %3906  ;;  %v3896_v8 = vadd.f32 %v3894_v47, %v3890_v30 }
 0x7ae   : > { %v3897_v33 = vadd.f32 %v3895_v17, %v3891_v6  ;;  %v3905_v57 = vpop.permute.xlu0 %3904 }
 0x7af   : > { %v3910_v18 = vadd.f32 %v3905_v57, %v3896_v8 }
 0x7b0   : > { %v3911_v35 = vadd.f32 %v3907_v29, %v3897_v33 }
 0x7b1   : > { %v3921_v20 = vpop.permute.xlu1 %3920 }
 0x7b2   : > { %v3925_v14 = vadd.f32 %v3921_v20, %v3911_v35  ;;  %v3919_v26 = vpop.permute.xlu0 %3918  ;;  %v5673_v35 = vld [vmem:[#allocation13] sm:$0x7f]  ;;  %v5833_v20 = vld [vmem:[#allocation13 + $0x10] sm:$0x7f] }
 0x7b3   : > { %v3924_v32 = vadd.f32 %v3919_v26, %v3910_v18  ;;  %v5754_v18 = vld [vmem:[#allocation13 + $0x8] sm:$0x7f]  ;;  %v5912_v26 = vld [vmem:[#allocation13 + $0x18] sm:$0x7f] }
 0x7b4   : > { %v3929_v19 = vadd.f32 %v3927_v13, %v3925_v14 }
 0x7b5   : > { %v3928_v24 = vadd.f32 %v3927_v13, %v3924_v32 }
 0x7b6   : > { %v3931_v53 = vmax.f32 %v3929_v19, 0.0  ;;  %v5991_v19 = vld [vmem:[#allocation13 + $0x20] sm:$0x7f] }
 0x7b7   : > { %v3930_v63 = vmax.f32 %v3928_v24, 0.0 }
 0x7b9   : > { %v12828_v40 = vpack.c.bf16 %v3931_v53, %v3930_v63  ;;  %v6070_v53 = vld [vmem:[#allocation13 + $0x28] sm:$0x7f] }
 0x803   : > { %v4154_v7 = vpop.f32.mrb[28].mxu1 }
 0x804   : > { %v10012_v48 = vpop.f32.mrb[29].mxu1 }
 0x805   : > { %v6228_v48 = vld [vmem:[#allocation13 + $0x38] sm:$0x7f] }
 0x807   : > { %v4227_v56 = vpop.f32.mrb[30].mxu1 }
 0x808   : > { %v12830_v31 = vmax.f32 %v4154_v7, %v4227_v56  ;;  %v10019_v45 = vpop.f32.mrb[31].mxu1  ;;  %v6307_v56 = vld [vmem:[#allocation13 + $0x40] sm:$0x7f] }
 0x809   : > { %v6386_v45 = vld [vmem:[#allocation13 + $0x48] sm:$0x7f] }
 0x80a   : > { %v5755_v13 = vrot.slane %v12830_v31, 1  ;;  %v5834_v14 = vrot.slane %v12830_v31, 2  ;;  %v5913_v32 = vrot.slane %v12830_v31, 3  ;;  %v5992_v24 = vrot.slane %v12830_v31, 4 }
 0x80b   : > { %v4301_v15 = vpop.f32.mrb[32].mxu1  ;;  %v6071_v63 = vrot.slane %v12830_v31, 5  ;;  %v6150_v7 = vrot.slane %v12830_v31, 6 }
 0x80c   : > { %v10026_v34 = vpop.f32.mrb[33].mxu1 }
 0x80d   : > { %v6465_v34 = vld [vmem:[#allocation13 + $0x50] sm:$0x7f] }
 0x80f   : > { %v4371_v16 = vpop.f32.mrb[34].mxu1 }
 0x810   : > { %v4375_v44 = vmax.f32 %v4301_v15, %v4371_v16  ;;  %v10033_v58 = vpop.f32.mrb[35].mxu1 }
 0x812   : > { %10039 = vmatmul.mubr.msk.f32.vlgmr.msra.gmra.mrb[36].mxu1 %vm3932_vm7, %v4375_v44 }
 0x813   : > { %10556 = vmatpush3.bf16.msk.msra.mxu1 %vm12705_vm12, %v11577_v46  ;;  %10045 = vmatprep.mubr.msk.f32.mxu1 %vm11048_vm4, %v11040_v0 }
 0x814   : > { %10557 = vmatprep.subr.bf16.mxu1 %v11047_v42 }
 0x816   : > { %10046 = vmatmul.mubr.msk.f32.vlgmr.msra.gmra.mrb[38].mxu1 %vm3932_vm7, %v4375_v44  ;;  %v6544_v44 = vld [vmem:[#allocation13 + $0x58] sm:$0x7f] }
 0x817   : > { %10560 = vmatpush3.bf16.msk.msra.mxu1 %vm12079_vm15, %v12499_v51  ;;  %10052 = vmatprep.mubr.msk.f32.mxu1 %vm11048_vm4, %v11040_v0 }
 0x818   : > { %10561 = vmatprep.subr.bf16.mxu1 %v11047_v42 }
 0x81a   : > { %10053 = vmatmul.mubr.msk.f32.vlgmr.msra.gmra.mrb[40].mxu1 %vm3932_vm7, %v11342_v60 }
 0x81b   : > { %10564 = vmatpush3.bf16.msk.msra.mxu1 %vm12079_vm15, %v12499_v51  ;;  %10059 = vmatprep.mubr.msk.f32.mxu1 %vm11048_vm4, %v11040_v0 }
 0x81c   : > { %10569 = vmatprep.subr.bf16.mxu1 %v11047_v42 }
 0x81e   : > { %10060 = vmatmul.mubr.msk.f32.vlgmr.msra.gmra.mrb[42].mxu1 %vm3932_vm7, %v11475_v23 }
 0x81f   : > { %10572 = vmatpush3.bf16.msk.msra.mxu1 %vm12705_vm12, %v11577_v46  ;;  %10073 = vmatprep.mubr.msk.f32.mxu1 %vm11048_vm4, %v11040_v0 }
 0x820   : > { %10577 = vmatprep.subr.bf16.mxu1 %v11047_v42 }
 0x8e5   : > { %v4445_v50 = vpop.f32.mrb[36].mxu1 }
 0x8e6   : > { %v10040_v54 = vpop.f32.mrb[37].mxu1 }
 0x8e9   : > { %v4515_v51 = vpop.f32.mrb[38].mxu1 }
 0x8ea   : > { %v12862_v3 = vmax.f32 %v4445_v50, %v4515_v51  ;;  %v10047_v52 = vpop.f32.mrb[39].mxu1  ;;  %v6623_v50 = vld [vmem:[#allocation13 + $0x60] sm:$0x7f]  ;;  %v6702_v51 = vld [vmem:[#allocation13 + $0x68] sm:$0x7f] }
 0x8ec   : > { %v6387_v15 = vrot.slane %v12862_v3, 2  ;;  %v6466_v16 = vrot.slane %v12862_v3, 3  ;;  %v6545_v58 = vrot.slane %v12862_v3, 4  ;;  %v6624_v54 = vrot.slane %v12862_v3, 5 }
 0x8ed   : > { %v4589_v61 = vpop.f32.mrb[40].mxu1  ;;  %v6703_v52 = vrot.slane %v12862_v3, 6 }
 0x8ee   : > { %v10054_v55 = vpop.f32.mrb[41].mxu1 }
 0x8ef   : > { %v6860_v55 = vld [vmem:[#allocation13 + $0x78] sm:$0x7f] }
 0x8f1   : > { %v4659_v22 = vpop.f32.mrb[42].mxu1 }
 0x8f2   : > { %v4663_v38 = vmax.f32 %v4589_v61, %v4659_v22  ;;  %v10061_v36 = vpop.f32.mrb[43].mxu1  ;;  %v6781_v61 = vld [vmem:[#allocation13 + $0x70] sm:$0x7f]  ;;  %v6939_v22 = vld [vmem:[#allocation13 + $0x80] sm:$0x7f] }
 0x8f3   : > { %v7018_v36 = vld [vmem:[#allocation13 + $0x88] sm:$0x7f] }
 0x8f4   : > { %10067 = vmatmul.mubr.msk.f32.vlgmr.msra.gmra.mrb[0].mxu0 %vm3932_vm7, %v4663_v38  ;;  %10074 = vmatmul.mubr.msk.f32.vlgmr.msra.gmra.mrb[44].mxu1 %vm3932_vm7, %v4663_v38 }
 0x8f5   : > { %10576 = vmatpush3.bf16.msk.msra.mxu0 %vm12079_vm15, %v12683_v1  ;;  %10580 = vmatpush3.bf16.msk.msra.mxu1 %vm12079_vm15, %v12683_v1 }
 0x8f6   : > { %10080 = vmatprep.mubr.msk.f32.mxu0 %vm11048_vm4, %v11040_v0  ;;  %10087 = vmatprep.mubr.msk.f32.mxu1 %vm11048_vm4, %v11040_v0 }
 0x8f7   : > { %10581 = vmatprep.subr.bf16.mxu0 %v11047_v42  ;;  %10585 = vmatprep.subr.bf16.mxu1 %v11047_v42 }
 0x8f8   : > { %10081 = vmatmul.mubr.msk.f32.vlgmr.msra.gmra.mrb[2].mxu0 %vm3932_vm7, %v11342_v60  ;;  %10088 = vmatmul.mubr.msk.f32.vlgmr.msra.gmra.mrb[46].mxu1 %vm3932_vm7, %v11475_v23 }
 0x8f9   : > { %10584 = vmatpush3.bf16.msk.msra.mxu0 %vm12358_vm0, %v11534_v27  ;;  %10588 = vmatpush3.bf16.msk.msra.mxu1 %vm12705_vm12, %v11577_v46 }
 0x8fa   : > { %10094 = vmatprep.mubr.msk.f32.mxu0 %vm11048_vm4, %v11040_v0  ;;  %10101 = vmatprep.mubr.msk.f32.mxu1 %vm11048_vm4, %v11040_v0 }
 0x8fb   : > { %10589 = vmatprep.subr.bf16.mxu0 %v11047_v42  ;;  %10593 = vmatprep.subr.bf16.mxu1 %v11047_v42 }
 0x9c7   : > { %v4733_v1 = vpop.f32.mrb[0].mxu0  ;;  %v4803_v59 = vpop.f32.mrb[44].mxu1 }
 0x9c8   : > { %v12894_v11 = vmax.f32 %v4733_v1, %v4803_v59  ;;  %v10068_v5 = vpop.f32.mrb[1].mxu0  ;;  %v10075_v62 = vpop.f32.mrb[45].mxu1  ;;  %v7097_v59 = vld [vmem:[#allocation13 + $0x90] sm:$0x7f] }
 0x9c9   : > { %v7176_v62 = vld [vmem:[#allocation13 + $0x98] sm:$0x7f] }
 0x9ca   : > { %v6940_v38 = vrot.slane %v12894_v11, 2  ;;  %v7019_v1 = vrot.slane %v12894_v11, 3  ;;  %v7098_v5 = vrot.slane %v12894_v11, 4 }
 0x9cb   : > { %v4877_v4 = vpop.f32.mrb[2].mxu0  ;;  %v4947_v2 = vpop.f32.mrb[46].mxu1 }
 0x9cc   : > { %v4951_v39 = vmax.f32 %v4877_v4, %v4947_v2  ;;  %v10082_v41 = vpop.f32.mrb[3].mxu0  ;;  %v10089_v10 = vpop.f32.mrb[47].mxu1  ;;  %v7177_v4 = vrot.slane %v12894_v11, 5  ;;  %v7255_v2 = vld [vmem:[#allocation13 + $0xa0] sm:$0x7f] }
 0x9cd   : > { %v7334_v41 = vld [vmem:[#allocation13 + $0xa8] sm:$0x7f]  ;;  %v7413_v10 = vld [vmem:[#allocation13 + $0xb0] sm:$0x7f] }
 0x9ce   : > { %10095 = vmatmul.mubr.msk.f32.vlgmr.msra.gmra.mrb[4].mxu0 %vm3932_vm7, %v4951_v39  ;;  %10102 = vmatmul.mubr.msk.f32.vlgmr.msra.gmra.mrb[48].mxu1 %vm3932_vm7, %v4951_v39  ;;  %v7256_v39 = vrot.slane %v12894_v11, 6 }
 0x9cf   : > { %10592 = vmatpush3.bf16.msk.msra.mxu0 %vm12079_vm15, %v12810_v9  ;;  %10596 = vmatpush3.bf16.msk.msra.mxu1 %vm12079_vm15, %v12810_v9 }
 0x9d0   : > { %10108 = vmatprep.mubr.msk.f32.mxu0 %vm11048_vm4, %v11040_v0  ;;  %10115 = vmatprep.mubr.msk.f32.mxu1 %vm11048_vm4, %v11040_v0 }
 0x9d1   : > { %10597 = vmatprep.subr.bf16.mxu0 %v11047_v42  ;;  %10601 = vmatprep.subr.bf16.mxu1 %v11047_v42 }
 0x9d2   : > { %10109 = vmatmul.mubr.msk.f32.vlgmr.msra.gmra.mrb[6].mxu0 %vm3932_vm7, %v11342_v60  ;;  %10116 = vmatmul.mubr.msk.f32.vlgmr.msra.gmra.mrb[50].mxu1 %vm3932_vm7, %v11475_v23 }
 0x9d3   : > { %10600 = vmatpush3.bf16.msk.msra.mxu0 %vm12358_vm0, %v11534_v27  ;;  %10604 = vmatpush3.bf16.msk.msra.mxu1 %vm12705_vm12, %v11577_v46 }
 0x9d4   : > { %10122 = vmatprep.mubr.msk.f32.mxu0 %vm11048_vm4, %v11040_v0  ;;  %10129 = vmatprep.mubr.msk.f32.mxu1 %vm11048_vm4, %v11040_v0 }
 0x9d5   : > { %10605 = vmatprep.subr.bf16.mxu0 %v11047_v42  ;;  %10609 = vmatprep.subr.bf16.mxu1 %v11047_v42 }
 0xaa1   : > { %v5021_v9 = vpop.f32.mrb[4].mxu0  ;;  %v5091_v49 = vpop.f32.mrb[48].mxu1 }
 0xaa2   : > { %v12926_v37 = vmax.f32 %v5021_v9, %v5091_v49  ;;  %v10096_v12 = vpop.f32.mrb[5].mxu0  ;;  %v10103_v21 = vpop.f32.mrb[49].mxu1  ;;  %v7492_v9 = vld [vmem:[#allocation13 + $0xb8] sm:$0x7f] }
 0xaa3   : > { %v7571_v12 = vld [vmem:[#allocation13 + $0xc0] sm:$0x7f] }
 0xaa4   : > { %v7493_v49 = vrot.slane %v12926_v37, 2  ;;  %v7572_v21 = vrot.slane %v12926_v37, 3 }
 0xaa5   : > { %v5165_v30 = vpop.f32.mrb[6].mxu0  ;;  %v5235_v47 = vpop.f32.mrb[50].mxu1 }
 0xaa6   : > { %v5239_v6 = vmax.f32 %v5165_v30, %v5235_v47  ;;  %v10110_v17 = vpop.f32.mrb[7].mxu0  ;;  %v10117_v29 = vpop.f32.mrb[51].mxu1  ;;  %v7650_v30 = vld [vmem:[#allocation13 + $0xc8] sm:$0x7f]  ;;  %v7651_v47 = vrot.slane %v12926_v37, 4 }
 0xaa7   : > { %v8993_v17 = vld [vmem:[%s13332_s7] sm:$0xff]  ;;  %v8994_v29 = vld [vmem:[%s13332_s7 + $0x8] sm:$0xff] }
 0xaa8   : > { %10123 = vmatmul.mubr.msk.f32.vlgmr.msra.gmra.mrb[8].mxu0 %vm3932_vm7, %v5239_v6  ;;  %10130 = vmatmul.mubr.msk.f32.vlgmr.msra.gmra.mrb[52].mxu1 %vm3932_vm7, %v5239_v6  ;;  %v7729_v6 = vld [vmem:[#allocation13 + $0xd0] sm:$0x7f] }
 0xaa9   : > { %10608 = vmatpush3.bf16.msk.msra.mxu0 %vm12079_vm15, %v12828_v40  ;;  %10612 = vmatpush3.bf16.msk.msra.mxu1 %vm12079_vm15, %v12828_v40  ;;  %v6149_v40 = vld [vmem:[#allocation13 + $0x30] sm:$0x7f] }
 0xaaa   : > { %10136 = vmatprep.mubr.msk.f32.mxu0 %vm11048_vm4, %v11040_v0  ;;  %10143 = vmatprep.mubr.msk.f32.mxu1 %vm11048_vm4, %v11040_v0 }
 0xaab   : > { %10613 = vmatprep.subr.bf16.mxu0 %v11047_v42  ;;  %10617 = vmatprep.subr.bf16.mxu1 %v11047_v42 }
 0xaac   : > { %10137 = vmatmul.mubr.msk.f32.vlgmr.msra.gmra.mrb[10].mxu0 %vm3932_vm7, %v11342_v60  ;;  %10144 = vmatmul.mubr.msk.f32.vlgmr.msra.gmra.mrb[54].mxu1 %vm3932_vm7, %v11475_v23 }
 0xaad   : > { %10616 = vmatpush3.bf16.msk.msra.mxu0 %vm12358_vm0, %v11534_v27  ;;  %10620 = vmatpush3.bf16.msk.msra.mxu1 %vm12705_vm12, %v11577_v46 }
 0xaae   : > { %10150 = vmatprep.mubr.msk.f32.mxu0 %vm11048_vm4, %v11040_v0  ;;  %10157 = vmatprep.mubr.msk.f32.mxu1 %vm11048_vm4, %v11040_v0 }
 0xaaf   : > { %10160 = vmatprep.subr.mxu0 %v11040_v0  ;;  %10621 = vmatprep.subr.bf16.mxu1 %v11047_v42 }
 0xb7b   : > { %v5309_v60 = vpop.f32.mrb[8].mxu0  ;;  %v5379_v23 = vpop.f32.mrb[52].mxu1 }
 0xb7c   : > { %v12958_v25 = vmax.f32 %v5309_v60, %v5379_v23  ;;  %v10124_v28 = vpop.f32.mrb[9].mxu0  ;;  %v10131_v27 = vpop.f32.mrb[53].mxu1  ;;  %v8995_v60 = vld [vmem:[%s13332_s7 + $0x10] sm:$0xff]  ;;  %v10622_v23 = vpack.c.bf16 %v8994_v29, %v8993_v17 }
 0xb7d   : > { %v8996_v28 = vld [vmem:[%s13332_s7 + $0x18] sm:$0xff] }
 0xb7e   : > { %v10625_v27 = vpack.c.bf16 %v8996_v28, %v8995_v60 }
 0xb7f   : > { %v5453_v8 = vpop.f32.mrb[10].mxu0  ;;  %v5523_v33 = vpop.f32.mrb[54].mxu1 }
 0xb80   : > { %v5527_v43 = vmax.f32 %v5453_v8, %v5523_v33  ;;  %v10138_v46 = vpop.f32.mrb[11].mxu0  ;;  %v10145_v57 = vpop.f32.mrb[55].mxu1  ;;  %v8997_v8 = vld [vmem:[%s13332_s7 + $0x20] sm:$0xff]  ;;  %v8998_v33 = vld [vmem:[%s13332_s7 + $0x28] sm:$0xff] }
 0xb81   : > { %v7808_v46 = vld [vmem:[#allocation13 + $0xd8] sm:$0x7f] }
 0xb82   : > { %10151 = vmatmul.mubr.msk.f32.vlgmr.msra.gmra.mrb[12].mxu0 %vm3932_vm7, %v5527_v43  ;;  %10158 = vmatmul.mubr.msk.f32.vlgmr.msra.gmra.mrb[56].mxu1 %vm3932_vm7, %v5527_v43  ;;  %v7730_v43 = vrot.slane %v12926_v37, 5 }
 0xb83   : > { %10161 = vmatpush3.msk.msra.mxu0 %vm5678_vm1, %v5673_v35  ;;  %10162 = vmatprep.mubr.msk.f32.mxu0 %vm11048_vm4, %v11040_v0 }
 0xb84   : > { %10165 = vmatprep.subr.mxu0 %v11040_v0  ;;  %10402 = vmatprep.mubr.msk.f32.mxu1 %vm11048_vm4, %v11040_v0 }
 0xb85   : > { %10623 = vmatpush3.bf16.msra.mxu1 %v10622_v23 }
 0xb86   : > { %10163 = vmatmul.mubr.msk.f32.vlgmr.msra.gmra.mrb[14].mxu0 %vm5674_vm2, %v12830_v31  ;;  %v6308_v31 = vrot.slane %v12862_v3, 1  ;;  %10624 = vmatprep.subr.bf16.mxu1 %v11047_v42 }
 0xb87   : > { %10166 = vmatpush3.msk.msra.mxu0 %vm5678_vm1, %v5754_v18  ;;  %10167 = vmatprep.mubr.msk.f32.mxu0 %vm11048_vm4, %v11040_v0  ;;  %v10628_v18 = vpack.c.bf16 %v8998_v33, %v8997_v8 }
 0xb88   : > { %10170 = vmatprep.subr.mxu0 %v11040_v0 }
 0xb89   : > { %10626 = vmatpush3.bf16.msra.mxu1 %v10625_v27 }
 0xb8a   : > { %10627 = vmatprep.subr.bf16.mxu1 %v11047_v42 }
 0xb8d   : > { %10629 = vmatpush3.bf16.msra.mxu1 %v10628_v18 }
 0xb8e   : > { %10168 = vmatmul.mubr.msk.f32.vlgmr.msra.gmra.mrb[14].mxu0 %vm5674_vm2, %v5755_v13  ;;  %10630 = vmatprep.subr.bf16.mxu1 %v11047_v42 }
 0xb8f   : > { %10171 = vmatpush3.msk.msra.mxu0 %vm5678_vm1, %v5833_v20  ;;  %10172 = vmatprep.mubr.msk.f32.mxu0 %vm11048_vm4, %v11040_v0 }
 0xb90   : > { %10175 = vmatprep.subr.mxu0 %v11040_v0 }
 0xb96   : > { %10173 = vmatmul.mubr.msk.f32.vlgmr.msra.gmra.mrb[14].mxu0 %vm5674_vm2, %v5834_v14 }
 0xb97   : > { %10176 = vmatpush3.msk.msra.mxu0 %vm5678_vm1, %v5912_v26  ;;  %10177 = vmatprep.mubr.msk.f32.mxu0 %vm11048_vm4, %v11040_v0  ;;  %v8999_v26 = vld [vmem:[%s13332_s7 + $0x30] sm:$0xff] }
 0xb98   : > { %10180 = vmatprep.subr.mxu0 %v11040_v0 }
 0xb9e   : > { %10178 = vmatmul.mubr.msk.f32.vlgmr.msra.gmra.mrb[14].mxu0 %vm5674_vm2, %v5913_v32  ;;  %v9000_v32 = vld [vmem:[%s13332_s7 + $0x38] sm:$0xff] }
 0xb9f   : > { %10181 = vmatpush3.msk.msra.mxu0 %vm5678_vm1, %v5991_v19  ;;  %10182 = vmatprep.mubr.msk.f32.mxu0 %vm11048_vm4, %v11040_v0  ;;  %v10631_v19 = vpack.c.bf16 %v9000_v32, %v8999_v26 }
 0xba0   : > { %10185 = vmatprep.subr.mxu0 %v11040_v0 }
 0xba1   : > { %10632 = vmatpush3.bf16.msra.mxu1 %v10631_v19 }
 0xba2   : > { %10633 = vmatprep.subr.bf16.mxu1 %v11047_v42 }
 0xba6   : > { %10183 = vmatmul.mubr.msk.f32.vlgmr.msra.gmra.mrb[14].mxu0 %vm5674_vm2, %v5992_v24  ;;  %v9001_v24 = vld [vmem:[%s13332_s7 + $0x40] sm:$0xff] }
 0xba7   : > { %10186 = vmatpush3.msk.msra.mxu0 %vm5678_vm1, %v6070_v53  ;;  %10187 = vmatprep.mubr.msk.f32.mxu0 %vm11048_vm4, %v11040_v0  ;;  %v9002_v53 = vld [vmem:[%s13332_s7 + $0x48] sm:$0xff] }
 0xba8   : > { %10190 = vmatprep.subr.mxu0 %v11040_v0 }
 0xbae   : > { %10188 = vmatmul.mubr.msk.f32.vlgmr.msra.gmra.mrb[14].mxu0 %vm5674_vm2, %v6071_v63  ;;  %v7809_v63 = vrot.slane %v12926_v37, 6 }
 0xbaf   : > { %10191 = vmatpush3.msk.msra.mxu0 %vm5678_vm1, %v6149_v40  ;;  %10192 = vmatprep.mubr.msk.f32.mxu0 %vm11048_vm4, %v11040_v0  ;;  %v7887_v40 = vld [vmem:[#allocation13 + $0xe0] sm:$0x7f] }
 0xbb0   : > { %10195 = vmatprep.subr.mxu0 %v11040_v0 }
 0xbb6   : > { %10193 = vmatmul.mubr.msk.f32.vlgmr.msra.gmra.mrb[14].mxu0 %vm5674_vm2, %v6150_v7  ;;  %v10634_v7 = vpack.c.bf16 %v9002_v53, %v9001_v24 }
 0xbb7   : > { %10196 = vmatpush3.msk.msra.mxu0 %vm5678_vm1, %v6228_v48  ;;  %10197 = vmatprep.mubr.msk.f32.mxu0 %vm11048_vm4, %v11040_v0  ;;  %v9003_v48 = vld [vmem:[%s13332_s7 + $0x50] sm:$0xff] }
 0xbb8   : > { %10200 = vmatprep.subr.mxu0 %v11040_v0  ;;  %10635 = vmatpush3.bf16.msra.mxu1 %v10634_v7 }
 0xbb9   : > { %10636 = vmatprep.subr.bf16.mxu1 %v11047_v42 }
 0xbbe   : > { %10198 = vmatmul.mubr.msk.f32.vlgmr.msra.gmra.mrb[14].mxu0 %vm5674_vm2, %v12862_v3  ;;  %v6861_v3 = vrot.slane %v12894_v11, 1 }
 0xbbf   : > { %10201 = vmatpush3.msk.msra.mxu0 %vm5678_vm1, %v6307_v56  ;;  %10202 = vmatprep.mubr.msk.f32.mxu0 %vm11048_vm4, %v11040_v0  ;;  %v9004_v56 = vld [vmem:[%s13332_s7 + $0x58] sm:$0xff] }
 0xbc0   : > { %10205 = vmatprep.subr.mxu0 %v11040_v0 }
 0xbc6   : > { %10203 = vmatmul.mubr.msk.f32.vlgmr.msra.gmra.mrb[14].mxu0 %vm5674_vm2, %v6308_v31  ;;  %v9005_v31 = vld [vmem:[%s13332_s7 + $0x60] sm:$0xff] }
 0xbc7   : > { %10206 = vmatpush3.msk.msra.mxu0 %vm5678_vm1, %v6386_v45  ;;  %10207 = vmatprep.mubr.msk.f32.mxu0 %vm11048_vm4, %v11040_v0  ;;  %v9006_v45 = vld [vmem:[%s13332_s7 + $0x68] sm:$0xff] }
 0xbc8   : > { %10210 = vmatprep.subr.mxu0 %v11040_v0 }
 0xbce   : > { %10208 = vmatmul.mubr.msk.f32.vlgmr.msra.gmra.mrb[14].mxu0 %vm5674_vm2, %v6387_v15  ;;  %v7966_v15 = vld [vmem:[#allocation13 + $0xe8] sm:$0x7f] }
 0xbcf   : > { %10211 = vmatpush3.msk.msra.mxu0 %vm5678_vm1, %v6465_v34  ;;  %10212 = vmatprep.mubr.msk.f32.mxu0 %vm11048_vm4, %v11040_v0  ;;  %v10640_v34 = vpack.c.bf16 %v9006_v45, %v9005_v31 }
 0xbd0   : > { %10215 = vmatprep.subr.mxu0 %v11040_v0 }
 0xbd6   : > { %10213 = vmatmul.mubr.msk.f32.vlgmr.msra.gmra.mrb[14].mxu0 %vm5674_vm2, %v6466_v16  ;;  %v7967_v16 = vrot.slane %v12958_v25, 1 }
 0xbd7   : > { %10216 = vmatpush3.msk.msra.mxu0 %vm5678_vm1, %v6544_v44  ;;  %10217 = vmatprep.mubr.msk.f32.mxu0 %vm11048_vm4, %v11040_v0  ;;  %v8045_v44 = vld [vmem:[#allocation13 + $0xf0] sm:$0x7f] }
 0xbd8   : > { %10220 = vmatprep.subr.mxu0 %v11040_v0 }
 0xbde   : > { %10218 = vmatmul.mubr.msk.f32.vlgmr.msra.gmra.mrb[14].mxu0 %vm5674_vm2, %v6545_v58  ;;  %v8046_v58 = vrot.slane %v12958_v25, 2 }
 0xbdf   : > { %10221 = vmatpush3.msk.msra.mxu0 %vm5678_vm1, %v6623_v50  ;;  %10222 = vmatprep.mubr.msk.f32.mxu0 %vm11048_vm4, %v11040_v0  ;;  %v8124_v50 = vld [vmem:[#allocation13 + $0xf8] sm:$0x7f] }
 0xbe0   : > { %10225 = vmatprep.subr.mxu0 %v11040_v0 }
 0xbe6   : > { %10223 = vmatmul.mubr.msk.f32.vlgmr.msra.gmra.mrb[14].mxu0 %vm5674_vm2, %v6624_v54  ;;  %v8203_v54 = vld [vmem:[#allocation13 + $0x100] sm:$0x7f] }
 0xbe7   : > { %10226 = vmatpush3.msk.msra.mxu0 %vm5678_vm1, %v6702_v51  ;;  %10227 = vmatprep.mubr.msk.f32.mxu0 %vm11048_vm4, %v11040_v0  ;;  %v8204_v51 = vrot.slane %v12958_v25, 4 }
 0xbe8   : > { %10230 = vmatprep.subr.mxu0 %v11040_v0 }
 0xbee   : > { %10228 = vmatmul.mubr.msk.f32.vlgmr.msra.gmra.mrb[14].mxu0 %vm5674_vm2, %v6703_v52  ;;  %v8282_v52 = vld [vmem:[#allocation13 + $0x108] sm:$0x7f] }
 0xbef   : > { %10231 = vmatpush3.msk.msra.mxu0 %vm5678_vm1, %v6781_v61  ;;  %10232 = vmatprep.mubr.msk.f32.mxu0 %vm11048_vm4, %v11040_v0  ;;  %v8283_v61 = vrot.slane %v12958_v25, 5 }
 0xbf0   : > { %10235 = vmatprep.subr.mxu0 %v11040_v0 }
 0xbf6   : > { %10233 = vmatmul.mubr.msk.f32.vlgmr.msra.gmra.mrb[14].mxu0 %vm5674_vm2, %v12894_v11  ;;  %v7414_v11 = vrot.slane %v12926_v37, 1 }
 0xbf7   : > { %10236 = vmatpush3.msk.msra.mxu0 %vm5678_vm1, %v6860_v55  ;;  %10237 = vmatprep.mubr.msk.f32.mxu0 %vm11048_vm4, %v11040_v0  ;;  %v8361_v55 = vld [vmem:[#allocation13 + $0x110] sm:$0x7f] }
 0xbf8   : > { %10240 = vmatprep.subr.mxu0 %v11040_v0 }
 0xbfe   : > { %10238 = vmatmul.mubr.msk.f32.vlgmr.msra.gmra.mrb[14].mxu0 %vm5674_vm2, %v6861_v3  ;;  %v8362_v3 = vrot.slane %v12958_v25, 6 }
 0xbff   : > { %10241 = vmatpush3.msk.msra.mxu0 %vm5678_vm1, %v6939_v22  ;;  %10242 = vmatprep.mubr.msk.f32.mxu0 %vm11048_vm4, %v11040_v0  ;;  %v8440_v22 = vld [vmem:[#allocation13 + $0x118] sm:$0x7f] }
 0xc00   : > { %10245 = vmatprep.subr.mxu0 %v11040_v0 }
 0xc06   : > { %10243 = vmatmul.mubr.msk.f32.vlgmr.msra.gmra.mrb[14].mxu0 %vm5674_vm2, %v6940_v38  ;;  %v8519_v38 = vld [vmem:[#allocation13 + $0x120] sm:$0x7f] }
 0xc07   : > { %10246 = vmatpush3.msk.msra.mxu0 %vm5678_vm1, %v7018_v36  ;;  %10247 = vmatprep.mubr.msk.f32.mxu0 %vm11048_vm4, %v11040_v0  ;;  %v8598_v36 = vld [vmem:[#allocation13 + $0x128] sm:$0x7f] }
 0xc08   : > { %10250 = vmatprep.subr.mxu0 %v11040_v0 }
 0xc0e   : > { %10248 = vmatmul.mubr.msk.f32.vlgmr.msra.gmra.mrb[14].mxu0 %vm5674_vm2, %v7019_v1 }
 0xc0f   : > { %10251 = vmatpush3.msk.msra.mxu0 %vm5678_vm1, %v7097_v59  ;;  %10252 = vmatprep.mubr.msk.f32.mxu0 %vm11048_vm4, %v11040_v0  ;;  %v8677_v59 = vld [vmem:[#allocation13 + $0x130] sm:$0x7f] }
 0xc10   : > { %10255 = vmatprep.subr.mxu0 %v11040_v0 }
 0xc16   : > { %10253 = vmatmul.mubr.msk.f32.vlgmr.msra.gmra.mrb[14].mxu0 %vm5674_vm2, %v7098_v5 }
 0xc17   : > { %10256 = vmatpush3.msk.msra.mxu0 %vm5678_vm1, %v7176_v62  ;;  %10257 = vmatprep.mubr.msk.f32.mxu0 %vm11048_vm4, %v11040_v0  ;;  %v8756_v62 = vld [vmem:[#allocation13 + $0x138] sm:$0x7f] }
 0xc18   : > { %10260 = vmatprep.subr.mxu0 %v11040_v0 }
 0xc1e   : > { %10258 = vmatmul.mubr.msk.f32.vlgmr.msra.gmra.mrb[14].mxu0 %vm5674_vm2, %v7177_v4 }
 0xc1f   : > { %10261 = vmatpush3.msk.msra.mxu0 %vm5678_vm1, %v7255_v2  ;;  %10262 = vmatprep.mubr.msk.f32.mxu0 %vm11048_vm4, %v11040_v0  ;;  %v8835_v2 = vld [vmem:[#allocation13 + $0x140] sm:$0x7f] }
 0xc20   : > { %10265 = vmatprep.subr.mxu0 %v11040_v0 }
 0xc26   : > { %10263 = vmatmul.mubr.msk.f32.vlgmr.msra.gmra.mrb[14].mxu0 %vm5674_vm2, %v7256_v39 }
 0xc27   : > { %10266 = vmatpush3.msk.msra.mxu0 %vm5678_vm1, %v7334_v41  ;;  %10267 = vmatprep.mubr.msk.f32.mxu0 %vm11048_vm4, %v11040_v0  ;;  %v8914_v41 = vld [vmem:[#allocation13 + $0x148] sm:$0x7f] }
 0xc28   : > { %10270 = vmatprep.subr.mxu0 %v11040_v0 }
 0xc2e   : > { %10268 = vmatmul.mubr.msk.f32.vlgmr.msra.gmra.mrb[14].mxu0 %vm5674_vm2, %v12926_v37  ;;  %v10637_v37 = vpack.c.bf16 %v9004_v56, %v9003_v48 }
 0xc2f   : > { %10271 = vmatpush3.msk.msra.mxu0 %vm5678_vm1, %v7413_v10  ;;  %10272 = vmatprep.mubr.msk.f32.mxu0 %vm11048_vm4, %v11040_v0 }
 0xc30   : > { %10275 = vmatprep.subr.mxu0 %v11040_v0  ;;  %10638 = vmatpush3.bf16.msra.mxu1 %v10637_v37 }
 0xc31   : > { %10639 = vmatprep.subr.bf16.mxu1 %v11047_v42 }
 0xc34   : > { %10641 = vmatpush3.bf16.msra.mxu1 %v10640_v34 }
 0xc35   : > { %10642 = vmatprep.subr.bf16.mxu1 %v11047_v42  ;;  %v8125_v42 = vrot.slane %v12958_v25, 3 }
 0xc36   : > { %10273 = vmatmul.mubr.msk.f32.vlgmr.msra.gmra.mrb[14].mxu0 %vm5674_vm2, %v7414_v11  ;;  %v9007_v11 = vld [vmem:[%s13332_s7 + $0x70] sm:$0xff] }
 0xc37   : > { %10276 = vmatpush3.msk.msra.mxu0 %vm5678_vm1, %v7492_v9  ;;  %10277 = vmatprep.mubr.msk.f32.mxu0 %vm11048_vm4, %v11040_v0  ;;  %v9008_v9 = vld [vmem:[%s13332_s7 + $0x78] sm:$0xff] }
 0xc38   : > { %10280 = vmatprep.subr.mxu0 %v11040_v0 }
 0xc3e   : > { %10278 = vmatmul.mubr.msk.f32.vlgmr.msra.gmra.mrb[14].mxu0 %vm5674_vm2, %v7493_v49  ;;  %v10643_v49 = vpack.c.bf16 %v9008_v9, %v9007_v11 }
 0xc3f   : > { %10281 = vmatpush3.msk.msra.mxu0 %vm5678_vm1, %v7571_v12  ;;  %10282 = vmatprep.mubr.msk.f32.mxu0 %vm11048_vm4, %v11040_v0  ;;  %v5672_v12 = vld [vmem:[%s13331_s6] sm:$0x1] }
 0xc40   : > { %10285 = vmatprep.subr.mxu0 %v11040_v0  ;;  %10644 = vmatpush3.bf16.msra.mxu1 %v10643_v49 }
 0xc46   : > { %10283 = vmatmul.mubr.msk.f32.vlgmr.msra.gmra.mrb[14].mxu0 %vm5674_vm2, %v7572_v21 }
 0xc47   : > { %10286 = vmatpush3.msk.msra.mxu0 %vm5678_vm1, %v7650_v30  ;;  %10287 = vmatprep.mubr.msk.f32.mxu0 %vm11048_vm4, %v11040_v0 }
 0xc48   : > { %10290 = vmatprep.subr.mxu0 %v11040_v0 }
 0xc4e   : > { %10288 = vmatmul.mubr.msk.f32.vlgmr.msra.gmra.mrb[14].mxu0 %vm5674_vm2, %v7651_v47 }
 0xc4f   : > { %10291 = vmatpush3.msk.msra.mxu0 %vm5678_vm1, %v7729_v6  ;;  %10292 = vmatprep.mubr.msk.f32.mxu0 %vm11048_vm4, %v11040_v0  ;;  %v9009_v6 = vld [vmem:[%s13333_s8] sm:$0x1] }
 0xc50   : > { %10295 = vmatprep.subr.mxu0 %v11040_v0 }
 0xc55   : > { %v5597_v57 = vpop.f32.mrb[12].mxu0  ;;  %v5667_v35 = vpop.f32.mrb[56].mxu1 }
 0xc56   : > { %v13144_v13 = vmax.f32 %v5597_v57, %v5667_v35  ;;  %v10152_v20 = vpop.f32.mrb[13].mxu0  ;;  %v10159_v14 = vpop.f32.mrb[57].mxu1  ;;  %10293 = vmatmul.mubr.msk.f32.vlgmr.msra.gmra.mrb[14].mxu0 %vm5674_vm2, %v7730_v43 }
 0xc57   : > { %10296 = vmatpush3.msk.msra.mxu0 %vm5678_vm1, %v7808_v46  ;;  %10297 = vmatprep.mubr.msk.f32.mxu0 %vm11048_vm4, %v11040_v0 }
 0xc58   : > { %10300 = vmatprep.subr.mxu0 %v11040_v0  ;;  %v8599_v1 = vrot.slane %v13144_v13, 2  ;;  %v8678_v5 = vrot.slane %v13144_v13, 3  ;;  %v8757_v4 = vrot.slane %v13144_v13, 4  ;;  %v8836_v39 = vrot.slane %v13144_v13, 5 }
 0xc59   : > { %v8915_v10 = vrot.slane %v13144_v13, 6 }
 0xc5e   : > { %10298 = vmatmul.mubr.msk.f32.vlgmr.msra.gmra.mrb[14].mxu0 %vm5674_vm2, %v7809_v63 }
 0xc5f   : > { %10301 = vmatpush3.msk.msra.mxu0 %vm5678_vm1, %v7887_v40  ;;  %10302 = vmatprep.mubr.msk.f32.mxu0 %vm11048_vm4, %v11040_v0 }
 0xc60   : > { %10305 = vmatprep.subr.mxu0 %v11040_v0 }
 0xc66   : > { %10303 = vmatmul.mubr.msk.f32.vlgmr.msra.gmra.mrb[14].mxu0 %vm5674_vm2, %v12958_v25  ;;  %v8520_v25 = vrot.slane %v13144_v13, 1 }
 0xc67   : > { %10306 = vmatpush3.msk.msra.mxu0 %vm5678_vm1, %v7966_v15  ;;  %10307 = vmatprep.mubr.msk.f32.mxu0 %vm11048_vm4, %v11040_v0 }
 0xc68   : > { %10310 = vmatprep.subr.mxu0 %v11040_v0 }
 0xc6e   : > { %10308 = vmatmul.mubr.msk.f32.vlgmr.msra.gmra.mrb[14].mxu0 %vm5674_vm2, %v7967_v16 }
 0xc6f   : > { %10311 = vmatpush3.msk.msra.mxu0 %vm5678_vm1, %v8045_v44  ;;  %10312 = vmatprep.mubr.msk.f32.mxu0 %vm11048_vm4, %v11040_v0 }
 0xc70   : > { %10315 = vmatprep.subr.mxu0 %v11040_v0 }
 0xc76   : > { %10313 = vmatmul.mubr.msk.f32.vlgmr.msra.gmra.mrb[14].mxu0 %vm5674_vm2, %v8046_v58 }
 0xc77   : > { %10316 = vmatpush3.msk.msra.mxu0 %vm5678_vm1, %v8124_v50  ;;  %10317 = vmatprep.mubr.msk.f32.mxu0 %vm11048_vm4, %v11040_v0 }
 0xc78   : > { %10320 = vmatprep.subr.mxu0 %v11040_v0 }
 0xc7e   : > { %10318 = vmatmul.mubr.msk.f32.vlgmr.msra.gmra.mrb[14].mxu0 %vm5674_vm2, %v8125_v42 }
 0xc7f   : > { %10321 = vmatpush3.msk.msra.mxu0 %vm5678_vm1, %v8203_v54  ;;  %10322 = vmatprep.mubr.msk.f32.mxu0 %vm11048_vm4, %v11040_v0 }
 0xc80   : > { %10325 = vmatprep.subr.mxu0 %v11040_v0 }
 0xc86   : > { %10323 = vmatmul.mubr.msk.f32.vlgmr.msra.gmra.mrb[14].mxu0 %vm5674_vm2, %v8204_v51 }
 0xc87   : > { %10326 = vmatpush3.msk.msra.mxu0 %vm5678_vm1, %v8282_v52  ;;  %10327 = vmatprep.mubr.msk.f32.mxu0 %vm11048_vm4, %v11040_v0 }
 0xc88   : > { %10330 = vmatprep.subr.mxu0 %v11040_v0 }
 0xc8e   : > { %10328 = vmatmul.mubr.msk.f32.vlgmr.msra.gmra.mrb[14].mxu0 %vm5674_vm2, %v8283_v61 }
 0xc8f   : > { %10331 = vmatpush3.msk.msra.mxu0 %vm5678_vm1, %v8361_v55  ;;  %10332 = vmatprep.mubr.msk.f32.mxu0 %vm11048_vm4, %v11040_v0 }
 0xc90   : > { %10335 = vmatprep.subr.mxu0 %v11040_v0 }
 0xc96   : > { %10333 = vmatmul.mubr.msk.f32.vlgmr.msra.gmra.mrb[14].mxu0 %vm5674_vm2, %v8362_v3 }
 0xc97   : > { %10336 = vmatpush3.msk.msra.mxu0 %vm5678_vm1, %v8440_v22  ;;  %10337 = vmatprep.mubr.msk.f32.mxu0 %vm11048_vm4, %v11040_v0 }
 0xc98   : > { %10340 = vmatprep.subr.mxu0 %v11040_v0 }
 0xc9e   : > { %10338 = vmatmul.mubr.msk.f32.vlgmr.msra.gmra.mrb[14].mxu0 %vm5674_vm2, %v13144_v13 }
 0xc9f   : > { %10341 = vmatpush3.msk.msra.mxu0 %vm5678_vm1, %v8519_v38  ;;  %10342 = vmatprep.mubr.msk.f32.mxu0 %vm11048_vm4, %v11040_v0 }
 0xca0   : > { %10345 = vmatprep.subr.mxu0 %v11040_v0 }
 0xca6   : > { %10343 = vmatmul.mubr.msk.f32.vlgmr.msra.gmra.mrb[14].mxu0 %vm5674_vm2, %v8520_v25 }
 0xca7   : > { %10346 = vmatpush3.msk.msra.mxu0 %vm5678_vm1, %v8598_v36  ;;  %10347 = vmatprep.mubr.msk.f32.mxu0 %vm11048_vm4, %v11040_v0 }
 0xca8   : > { %10350 = vmatprep.subr.mxu0 %v11040_v0 }
 0xcae   : > { %10348 = vmatmul.mubr.msk.f32.vlgmr.msra.gmra.mrb[14].mxu0 %vm5674_vm2, %v8599_v1 }
 0xcaf   : > { %10351 = vmatpush3.msk.msra.mxu0 %vm5678_vm1, %v8677_v59  ;;  %10352 = vmatprep.mubr.msk.f32.mxu0 %vm11048_vm4, %v11040_v0 }
 0xcb0   : > { %10355 = vmatprep.subr.mxu0 %v11040_v0 }
 0xcb6   : > { %10353 = vmatmul.mubr.msk.f32.vlgmr.msra.gmra.mrb[14].mxu0 %vm5674_vm2, %v8678_v5 }
 0xcb7   : > { %10356 = vmatpush3.msk.msra.mxu0 %vm5678_vm1, %v8756_v62  ;;  %10357 = vmatprep.mubr.msk.f32.mxu0 %vm11048_vm4, %v11040_v0 }
 0xcb8   : > { %10360 = vmatprep.subr.mxu0 %v11040_v0 }
 0xcbe   : > { %10358 = vmatmul.mubr.msk.f32.vlgmr.msra.gmra.mrb[14].mxu0 %vm5674_vm2, %v8757_v4 }
 0xcbf   : > { %10361 = vmatpush3.msk.msra.mxu0 %vm5678_vm1, %v8835_v2  ;;  %10362 = vmatprep.mubr.msk.f32.mxu0 %vm11048_vm4, %v11040_v0 }
 0xcc0   : > { %10365 = vmatprep.subr.mxu0 %v11040_v0 }
 0xcc6   : > { %10363 = vmatmul.mubr.msk.f32.vlgmr.msra.gmra.mrb[14].mxu0 %vm5674_vm2, %v8836_v39 }
 0xcc7   : > { %10366 = vmatpush3.msk.msra.mxu0 %vm5678_vm1, %v8914_v41  ;;  %10367 = vmatprep.mubr.msk.f32.mxu0 %vm11048_vm4, %v11040_v0 }
 0xcce   : > { %10368 = vmatmul.mubr.msk.f32.vlgmr.msra.gmra.mrb[14].mxu0 %vm5674_vm2, %v8915_v10 }
 0xda1   : > { %v8987_v21 = vpop.f32.mrb[14].mxu0 }
 0xda2   : > { %v10645_v0 = vadd.f32 %v8987_v21, %v5672_v12  ;;  %v10369_v30 = vpop.f32.mrb[15].mxu0 }
 0xda4   : > { %v8992_v47 = vmax.f32 %v10645_v0, 0.0 }
 0xda6   : > { %10403 = vmatmul.mubr.f32.vlgmr.msra.gmra.mrb[58].mxu1 %v8992_v47 }
 0xe79   : > { %v9076_v17 = vpop.f32.mrb[58].mxu1 }
 0xe7a   : > { %v9077_v29 = vadd.f32 %v9076_v17, %v9009_v6  ;;  %v10404_v60 = vpop.f32.mrb[59].mxu1 }
 0xe7c   : > { %9081 = vst.msk [vmem:[%s391_s23] sm:$0x1] %vm9080_vm3, %v9077_v29 }
 0xe7d   : > { %10966 = shalt.err (!%p10963_p7)
}
 0xe7e   : > { %s10967_s29 = scalar_lea.hbm %s13283_s1, 16  ;;  %s10971_s22 = scalar_lea.hbm %s13334_s9, 32 }
 0xe7f   : > { %p10968_p8 = scmp.ne.s32.totalorder %s13283_s1, %s10967_s29  ;;  %p10972_p6 = scmp.lt.u32.totalorder %s13283_s1, %s13334_s9 }
 0xe80   : > { %p10973_p10 = scmp.lt.u32.totalorder %s10971_s22, %s10967_s29  ;;  %p10975_p13 = scmp.lt.u32.totalorder %s10967_s29, %s13283_s1 }
 0xe81   : > { %p10969_p5 = pnand %p10968_p8, %p13372_p1 }
 0xe82   : > { %p10974_p11 = por %p10973_p10, %p10972_p6 }
 0xe83   : > { %p10970_p12 = pneg %p10969_p5 }
 0xe84   : > { %p10976_p2 = por %p10975_p13, %p10974_p11 }
 0xe86   : > { %p10977_p3 = pnand %p10976_p2, %p10970_p12 }
 0xe88   : > { %10980 = shalt.err (!%p10977_p3)
}
 0xe89   : > { %10748 = dma.vmem_to_hbm [thread:$0]  (%p13372_p1), %s13285_s16, 16, %s13283_s1, %s9083_s26  }
 0xe8a PF: > { %p10780_p4 = scmp.ge.s32.totalorder %s11031_s12, 2  ;;  %s9107_s14 = sand.u32 1, %s11019_s30  }
 0xe8b   : > { %p13373_p9 = scmp.ne.s32.totalorder %s13341_s20, 0  ;;  %s9108_s27 = scalar_lea.sflag [#allocation6], %s9107_s14 }
 0xe8d   : > { %p10767_p0 = pnand %p10780_p4, %p13373_p9 }
 0xe8f   : > { %11014 = dma.done.wait (!%p10767_p0), %s9108_s27, 16  }
 0xe90   : > { %11016 = vsyncadd (!%p10767_p0), %s9108_s27, 4294967280  ;;  %p23_p7 = scmp.ge.s32.totalorder %s11125_s15, 4   ;;  %s13374_s30 = smov %s11023_s10 }
 0xe91   : > { %s13375_s10 = smov %s11027_s11  ;;  %s13376_s11 = smov %s11136_s18 }
 0xe92   : > { %s13377_s12 = smov %s11125_s15  ;;  %25 = sbr.rel (!%p23_p7) target bundleno = 10 (0xa), region = 156 }
 0xe99   :  { %9112 = vsyncpa [#allocation5], 1 }
 0xe9a   :  { %9114 = vsyncpa [#allocation5 + $0x1], 1 }
 0xe9b   :  { %9115 = vsyncpa [#allocation6], 1 }
 0xe9c   :  { %9117 = vsyncpa [#allocation6 + $0x1], 1 }
 0xe9d   :  { %9118 = vsyncpa [#allocation7], 1 }
 0xe9e   :  { %9120 = vsyncpa [#allocation7 + $0x1], 1 }
 0xe9f   :  { %9121 = vsyncpa [#allocation9], 1 }
 0xea0   :  { %9122 = vsyncpa [#allocation12], 1 }

</bundles_post_ra>
